<compile_context>
chip_gen: v5e
topology: v5e:2x2
jax: 0.10.0
libtpu: 0.0.40
codegen_flags: <defaults>
</compile_context>

<pallas_src>
import jax
import jax.numpy as jnp
from jax import lax
from jax.experimental import pallas as pl
from jax.experimental.pallas import tpu as pltpu

FEAT = 1408   # EfficientNet-B2 feature width (fixed by the module's Linear(1408, 2))


def _round_up(x, m):
    return (x + m - 1) // m * m


def _vmem_limit_bytes():
    """~75% of physical per-core VMEM: 96 MiB on v5e/v6e, 48 MiB on v7x."""
    cap = 64 << 20                                   # conservative default (v7x)
    try:
        info = pltpu.get_tpu_info()
        for attr in ("vmem_capacity_bytes", "vmem_bytes"):
            v = getattr(info, attr, None)
            if v:
                cap = int(v)
                break
    except Exception:
        pass
    return max(min(cap * 3 // 4, 100 << 20), 32 << 20)


def _largest_divisor_leq(n, m):
    for d in range(max(min(n, m), 1), 0, -1):
        if n % d == 0:
            return d
    return 1


def _pick_batch_block(batch):
    """Largest divisor of batch <= 8 keeping >= 2 batch grid blocks (megacore)."""
    for d in range(min(8, batch), 0, -1):
        if batch % d == 0 and batch // d >= 2:
            return d
    return batch                                     # batch == 1


def _pick_hw_tile(hw, quantum, cap):
    """Largest multiple-of-`quantum` divisor of hw that is <= cap; otherwise a
    single full-width tile if it fits, otherwise a capped tile + zero padding."""
    t = max((cap // quantum) * quantum, quantum)
    while t >= quantum:
        if hw % t == 0:
            return t, hw
        t -= quantum
    if hw <= cap:
        return hw, hw                                # single full-width tile
    t = max((cap // quantum) * quantum, quantum)
    return t, _round_up(hw, t)


def _plan(batch, hw, n, itemsize, layout, vmem_limit):
    """Choose (batch block, hw tile, padded hw) under the VMEM budget."""
    quantum = 128 if layout == "NCHW" else 8
    x_budget = max(vmem_limit - (8 << 20), 8 << 20)  # headroom for weights/acc/outs
    bt = _pick_batch_block(batch)
    while True:
        per_hw_elem = n * 2 * bt * FEAT * itemsize   # 2 = double-buffered x tiles
        cap = max(x_budget // per_hw_elem, quantum)
        hw_tile, hw_pad = _pick_hw_tile(hw, quantum, cap)
        if layout == "NCHW":                         # account for (8,128) tile padding
            foot = n * 2 * bt * FEAT * _round_up(hw_tile, 128) * itemsize
        else:
            foot = n * 2 * bt * _round_up(hw_tile, 8) * FEAT * itemsize
        if foot <= x_budget or bt == 1:
            return bt, hw_tile, hw_pad
        bt = _largest_divisor_leq(batch, bt - 1)


def _make_kernel(n, bt, hw_tile, hw_true, layout, x_dtype, midp, finp):
    inv_hw = 1.0 / float(hw_true)
    if layout == "NCHW":
        pool_dims = (((1,), (1,)), ((), ()))         # ones(1,hw) . x_b(C,hw)^T
    else:
        pool_dims = (((1,), (0,)), ((), ()))         # ones(1,hw) . x_b(hw,C)

    def kernel(*refs):
        x_refs = refs[:n]
        wst_ref, bcat_ref, wf_ref, bf_ref = refs[n:n + 4]
        out_fin_ref, out_mid_ref = refs[n + 4], refs[n + 5]
        acc_ref = refs[n + 6]                        # (bt, n*FEAT) f32 pooled sums

        s = pl.program_id(1)

        @pl.when(s == 0)
        def _init():
            acc_ref[...] = jnp.zeros_like(acc_ref)

        # Pooling partial sums on the MXU: ones(1,hw) contracted against each
        # (batch-element, branch) tile; channels land lane-dense in f32.
        ones_row = jnp.ones((1, hw_tile), x_dtype)
        for i in range(n):
            for b in range(bt):
                psum = lax.dot_general(
                    ones_row, x_refs[i][b],
                    dimension_numbers=pool_dims,
                    preferred_element_type=jnp.float32)        # (1, FEAT)
                acc_ref[b:b + 1, i * FEAT:(i + 1) * FEAT] += psum

        @pl.when(s == pl.num_programs(1) - 1)
        def _finalize():
            feats = acc_ref[...] * inv_hw                       # (bt, n*FEAT) means
            # One fused branch-fc matmul over the block-stacked weight: row 2i+j
            # of wst holds Wb_i[:, j] in lanes i*FEAT:(i+1)*FEAT.
            mid = lax.dot_general(
                feats, wst_ref[...],
                dimension_numbers=(((1,), (1,)), ((), ())),
                preferred_element_type=jnp.float32) + bcat_ref[...]   # (bt, midp)
            # Final Linear(2n, 2): tiny, do it with VPU FMAs (rows >= 2n are 0).
            fin = jnp.zeros((bt, finp), jnp.float32) + bf_ref[...]
            for r in range(min(midp, 2 * n)):
                fin = fin + mid[:, r:r + 1] * wf_ref[r:r + 1, :]
            out_mid_ref[...] = mid                              # lanes 0:2n real
            out_fin_ref[...] = fin                              # lanes 0:2  real

    return kernel


def fusion_efficientnet_head(x_list, params, data_format="NCHW"):
    """Fused pool + branch fcs + final fc (FusionEfficientNet.forward, eval mode).

    x_list : list of num_nets feature maps, each (B,1408,H,W) [NCHW] or
             (B,H,W,1408) [NHWC], f32 or bf16 (bf16 preferred: halves HBM reads).
    params : (wb, bb, wf, bf) with wb (n,1408,2), bb (n,2), wf (2n,2), bf (2,),
             stored as (in, out) so y = x @ W + b  (== PyTorch x @ W.T + b).
    Returns (final (B,2), [mid_0, ..., mid_{n-1}] each (B,2)).
    """
    wb, bb, wf, bf = params
    n = wb.shape[0]
    assert len(x_list) == n
    x0 = x_list[0]
    if data_format == "NCHW":
        B, C, H, W = x0.shape
    else:
        B, H, W, C = x0.shape
    assert C == FEAT, f"channel dim must be {FEAT}, got {C}"
    for x in x_list:
        assert x.shape == x0.shape
    HW = H * W
    f32 = jnp.float32
    x_dtype = x0.dtype
    itemsize = jnp.dtype(x_dtype).itemsize

    vmem_limit = _vmem_limit_bytes()
    bt, hw_tile, hw_pad = _plan(B, HW, n, itemsize, data_format, vmem_limit)
    n_hw = hw_pad // hw_tile
    nb = B // bt
    midp = _round_up(max(2 * n, 2), 8)
    finp = 8

    # Free contiguous reshape; zero-pad the spatial axis only when HW has no
    # VMEM-friendly tiling (zeros do not change the pooled sum).
    if data_format == "NCHW":
        xs = [x.reshape(B, C, HW) for x in x_list]
        if hw_pad != HW:
            xs = [jnp.pad(x, ((0, 0), (0, 0), (0, hw_pad - HW))) for x in xs]
        x_specs = [pl.BlockSpec((bt, C, hw_tile), lambda b, s: (b, 0, s))
                   for _ in range(n)]
    else:
        xs = [x.reshape(B, HW, C) for x in x_list]
        if hw_pad != HW:
            xs = [jnp.pad(x, ((0, 0), (0, hw_pad - HW), (0, 0))) for x in xs]
        x_specs = [pl.BlockSpec((bt, hw_tile, C), lambda b, s: (b, s, 0))
                   for _ in range(n)]

    # Branch fc weights block-stacked & transposed: (midp, n*FEAT) instead of
    # three 128-lane-padded (FEAT,128) slabs — one finalize matmul, ~135 KB.
    wst = jnp.zeros((midp, n * FEAT), f32)
    for i in range(n):
        wst = wst.at[2 * i:2 * i + 2, i * FEAT:(i + 1) * FEAT].set(
            wb[i].astype(f32).T)
    bcat = jnp.zeros((1, midp), f32).at[0, :2 * n].set(bb.reshape(-1).astype(f32))
    wfp = jnp.zeros((midp, finp), f32).at[:2 * n, :2].set(wf.astype(f32))
    bfp = jnp.zeros((1, finp), f32).at[0, :2].set(bf.astype(f32))

    w_specs = [
        pl.BlockSpec((midp, n * FEAT), lambda b, s: (0, 0)),  # resident branch fcs
        pl.BlockSpec((1, midp), lambda b, s: (0, 0)),         # concat branch bias
        pl.BlockSpec((midp, finp), lambda b, s: (0, 0)),      # final fc
        pl.BlockSpec((1, finp), lambda b, s: (0, 0)),         # final bias
    ]
    out_specs = (
        pl.BlockSpec((None, bt, finp), lambda b, s: (b, 0, 0)),  # final (padded)
        pl.BlockSpec((None, bt, midp), lambda b, s: (b, 0, 0)),  # branch logits
    )
    out_shape = (
        jax.ShapeDtypeStruct((nb, bt, finp), f32),
        jax.ShapeDtypeStruct((nb, bt, midp), f32),
    )

    flops = (2 * n * B * FEAT * HW            # MXU pooling
             + 2 * B * n * FEAT * midp        # fused branch fcs
             + 2 * B * midp * finp)           # final fc
    bytes_accessed = (n * B * FEAT * hw_pad * itemsize
                      + 4 * (midp * n * FEAT + midp + midp * finp + finp)
                      + 4 * B * (midp + finp))
    cost = pl.CostEstimate(flops=flops, transcendentals=0,
                           bytes_accessed=bytes_accessed)

    fin_pad, mid_pad = pl.pallas_call(
        _make_kernel(n, bt, hw_tile, HW, data_format, x_dtype, midp, finp),
        out_shape=out_shape,
        grid_spec=pltpu.PrefetchScalarGridSpec(
            num_scalar_prefetch=0,
            grid=(nb, n_hw),
            in_specs=x_specs + w_specs,
            out_specs=out_specs,
            scratch_shapes=[pltpu.VMEM((bt, n * FEAT), f32)],
        ),
        compiler_params=pltpu.CompilerParams(
            dimension_semantics=("parallel", "arbitrary"),
            vmem_limit_bytes=vmem_limit,
        ),
        cost_estimate=cost,
    )(*xs, wst, bcat, wfp, bfp)

    final = fin_pad.reshape(B, finp)[:, :2]
    mid = mid_pad.reshape(B, midp)[:, :2 * n]
    mids = [mid[:, 2 * i:2 * i + 2] for i in range(n)]
    return final, mids


def init_params(key, num_nets):
    """Deterministic synthetic init mirroring PyTorch Linear (uniform +-1/sqrt(fan_in))."""
    k1, k2, k3, k4 = jax.random.split(key, 4)
    s1 = 1.0 / (FEAT ** 0.5)
    wb = jax.random.uniform(k1, (num_nets, FEAT, 2), jnp.float32, -s1, s1)
    bb = jax.random.uniform(k2, (num_nets, 2), jnp.float32, -s1, s1)
    s2 = 1.0 / ((2 * num_nets) ** 0.5)
    wf = jax.random.uniform(k3, (2 * num_nets, 2), jnp.float32, -s2, s2)
    bf = jax.random.uniform(k4, (2,), jnp.float32, -s2, s2)
    return wb, bb, wf, bf


def ref_forward(x_list, params, data_format="NCHW"):
    """Pure-JAX reference mirroring FusionEfficientNet.forward (eval mode)."""
    wb, bb, wf, bf = params
    axes = (2, 3) if data_format == "NCHW" else (1, 2)
    mids = [jnp.mean(x.astype(jnp.float32), axis=axes) @ wb[i] + bb[i]
            for i, x in enumerate(x_list)]
    branch_cls = jnp.concatenate(mids, axis=1)
    final = branch_cls @ wf + bf
    return final, mids


if __name__ == "__main__":
    key = jax.random.PRNGKey(0)
    num_nets = 3
    B, H, W = 2, 16, 24          # small spatial demo; C fixed at 1408 by the module

    keys = jax.random.split(key, num_nets + 1)
    # Feature maps as the backbones would emit them, kept in bf16 (halves the
    # HBM traffic of this bandwidth-bound kernel).
    xs_nchw = [jax.random.normal(keys[i], (B, FEAT, H, W), jnp.float32)
               .astype(jnp.bfloat16) for i in range(num_nets)]
    params = init_params(keys[-1], num_nets)

    ref_final, ref_mids = ref_forward(xs_nchw, params, data_format="NCHW")

    # NCHW path (matches the PyTorch module's layout).
    final, mids = fusion_efficientnet_head(xs_nchw, params, data_format="NCHW")
    final = jax.block_until_ready(final)
    assert final.shape == (B, 2)
    assert len(mids) == num_nets and all(m.shape == (B, 2) for m in mids)
    assert jnp.allclose(final, ref_final, rtol=2e-3, atol=2e-3), "final mismatch (NCHW)"
    for m, rm in zip(mids, ref_mids):
        assert jnp.allclose(m, rm, rtol=2e-3, atol=2e-3), "mid_fc mismatch (NCHW)"

    # NHWC path (preferred when the backbone emits channels-last features).
    xs_nhwc = [jnp.transpose(x, (0, 2, 3, 1)) for x in xs_nchw]
    final2, mids2 = fusion_efficientnet_head(xs_nhwc, params, data_format="NHWC")
    final2 = jax.block_until_ready(final2)
    assert jnp.allclose(final2, ref_final, rtol=2e-3, atol=2e-3), "final mismatch (NHWC)"
    for m, rm in zip(mids2, ref_mids):
        assert jnp.allclose(m, rm, rtol=2e-3, atol=2e-3), "mid_fc mismatch (NHWC)"

    print("KERNEL_OK")
</pallas_src>

<mosaic_0001>
module attributes {stable_mosaic.version = 11 : i64} {
  func.func @kernel(%arg0: i32, %arg1: i32, %arg2: memref<1x1408x384xbf16, #tpu.memory_space<vmem>>, %arg3: memref<1x1408x384xbf16, #tpu.memory_space<vmem>>, %arg4: memref<1x1408x384xbf16, #tpu.memory_space<vmem>>, %arg5: memref<8x4224xf32, #tpu.memory_space<vmem>>, %arg6: memref<1x8xf32, #tpu.memory_space<vmem>>, %arg7: memref<8x8xf32, #tpu.memory_space<vmem>>, %arg8: memref<1x8xf32, #tpu.memory_space<vmem>>, %arg9: memref<1x1x8xf32, #tpu.memory_space<vmem>>, %arg10: memref<1x1x8xf32, #tpu.memory_space<vmem>>, %arg11: memref<1x4224xf32, #tpu.memory_space<vmem>>) attributes {dimension_semantics = [#tpu.dimension_semantics<parallel>, #tpu.dimension_semantics<arbitrary>], iteration_bounds = array<i64: 2, 1>, scalar_prefetch = 0 : i64, scratch_operands = 1 : i64, tpu.core_type = #tpu.core_type<tc>, window_params = [{transform_indices = @transform_0, window_bounds = array<i64: 1, 1408, 384>}, {transform_indices = @transform_1, window_bounds = array<i64: 1, 1408, 384>}, {transform_indices = @transform_2, window_bounds = array<i64: 1, 1408, 384>}, {pipeline_mode = #tpu.pipeline_mode<synchronous>, transform_indices = @transform_3, window_bounds = array<i64: 8, 4224>}, {pipeline_mode = #tpu.pipeline_mode<synchronous>, transform_indices = @transform_4, window_bounds = array<i64: 1, 8>}, {pipeline_mode = #tpu.pipeline_mode<synchronous>, transform_indices = @transform_5, window_bounds = array<i64: 8, 8>}, {pipeline_mode = #tpu.pipeline_mode<synchronous>, transform_indices = @transform_6, window_bounds = array<i64: 1, 8>}, {transform_indices = @transform_7, window_bounds = array<i64: 1, 1, 8>}, {transform_indices = @transform_8, window_bounds = array<i64: 1, 1, 8>}]} {
    %c0_i32 = arith.constant 0 : i32
    %0 = arith.cmpi eq, %arg1, %c0_i32 : i32
    %1 = arith.extui %0 : i1 to i32
    %c0_i32_0 = arith.constant 0 : i32
    %2 = arith.cmpi ne, %1, %c0_i32_0 : i32
    scf.if %2 {
      %cst_24 = arith.constant 0.000000e+00 : f32
      %25 = vector.broadcast %cst_24 : f32 to vector<1x4224xf32>
      %c0_25 = arith.constant 0 : index
      %c0_26 = arith.constant 0 : index
      %26 = vector.load %arg11[%c0_25, %c0_26] : memref<1x4224xf32, #tpu.memory_space<vmem>>, vector<1x4224xf32>
      tpu.vector_store %arg11[%c0_25, %c0_26], %25 {strides = array<i32>} : memref<1x4224xf32, #tpu.memory_space<vmem>>, vector<1x4224xf32>,
    } else {
    }
    %cst = arith.constant 1.000000e+00 : bf16
    %3 = vector.broadcast %cst : bf16 to vector<1x384xbf16>
    %c0 = arith.constant 0 : index
    %c0_1 = arith.constant 0 : index
    %c0_2 = arith.constant 0 : index
    %4 = vector.load %arg2[%c0, %c0_1, %c0_2] : memref<1x1408x384xbf16, #tpu.memory_space<vmem>>, vector<1x1408x384xbf16>
    %5 = vector.shape_cast %4 : vector<1x1408x384xbf16> to vector<1408x384xbf16>
    %cst_3 = arith.constant dense<0.000000e+00> : vector<1x1408xf32>
    %6 = tpu.matmul %3, %5, %cst_3 {dimension_numbers = #tpu.dot_dimension_numbers<[1], [1], [0], [0], [0, 0, 1, 0], [], []>} : vector<1x384xbf16>, vector<1408x384xbf16>, vector<1x1408xf32> -> vector<1x1408xf32>
    %c0_4 = arith.constant 0 : index
    %c0_5 = arith.constant 0 : index
    %7 = vector.load %arg11[%c0_4, %c0_5] : memref<1x4224xf32, #tpu.memory_space<vmem>>, vector<1x1408xf32>
    %8 = arith.addf %7, %6 : vector<1x1408xf32>
    %c0_6 = arith.constant 0 : index
    %c0_7 = arith.constant 0 : index
    %9 = vector.load %arg11[%c0_6, %c0_7] : memref<1x4224xf32, #tpu.memory_space<vmem>>, vector<1x1408xf32>
    tpu.vector_store %arg11[%c0_6, %c0_7], %8 {strides = array<i32>} : memref<1x4224xf32, #tpu.memory_space<vmem>>, vector<1x1408xf32>,
    %c0_8 = arith.constant 0 : index
    %c0_9 = arith.constant 0 : index
    %c0_10 = arith.constant 0 : index
    %10 = vector.load %arg3[%c0_8, %c0_9, %c0_10] : memref<1x1408x384xbf16, #tpu.memory_space<vmem>>, vector<1x1408x384xbf16>
    %11 = vector.shape_cast %10 : vector<1x1408x384xbf16> to vector<1408x384xbf16>
    %cst_11 = arith.constant dense<0.000000e+00> : vector<1x1408xf32>
    %12 = tpu.matmul %3, %11, %cst_11 {dimension_numbers = #tpu.dot_dimension_numbers<[1], [1], [0], [0], [0, 0, 1, 0], [], []>} : vector<1x384xbf16>, vector<1408x384xbf16>, vector<1x1408xf32> -> vector<1x1408xf32>
    %c0_12 = arith.constant 0 : index
    %c1408 = arith.constant 1408 : index
    %13 = vector.load %arg11[%c0_12, %c1408] : memref<1x4224xf32, #tpu.memory_space<vmem>>, vector<1x1408xf32>
    %14 = arith.addf %13, %12 : vector<1x1408xf32>
    %c0_13 = arith.constant 0 : index
    %c1408_14 = arith.constant 1408 : index
    %15 = vector.load %arg11[%c0_13, %c1408_14] : memref<1x4224xf32, #tpu.memory_space<vmem>>, vector<1x1408xf32>
    tpu.vector_store %arg11[%c0_13, %c1408_14], %14 {strides = array<i32>} : memref<1x4224xf32, #tpu.memory_space<vmem>>, vector<1x1408xf32>,
    %c0_15 = arith.constant 0 : index
    %c0_16 = arith.constant 0 : index
    %c0_17 = arith.constant 0 : index
    %16 = vector.load %arg4[%c0_15, %c0_16, %c0_17] : memref<1x1408x384xbf16, #tpu.memory_space<vmem>>, vector<1x1408x384xbf16>
    %17 = vector.shape_cast %16 : vector<1x1408x384xbf16> to vector<1408x384xbf16>
    %cst_18 = arith.constant dense<0.000000e+00> : vector<1x1408xf32>
    %18 = tpu.matmul %3, %17, %cst_18 {dimension_numbers = #tpu.dot_dimension_numbers<[1], [1], [0], [0], [0, 0, 1, 0], [], []>} : vector<1x384xbf16>, vector<1408x384xbf16>, vector<1x1408xf32> -> vector<1x1408xf32>
    %c0_19 = arith.constant 0 : index
    %c2816 = arith.constant 2816 : index
    %19 = vector.load %arg11[%c0_19, %c2816] : memref<1x4224xf32, #tpu.memory_space<vmem>>, vector<1x1408xf32>
    %20 = arith.addf %19, %18 : vector<1x1408xf32>
    %c0_20 = arith.constant 0 : index
    %c2816_21 = arith.constant 2816 : index
    %21 = vector.load %arg11[%c0_20, %c2816_21] : memref<1x4224xf32, #tpu.memory_space<vmem>>, vector<1x1408xf32>
    tpu.vector_store %arg11[%c0_20, %c2816_21], %20 {strides = array<i32>} : memref<1x4224xf32, #tpu.memory_space<vmem>>, vector<1x1408xf32>,
    %c0_i32_22 = arith.constant 0 : i32
    %22 = arith.cmpi eq, %arg1, %c0_i32_22 : i32
    %23 = arith.extui %22 : i1 to i32
    %c0_i32_23 = arith.constant 0 : i32
    %24 = arith.cmpi ne, %23, %c0_i32_23 : i32
    scf.if %24 {
      %c0_24 = arith.constant 0 : index
      %c0_25 = arith.constant 0 : index
      %25 = vector.load %arg11[%c0_24, %c0_25] : memref<1x4224xf32, #tpu.memory_space<vmem>>, vector<1x4224xf32>
      %cst_26 = arith.constant 0.00260416674 : f32
      %26 = vector.broadcast %cst_26 : f32 to vector<1x4224xf32>
      %27 = arith.mulf %25, %26 : vector<1x4224xf32>
      %c0_27 = arith.constant 0 : index
      %c0_28 = arith.constant 0 : index
      %28 = vector.load %arg5[%c0_27, %c0_28] : memref<8x4224xf32, #tpu.memory_space<vmem>>, vector<8x4224xf32>
      %cst_29 = arith.constant dense<0.000000e+00> : vector<1x8xf32>
      %29 = tpu.matmul %27, %28, %cst_29 {dimension_numbers = #tpu.dot_dimension_numbers<[1], [1], [0], [0], [0, 0, 1, 0], [], []>} : vector<1x4224xf32>, vector<8x4224xf32>, vector<1x8xf32> -> vector<1x8xf32>
      %c0_30 = arith.constant 0 : index
      %c0_31 = arith.constant 0 : index
      %30 = vector.load %arg6[%c0_30, %c0_31] : memref<1x8xf32, #tpu.memory_space<vmem>>, vector<1x8xf32>
      %31 = arith.addf %29, %30 : vector<1x8xf32>
      %cst_32 = arith.constant 0.000000e+00 : f32
      %32 = vector.broadcast %cst_32 : f32 to vector<1x8xf32>
      %c0_33 = arith.constant 0 : index
      %c0_34 = arith.constant 0 : index
      %33 = vector.load %arg8[%c0_33, %c0_34] : memref<1x8xf32, #tpu.memory_space<vmem>>, vector<1x8xf32>
      %34 = arith.addf %32, %33 : vector<1x8xf32>
      %35 = vector.extract_strided_slice %31 {offsets = [0, 0], sizes = [1, 1], strides = [1, 1]} : vector<1x8xf32> to vector<1x1xf32>
      %c0_35 = arith.constant 0 : index
      %c0_36 = arith.constant 0 : index
      %36 = vector.load %arg7[%c0_35, %c0_36] : memref<8x8xf32, #tpu.memory_space<vmem>>, vector<1x8xf32>
      %37 = vector.broadcast %35 : vector<1x1xf32> to vector<1x8xf32>
      %38 = arith.mulf %37, %36 : vector<1x8xf32>
      %39 = arith.addf %34, %38 : vector<1x8xf32>
      %40 = vector.extract_strided_slice %31 {offsets = [0, 1], sizes = [1, 1], strides = [1, 1]} : vector<1x8xf32> to vector<1x1xf32>
      %c1 = arith.constant 1 : index
      %c0_37 = arith.constant 0 : index
      %41 = vector.load %arg7[%c1, %c0_37] : memref<8x8xf32, #tpu.memory_space<vmem>>, vector<1x8xf32>
      %42 = vector.broadcast %40 : vector<1x1xf32> to vector<1x8xf32>
      %43 = arith.mulf %42, %41 : vector<1x8xf32>
      %44 = arith.addf %39, %43 : vector<1x8xf32>
      %45 = vector.extract_strided_slice %31 {offsets = [0, 2], sizes = [1, 1], strides = [1, 1]} : vector<1x8xf32> to vector<1x1xf32>
      %c2 = arith.constant 2 : index
      %c0_38 = arith.constant 0 : index
      %46 = vector.load %arg7[%c2, %c0_38] : memref<8x8xf32, #tpu.memory_space<vmem>>, vector<1x8xf32>
      %47 = vector.broadcast %45 : vector<1x1xf32> to vector<1x8xf32>
      %48 = arith.mulf %47, %46 : vector<1x8xf32>
      %49 = arith.addf %44, %48 : vector<1x8xf32>
      %50 = vector.extract_strided_slice %31 {offsets = [0, 3], sizes = [1, 1], strides = [1, 1]} : vector<1x8xf32> to vector<1x1xf32>
      %c3 = arith.constant 3 : index
      %c0_39 = arith.constant 0 : index
      %51 = vector.load %arg7[%c3, %c0_39] : memref<8x8xf32, #tpu.memory_space<vmem>>, vector<1x8xf32>
      %52 = vector.broadcast %50 : vector<1x1xf32> to vector<1x8xf32>
      %53 = arith.mulf %52, %51 : vector<1x8xf32>
      %54 = arith.addf %49, %53 : vector<1x8xf32>
      %55 = vector.extract_strided_slice %31 {offsets = [0, 4], sizes = [1, 1], strides = [1, 1]} : vector<1x8xf32> to vector<1x1xf32>
      %c4 = arith.constant 4 : index
      %c0_40 = arith.constant 0 : index
      %56 = vector.load %arg7[%c4, %c0_40] : memref<8x8xf32, #tpu.memory_space<vmem>>, vector<1x8xf32>
      %57 = vector.broadcast %55 : vector<1x1xf32> to vector<1x8xf32>
      %58 = arith.mulf %57, %56 : vector<1x8xf32>
      %59 = arith.addf %54, %58 : vector<1x8xf32>
      %60 = vector.extract_strided_slice %31 {offsets = [0, 5], sizes = [1, 1], strides = [1, 1]} : vector<1x8xf32> to vector<1x1xf32>
      %c5 = arith.constant 5 : index
      %c0_41 = arith.constant 0 : index
      %61 = vector.load %arg7[%c5, %c0_41] : memref<8x8xf32, #tpu.memory_space<vmem>>, vector<1x8xf32>
      %62 = vector.broadcast %60 : vector<1x1xf32> to vector<1x8xf32>
      %63 = arith.mulf %62, %61 : vector<1x8xf32>
      %64 = arith.addf %59, %63 : vector<1x8xf32>
      %c0_42 = arith.constant 0 : index
      %c0_43 = arith.constant 0 : index
      %c0_44 = arith.constant 0 : index
      %65 = vector.load %arg10[%c0_42, %c0_43, %c0_44] : memref<1x1x8xf32, #tpu.memory_space<vmem>>, vector<1x1x8xf32>
      %66 = vector.shape_cast %65 : vector<1x1x8xf32> to vector<1x8xf32>
      %67 = vector.shape_cast %31 : vector<1x8xf32> to vector<1x1x8xf32>
      tpu.vector_store %arg10[%c0_42, %c0_43, %c0_44], %67 {strides = array<i32>} : memref<1x1x8xf32, #tpu.memory_space<vmem>>, vector<1x1x8xf32>,
      %c0_45 = arith.constant 0 : index
      %c0_46 = arith.constant 0 : index
      %c0_47 = arith.constant 0 : index
      %68 = vector.load %arg9[%c0_45, %c0_46, %c0_47] : memref<1x1x8xf32, #tpu.memory_space<vmem>>, vector<1x1x8xf32>
      %69 = vector.shape_cast %68 : vector<1x1x8xf32> to vector<1x8xf32>
      %70 = vector.shape_cast %64 : vector<1x8xf32> to vector<1x1x8xf32>
      tpu.vector_store %arg9[%c0_45, %c0_46, %c0_47], %70 {strides = array<i32>} : memref<1x1x8xf32, #tpu.memory_space<vmem>>, vector<1x1x8xf32>,
    } else {
    }
    return
  }
  func.func @transform_0(%arg0: i32, %arg1: i32) -> (i32, i32, i32) {
    %c0_i32 = arith.constant 0 : i32
    %c0_i32_0 = arith.constant 0 : i32
    return %arg0, %c0_i32, %arg1 : i32, i32, i32
  }
  func.func @transform_1(%arg0: i32, %arg1: i32) -> (i32, i32, i32) {
    %c0_i32 = arith.constant 0 : i32
    %c0_i32_0 = arith.constant 0 : i32
    return %arg0, %c0_i32, %arg1 : i32, i32, i32
  }
  func.func @transform_2(%arg0: i32, %arg1: i32) -> (i32, i32, i32) {
    %c0_i32 = arith.constant 0 : i32
    %c0_i32_0 = arith.constant 0 : i32
    return %arg0, %c0_i32, %arg1 : i32, i32, i32
  }
  func.func @transform_3(%arg0: i32, %arg1: i32) -> (i32, i32) {
    %c0_i32 = arith.constant 0 : i32
    %c0_i32_0 = arith.constant 0 : i32
    %c0_i32_1 = arith.constant 0 : i32
    return %c0_i32, %c0_i32_0 : i32, i32
  }
  func.func @transform_4(%arg0: i32, %arg1: i32) -> (i32, i32) {
    %c0_i32 = arith.constant 0 : i32
    %c0_i32_0 = arith.constant 0 : i32
    %c0_i32_1 = arith.constant 0 : i32
    return %c0_i32, %c0_i32_0 : i32, i32
  }
  func.func @transform_5(%arg0: i32, %arg1: i32) -> (i32, i32) {
    %c0_i32 = arith.constant 0 : i32
    %c0_i32_0 = arith.constant 0 : i32
    %c0_i32_1 = arith.constant 0 : i32
    return %c0_i32, %c0_i32_0 : i32, i32
  }
  func.func @transform_6(%arg0: i32, %arg1: i32) -> (i32, i32) {
    %c0_i32 = arith.constant 0 : i32
    %c0_i32_0 = arith.constant 0 : i32
    %c0_i32_1 = arith.constant 0 : i32
    return %c0_i32, %c0_i32_0 : i32, i32
  }
  func.func @transform_7(%arg0: i32, %arg1: i32) -> (i32, i32, i32) {
    %c0_i32 = arith.constant 0 : i32
    %c0_i32_0 = arith.constant 0 : i32
    %c0_i32_1 = arith.constant 0 : i32
    return %arg0, %c0_i32, %c0_i32_0 : i32, i32, i32
  }
  func.func @transform_8(%arg0: i32, %arg1: i32) -> (i32, i32, i32) {
    %c0_i32 = arith.constant 0 : i32
    %c0_i32_0 = arith.constant 0 : i32
    %c0_i32_1 = arith.constant 0 : i32
    return %arg0, %c0_i32, %c0_i32_0 : i32, i32, i32
  }
}

</mosaic_0001>

<bundles_post_ra>
// kernel: tpu_custom_call.1
= control target key start
LH: loop header
LB: loop body
LE: loop exit
PB: predicated region body
PF: predicated region fallthrough
CT: control target
= control target key end

     0   :  { %s14881_s0 = inlined_call_operand.hbm [shape: bf16[2,1408,384], index: 0, kind: input, shape index: {}]   ;;  %s14882_s1 = inlined_call_operand.hbm [shape: bf16[2,1408,384], index: 1, kind: input, shape index: {}]   ;;  %s14883_s2 = inlined_call_operand.hbm [shape: bf16[2,1408,384], index: 2, kind: input, shape index: {}]   ;;  %s14884_s3 = inlined_call_operand.hbm [shape: f32[8,4224], index: 3, kind: input, shape index: {}]   ;;  %s14885_s4 = inlined_call_operand.hbm [shape: f32[1,8], index: 4, kind: input, shape index: {}]   ;;  %s14886_s5 = inlined_call_operand.hbm [shape: f32[8,8], index: 5, kind: input, shape index: {}]   ;;  %s14887_s6 = inlined_call_operand.hbm [shape: f32[1,8], index: 6, kind: input, shape index: {}]   ;;  %s14888_s7 = inlined_call_operand.hbm [shape: f32[2,1,8], index: 7, kind: output, shape index: {0}]   ;;  %s14889_s8 = inlined_call_operand.hbm [shape: f32[2,1,8], index: 8, kind: output, shape index: {1}]  }
   0x1   :  { %14900 = sst [smem:[#allocation29_spill]] %s14881_s0 }
   0x2   :  { %14901 = sst [smem:[#allocation30_spill]] %s14882_s1 }
   0x3   :  { %14902 = sst [smem:[#allocation31_spill]] %s14884_s3 }
   0x4   :  { %14903 = sst [smem:[#allocation32_spill]] %s14885_s4 }
   0x5   :  { %14904 = sst [smem:[#allocation33_spill]] %s14886_s5 }
   0x6   :  { %14905 = sst [smem:[#allocation34_spill]] %s14888_s7 }
   0x7   :  { %14 = vsyncpa [#allocation4], 0 }
   0x8   :  { %16 = vsyncpa [#allocation4 + $0x1], 0 }
   0x9   :  { %17 = vsyncpa [#allocation7], 0 }
   0xa   :  { %19 = vsyncpa [#allocation7 + $0x1], 0 }
   0xb   :  { %20 = vsyncpa [#allocation10], 0 }
   0xc   :  { %21 = vsyncpa [#allocation13], 0 }
   0xd   :  { %22 = vsyncpa [#allocation5], 0 }
   0xe   :  { %24 = vsyncpa [#allocation5 + $0x1], 0 }
   0xf   :  { %25 = vsyncpa [#allocation17], 0 }
  0x10   :  { %27 = vsyncpa [#allocation17 + $0x1], 0  ;;  %s12769_s27 = smov 0   ;;  %s12771_s28 = smov 0  }
  0x11   :  { %s12773_s29 = smov 0   ;;  %s12775_s30 = smov 0  }
  0x12   :  { %s12777_s9 = smov 0   ;;  %s12779_s10 = smov 0  }
  0x13 LB: > { %14906 = sst [smem:[#allocation24_spill]] %s12688_s27  ;;  %s12800_s11 = sadd.s32 4294967295, %s12708_s10   ;;  %s12708_s10 = sphi %s12779_s10, %s33_s10   ;;  %s12704_s9 = sphi %s12777_s9, %s14933_s9   ;;  %s12700_s30 = sphi %s12775_s30, %s14932_s30   ;;  %s12696_s29 = sphi %s12773_s29, %s14936_s29   ;;  %s12692_s28 = sphi %s12771_s28, %s14935_s28   ;;  %s12688_s27 = sphi %s12769_s27, %s14934_s27  }
  0x14   : > { %14907 = sst [smem:[#allocation25_spill]] %s12704_s9  ;;  %s8253_s12 = sadd.s32 4294967294, %s12708_s10  }
  0x15   : > { %p67_p0 = scmp.ne.s32.totalorder %s12692_s28, %s12688_s27  ;;  %p68_p1 = scmp.eq.s32.totalorder %s12800_s11, 0 }
  0x16   : > { %p231_p2 = scmp.eq.s32.totalorder %s12800_s11, 1  ;;  %p237_p3 = scmp.eq.s32.totalorder %s8253_s12, 1 }
  0x17   : > { %p12809_p4 = por %p68_p1, %p67_p0  ;;  %p8254_p5 = scmp.ge.s32.totalorder %s12708_s10, 1 }
  0x18   : > { %p12814_p6 = por %p237_p3, %p67_p0  ;;  %p270_p7 = scmp.lt.s32.totalorder %s12708_s10, 3 }
  0x19   : > { %s14911_s3 = sld [smem:[#allocation31_spill]]  ;;  %s12710_s19 = smov [#allocation9]  }
  0x1a   : > { %s14909_s14 = scalar_select %p12814_p6, 1, 0 }
  0x1b   : > { %p12822_p8 = pnand %p8254_p5, %p270_p7  ;;  %s284_s20 = sshll.u32 %s12710_s19, 4  ;;  %s285_s20 = int_to_ptr.vmem [resolvable:$true] %s284_s20 }
  0x1c   : > { %14910 = sst [smem:[#allocation26_spill]] %s14909_s14  ;;  %s12711_s25 = smov [#allocation12]  }
  0x1d   : > { %p12263_p10 = pneg %p12822_p8  ;;  %s14913_s5 = sld [smem:[#allocation33_spill]] }
  0x1e   : > { %s308_s26 = sshll.u32 %s12711_s25, 4  ;;  %s45_s12 = sadd.s32 1, %s12704_s9  ;;  %s309_s26 = int_to_ptr.vmem [resolvable:$true] %s308_s26 }
  0x1f   : > { %s282_s17 = sshll.u32 %s14911_s3, 4  ;;  %p12834_p11 = pnand %p12263_p10, %p68_p1  ;;  %s283_s17 = int_to_ptr.hbm [resolvable:$true] %s282_s17 }
  0x20   : > { %s54_s15 = sadd.s32 1, %s12696_s29  ;;  %p47_p12 = scmp.ge.s32.totalorder %s45_s12, 2 }
  0x21   : > { %12266 = dma.hbm_to_vmem [thread:$0]  (!%p12834_p11), %s283_s17, 4224, %s285_s20, [#allocation10]  }
  0x22   : > { %p61_p13 = scmp.ne.s32.totalorder %s12696_s29, %s12692_s28  ;;  %p62_p0 = scmp.eq.s32.totalorder %s12708_s10, 0 }
  0x23   : > { %s306_s23 = sshll.u32 %s14913_s5, 4  ;;  %p12297_p3 = scmp.lt.s32.totalorder %s12708_s10, 2  ;;  %s307_s23 = int_to_ptr.hbm [resolvable:$true] %s306_s23 }
  0x24   : > { %12272 = dma.hbm_to_vmem [thread:$0]  (!%p12834_p11), %s307_s23, 128, %s309_s26, [#allocation13]  }
  0x25   : > { %s14938_s12 = smov (%p47_p12, %s45_s12), 0  ;;  %p63_p5 = por %p62_p0, %p61_p13 }
  0x26   : > { %14915 = sst [smem:[#allocation27_spill]] %s14938_s12  ;;  %p12852_p7 = por %p231_p2, %p61_p13 }
  0x27   : > { %s49_s17 = ssub.s32 %s12704_s9, %s14938_s12  ;;  %s14890_s19 = sand.u32 1, %s12696_s29  }
  0x28   : > { %p52_p10 = scmp.eq.s32.totalorder %s49_s17, 0  ;;  %s12861_s20 = smul.u32 2112, %s14890_s19 }
  0x29   : > { %s12864_s21 = smul.u32 2112, %s12704_s9  ;;  %p12866_p9 = pnand %p12297_p3, %p63_p5 }
  0x2a   : > { %s12871_s23 = scalar_select %p52_p10, %s12696_s29, %s54_s15  }
  0x2b   : > { %s355_s25 = sand.u32 1, %s12708_s10   ;;  %s14919_s1 = sld [smem:[#allocation30_spill]] }
  0x2c   : > { %14918 = sst [smem:[#allocation28_spill]] %s12871_s23  ;;  %s359_s17 = scalar_lea.vmem [#allocation6], %s12861_s20 }
  0x2d   : > { %s369_s19 = sshll.u32 %s359_s17, 4  ;;  %s14920_s4 = sld [smem:[#allocation32_spill]]  ;;  %s370_s19 = int_to_ptr.vmem [resolvable:$true] %s369_s19 }
  0x2e   : > { %s12882_s7 = scalar_lea.sflag [#allocation7], %s355_s25  ;;  %s14896_s15 = smov 192  }
  0x2f   : > { %s14898_s23 = smov 12   ;;  %s12714_s3 = smov [#allocation11]  }
  0x30   : > { %s318_s14 = sshll.u32 %s14887_s6, 4  ;;  %s12715_s25 = smov [#allocation14]   ;;  %s319_s14 = int_to_ptr.hbm [resolvable:$true] %s318_s14 }
  0x31   : > { %s366_s5 = scalar_lea.hbm %s14919_s1, %s12864_s21  ;;  %s320_s17 = sshll.u32 %s12715_s25, 4  ;;  %s321_s17 = int_to_ptr.vmem [resolvable:$true] %s320_s17 }
  0x32   : > { %s367_s12 = sshll.u32 %s366_s5, 4  ;;  %s296_s5 = sshll.u32 %s12714_s3, 4  ;;  %s368_s12 = int_to_ptr.hbm [resolvable:$true] %s367_s12  ;;  %s297_s5 = int_to_ptr.vmem [resolvable:$true] %s296_s5 }
  0x33   : > { %s294_s27 = sshll.u32 %s14920_s4, 4  ;;  %s14921_s0 = sld [smem:[#allocation29_spill]]  ;;  %s295_s27 = int_to_ptr.hbm [resolvable:$true] %s294_s27 }
  0x34   : > { %12282 = dma.hbm_to_vmem [thread:$0]  (!%p12866_p9), %s368_s12, 33792, %s370_s19, %s12882_s7, %s14896_s15, %s14896_s15, %s14898_s23  }
  0x35   : > { %12269 = dma.hbm_to_vmem [thread:$0]  (!%p12834_p11), %s295_s27, 16, %s297_s5, [#allocation10]  }
  0x36   : > { %12275 = dma.hbm_to_vmem [thread:$0]  (!%p12834_p11), %s319_s14, 16, %s321_s17, [#allocation13]  }
  0x37   : > { %s335_s26 = scalar_lea.vmem [#allocation3], %s12861_s20  ;;  %s14922_s15 = sand.u32 1, %s12696_s29  }
  0x38   : > { %s345_s9 = sshll.u32 %s335_s26, 4  ;;  %s332_s23 = scalar_lea.sflag [#allocation4], %s14922_s15  ;;  %s346_s9 = int_to_ptr.vmem [resolvable:$true] %s345_s9 }
  0x39   : > { %s342_s19 = scalar_lea.hbm %s14921_s0, %s12864_s21  ;;  %s14923_s27 = smov 12  }
  0x3a   : > { %s343_s3 = sshll.u32 %s342_s19, 4  ;;  %s14924_s5 = smov 192   ;;  %s344_s3 = int_to_ptr.hbm [resolvable:$true] %s343_s3 }
  0x3b   : > { %12279 = dma.hbm_to_vmem [thread:$0]  (!%p12866_p9), %s344_s3, 33792, %s346_s9, %s332_s23, %s14924_s5, %s14924_s5, %s14923_s27  }
  0x3c   : > { %s390_s1 = scalar_lea.hbm %s14883_s2, %s12864_s21  ;;  %s383_s0 = scalar_lea.vmem [#allocation8], %s12861_s20 }
  0x3d   : > { %s391_s12 = sshll.u32 %s390_s1, 4  ;;  %s393_s24 = sshll.u32 %s383_s0, 4  ;;  %s392_s12 = int_to_ptr.hbm [resolvable:$true] %s391_s12  ;;  %s394_s24 = int_to_ptr.vmem [resolvable:$true] %s393_s24 }
  0x3e   : > { %12285 = dma.hbm_to_vmem [thread:$0]  (!%p12866_p9), %s392_s12, 33792, %s394_s24, %s12882_s7, %s14924_s5, %s14924_s5, %s14923_s27  }
  0x3f   : > { %405 = sbr.rel (%p12822_p8) target bundleno = 2118 (0x846), region = 48  ;;  %s12923_s23 = sand.u32 (!%p12822_p8), 1, %s12692_s28  }
  0x40   : > { %s12236_s4 = smul.u32 (!%p12822_p8), 2112, %s12923_s23  ;;  %s408_s21 = scalar_lea.sflag (!%p12822_p8), [#allocation4], %s12923_s23 }
  0x42   : > { %s12927_s20 = scalar_lea.vmem (!%p12822_p8), [#allocation3], %s12236_s4 }
  0x44   : > { %12663 = dma.done.wait (%p12809_p4), %s408_s21, 33792  }
  0x45   : > { %12665 = vsyncadd (%p12809_p4), %s408_s21, 4294933504  ;;  %s417_s0 = sand.u32 1, %s12800_s11   ;;  %s12934_s18 = scalar_lea.vmem [#allocation6], %s12236_s4 }
  0x46   : > { %s418_s7 = scalar_lea.sflag [#allocation7], %s417_s0 }
  0x47   : > { %12667 = dma.done.wait (%p12809_p4), %s418_s7, 67584  }
  0x48   : > { %12669 = vsyncadd (%p12809_p4), %s418_s7, 4294899712  ;;  %s12940_s22 = scalar_lea.vmem [#allocation8], %s12236_s4 }
  0x49   : > { %12671 = dma.done.wait (%p68_p1), [#allocation10], 4240  }
  0x4a   : > { %12673 = vsyncadd (%p68_p1), [#allocation10], 4294963056 }
  0x4b   : > { %12675 = dma.done.wait (%p68_p1), [#allocation13], 144  }
  0x4c   : > { %12677 = vsyncadd (%p68_p1), [#allocation13], 4294967152  ;;  %v8354_v0 = vld [vmem:[%s12927_s20 + $0xa8] sm:$0xf]  ;;  %v11460_v1 = vld [vmem:[%s12927_s20 + $0xb0] sm:$0xf0]  ;;  %s8056_s14 = scalar_lea.hbm %s14889_s8, %s12700_s30 }
  0x4d   : > { %v11459_v2 = vld [vmem:[%s12927_s20 + $0xac] sm:$0xf]  ;;  %v8355_v3 = vor.u32 %v11460_v1, %v8354_v0  ;;  %v8356_v4 = vld [vmem:[%s12927_s20 + $0xb4] sm:$0xf0]  ;;  %v8362_v5 = vld [vmem:[%s12927_s20 + $0xb0] sm:$0xf] }
  0x4e   : > { %v11461_v6 = vld [vmem:[%s12927_s20 + $0xb8] sm:$0xf0]  ;;  %v8359_v7 = vor.u32 %v11459_v2, %v8356_v4  ;;  %v8450_v9 = vld [vmem:[%s12927_s20 + $0x168] sm:$0xf]  ;;  %v11484_v10 = vld [vmem:[%s12927_s20 + $0x170] sm:$0xf0] }
  0x4f   : > { %v8363_v8 = vor.u32 %v11461_v6, %v8362_v5  ;;  %2275 = vmatpush.bf16.xpose.msra.mxu0 %v8355_v3  ;;  %v8451_v11 = vor.u32 %v11484_v10, %v8450_v9  ;;  %v8342_v12 = vld [vmem:[%s12927_s20 + $0x90] sm:$0xf]  ;;  %v11457_v13 = vld [vmem:[%s12927_s20 + $0x98] sm:$0xf0]  ;;  %v11456_v14 = vld [vmem:[%s12927_s20 + $0x94] sm:$0xf] }
  0x50   : > { %2288 = vmatpush.bf16.xpose.msra.mxu1 %v8359_v7  ;;  %v8344_v15 = vld [vmem:[%s12927_s20 + $0x9c] sm:$0xf0]  ;;  %v8350_v16 = vld [vmem:[%s12927_s20 + $0x98] sm:$0xf]  ;;  %v11458_v17 = vld [vmem:[%s12927_s20 + $0xa0] sm:$0xf0]  ;;  %v8343_v20 = vor.u32 %v11457_v13, %v8342_v12 }
  0x51   : > { %2301 = vmatpush.bf16.xpose.msra.mxu2 %v8363_v8  ;;  %2314 = vmatpush.bf16.xpose.msra.mxu3 %v8451_v11  ;;  %v8438_v18 = vld [vmem:[%s12927_s20 + $0x150] sm:$0xf]  ;;  %v11481_v19 = vld [vmem:[%s12927_s20 + $0x158] sm:$0xf0]  ;;  %v8347_v21 = vor.u32 %v11456_v14, %v8344_v15  ;;  %v8351_v22 = vor.u32 %v11458_v17, %v8350_v16  ;;  %v8330_v24 = vld [vmem:[%s12927_s20 + $0x78] sm:$0xf] }
  0x52   : > { %v8439_v23 = vor.u32 %v11481_v19, %v8438_v18  ;;  %v11454_v25 = vld [vmem:[%s12927_s20 + $0x80] sm:$0xf0]  ;;  %v11453_v26 = vld [vmem:[%s12927_s20 + $0x7c] sm:$0xf]  ;;  %v8332_v27 = vld [vmem:[%s12927_s20 + $0x84] sm:$0xf0] }
  0x53   : > { %v8338_v28 = vld [vmem:[%s12927_s20 + $0x80] sm:$0xf]  ;;  %v11455_v29 = vld [vmem:[%s12927_s20 + $0x88] sm:$0xf0]  ;;  %v8426_v30 = vld [vmem:[%s12927_s20 + $0x138] sm:$0xf]  ;;  %v8331_v32 = vor.u32 %v11454_v25, %v8330_v24  ;;  %v8335_v33 = vor.u32 %v11453_v26, %v8332_v27 }
  0x54   : > { %v11478_v31 = vld [vmem:[%s12927_s20 + $0x140] sm:$0xf0]  ;;  %v8339_v34 = vor.u32 %v11455_v29, %v8338_v28  ;;  %v8318_v36 = vld [vmem:[%s12927_s20 + $0x60] sm:$0xf]  ;;  %v11451_v37 = vld [vmem:[%s12927_s20 + $0x68] sm:$0xf0] }
  0x55   : > { %v8427_v35 = vor.u32 %v11478_v31, %v8426_v30  ;;  %v11450_v38 = vld [vmem:[%s12927_s20 + $0x64] sm:$0xf]  ;;  %v8320_v39 = vld [vmem:[%s12927_s20 + $0x6c] sm:$0xf0]  ;;  %v8326_v40 = vld [vmem:[%s12927_s20 + $0x68] sm:$0xf]  ;;  %v8319_v44 = vor.u32 %v11451_v37, %v8318_v36 }
  0x56   : > { %v11452_v41 = vld [vmem:[%s12927_s20 + $0x70] sm:$0xf0]  ;;  %v8414_v42 = vld [vmem:[%s12927_s20 + $0x120] sm:$0xf]  ;;  %v11475_v43 = vld [vmem:[%s12927_s20 + $0x128] sm:$0xf0]  ;;  %v8323_v45 = vor.u32 %v11450_v38, %v8320_v39 }
  0x57   : > { %2276 = vmatpush.bf16.xpose.msra.mxu0 %v8343_v20  ;;  %v8327_v46 = vor.u32 %v11452_v41, %v8326_v40  ;;  %v8415_v47 = vor.u32 %v11475_v43, %v8414_v42  ;;  %v8306_v48 = vld [vmem:[%s12927_s20 + $0x48] sm:$0xf]  ;;  %v11448_v49 = vld [vmem:[%s12927_s20 + $0x50] sm:$0xf0]  ;;  %v11447_v50 = vld [vmem:[%s12927_s20 + $0x4c] sm:$0xf] }
  0x58   : > { %2289 = vmatpush.bf16.xpose.msra.mxu1 %v8347_v21  ;;  %v8308_v51 = vld [vmem:[%s12927_s20 + $0x54] sm:$0xf0]  ;;  %v8314_v52 = vld [vmem:[%s12927_s20 + $0x50] sm:$0xf]  ;;  %v11449_v53 = vld [vmem:[%s12927_s20 + $0x58] sm:$0xf0]  ;;  %v8307_v56 = vor.u32 %v11448_v49, %v8306_v48 }
  0x59   : > { %2302 = vmatpush.bf16.xpose.msra.mxu2 %v8351_v22  ;;  %2315 = vmatpush.bf16.xpose.msra.mxu3 %v8439_v23  ;;  %v8402_v54 = vld [vmem:[%s12927_s20 + $0x108] sm:$0xf]  ;;  %v11472_v55 = vld [vmem:[%s12927_s20 + $0x110] sm:$0xf0]  ;;  %v8311_v57 = vor.u32 %v11447_v50, %v8308_v51  ;;  %v8315_v58 = vor.u32 %v11449_v53, %v8314_v52  ;;  %v8294_v60 = vld [vmem:[%s12927_s20 + $0x30] sm:$0xf] }
  0x5a   : > { %v8403_v59 = vor.u32 %v11472_v55, %v8402_v54  ;;  %v11445_v61 = vld [vmem:[%s12927_s20 + $0x38] sm:$0xf0]  ;;  %v11444_v62 = vld [vmem:[%s12927_s20 + $0x34] sm:$0xf]  ;;  %v8296_v63 = vld [vmem:[%s12927_s20 + $0x3c] sm:$0xf0] }
  0x5b   : > { %v8302_v0 = vld [vmem:[%s12927_s20 + $0x38] sm:$0xf]  ;;  %v11446_v1 = vld [vmem:[%s12927_s20 + $0x40] sm:$0xf0]  ;;  %v8390_v2 = vld [vmem:[%s12927_s20 + $0xf0] sm:$0xf]  ;;  %v8295_v4 = vor.u32 %v11445_v61, %v8294_v60  ;;  %v8299_v5 = vor.u32 %v11444_v62, %v8296_v63 }
  0x5c   : > { %v11469_v3 = vld [vmem:[%s12927_s20 + $0xf8] sm:$0xf0]  ;;  %v8303_v6 = vor.u32 %v11446_v1, %v8302_v0  ;;  %v8282_v8 = vld [vmem:[%s12927_s20 + $0x18] sm:$0xf]  ;;  %v11442_v9 = vld [vmem:[%s12927_s20 + $0x20] sm:$0xf0] }
  0x5d   : > { %v8391_v7 = vor.u32 %v11469_v3, %v8390_v2  ;;  %v11441_v10 = vld [vmem:[%s12927_s20 + $0x1c] sm:$0xf]  ;;  %v8284_v11 = vld [vmem:[%s12927_s20 + $0x24] sm:$0xf0]  ;;  %v8290_v12 = vld [vmem:[%s12927_s20 + $0x20] sm:$0xf]  ;;  %v8283_v16 = vor.u32 %v11442_v9, %v8282_v8 }
  0x5e   : > { %v11443_v13 = vld [vmem:[%s12927_s20 + $0x28] sm:$0xf0]  ;;  %v8378_v14 = vld [vmem:[%s12927_s20 + $0xd8] sm:$0xf]  ;;  %v11466_v15 = vld [vmem:[%s12927_s20 + $0xe0] sm:$0xf0]  ;;  %v8287_v17 = vor.u32 %v11441_v10, %v8284_v11 }
  0x5f   : > { %2277 = vmatpush.bf16.xpose.msra.mxu0 %v8331_v32  ;;  %v8291_v18 = vor.u32 %v11443_v13, %v8290_v12  ;;  %v8379_v19 = vor.u32 %v11466_v15, %v8378_v14  ;;  %v8270_v20 = vld [vmem:[%s12927_s20] sm:$0xf]  ;;  %v11439_v21 = vld [vmem:[%s12927_s20 + $0x8] sm:$0xf0]  ;;  %v11438_v22 = vld [vmem:[%s12927_s20 + $0x4] sm:$0xf] }
  0x60   : > { %2290 = vmatpush.bf16.xpose.msra.mxu1 %v8335_v33  ;;  %v8272_v23 = vld [vmem:[%s12927_s20 + $0xc] sm:$0xf0]  ;;  %v8278_v24 = vld [vmem:[%s12927_s20 + $0x8] sm:$0xf]  ;;  %v11440_v25 = vld [vmem:[%s12927_s20 + $0x10] sm:$0xf0]  ;;  %v8271_v31 = vor.u32 %v11439_v21, %v8270_v20 }
  0x61   : > { %2303 = vmatpush.bf16.xpose.msra.mxu2 %v8339_v34  ;;  %2316 = vmatpush.bf16.xpose.msra.mxu3 %v8427_v35  ;;  %v8366_v26 = vld [vmem:[%s12927_s20 + $0xc0] sm:$0xf]  ;;  %v11463_v27 = vld [vmem:[%s12927_s20 + $0xc8] sm:$0xf0]  ;;  %v8452_v29 = vld [vmem:[%s12927_s20 + $0x174] sm:$0xf0]  ;;  %v8275_v35 = vor.u32 %v11438_v22, %v8272_v23  ;;  %v8279_v36 = vor.u32 %v11440_v25, %v8278_v24 }
  0x62   : > { %v11483_v28 = vld [vmem:[%s12927_s20 + $0x16c] sm:$0xf]  ;;  %v8458_v30 = vld [vmem:[%s12927_s20 + $0x170] sm:$0xf]  ;;  %v11485_v32 = vld [vmem:[%s12927_s20 + $0x178] sm:$0xf0]  ;;  %v8367_v39 = vor.u32 %v11463_v27, %v8366_v26 }
  0x63   : > { %v8546_v33 = vld [vmem:[%s12927_s20 + $0x228] sm:$0xf]  ;;  %v11508_v34 = vld [vmem:[%s12927_s20 + $0x230] sm:$0xf0]  ;;  %v11507_v37 = vld [vmem:[%s12927_s20 + $0x22c] sm:$0xf]  ;;  %v8455_v40 = vor.u32 %v11483_v28, %v8452_v29  ;;  %v8459_v41 = vor.u32 %v11485_v32, %v8458_v30 }
  0x64   : > { %v8548_v38 = vld [vmem:[%s12927_s20 + $0x234] sm:$0xf0]  ;;  %v8547_v42 = vor.u32 %v11508_v34, %v8546_v33  ;;  %v8534_v48 = vld [vmem:[%s12927_s20 + $0x210] sm:$0xf]  ;;  %v11505_v49 = vld [vmem:[%s12927_s20 + $0x218] sm:$0xf0] }
  0x65   : > { %v8551_v43 = vor.u32 %v11507_v37, %v8548_v38  ;;  %v11504_v50 = vld [vmem:[%s12927_s20 + $0x214] sm:$0xf]  ;;  %v8536_v51 = vld [vmem:[%s12927_s20 + $0x21c] sm:$0xf0]  ;;  %v8535_v54 = vor.u32 %v11505_v49, %v8534_v48  ;;  %v8522_v60 = vld [vmem:[%s12927_s20 + $0x1f8] sm:$0xf] }
  0x66   : > { %v8539_v55 = vor.u32 %v11504_v50, %v8536_v51  ;;  %v11502_v61 = vld [vmem:[%s12927_s20 + $0x200] sm:$0xf0]  ;;  %v11501_v62 = vld [vmem:[%s12927_s20 + $0x1fc] sm:$0xf]  ;;  %v8524_v63 = vld [vmem:[%s12927_s20 + $0x204] sm:$0xf0] }
  0x67   : > { %2278 = vmatpush.bf16.xpose.msra.mxu0 %v8319_v44  ;;  %v11480_v44 = vld [vmem:[%s12927_s20 + $0x154] sm:$0xf]  ;;  %v12716_v0 = vmov 1065369472   ;;  %v8523_v3 = vor.u32 %v11502_v61, %v8522_v60  ;;  %v8510_v9 = vld [vmem:[%s12927_s20 + $0x1e0] sm:$0xf] }
  0x68   : > { %2291 = vmatpush.bf16.xpose.msra.mxu1 %v8323_v45  ;;  %v8440_v45 = vld [vmem:[%s12927_s20 + $0x15c] sm:$0xf0]  ;;  %v11476_v8 = vld [vmem:[%s12927_s20 + $0x130] sm:$0xf0]  ;;  %v11499_v10 = vld [vmem:[%s12927_s20 + $0x1e8] sm:$0xf0] }
  0x69   : > { %2304 = vmatpush.bf16.xpose.msra.mxu2 %v8327_v46  ;;  %2317 = vmatpush.bf16.xpose.msra.mxu3 %v8415_v47  ;;  %v8446_v46 = vld [vmem:[%s12927_s20 + $0x158] sm:$0xf]  ;;  %v11482_v47 = vld [vmem:[%s12927_s20 + $0x160] sm:$0xf0]  ;;  %v8443_v52 = vor.u32 %v11480_v44, %v8440_v45  ;;  %v8512_v12 = vld [vmem:[%s12927_s20 + $0x1ec] sm:$0xf0]  ;;  %v8511_v15 = vor.u32 %v11499_v10, %v8510_v9 }
  0x6a   : > { %v8447_v53 = vor.u32 %v11482_v47, %v8446_v46  ;;  %v11498_v11 = vld [vmem:[%s12927_s20 + $0x1e4] sm:$0xf]  ;;  %v11473_v20 = vld [vmem:[%s12927_s20 + $0x118] sm:$0xf0]  ;;  %v8498_v21 = vld [vmem:[%s12927_s20 + $0x1c8] sm:$0xf] }
  0x6b   : > { %v11496_v22 = vld [vmem:[%s12927_s20 + $0x1d0] sm:$0xf0]  ;;  %v11495_v23 = vld [vmem:[%s12927_s20 + $0x1cc] sm:$0xf]  ;;  %v8500_v24 = vld [vmem:[%s12927_s20 + $0x1d4] sm:$0xf0] }
  0x6c   : > { %v8499_v27 = vor.u32 %v11496_v22, %v8498_v21  ;;  %v8503_v28 = vor.u32 %v11495_v23, %v8500_v24  ;;  %v11468_v29 = vld [vmem:[%s12927_s20 + $0xf4] sm:$0xf]  ;;  %v8392_v30 = vld [vmem:[%s12927_s20 + $0xfc] sm:$0xf0]  ;;  %v11470_v32 = vld [vmem:[%s12927_s20 + $0x100] sm:$0xf0] }
  0x6d   : > { %v8486_v33 = vld [vmem:[%s12927_s20 + $0x1b0] sm:$0xf]  ;;  %v11493_v34 = vld [vmem:[%s12927_s20 + $0x1b8] sm:$0xf0]  ;;  %v8395_v37 = vor.u32 %v11468_v29, %v8392_v30  ;;  %v11467_v44 = vld [vmem:[%s12927_s20 + $0xe8] sm:$0xf0] }
  0x6e   : > { %v8474_v45 = vld [vmem:[%s12927_s20 + $0x198] sm:$0xf]  ;;  %v11490_v46 = vld [vmem:[%s12927_s20 + $0x1a0] sm:$0xf0]  ;;  %v11489_v47 = vld [vmem:[%s12927_s20 + $0x19c] sm:$0xf] }
  0x6f   : > { %2279 = vmatpush.bf16.xpose.msra.mxu0 %v8307_v56  ;;  %v11477_v56 = vld [vmem:[%s12927_s20 + $0x13c] sm:$0xf]  ;;  %v8476_v48 = vld [vmem:[%s12927_s20 + $0x1a4] sm:$0xf0]  ;;  %v8475_v51 = vor.u32 %v11490_v46, %v8474_v45  ;;  %v8464_v60 = vld [vmem:[%s12927_s20 + $0x18c] sm:$0xf0] }
  0x70   : > { %2292 = vmatpush.bf16.xpose.msra.mxu1 %v8311_v57  ;;  %v8428_v57 = vld [vmem:[%s12927_s20 + $0x144] sm:$0xf0]  ;;  %v8554_v61 = vld [vmem:[%s12927_s20 + $0x230] sm:$0xf]  ;;  %v11530_v21 = vld [vmem:[%s12927_s20 + $0x2e0] sm:$0xf0] }
  0x71   : > { %2305 = vmatpush.bf16.xpose.msra.mxu2 %v8315_v58  ;;  %2318 = vmatpush.bf16.xpose.msra.mxu3 %v8403_v59  ;;  %v8434_v58 = vld [vmem:[%s12927_s20 + $0x140] sm:$0xf]  ;;  %v11479_v59 = vld [vmem:[%s12927_s20 + $0x148] sm:$0xf0]  ;;  %v8431_v1 = vor.u32 %v11477_v56, %v8428_v57  ;;  %v11464_v56 = vld [vmem:[%s12927_s20 + $0xd0] sm:$0xf0] }
  0x72   : > { %v8435_v2 = vor.u32 %v11479_v59, %v8434_v58  ;;  %v8462_v57 = vld [vmem:[%s12927_s20 + $0x180] sm:$0xf]  ;;  %v11487_v58 = vld [vmem:[%s12927_s20 + $0x188] sm:$0xf0]  ;;  %v11486_v59 = vld [vmem:[%s12927_s20 + $0x184] sm:$0xf] }
  0x73   : > { %v8467_v9 = vor.u32 %v11486_v59, %v8464_v60  ;;  %v11526_v29 = vld [vmem:[%s12927_s20 + $0x2c0] sm:$0xf0]  ;;  %v11525_v30 = vld [vmem:[%s12927_s20 + $0x2bc] sm:$0xf]  ;;  %v11524_v45 = vld [vmem:[%s12927_s20 + $0x2b0] sm:$0xf0] }
  0x74   : > { %vm2726_vm0 = vcmask 1040384   ;;  %vm2728_vm1 = vcmask 1042434   ;;  %vm2730_vm2 = vcmask 1041408   ;;  %vm2732_vm3 = vcmask 1044484   ;;  %s497_s11 = scalar_lea.vmem [#allocation16], %s12923_s23  ;;  %s8060_s19 = sshll.u32 %s8056_s14, 4  ;;  %s8061_s19 = int_to_ptr.hbm [resolvable:$true] %s8060_s19 }
  0x75   : > { %vm2734_vm4 = vcmask 1046534   ;;  %vm2736_vm5 = vcmask 1045508   ;;  %vm2738_vm6 = vcmask 1043456   ;;  %vm8027_vm9 = vcmask 57344   ;;  %s8058_s17 = sshll.u32 %s497_s11, 4  ;;  %s8035_s3 = scalar_lea.sflag [#allocation17], %s12923_s23  ;;  %s8059_s17 = int_to_ptr.vmem [resolvable:$true] %s8058_s17 }
  0x76   : > { %s12596_s26 = sshra.s32 %s8061_s19, 4  ;;  %s12602_s25 = scalar_lea.hbm %s14889_s8, 2  ;;  %s12597_s26 = int_to_ptr.hbm [resolvable:$true] %s12596_s26 }
  0x77   : > { %2280 = vmatpush.bf16.xpose.msra.mxu0 %v8295_v4  ;;  %v8527_v4 = vor.u32 %v11501_v62, %v8524_v63  ;;  %v11509_v62 = vld [vmem:[%s12927_s20 + $0x238] sm:$0xf0]  ;;  %v8642_v63 = vld [vmem:[%s12927_s20 + $0x2e8] sm:$0xf]  ;;  %s12598_s9 = scalar_lea.hbm %s12597_s26, 1  ;;  %p12603_p8 = scmp.lt.s32.totalorder %s12597_s26, %s14889_s8 }
  0x78   : > { %2293 = vmatpush.bf16.xpose.msra.mxu1 %v8299_v5  ;;  %v11474_v5 = vld [vmem:[%s12927_s20 + $0x124] sm:$0xf]  ;;  %v8555_v10 = vor.u32 %v11509_v62, %v8554_v61  ;;  %v8494_v62 = vld [vmem:[%s12927_s20 + $0x1b8] sm:$0xf]  ;;  %p12599_p1 = scmp.ne.s32.totalorder %s12597_s26, %s12598_s9  ;;  %p12604_p9 = scmp.lt.s32.totalorder %s12602_s25, %s12598_s9 }
  0x79   : > { %2306 = vmatpush.bf16.xpose.msra.mxu2 %v8303_v6  ;;  %2319 = vmatpush.bf16.xpose.msra.mxu3 %v8391_v7  ;;  %v8416_v6 = vld [vmem:[%s12927_s20 + $0x12c] sm:$0xf0]  ;;  %v8422_v7 = vld [vmem:[%s12927_s20 + $0x128] sm:$0xf] }
  0x7a   : > { %v8419_v13 = vor.u32 %v11474_v5, %v8416_v6  ;;  %v8423_v14 = vor.u32 %v11476_v8, %v8422_v7  ;;  %v8463_v6 = vor.u32 %v11487_v58, %v8462_v57  ;;  %v8650_v7 = vld [vmem:[%s12927_s20 + $0x2f0] sm:$0xf]  ;;  %v11533_v8 = vld [vmem:[%s12927_s20 + $0x2f8] sm:$0xf0]  ;;  %p12600_p2 = pnand %p12599_p1, %p12852_p7  ;;  %p12605_p11 = por %p12604_p9, %p12603_p8 }
  0x7b   : > { %v11521_v57 = vld [vmem:[%s12927_s20 + $0x298] sm:$0xf0] }
  0x7c   : > { %p12601_p4 = pneg %p12600_p2 }
  0x7e   : > { %p12606_p12 = pnand %p12605_p11, %p12601_p4 }
  0x7f   : > { %2281 = vmatpush.bf16.xpose.msra.mxu0 %v8283_v16  ;;  %v8515_v16 = vor.u32 %v11498_v11, %v8512_v12 }
  0x80   : > { %2294 = vmatpush.bf16.xpose.msra.mxu1 %v8287_v17  ;;  %v11471_v17 = vld [vmem:[%s12927_s20 + $0x10c] sm:$0xf] }
  0x81   : > { %2307 = vmatpush.bf16.xpose.msra.mxu2 %v8291_v18  ;;  %2320 = vmatpush.bf16.xpose.msra.mxu3 %v8379_v19  ;;  %v8404_v18 = vld [vmem:[%s12927_s20 + $0x114] sm:$0xf0]  ;;  %v8410_v19 = vld [vmem:[%s12927_s20 + $0x110] sm:$0xf] }
  0x82   : > { %v8407_v25 = vor.u32 %v11471_v17, %v8404_v18  ;;  %v8411_v26 = vor.u32 %v11473_v20, %v8410_v19  ;;  %v11529_v17 = vld [vmem:[%s12927_s20 + $0x2d8] sm:$0xf0]  ;;  %v11528_v18 = vld [vmem:[%s12927_s20 + $0x2d4] sm:$0xf]  ;;  %v8632_v19 = vld [vmem:[%s12927_s20 + $0x2dc] sm:$0xf0] }
  0x83   : > { %v8638_v20 = vld [vmem:[%s12927_s20 + $0x2d8] sm:$0xf]  ;;  %v8635_v24 = vor.u32 %v11528_v18, %v8632_v19  ;;  %v11515_v18 = vld [vmem:[%s12927_s20 + $0x268] sm:$0xf0] }
  0x87   : > { %2282 = vmatpush.bf16.xpose.msra.mxu0 %v8271_v31  ;;  %v8398_v31 = vld [vmem:[%s12927_s20 + $0xf8] sm:$0xf] }
  0x88   : > { %2295 = vmatpush.bf16.xpose.msra.mxu1 %v8275_v35  ;;  %v11492_v35 = vld [vmem:[%s12927_s20 + $0x1b4] sm:$0xf]  ;;  %v8399_v38 = vor.u32 %v11470_v32, %v8398_v31  ;;  %v8620_v31 = vld [vmem:[%s12927_s20 + $0x2c4] sm:$0xf0]  ;;  %v8626_v32 = vld [vmem:[%s12927_s20 + $0x2c0] sm:$0xf] }
  0x89   : > { %2308 = vmatpush.bf16.xpose.msra.mxu2 %v8279_v36  ;;  %2321 = vmatpush.bf16.xpose.msra.mxu3 %v8367_v39  ;;  %v8488_v36 = vld [vmem:[%s12927_s20 + $0x1bc] sm:$0xf0]  ;;  %v8487_v39 = vor.u32 %v11493_v34, %v8486_v33  ;;  %v11527_v33 = vld [vmem:[%s12927_s20 + $0x2c8] sm:$0xf0] }
  0x8e   : > { %2283 = vmatmul.bf16.vlgmr.msra.gmra.mxu0 %v12716_v0 }
  0x8f   : > { %2327 = vmatpush.bf16.xpose.msrb.mxu0 %v8455_v40  ;;  %2296 = vmatmul.bf16.vlgmr.msra.gmra.mxu1 %v12716_v0  ;;  %v8491_v40 = vor.u32 %v11492_v35, %v8488_v36  ;;  %v8623_v36 = vor.u32 %v11525_v30, %v8620_v31  ;;  %v11512_v30 = vld [vmem:[%s12927_s20 + $0x250] sm:$0xf0]  ;;  %v8738_v31 = vld [vmem:[%s12927_s20 + $0x3a8] sm:$0xf] }
  0x90   : > { %2340 = vmatpush.bf16.xpose.msrb.mxu1 %v8459_v41  ;;  %2309 = vmatmul.bf16.vlgmr.msra.gmra.mxu2 %v12716_v0  ;;  %v11465_v41 = vld [vmem:[%s12927_s20 + $0xdc] sm:$0xf] }
  0x91   : > { %2353 = vmatpush.bf16.xpose.msrb.mxu2 %v8547_v42  ;;  %2366 = vmatpush.bf16.xpose.msrb.mxu3 %v8551_v43  ;;  %v8380_v42 = vld [vmem:[%s12927_s20 + $0xe4] sm:$0xf0]  ;;  %v8386_v43 = vld [vmem:[%s12927_s20 + $0xe0] sm:$0xf] }
  0x92   : > { %2322 = vmatmul.bf16.vlgmr.msra.gmra.mxu3 %v12716_v0  ;;  %v8383_v49 = vor.u32 %v11465_v41, %v8380_v42  ;;  %v8387_v50 = vor.u32 %v11467_v44, %v8386_v43  ;;  %v11523_v41 = vld [vmem:[%s12927_s20 + $0x2a8] sm:$0xf0]  ;;  %v11522_v42 = vld [vmem:[%s12927_s20 + $0x2a4] sm:$0xf]  ;;  %v8608_v43 = vld [vmem:[%s12927_s20 + $0x2ac] sm:$0xf0] }
  0x93   : > { %v8614_v44 = vld [vmem:[%s12927_s20 + $0x2a8] sm:$0xf] }
  0x97   : > { %2328 = vmatpush.bf16.xpose.msrb.mxu0 %v8443_v52  ;;  %v8479_v52 = vor.u32 %v11489_v47, %v8476_v48  ;;  %v8611_v48 = vor.u32 %v11522_v42, %v8608_v43 }
  0x98   : > { %2341 = vmatpush.bf16.xpose.msrb.mxu1 %v8447_v53  ;;  %v11462_v53 = vld [vmem:[%s12927_s20 + $0xc4] sm:$0xf] }
  0x99   : > { %2354 = vmatpush.bf16.xpose.msrb.mxu2 %v8535_v54  ;;  %2367 = vmatpush.bf16.xpose.msrb.mxu3 %v8539_v55  ;;  %v8368_v54 = vld [vmem:[%s12927_s20 + $0xcc] sm:$0xf0]  ;;  %v8374_v55 = vld [vmem:[%s12927_s20 + $0xc8] sm:$0xf] }
  0x9a   : > { %v8375_v5 = vor.u32 %v11464_v56, %v8374_v55  ;;  %v8596_v55 = vld [vmem:[%s12927_s20 + $0x294] sm:$0xf0]  ;;  %v8602_v56 = vld [vmem:[%s12927_s20 + $0x290] sm:$0xf] }
  0x9b   : > { %v8603_v61 = vor.u32 %v11521_v57, %v8602_v56 }
  0x9f   : > { %2329 = vmatpush.bf16.xpose.msrb.mxu0 %v8431_v1  ;;  %v8371_v1 = vor.u32 %v11462_v53, %v8368_v54  ;;  %v11520_v53 = vld [vmem:[%s12927_s20 + $0x290] sm:$0xf0]  ;;  %v11519_v54 = vld [vmem:[%s12927_s20 + $0x28c] sm:$0xf] }
  0xa0   : > { %2342 = vmatpush.bf16.xpose.msrb.mxu1 %v8435_v2  ;;  %v11532_v2 = vld [vmem:[%s12927_s20 + $0x2f0] sm:$0xf0]  ;;  %v8599_v60 = vor.u32 %v11519_v54, %v8596_v55  ;;  %v11577_v54 = vld [vmem:[%s12927_s20 + $0x458] sm:$0xf0] }
  0xa1   : > { %2355 = vmatpush.bf16.xpose.msrb.mxu2 %v8523_v3  ;;  %2368 = vmatpush.bf16.xpose.msrb.mxu3 %v8527_v4  ;;  %v11531_v3 = vld [vmem:[%s12927_s20 + $0x2ec] sm:$0xf]  ;;  %v8644_v4 = vld [vmem:[%s12927_s20 + $0x2f4] sm:$0xf0]  ;;  %v8643_v11 = vor.u32 %v11532_v2, %v8642_v63  ;;  %v11494_v63 = vld [vmem:[%s12927_s20 + $0x1c0] sm:$0xf0] }
  0xa2   : > { %v8647_v12 = vor.u32 %v11531_v3, %v8644_v4  ;;  %v11517_v2 = vld [vmem:[%s12927_s20 + $0x278] sm:$0xf0]  ;;  %v11516_v3 = vld [vmem:[%s12927_s20 + $0x274] sm:$0xf]  ;;  %v8584_v4 = vld [vmem:[%s12927_s20 + $0x27c] sm:$0xf0] }
  0xa7   : > { %2330 = vmatpush.bf16.xpose.msrb.mxu0 %v8419_v13  ;;  %v8651_v13 = vor.u32 %v11533_v8, %v8650_v7  ;;  %v8495_v7 = vor.u32 %v11494_v63, %v8494_v62  ;;  %v8716_v62 = vld [vmem:[%s12927_s20 + $0x384] sm:$0xf0]  ;;  %v8722_v63 = vld [vmem:[%s12927_s20 + $0x380] sm:$0xf] }
  0xa8   : > { %2343 = vmatpush.bf16.xpose.msrb.mxu1 %v8423_v14  ;;  %v8542_v14 = vld [vmem:[%s12927_s20 + $0x218] sm:$0xf] }
  0xa9   : > { %2356 = vmatpush.bf16.xpose.msrb.mxu2 %v8511_v15  ;;  %2369 = vmatpush.bf16.xpose.msrb.mxu3 %v8515_v16  ;;  %v11506_v15 = vld [vmem:[%s12927_s20 + $0x220] sm:$0xf0]  ;;  %v8630_v16 = vld [vmem:[%s12927_s20 + $0x2d0] sm:$0xf] }
  0xaa   : > { %v8543_v22 = vor.u32 %v11506_v15, %v8542_v14  ;;  %v8631_v23 = vor.u32 %v11529_v17, %v8630_v16  ;;  %v11514_v14 = vld [vmem:[%s12927_s20 + $0x260] sm:$0xf0]  ;;  %v11513_v15 = vld [vmem:[%s12927_s20 + $0x25c] sm:$0xf]  ;;  %v8572_v16 = vld [vmem:[%s12927_s20 + $0x264] sm:$0xf0] }
  0xab   : > { %v8578_v17 = vld [vmem:[%s12927_s20 + $0x260] sm:$0xf] }
  0xaf   : > { %2331 = vmatpush.bf16.xpose.msrb.mxu0 %v8407_v25  ;;  %v8639_v25 = vor.u32 %v11530_v21, %v8638_v20  ;;  %v8575_v21 = vor.u32 %v11513_v15, %v8572_v16  ;;  %v11571_v15 = vld [vmem:[%s12927_s20 + $0x428] sm:$0xf0] }
  0xb0   : > { %2344 = vmatpush.bf16.xpose.msrb.mxu1 %v8411_v26  ;;  %v8530_v26 = vld [vmem:[%s12927_s20 + $0x200] sm:$0xf] }
  0xb1   : > { %2357 = vmatpush.bf16.xpose.msrb.mxu2 %v8499_v27  ;;  %2370 = vmatpush.bf16.xpose.msrb.mxu3 %v8503_v28  ;;  %v11503_v27 = vld [vmem:[%s12927_s20 + $0x208] sm:$0xf0]  ;;  %v8618_v28 = vld [vmem:[%s12927_s20 + $0x2b8] sm:$0xf] }
  0xb2   : > { %v8531_v34 = vor.u32 %v11503_v27, %v8530_v26  ;;  %v8619_v35 = vor.u32 %v11526_v29, %v8618_v28  ;;  %v11511_v26 = vld [vmem:[%s12927_s20 + $0x248] sm:$0xf0]  ;;  %v11510_v27 = vld [vmem:[%s12927_s20 + $0x244] sm:$0xf]  ;;  %v8560_v28 = vld [vmem:[%s12927_s20 + $0x24c] sm:$0xf0] }
  0xb3   : > { %v8566_v29 = vld [vmem:[%s12927_s20 + $0x248] sm:$0xf] }
  0xb4   : > { %v8567_v42 = vor.u32 %v11512_v30, %v8566_v29 }
  0xb7   : > { %2332 = vmatpush.bf16.xpose.msrb.mxu0 %v8395_v37  ;;  %v8627_v37 = vor.u32 %v11527_v33, %v8626_v32  ;;  %v11556_v32 = vld [vmem:[%s12927_s20 + $0x3b0] sm:$0xf0]  ;;  %v11555_v33 = vld [vmem:[%s12927_s20 + $0x3ac] sm:$0xf] }
  0xb8   : > { %2345 = vmatpush.bf16.xpose.msrb.mxu1 %v8399_v38  ;;  %v8518_v38 = vld [vmem:[%s12927_s20 + $0x1e8] sm:$0xf]  ;;  %v8739_v43 = vor.u32 %v11556_v32, %v8738_v31 }
  0xb9   : > { %2358 = vmatpush.bf16.xpose.msrb.mxu2 %v8487_v39  ;;  %2371 = vmatpush.bf16.xpose.msrb.mxu3 %v8491_v40  ;;  %v11500_v39 = vld [vmem:[%s12927_s20 + $0x1f0] sm:$0xf0]  ;;  %v8606_v40 = vld [vmem:[%s12927_s20 + $0x2a0] sm:$0xf] }
  0xba   : > { %v8519_v46 = vor.u32 %v11500_v39, %v8518_v38  ;;  %v8607_v47 = vor.u32 %v11523_v41, %v8606_v40  ;;  %v8563_v39 = vor.u32 %v11510_v27, %v8560_v28  ;;  %v8834_v40 = vld [vmem:[%s12927_s20 + $0x468] sm:$0xf]  ;;  %v11580_v41 = vld [vmem:[%s12927_s20 + $0x470] sm:$0xf0] }
  0xbb   : > { %v11568_v27 = vld [vmem:[%s12927_s20 + $0x410] sm:$0xf0] }
  0xbf   : > { %2333 = vmatpush.bf16.xpose.msrb.mxu0 %v8383_v49  ;;  %v8615_v49 = vor.u32 %v11524_v45, %v8614_v44 }
  0xc0   : > { %2346 = vmatpush.bf16.xpose.msrb.mxu1 %v8387_v50  ;;  %v8506_v50 = vld [vmem:[%s12927_s20 + $0x1d0] sm:$0xf] }
  0xc1   : > { %2359 = vmatpush.bf16.xpose.msrb.mxu2 %v8475_v51  ;;  %2372 = vmatpush.bf16.xpose.msrb.mxu3 %v8479_v52  ;;  %v11497_v51 = vld [vmem:[%s12927_s20 + $0x1d8] sm:$0xf0]  ;;  %v8594_v52 = vld [vmem:[%s12927_s20 + $0x288] sm:$0xf] }
  0xc2   : > { %v8507_v58 = vor.u32 %v11497_v51, %v8506_v50  ;;  %v8595_v59 = vor.u32 %v11520_v53, %v8594_v52  ;;  %v8728_v50 = vld [vmem:[%s12927_s20 + $0x39c] sm:$0xf0]  ;;  %v8734_v51 = vld [vmem:[%s12927_s20 + $0x398] sm:$0xf]  ;;  %v11554_v52 = vld [vmem:[%s12927_s20 + $0x3a0] sm:$0xf0] }
  0xc3   : > { %v8822_v53 = vld [vmem:[%s12927_s20 + $0x450] sm:$0xf]  ;;  %v8735_v57 = vor.u32 %v11554_v52, %v8734_v51  ;;  %v8666_v51 = vld [vmem:[%s12927_s20 + $0x318] sm:$0xf]  ;;  %v11538_v52 = vld [vmem:[%s12927_s20 + $0x320] sm:$0xf0] }
  0xc7   : > { %2334 = vmatpush.bf16.xpose.msrb.mxu0 %v8371_v1  ;;  %v8582_v1 = vld [vmem:[%s12927_s20 + $0x270] sm:$0xf] }
  0xc8   : > { %2347 = vmatpush.bf16.xpose.msrb.mxu1 %v8375_v5  ;;  %v8590_v5 = vld [vmem:[%s12927_s20 + $0x278] sm:$0xf]  ;;  %v8583_v8 = vor.u32 %v11517_v2, %v8582_v1  ;;  %v11551_v1 = vld [vmem:[%s12927_s20 + $0x388] sm:$0xf0] }
  0xc9   : > { %2360 = vmatpush.bf16.xpose.msrb.mxu2 %v8463_v6  ;;  %2373 = vmatpush.bf16.xpose.msrb.mxu3 %v8467_v9  ;;  %v11518_v6 = vld [vmem:[%s12927_s20 + $0x280] sm:$0xf0]  ;;  %v8587_v9 = vor.u32 %v11516_v3, %v8584_v4  ;;  %v8810_v2 = vld [vmem:[%s12927_s20 + $0x438] sm:$0xf] }
  0xca   : > { %v11574_v3 = vld [vmem:[%s12927_s20 + $0x440] sm:$0xf0] }
  0xce   : > { %2335 = vmatmul.bf16.vlgmr.msrb.gmra.mxu0 %v12716_v0 }
  0xcf   : > { %2379 = vmatpush.bf16.xpose.msra.mxu0 %v8555_v10  ;;  %2348 = vmatmul.bf16.vlgmr.msrb.gmra.mxu1 %v12716_v0  ;;  %v8591_v10 = vor.u32 %v11518_v6, %v8590_v5  ;;  %v8723_v6 = vor.u32 %v11551_v1, %v8722_v63 }
  0xd0   : > { %2392 = vmatpush.bf16.xpose.msra.mxu1 %v8643_v11  ;;  %2361 = vmatmul.bf16.vlgmr.msrb.gmra.mxu2 %v12716_v0  ;;  %v8482_v11 = vld [vmem:[%s12927_s20 + $0x1a0] sm:$0xf] }
  0xd1   : > { %2405 = vmatpush.bf16.xpose.msra.mxu2 %v8647_v12  ;;  %2418 = vmatpush.bf16.xpose.msra.mxu3 %v8651_v13  ;;  %v11491_v12 = vld [vmem:[%s12927_s20 + $0x1a8] sm:$0xf0]  ;;  %v8570_v13 = vld [vmem:[%s12927_s20 + $0x258] sm:$0xf] }
  0xd2   : > { %2374 = vmatmul.bf16.vlgmr.msrb.gmra.mxu3 %v12716_v0  ;;  %v8483_v19 = vor.u32 %v11491_v12, %v8482_v11  ;;  %v8571_v20 = vor.u32 %v11514_v14, %v8570_v13  ;;  %v8704_v11 = vld [vmem:[%s12927_s20 + $0x36c] sm:$0xf0]  ;;  %v8710_v12 = vld [vmem:[%s12927_s20 + $0x368] sm:$0xf]  ;;  %v11548_v13 = vld [vmem:[%s12927_s20 + $0x370] sm:$0xf0] }
  0xd3   : > { %v8798_v14 = vld [vmem:[%s12927_s20 + $0x420] sm:$0xf] }
  0xd7   : > { %2380 = vmatpush.bf16.xpose.msra.mxu0 %v8543_v22  ;;  %v8579_v22 = vor.u32 %v11515_v18, %v8578_v17  ;;  %v8711_v18 = vor.u32 %v11548_v13, %v8710_v12  ;;  %v8842_v12 = vld [vmem:[%s12927_s20 + $0x470] sm:$0xf] }
  0xd8   : > { %2393 = vmatpush.bf16.xpose.msra.mxu1 %v8631_v23  ;;  %v8470_v23 = vld [vmem:[%s12927_s20 + $0x188] sm:$0xf] }
  0xd9   : > { %2406 = vmatpush.bf16.xpose.msra.mxu2 %v8635_v24  ;;  %2419 = vmatpush.bf16.xpose.msra.mxu3 %v8639_v25  ;;  %v11488_v24 = vld [vmem:[%s12927_s20 + $0x190] sm:$0xf0]  ;;  %v8558_v25 = vld [vmem:[%s12927_s20 + $0x240] sm:$0xf] }
  0xda   : > { %v8559_v38 = vor.u32 %v11511_v26, %v8558_v25  ;;  %v11545_v25 = vld [vmem:[%s12927_s20 + $0x358] sm:$0xf0]  ;;  %v8786_v26 = vld [vmem:[%s12927_s20 + $0x408] sm:$0xf] }
  0xdf   : > { %2381 = vmatpush.bf16.xpose.msra.mxu0 %v8531_v34  ;;  %v8471_v34 = vor.u32 %v11488_v24, %v8470_v23  ;;  %v8692_v23 = vld [vmem:[%s12927_s20 + $0x354] sm:$0xf0]  ;;  %v8698_v24 = vld [vmem:[%s12927_s20 + $0x350] sm:$0xf] }
  0xe0   : > { %2394 = vmatpush.bf16.xpose.msra.mxu1 %v8619_v35  ;;  %v8740_v35 = vld [vmem:[%s12927_s20 + $0x3b4] sm:$0xf0]  ;;  %v8699_v32 = vor.u32 %v11545_v25, %v8698_v24 }
  0xe1   : > { %2407 = vmatpush.bf16.xpose.msra.mxu2 %v8623_v36  ;;  %2420 = vmatpush.bf16.xpose.msra.mxu3 %v8627_v37  ;;  %v8746_v36 = vld [vmem:[%s12927_s20 + $0x3b0] sm:$0xf]  ;;  %v11557_v37 = vld [vmem:[%s12927_s20 + $0x3b8] sm:$0xf0]  ;;  %v8743_v44 = vor.u32 %v11555_v33, %v8740_v35 }
  0xe2   : > { %v8747_v45 = vor.u32 %v11557_v37, %v8746_v36  ;;  %v8678_v35 = vld [vmem:[%s12927_s20 + $0x330] sm:$0xf]  ;;  %v11541_v36 = vld [vmem:[%s12927_s20 + $0x338] sm:$0xf0]  ;;  %v11540_v37 = vld [vmem:[%s12927_s20 + $0x334] sm:$0xf] }
  0xe7   : > { %2382 = vmatpush.bf16.xpose.msra.mxu0 %v8519_v46  ;;  %v8835_v46 = vor.u32 %v11580_v41, %v8834_v40  ;;  %v11542_v40 = vld [vmem:[%s12927_s20 + $0x340] sm:$0xf0]  ;;  %v8774_v41 = vld [vmem:[%s12927_s20 + $0x3f0] sm:$0xf] }
  0xe8   : > { %2395 = vmatpush.bf16.xpose.msra.mxu1 %v8607_v47  ;;  %v8726_v47 = vld [vmem:[%s12927_s20 + $0x390] sm:$0xf] }
  0xe9   : > { %2408 = vmatpush.bf16.xpose.msra.mxu2 %v8611_v48  ;;  %2421 = vmatpush.bf16.xpose.msra.mxu3 %v8615_v49  ;;  %v11553_v48 = vld [vmem:[%s12927_s20 + $0x398] sm:$0xf0]  ;;  %v11552_v49 = vld [vmem:[%s12927_s20 + $0x394] sm:$0xf] }
  0xea   : > { %v8727_v55 = vor.u32 %v11553_v48, %v8726_v47  ;;  %v8731_v56 = vor.u32 %v11552_v49, %v8728_v50 }
  0xef   : > { %2383 = vmatpush.bf16.xpose.msra.mxu0 %v8507_v58  ;;  %v8823_v58 = vor.u32 %v11577_v54, %v8822_v53  ;;  %v11537_v53 = vld [vmem:[%s12927_s20 + $0x31c] sm:$0xf]  ;;  %v8668_v54 = vld [vmem:[%s12927_s20 + $0x324] sm:$0xf0] }
  0xf0   : > { %2396 = vmatpush.bf16.xpose.msra.mxu1 %v8595_v59  ;;  %v8714_v59 = vld [vmem:[%s12927_s20 + $0x378] sm:$0xf] }
  0xf1   : > { %2409 = vmatpush.bf16.xpose.msra.mxu2 %v8599_v60  ;;  %2422 = vmatpush.bf16.xpose.msra.mxu3 %v8603_v61  ;;  %v11550_v60 = vld [vmem:[%s12927_s20 + $0x380] sm:$0xf0]  ;;  %v11549_v61 = vld [vmem:[%s12927_s20 + $0x37c] sm:$0xf] }
  0xf2   : > { %v8715_v4 = vor.u32 %v11550_v60, %v8714_v59  ;;  %v8719_v5 = vor.u32 %v11549_v61, %v8716_v62  ;;  %v8667_v59 = vor.u32 %v11538_v52, %v8666_v51  ;;  %v8671_v62 = vor.u32 %v11537_v53, %v8668_v54 }
  0xf7   : > { %2384 = vmatpush.bf16.xpose.msra.mxu0 %v8495_v7  ;;  %v8811_v7 = vor.u32 %v11574_v3, %v8810_v2  ;;  %v8654_v2 = vld [vmem:[%s12927_s20 + $0x300] sm:$0xf]  ;;  %v11535_v3 = vld [vmem:[%s12927_s20 + $0x308] sm:$0xf0] }
  0xf8   : > { %2397 = vmatpush.bf16.xpose.msra.mxu1 %v8583_v8  ;;  %v8702_v8 = vld [vmem:[%s12927_s20 + $0x360] sm:$0xf]  ;;  %v8655_v13 = vor.u32 %v11535_v3, %v8654_v2 }
  0xf9   : > { %2410 = vmatpush.bf16.xpose.msra.mxu2 %v8587_v9  ;;  %2423 = vmatpush.bf16.xpose.msra.mxu3 %v8591_v10  ;;  %v11547_v9 = vld [vmem:[%s12927_s20 + $0x368] sm:$0xf0]  ;;  %v11546_v10 = vld [vmem:[%s12927_s20 + $0x364] sm:$0xf] }
  0xfa   : > { %v8703_v16 = vor.u32 %v11547_v9, %v8702_v8  ;;  %v8707_v17 = vor.u32 %v11546_v10, %v8704_v11  ;;  %v8750_v8 = vld [vmem:[%s12927_s20 + $0x3c0] sm:$0xf]  ;;  %v11559_v9 = vld [vmem:[%s12927_s20 + $0x3c8] sm:$0xf0]  ;;  %v8836_v11 = vld [vmem:[%s12927_s20 + $0x474] sm:$0xf0] }
  0xfb   : > { %v11579_v10 = vld [vmem:[%s12927_s20 + $0x46c] sm:$0xf] }
  0xff   : > { %2385 = vmatpush.bf16.xpose.msra.mxu0 %v8483_v19  ;;  %v8799_v19 = vor.u32 %v11571_v15, %v8798_v14  ;;  %v11581_v14 = vld [vmem:[%s12927_s20 + $0x478] sm:$0xf0]  ;;  %v8930_v15 = vld [vmem:[%s12927_s20 + $0x528] sm:$0xf] }
 0x100   : > { %2398 = vmatpush.bf16.xpose.msra.mxu1 %v8571_v20  ;;  %v8690_v20 = vld [vmem:[%s12927_s20 + $0x348] sm:$0xf]  ;;  %v8843_v24 = vor.u32 %v11581_v14, %v8842_v12  ;;  %v11569_v12 = vld [vmem:[%s12927_s20 + $0x418] sm:$0xf0]  ;;  %v11591_v14 = vld [vmem:[%s12927_s20 + $0x4cc] sm:$0xf] }
 0x101   : > { %2411 = vmatpush.bf16.xpose.msra.mxu2 %v8575_v21  ;;  %2424 = vmatpush.bf16.xpose.msra.mxu3 %v8579_v22  ;;  %v11544_v21 = vld [vmem:[%s12927_s20 + $0x350] sm:$0xf0]  ;;  %v11543_v22 = vld [vmem:[%s12927_s20 + $0x34c] sm:$0xf] }
 0x102   : > { %v8691_v28 = vor.u32 %v11544_v21, %v8690_v20  ;;  %v8695_v31 = vor.u32 %v11543_v22, %v8692_v23  ;;  %v11603_v20 = vld [vmem:[%s12927_s20 + $0x52c] sm:$0xf]  ;;  %v8932_v21 = vld [vmem:[%s12927_s20 + $0x534] sm:$0xf0]  ;;  %v8751_v22 = vor.u32 %v11559_v9, %v8750_v8  ;;  %v8839_v23 = vor.u32 %v11579_v10, %v8836_v11  ;;  %v8794_v11 = vld [vmem:[%s12927_s20 + $0x410] sm:$0xf] }
 0x103   : > { %v11567_v9 = vld [vmem:[%s12927_s20 + $0x40c] sm:$0xf]  ;;  %v8788_v10 = vld [vmem:[%s12927_s20 + $0x414] sm:$0xf0] }
 0x107   : > { %2386 = vmatpush.bf16.xpose.msra.mxu0 %v8471_v34  ;;  %v8787_v34 = vor.u32 %v11568_v27, %v8786_v26  ;;  %v8935_v26 = vor.u32 %v11603_v20, %v8932_v21  ;;  %v11576_v27 = vld [vmem:[%s12927_s20 + $0x454] sm:$0xf] }
 0x108   : > { %2399 = vmatpush.bf16.xpose.msra.mxu1 %v8559_v38  ;;  %v8680_v38 = vld [vmem:[%s12927_s20 + $0x33c] sm:$0xf0]  ;;  %v11564_v21 = vld [vmem:[%s12927_s20 + $0x3f4] sm:$0xf] }
 0x109   : > { %2412 = vmatpush.bf16.xpose.msra.mxu2 %v8563_v39  ;;  %2425 = vmatpush.bf16.xpose.msra.mxu3 %v8567_v42  ;;  %v8686_v39 = vld [vmem:[%s12927_s20 + $0x338] sm:$0xf]  ;;  %v11565_v42 = vld [vmem:[%s12927_s20 + $0x3f8] sm:$0xf0] }
 0x10a   : > { %v8687_v47 = vor.u32 %v11542_v40, %v8686_v39  ;;  %v8775_v50 = vor.u32 %v11565_v42, %v8774_v41  ;;  %v11573_v39 = vld [vmem:[%s12927_s20 + $0x43c] sm:$0xf]  ;;  %v8812_v40 = vld [vmem:[%s12927_s20 + $0x444] sm:$0xf0]  ;;  %v8818_v41 = vld [vmem:[%s12927_s20 + $0x440] sm:$0xf] }
 0x10b   : > { %v2284_v29 = vpop.f32.mrf.mxu0  ;;  %v11575_v42 = vld [vmem:[%s12927_s20 + $0x448] sm:$0xf0] }
 0x10c   : > { %v2297_v30 = vpop.f32.mrf.mxu1 }
 0x10d   : > { %v2298_v33 = vadd.f32 %v2297_v30, %v2284_v29  ;;  %v8830_v29 = vld [vmem:[%s12927_s20 + $0x458] sm:$0xf]  ;;  %v11578_v30 = vld [vmem:[%s12927_s20 + $0x460] sm:$0xf0] }
 0x10e   : > { %2387 = vmatmul.bf16.vlgmr.msra.gmra.mxu0 %v12716_v0 }
 0x10f   : > { %2431 = vmatpush.bf16.xpose.msrb.mxu0 %v8739_v43  ;;  %2400 = vmatmul.bf16.vlgmr.msra.gmra.mxu1 %v12716_v0  ;;  %v8679_v43 = vor.u32 %v11541_v36, %v8678_v35  ;;  %v8831_v36 = vor.u32 %v11578_v30, %v8830_v29 }
 0x110   : > { %2444 = vmatpush.bf16.xpose.msrb.mxu1 %v8743_v44  ;;  %2413 = vmatmul.bf16.vlgmr.msra.gmra.mxu2 %v12716_v0 }
 0x111   : > { %2457 = vmatpush.bf16.xpose.msrb.mxu2 %v8747_v45  ;;  %2470 = vmatpush.bf16.xpose.msrb.mxu3 %v8835_v46  ;;  %v8683_v46 = vor.u32 %v11540_v37, %v8680_v38 }
 0x112   : > { %2426 = vmatmul.bf16.vlgmr.msra.gmra.mxu3 %v12716_v0 }
 0x113   : > { %v2286_v44 = vpop.f32.mrf.mxu0  ;;  %v2310_v45 = vpop.f32.mrf.mxu2 }
 0x114   : > { %v13202_v48 = vadd.f32 %v2310_v45, %v2298_v33  ;;  %v2299_v49 = vpop.f32.mrf.mxu1  ;;  %v11600_v33 = vld [vmem:[%s12927_s20 + $0x514] sm:$0xf]  ;;  %v11598_v44 = vld [vmem:[%s12927_s20 + $0x500] sm:$0xf0]  ;;  %v11597_v45 = vld [vmem:[%s12927_s20 + $0x4fc] sm:$0xf] }
 0x115   : > { %v13212_v61 = vpop.f32.mrf.mxu3  ;;  %v8819_v49 = vor.u32 %v11575_v42, %v8818_v41  ;;  %v11586_v41 = vld [vmem:[%s12927_s20 + $0x4a0] sm:$0xf0]  ;;  %v11585_v42 = vld [vmem:[%s12927_s20 + $0x49c] sm:$0xf] }
 0x117   : > { %2432 = vmatpush.bf16.xpose.msrb.mxu0 %v8727_v55  ;;  %v8674_v55 = vld [vmem:[%s12927_s20 + $0x320] sm:$0xf] }
 0x118   : > { %2445 = vmatpush.bf16.xpose.msrb.mxu1 %v8731_v56  ;;  %v11539_v56 = vld [vmem:[%s12927_s20 + $0x328] sm:$0xf0] }
 0x119   : > { %2458 = vmatpush.bf16.xpose.msrb.mxu2 %v8735_v57  ;;  %2471 = vmatpush.bf16.xpose.msrb.mxu3 %v8823_v58  ;;  %v8762_v57 = vld [vmem:[%s12927_s20 + $0x3d8] sm:$0xf]  ;;  %v11562_v58 = vld [vmem:[%s12927_s20 + $0x3e0] sm:$0xf0]  ;;  %v8675_v63 = vor.u32 %v11539_v56, %v8674_v55 }
 0x11a   : > { %v8763_v1 = vor.u32 %v11562_v58, %v8762_v57  ;;  %v11570_v56 = vld [vmem:[%s12927_s20 + $0x424] sm:$0xf]  ;;  %v8800_v57 = vld [vmem:[%s12927_s20 + $0x42c] sm:$0xf0]  ;;  %v8806_v58 = vld [vmem:[%s12927_s20 + $0x428] sm:$0xf] }
 0x11b   : > { %v2312_v60 = vpop.f32.mrf.mxu2  ;;  %v8803_v2 = vor.u32 %v11570_v56, %v8800_v57  ;;  %v11582_v56 = vld [vmem:[%s12927_s20 + $0x484] sm:$0xf]  ;;  %v8848_v57 = vld [vmem:[%s12927_s20 + $0x48c] sm:$0xf0] }
 0x11c   : > { %v8894_v60 = vld [vmem:[%s12927_s20 + $0x4e0] sm:$0xf] }
 0x11f   : > { %2433 = vmatpush.bf16.xpose.msrb.mxu0 %v8715_v4  ;;  %v11534_v4 = vld [vmem:[%s12927_s20 + $0x304] sm:$0xf] }
 0x120   : > { %2446 = vmatpush.bf16.xpose.msrb.mxu1 %v8719_v5  ;;  %v8656_v5 = vld [vmem:[%s12927_s20 + $0x30c] sm:$0xf0] }
 0x121   : > { %2459 = vmatpush.bf16.xpose.msrb.mxu2 %v8723_v6  ;;  %2472 = vmatpush.bf16.xpose.msrb.mxu3 %v8811_v7  ;;  %v8662_v6 = vld [vmem:[%s12927_s20 + $0x308] sm:$0xf]  ;;  %v11536_v7 = vld [vmem:[%s12927_s20 + $0x310] sm:$0xf0] }
 0x127   : > { %2434 = vmatpush.bf16.xpose.msrb.mxu0 %v8703_v16  ;;  %v11604_v16 = vld [vmem:[%s12927_s20 + $0x530] sm:$0xf0] }
 0x128   : > { %2447 = vmatpush.bf16.xpose.msrb.mxu1 %v8707_v17  ;;  %v2325_v17 = vpop.f32.mrf.mxu3  ;;  %v8931_v25 = vor.u32 %v11604_v16, %v8930_v15  ;;  %v8884_v15 = vld [vmem:[%s12927_s20 + $0x4d4] sm:$0xf0]  ;;  %v8791_v16 = vor.u32 %v11567_v9, %v8788_v10 }
 0x129   : > { %2460 = vmatpush.bf16.xpose.msrb.mxu2 %v8711_v18  ;;  %2473 = vmatpush.bf16.xpose.msrb.mxu3 %v8799_v19  ;;  %v8659_v18 = vor.u32 %v11534_v4, %v8656_v5  ;;  %v8663_v19 = vor.u32 %v11536_v7, %v8662_v6  ;;  %v8795_v17 = vor.u32 %v11569_v12, %v8794_v11  ;;  %v8926_v12 = vld [vmem:[%s12927_s20 + $0x518] sm:$0xf] }
 0x12f   : > { %2435 = vmatpush.bf16.xpose.msrb.mxu0 %v8691_v28  ;;  %v8824_v28 = vld [vmem:[%s12927_s20 + $0x45c] sm:$0xf0] }
 0x130   : > { %2448 = vmatpush.bf16.xpose.msrb.mxu1 %v8695_v31  ;;  %v8918_v31 = vld [vmem:[%s12927_s20 + $0x510] sm:$0xf]  ;;  %v8827_v35 = vor.u32 %v11576_v27, %v8824_v28  ;;  %v11588_v27 = vld [vmem:[%s12927_s20 + $0x4b4] sm:$0xf]  ;;  %v8872_v28 = vld [vmem:[%s12927_s20 + $0x4bc] sm:$0xf0] }
 0x131   : > { %2461 = vmatpush.bf16.xpose.msrb.mxu2 %v8699_v32  ;;  %2474 = vmatpush.bf16.xpose.msrb.mxu3 %v8787_v34  ;;  %v11601_v32 = vld [vmem:[%s12927_s20 + $0x518] sm:$0xf0]  ;;  %v8920_v34 = vld [vmem:[%s12927_s20 + $0x51c] sm:$0xf0] }
 0x132   : > { %v8919_v37 = vor.u32 %v11601_v32, %v8918_v31  ;;  %v8923_v38 = vor.u32 %v11600_v33, %v8920_v34  ;;  %v8875_v34 = vor.u32 %v11588_v27, %v8872_v28  ;;  %v11621_v27 = vld [vmem:[%s12927_s20 + $0x5bc] sm:$0xf]  ;;  %v9004_v28 = vld [vmem:[%s12927_s20 + $0x5c4] sm:$0xf0] }
 0x137   : > { %2436 = vmatpush.bf16.xpose.msrb.mxu0 %v8679_v43  ;;  %v8906_v43 = vld [vmem:[%s12927_s20 + $0x4f8] sm:$0xf] }
 0x138   : > { %2449 = vmatpush.bf16.xpose.msrb.mxu1 %v8683_v46  ;;  %v8908_v46 = vld [vmem:[%s12927_s20 + $0x504] sm:$0xf0] }
 0x139   : > { %2462 = vmatpush.bf16.xpose.msrb.mxu2 %v8687_v47  ;;  %2475 = vmatpush.bf16.xpose.msrb.mxu3 %v8775_v50  ;;  %v8815_v47 = vor.u32 %v11573_v39, %v8812_v40  ;;  %v8907_v50 = vor.u32 %v11598_v44, %v8906_v43  ;;  %v8911_v51 = vor.u32 %v11597_v45, %v8908_v46  ;;  %v11563_v39 = vld [vmem:[%s12927_s20 + $0x3e8] sm:$0xf0]  ;;  %v8858_v40 = vld [vmem:[%s12927_s20 + $0x498] sm:$0xf]  ;;  %v8860_v43 = vld [vmem:[%s12927_s20 + $0x4a4] sm:$0xf0] }
 0x13f   : > { %2437 = vmatpush.bf16.xpose.msrb.mxu0 %v8667_v59  ;;  %v11572_v59 = vld [vmem:[%s12927_s20 + $0x430] sm:$0xf0] }
 0x140   : > { %2450 = vmatpush.bf16.xpose.msrb.mxu1 %v8671_v62  ;;  %v11595_v62 = vld [vmem:[%s12927_s20 + $0x4e8] sm:$0xf0]  ;;  %v8807_v4 = vor.u32 %v11572_v59, %v8806_v58  ;;  %v8938_v58 = vld [vmem:[%s12927_s20 + $0x530] sm:$0xf]  ;;  %v11605_v59 = vld [vmem:[%s12927_s20 + $0x538] sm:$0xf0] }
 0x141   : > { %2463 = vmatpush.bf16.xpose.msrb.mxu2 %v8675_v63  ;;  %2476 = vmatpush.bf16.xpose.msrb.mxu3 %v8763_v1  ;;  %v11594_v1 = vld [vmem:[%s12927_s20 + $0x4e4] sm:$0xf]  ;;  %v8895_v5 = vor.u32 %v11595_v62, %v8894_v60  ;;  %v9026_v60 = vld [vmem:[%s12927_s20 + $0x5e8] sm:$0xf] }
 0x147   : > { %2438 = vmatpush.bf16.xpose.msrb.mxu0 %v8655_v13  ;;  %v11592_v13 = vld [vmem:[%s12927_s20 + $0x4d0] sm:$0xf0] }
 0x148   : > { %2451 = vmatpush.bf16.xpose.msrb.mxu1 %v8659_v18 }
 0x149   : > { %2464 = vmatpush.bf16.xpose.msrb.mxu2 %v8663_v19  ;;  %2477 = vmatpush.bf16.xpose.msrb.mxu3 %v8751_v22  ;;  %v8887_v19 = vor.u32 %v11591_v14, %v8884_v15  ;;  %v8776_v22 = vld [vmem:[%s12927_s20 + $0x3fc] sm:$0xf0]  ;;  %v11625_v14 = vld [vmem:[%s12927_s20 + $0x5d8] sm:$0xf0]  ;;  %v11624_v15 = vld [vmem:[%s12927_s20 + $0x5d4] sm:$0xf] }
 0x14a   : > { %v8779_v29 = vor.u32 %v11564_v21, %v8776_v22 }
 0x14b   : > { %v2336_v52 = vpop.f32.mrf.mxu0 }
 0x14c   : > { %v2337_v53 = vadd.f32 %v2336_v52, %v13212_v61  ;;  %v2349_v54 = vpop.f32.mrf.mxu1  ;;  %v8896_v61 = vld [vmem:[%s12927_s20 + $0x4ec] sm:$0xf0]  ;;  %v8758_v52 = vld [vmem:[%s12927_s20 + $0x3c8] sm:$0xf] }
 0x14d   : > { %v8899_v6 = vor.u32 %v11594_v1, %v8896_v61  ;;  %v11627_v1 = vld [vmem:[%s12927_s20 + $0x5ec] sm:$0xf]  ;;  %v9028_v61 = vld [vmem:[%s12927_s20 + $0x5f4] sm:$0xf0] }
 0x14e   : > { %2439 = vmatmul.bf16.vlgmr.msrb.gmra.mxu0 %v12716_v0  ;;  %v2350_v55 = vadd.f32 %v2349_v54, %v2337_v53  ;;  %v11560_v53 = vld [vmem:[%s12927_s20 + $0x3d0] sm:$0xf0]  ;;  %v8846_v54 = vld [vmem:[%s12927_s20 + $0x480] sm:$0xf]  ;;  %v9031_v10 = vor.u32 %v11627_v1, %v9028_v61  ;;  %v11615_v1 = vld [vmem:[%s12927_s20 + $0x58c] sm:$0xf] }
 0x14f   : > { %2483 = vmatpush.bf16.xpose.msra.mxu0 %v8839_v23  ;;  %2452 = vmatmul.bf16.vlgmr.msrb.gmra.mxu1 %v12716_v0  ;;  %v8782_v23 = vld [vmem:[%s12927_s20 + $0x3f8] sm:$0xf] }
 0x150   : > { %2496 = vmatpush.bf16.xpose.msra.mxu1 %v8843_v24  ;;  %2465 = vmatmul.bf16.vlgmr.msrb.gmra.mxu2 %v12716_v0  ;;  %v2717_v63 = vrot.slane %v2350_v55, 7  ;;  %v11566_v24 = vld [vmem:[%s12927_s20 + $0x400] sm:$0xf0]  ;;  %v11583_v55 = vld [vmem:[%s12927_s20 + $0x488] sm:$0xf0] }
 0x151   : > { %2509 = vmatpush.bf16.xpose.msra.mxu2 %v8931_v25  ;;  %2522 = vmatpush.bf16.xpose.msra.mxu3 %v8935_v26  ;;  %v8870_v25 = vld [vmem:[%s12927_s20 + $0x4b0] sm:$0xf]  ;;  %v11589_v26 = vld [vmem:[%s12927_s20 + $0x4b8] sm:$0xf0]  ;;  %v8783_v31 = vor.u32 %v11566_v24, %v8782_v23  ;;  %v8914_v23 = vld [vmem:[%s12927_s20 + $0x500] sm:$0xf] }
 0x152   : > { %2478 = vmatmul.bf16.vlgmr.msrb.gmra.mxu3 %v12716_v0  ;;  %v13261_v3 = vsel %vm2726_vm0, %v13202_v48, %v2717_v63  ;;  %v8882_v48 = vld [vmem:[%s12927_s20 + $0x4c8] sm:$0xf]  ;;  %v8871_v32 = vor.u32 %v11589_v26, %v8870_v25  ;;  %v11628_v63 = vld [vmem:[%s12927_s20 + $0x5f0] sm:$0xf0]  ;;  %v11599_v24 = vld [vmem:[%s12927_s20 + $0x508] sm:$0xf0] }
 0x153   : > { %v2338_v7 = vpop.f32.mrf.mxu0  ;;  %v8883_v18 = vor.u32 %v11592_v13, %v8882_v48  ;;  %v2362_v20 = vpop.f32.mrf.mxu2  ;;  %v9027_v9 = vor.u32 %v11628_v63, %v9026_v60  ;;  %v11602_v48 = vld [vmem:[%s12927_s20 + $0x520] sm:$0xf0]  ;;  %v9014_v13 = vld [vmem:[%s12927_s20 + $0x5d0] sm:$0xf]  ;;  %v9002_v25 = vld [vmem:[%s12927_s20 + $0x5b8] sm:$0xf] }
 0x154   : > { %v2351_v8 = vpop.f32.mrf.mxu1  ;;  %v8851_v7 = vor.u32 %v11582_v56, %v8848_v57  ;;  %v11622_v26 = vld [vmem:[%s12927_s20 + $0x5c0] sm:$0xf0]  ;;  %v8890_v57 = vld [vmem:[%s12927_s20 + $0x4d0] sm:$0xf]  ;;  %v11616_v60 = vld [vmem:[%s12927_s20 + $0x590] sm:$0xf0] }
 0x155   : > { %v2375_v30 = vpop.f32.mrf.mxu3  ;;  %v8939_v8 = vor.u32 %v11605_v59, %v8938_v58  ;;  %v11593_v58 = vld [vmem:[%s12927_s20 + $0x4d8] sm:$0xf0]  ;;  %v8978_v59 = vld [vmem:[%s12927_s20 + $0x588] sm:$0xf]  ;;  %v8980_v61 = vld [vmem:[%s12927_s20 + $0x594] sm:$0xf0] }
 0x156   : > { %v13279_v33 = vadd.f32 %v2375_v30, %v2362_v20  ;;  %v9015_v20 = vor.u32 %v11625_v14, %v9014_v13  ;;  %v11623_v30 = vld [vmem:[%s12927_s20 + $0x5c8] sm:$0xf0]  ;;  %v11590_v13 = vld [vmem:[%s12927_s20 + $0x4c0] sm:$0xf0]  ;;  %v8966_v14 = vld [vmem:[%s12927_s20 + $0x570] sm:$0xf] }
 0x157   : > { %2484 = vmatpush.bf16.xpose.msra.mxu0 %v8827_v35 }
 0x158   : > { %2497 = vmatpush.bf16.xpose.msra.mxu1 %v8831_v36  ;;  %v11561_v36 = vld [vmem:[%s12927_s20 + $0x3dc] sm:$0xf] }
 0x159   : > { %2510 = vmatpush.bf16.xpose.msra.mxu2 %v8919_v37  ;;  %2523 = vmatpush.bf16.xpose.msra.mxu3 %v8923_v38  ;;  %v8764_v37 = vld [vmem:[%s12927_s20 + $0x3e4] sm:$0xf0]  ;;  %v8770_v38 = vld [vmem:[%s12927_s20 + $0x3e0] sm:$0xf] }
 0x15a   : > { %v8767_v44 = vor.u32 %v11561_v36, %v8764_v37  ;;  %v8771_v46 = vor.u32 %v11563_v39, %v8770_v38  ;;  %v8902_v39 = vld [vmem:[%s12927_s20 + $0x4e8] sm:$0xf] }
 0x15b   : > { %v2364_v35 = vpop.f32.mrf.mxu2 }
 0x15d   : > { %v2377_v45 = vpop.f32.mrf.mxu3 }
 0x15e   : > { %v8998_v45 = vld [vmem:[%s12927_s20 + $0x5a8] sm:$0xf] }
 0x15f   : > { %2485 = vmatpush.bf16.xpose.msra.mxu0 %v8815_v47  ;;  %v8859_v47 = vor.u32 %v11586_v41, %v8858_v40  ;;  %v11596_v40 = vld [vmem:[%s12927_s20 + $0x4f0] sm:$0xf0]  ;;  %v8990_v41 = vld [vmem:[%s12927_s20 + $0x5a0] sm:$0xf] }
 0x160   : > { %2498 = vmatpush.bf16.xpose.msra.mxu1 %v8819_v49  ;;  %v8863_v49 = vor.u32 %v11585_v42, %v8860_v43  ;;  %v11619_v42 = vld [vmem:[%s12927_s20 + $0x5a8] sm:$0xf0]  ;;  %v11618_v43 = vld [vmem:[%s12927_s20 + $0x5a4] sm:$0xf] }
 0x161   : > { %2511 = vmatpush.bf16.xpose.msra.mxu2 %v8907_v50  ;;  %2524 = vmatpush.bf16.xpose.msra.mxu3 %v8911_v51  ;;  %v11558_v50 = vld [vmem:[%s12927_s20 + $0x3c4] sm:$0xf]  ;;  %v8752_v51 = vld [vmem:[%s12927_s20 + $0x3cc] sm:$0xf0] }
 0x162   : > { %v8755_v62 = vor.u32 %v11558_v50, %v8752_v51  ;;  %v8991_v50 = vor.u32 %v11619_v42, %v8990_v41  ;;  %v8944_v41 = vld [vmem:[%s12927_s20 + $0x54c] sm:$0xf0]  ;;  %v8950_v42 = vld [vmem:[%s12927_s20 + $0x548] sm:$0xf] }
 0x167   : > { %2486 = vmatpush.bf16.xpose.msra.mxu0 %v8803_v2  ;;  %v8759_v2 = vor.u32 %v11560_v53, %v8758_v52 }
 0x168   : > { %2499 = vmatpush.bf16.xpose.msra.mxu1 %v8807_v4  ;;  %v8847_v4 = vor.u32 %v11583_v55, %v8846_v54 }
 0x169   : > { %2512 = vmatpush.bf16.xpose.msra.mxu2 %v8895_v5  ;;  %2525 = vmatpush.bf16.xpose.msra.mxu3 %v8899_v6  ;;  %v9034_v5 = vld [vmem:[%s12927_s20 + $0x5f0] sm:$0xf]  ;;  %v11629_v6 = vld [vmem:[%s12927_s20 + $0x5f8] sm:$0xf0] }
 0x16a   : > { %v9035_v11 = vor.u32 %v11629_v6, %v9034_v5  ;;  %v8891_v6 = vor.u32 %v11593_v58, %v8890_v57 }
 0x16f   : > { %2487 = vmatpush.bf16.xpose.msra.mxu0 %v8791_v16  ;;  %v9016_v16 = vld [vmem:[%s12927_s20 + $0x5dc] sm:$0xf0] }
 0x170   : > { %2500 = vmatpush.bf16.xpose.msra.mxu1 %v8795_v17  ;;  %v9022_v17 = vld [vmem:[%s12927_s20 + $0x5d8] sm:$0xf]  ;;  %v9019_v21 = vor.u32 %v11624_v15, %v9016_v16  ;;  %v11613_v15 = vld [vmem:[%s12927_s20 + $0x578] sm:$0xf0]  ;;  %v8968_v16 = vld [vmem:[%s12927_s20 + $0x57c] sm:$0xf0] }
 0x171   : > { %2513 = vmatpush.bf16.xpose.msra.mxu2 %v8883_v18  ;;  %2526 = vmatpush.bf16.xpose.msra.mxu3 %v8887_v19  ;;  %v11626_v18 = vld [vmem:[%s12927_s20 + $0x5e0] sm:$0xf0]  ;;  %v8927_v19 = vor.u32 %v11602_v48, %v8926_v12  ;;  %v8878_v48 = vld [vmem:[%s12927_s20 + $0x4b8] sm:$0xf] }
 0x172   : > { %v9023_v22 = vor.u32 %v11626_v18, %v9022_v17  ;;  %v8974_v17 = vld [vmem:[%s12927_s20 + $0x578] sm:$0xf]  ;;  %v11614_v18 = vld [vmem:[%s12927_s20 + $0x580] sm:$0xf0] }
 0x177   : > { %2488 = vmatpush.bf16.xpose.msra.mxu0 %v8779_v29  ;;  %v9010_v29 = vld [vmem:[%s12927_s20 + $0x5c0] sm:$0xf] }
 0x178   : > { %2501 = vmatpush.bf16.xpose.msra.mxu1 %v8783_v31  ;;  %v8915_v31 = vor.u32 %v11599_v24, %v8914_v23  ;;  %v9011_v35 = vor.u32 %v11623_v30, %v9010_v29  ;;  %v8866_v23 = vld [vmem:[%s12927_s20 + $0x4a0] sm:$0xf]  ;;  %v11587_v24 = vld [vmem:[%s12927_s20 + $0x4a8] sm:$0xf0] }
 0x179   : > { %2514 = vmatpush.bf16.xpose.msra.mxu2 %v8871_v32  ;;  %2527 = vmatpush.bf16.xpose.msra.mxu3 %v8875_v34  ;;  %v9003_v32 = vor.u32 %v11622_v26, %v9002_v25  ;;  %v9007_v34 = vor.u32 %v11621_v27, %v9004_v28  ;;  %v8954_v25 = vld [vmem:[%s12927_s20 + $0x558] sm:$0xf]  ;;  %v11610_v26 = vld [vmem:[%s12927_s20 + $0x560] sm:$0xf0]  ;;  %v11609_v27 = vld [vmem:[%s12927_s20 + $0x55c] sm:$0xf] }
 0x17a   : > { %v8956_v28 = vld [vmem:[%s12927_s20 + $0x564] sm:$0xf0]  ;;  %v8962_v29 = vld [vmem:[%s12927_s20 + $0x560] sm:$0xf]  ;;  %v11611_v30 = vld [vmem:[%s12927_s20 + $0x568] sm:$0xf0] }
 0x17f   : > { %2489 = vmatpush.bf16.xpose.msra.mxu0 %v8767_v44  ;;  %v8992_v44 = vld [vmem:[%s12927_s20 + $0x5ac] sm:$0xf0] }
 0x180   : > { %2502 = vmatpush.bf16.xpose.msra.mxu1 %v8771_v46  ;;  %v11620_v46 = vld [vmem:[%s12927_s20 + $0x5b0] sm:$0xf0] }
 0x181   : > { %2515 = vmatpush.bf16.xpose.msra.mxu2 %v8859_v47  ;;  %2528 = vmatpush.bf16.xpose.msra.mxu3 %v8863_v49  ;;  %v8903_v47 = vor.u32 %v11596_v40, %v8902_v39  ;;  %v8999_v52 = vor.u32 %v11620_v46, %v8998_v45  ;;  %v11607_v39 = vld [vmem:[%s12927_s20 + $0x548] sm:$0xf0]  ;;  %v11606_v40 = vld [vmem:[%s12927_s20 + $0x544] sm:$0xf]  ;;  %v11652_v45 = vld [vmem:[%s12927_s20 + $0x6b0] sm:$0xf0] }
 0x182   : > { %v11651_v46 = vld [vmem:[%s12927_s20 + $0x6ac] sm:$0xf] }
 0x187   : > { %2490 = vmatpush.bf16.xpose.msra.mxu0 %v8755_v62 }
 0x188   : > { %2503 = vmatpush.bf16.xpose.msra.mxu1 %v8759_v2  ;;  %v8986_v2 = vld [vmem:[%s12927_s20 + $0x590] sm:$0xf] }
 0x189   : > { %2516 = vmatpush.bf16.xpose.msra.mxu2 %v8847_v4  ;;  %2529 = vmatpush.bf16.xpose.msra.mxu3 %v8851_v7  ;;  %v11617_v4 = vld [vmem:[%s12927_s20 + $0x598] sm:$0xf0] }
 0x18b   : > { %v2388_v36 = vpop.f32.mrf.mxu0 }
 0x18c   : > { %v2389_v37 = vadd.f32 %v2388_v36, %v13279_v33  ;;  %v2401_v38 = vpop.f32.mrf.mxu1  ;;  %v8995_v33 = vor.u32 %v11618_v43, %v8992_v44  ;;  %v8854_v36 = vld [vmem:[%s12927_s20 + $0x488] sm:$0xf]  ;;  %v11608_v43 = vld [vmem:[%s12927_s20 + $0x550] sm:$0xf0] }
 0x18d   : > { %v9122_v44 = vld [vmem:[%s12927_s20 + $0x6a8] sm:$0xf] }
 0x18e   : > { %2491 = vmatmul.bf16.vlgmr.msra.gmra.mxu0 %v12716_v0  ;;  %v2718_v62 = vrot.slane %v2389_v37, 6  ;;  %v11584_v37 = vld [vmem:[%s12927_s20 + $0x490] sm:$0xf0] }
 0x18f   : > { %2535 = vmatpush.bf16.xpose.msrb.mxu0 %v8939_v8  ;;  %2504 = vmatmul.bf16.vlgmr.msra.gmra.mxu1 %v12716_v0  ;;  %v8979_v8 = vor.u32 %v11616_v60, %v8978_v59  ;;  %v9110_v60 = vld [vmem:[%s12927_s20 + $0x690] sm:$0xf] }
 0x190   : > { %2548 = vmatpush.bf16.xpose.msrb.mxu1 %v9027_v9  ;;  %2517 = vmatmul.bf16.vlgmr.msra.gmra.mxu2 %v12716_v0  ;;  %v8983_v9 = vor.u32 %v11615_v1, %v8980_v61  ;;  %v9112_v1 = vld [vmem:[%s12927_s20 + $0x69c] sm:$0xf0]  ;;  %v9118_v61 = vld [vmem:[%s12927_s20 + $0x698] sm:$0xf] }
 0x191   : > { %2561 = vmatpush.bf16.xpose.msrb.mxu2 %v9031_v10  ;;  %2574 = vmatpush.bf16.xpose.msrb.mxu3 %v9035_v11  ;;  %v8987_v11 = vor.u32 %v11617_v4, %v8986_v2  ;;  %v11650_v2 = vld [vmem:[%s12927_s20 + $0x6a0] sm:$0xf0]  ;;  %v9206_v4 = vld [vmem:[%s12927_s20 + $0x750] sm:$0xf] }
 0x192   : > { %2530 = vmatmul.bf16.vlgmr.msra.gmra.mxu3 %v12716_v0 }
 0x193   : > { %v2414_v49 = vpop.f32.mrf.mxu2  ;;  %v2390_v54 = vpop.f32.mrf.mxu0 }
 0x194   : > { %v2415_v51 = vadd.f32 %v2414_v49, %v2401_v38  ;;  %v2403_v55 = vpop.f32.mrf.mxu1  ;;  %v8942_v38 = vld [vmem:[%s12927_s20 + $0x540] sm:$0xf]  ;;  %v9124_v49 = vld [vmem:[%s12927_s20 + $0x6b4] sm:$0xf0]  ;;  %v11676_v54 = vld [vmem:[%s12927_s20 + $0x770] sm:$0xf0] }
 0x195   : > { %v2427_v53 = vpop.f32.mrf.mxu3  ;;  %v8951_v55 = vor.u32 %v11608_v43, %v8950_v42  ;;  %v9127_v57 = vor.u32 %v11651_v46, %v9124_v49 }
 0x196   : > { %v2428_v56 = vadd.f32 %v2427_v53, %v2415_v51  ;;  %v8943_v51 = vor.u32 %v11607_v39, %v8942_v38  ;;  %v9218_v53 = vld [vmem:[%s12927_s20 + $0x768] sm:$0xf]  ;;  %v9082_v38 = vld [vmem:[%s12927_s20 + $0x650] sm:$0xf]  ;;  %v11641_v39 = vld [vmem:[%s12927_s20 + $0x658] sm:$0xf0] }
 0x197   : > { %2536 = vmatpush.bf16.xpose.msrb.mxu0 %v8927_v19  ;;  %v8879_v19 = vor.u32 %v11590_v13, %v8878_v48  ;;  %v9219_v59 = vor.u32 %v11676_v54, %v9218_v53  ;;  %v11645_v48 = vld [vmem:[%s12927_s20 + $0x67c] sm:$0xf]  ;;  %v9100_v13 = vld [vmem:[%s12927_s20 + $0x684] sm:$0xf0]  ;;  %v9083_v46 = vor.u32 %v11641_v39, %v9082_v38  ;;  %v9070_v53 = vld [vmem:[%s12927_s20 + $0x638] sm:$0xf] }
 0x198   : > { %2549 = vmatpush.bf16.xpose.msrb.mxu1 %v9015_v20  ;;  %v2719_v63 = vrot.slane %v2428_v56, 5  ;;  %v8967_v20 = vor.u32 %v11613_v15, %v8966_v14  ;;  %v9123_v56 = vor.u32 %v11652_v45, %v9122_v44  ;;  %v9106_v14 = vld [vmem:[%s12927_s20 + $0x680] sm:$0xf]  ;;  %v11647_v15 = vld [vmem:[%s12927_s20 + $0x688] sm:$0xf0] }
 0x199   : > { %2562 = vmatpush.bf16.xpose.msrb.mxu2 %v9019_v21  ;;  %2575 = vmatpush.bf16.xpose.msrb.mxu3 %v9023_v22  ;;  %v8975_v22 = vor.u32 %v11614_v18, %v8974_v17  ;;  %v9103_v18 = vor.u32 %v11645_v48, %v9100_v13  ;;  %v11638_v54 = vld [vmem:[%s12927_s20 + $0x640] sm:$0xf0] }
 0x19a   : > { %v2729_v5 = vsel %vm2728_vm1, %v2718_v62, %v2719_v63  ;;  %v11649_v62 = vld [vmem:[%s12927_s20 + $0x698] sm:$0xf0]  ;;  %v11648_v63 = vld [vmem:[%s12927_s20 + $0x694] sm:$0xf] }
 0x19b   : > { %v13345_v7 = vsel %vm2730_vm2, %v13261_v3, %v2729_v5  ;;  %v2416_v10 = vpop.f32.mrf.mxu2  ;;  %v11612_v3 = vld [vmem:[%s12927_s20 + $0x574] sm:$0xf]  ;;  %v11673_v5 = vld [vmem:[%s12927_s20 + $0x758] sm:$0xf0] }
 0x19c   : > { %v8971_v21 = vor.u32 %v11612_v3, %v8968_v16  ;;  %v9207_v10 = vor.u32 %v11673_v5, %v9206_v4  ;;  %v9194_v3 = vld [vmem:[%s12927_s20 + $0x738] sm:$0xf]  ;;  %v11670_v16 = vld [vmem:[%s12927_s20 + $0x740] sm:$0xf0]  ;;  %v11633_v5 = vld [vmem:[%s12927_s20 + $0x61c] sm:$0xf] }
 0x19d   : > { %v2429_v12 = vpop.f32.mrf.mxu3  ;;  %v11634_v4 = vld [vmem:[%s12927_s20 + $0x620] sm:$0xf0] }
 0x19e   : > { %v11646_v12 = vld [vmem:[%s12927_s20 + $0x680] sm:$0xf0] }
 0x19f   : > { %2537 = vmatpush.bf16.xpose.msrb.mxu0 %v8915_v31  ;;  %v8867_v31 = vor.u32 %v11587_v24, %v8866_v23  ;;  %v11642_v23 = vld [vmem:[%s12927_s20 + $0x664] sm:$0xf]  ;;  %v9088_v24 = vld [vmem:[%s12927_s20 + $0x66c] sm:$0xf0] }
 0x1a0   : > { %2550 = vmatpush.bf16.xpose.msrb.mxu1 %v9003_v32  ;;  %v8955_v32 = vor.u32 %v11610_v26, %v8954_v25  ;;  %v9094_v25 = vld [vmem:[%s12927_s20 + $0x668] sm:$0xf]  ;;  %v11644_v26 = vld [vmem:[%s12927_s20 + $0x670] sm:$0xf0] }
 0x1a1   : > { %2563 = vmatpush.bf16.xpose.msrb.mxu2 %v9007_v34  ;;  %2576 = vmatpush.bf16.xpose.msrb.mxu3 %v9011_v35  ;;  %v8959_v34 = vor.u32 %v11609_v27, %v8956_v28  ;;  %v8963_v35 = vor.u32 %v11611_v30, %v8962_v29  ;;  %v9182_v27 = vld [vmem:[%s12927_s20 + $0x720] sm:$0xf]  ;;  %v11667_v28 = vld [vmem:[%s12927_s20 + $0x728] sm:$0xf0]  ;;  %v9091_v30 = vor.u32 %v11642_v23, %v9088_v24 }
 0x1a2   : > { %v11655_v23 = vld [vmem:[%s12927_s20 + $0x6c8] sm:$0xf0] }
 0x1a3   : > { %v11675_v24 = vld [vmem:[%s12927_s20 + $0x76c] sm:$0xf] }
 0x1a7   : > { %2538 = vmatpush.bf16.xpose.msrb.mxu0 %v8903_v47  ;;  %v8855_v47 = vor.u32 %v11584_v37, %v8854_v36  ;;  %v11639_v36 = vld [vmem:[%s12927_s20 + $0x64c] sm:$0xf]  ;;  %v9076_v37 = vld [vmem:[%s12927_s20 + $0x654] sm:$0xf0] }
 0x1a8   : > { %2551 = vmatpush.bf16.xpose.msrb.mxu1 %v8991_v50  ;;  %v9130_v50 = vld [vmem:[%s12927_s20 + $0x6b0] sm:$0xf]  ;;  %v9079_v45 = vor.u32 %v11639_v36, %v9076_v37  ;;  %v9316_v36 = vld [vmem:[%s12927_s20 + $0x834] sm:$0xf0] }
 0x1a9   : > { %2564 = vmatpush.bf16.xpose.msrb.mxu2 %v8995_v33  ;;  %2577 = vmatpush.bf16.xpose.msrb.mxu3 %v8999_v52  ;;  %v11653_v33 = vld [vmem:[%s12927_s20 + $0x6b8] sm:$0xf0]  ;;  %v8947_v52 = vor.u32 %v11606_v40, %v8944_v41  ;;  %v9170_v40 = vld [vmem:[%s12927_s20 + $0x708] sm:$0xf]  ;;  %v11664_v41 = vld [vmem:[%s12927_s20 + $0x710] sm:$0xf0] }
 0x1aa   : > { %v9131_v58 = vor.u32 %v11653_v33, %v9130_v50  ;;  %v9171_v49 = vor.u32 %v11664_v41, %v9170_v40  ;;  %v9062_v50 = vld [vmem:[%s12927_s20 + $0x630] sm:$0xf]  ;;  %v11637_v33 = vld [vmem:[%s12927_s20 + $0x638] sm:$0xf0] }
 0x1af   : > { %2539 = vmatpush.bf16.xpose.msrb.mxu0 %v8891_v6  ;;  %v9111_v6 = vor.u32 %v11649_v62, %v9110_v60  ;;  %v9071_v62 = vor.u32 %v11638_v54, %v9070_v53  ;;  %v11669_v54 = vld [vmem:[%s12927_s20 + $0x73c] sm:$0xf] }
 0x1b0   : > { %2552 = vmatpush.bf16.xpose.msrb.mxu1 %v8979_v8  ;;  %v9115_v8 = vor.u32 %v11648_v63, %v9112_v1 }
 0x1b1   : > { %2565 = vmatpush.bf16.xpose.msrb.mxu2 %v8983_v9  ;;  %2578 = vmatpush.bf16.xpose.msrb.mxu3 %v8987_v11  ;;  %v9119_v9 = vor.u32 %v11650_v2, %v9118_v61  ;;  %v9098_v11 = vld [vmem:[%s12927_s20 + $0x678] sm:$0xf] }
 0x1b2   : > { %v9099_v17 = vor.u32 %v11646_v12, %v9098_v11  ;;  %v9050_v2 = vld [vmem:[%s12927_s20 + $0x618] sm:$0xf]  ;;  %v11658_v11 = vld [vmem:[%s12927_s20 + $0x6e0] sm:$0xf0] }
 0x1b3   : > { %v9051_v12 = vor.u32 %v11634_v4, %v9050_v2 }
 0x1b7   : > { %2540 = vmatpush.bf16.xpose.msrb.mxu0 %v8879_v19  ;;  %v9107_v19 = vor.u32 %v11647_v15, %v9106_v14 }
 0x1b8   : > { %2553 = vmatpush.bf16.xpose.msrb.mxu1 %v8967_v20  ;;  %v9195_v20 = vor.u32 %v11670_v16, %v9194_v3  ;;  %v9038_v16 = vld [vmem:[%s12927_s20 + $0x600] sm:$0xf] }
 0x1b9   : > { %2566 = vmatpush.bf16.xpose.msrb.mxu2 %v8971_v21  ;;  %2579 = vmatpush.bf16.xpose.msrb.mxu3 %v8975_v22  ;;  %v9086_v21 = vld [vmem:[%s12927_s20 + $0x660] sm:$0xf]  ;;  %v11643_v22 = vld [vmem:[%s12927_s20 + $0x668] sm:$0xf0] }
 0x1ba   : > { %v9087_v29 = vor.u32 %v11643_v22, %v9086_v21  ;;  %v11632_v21 = vld [vmem:[%s12927_s20 + $0x610] sm:$0xf0]  ;;  %v9134_v22 = vld [vmem:[%s12927_s20 + $0x6c0] sm:$0xf] }
 0x1bb   : > { %v9135_v37 = vor.u32 %v11655_v23, %v9134_v22 }
 0x1bf   : > { %2541 = vmatpush.bf16.xpose.msrb.mxu0 %v8867_v31  ;;  %v9095_v31 = vor.u32 %v11644_v26, %v9094_v25  ;;  %v9220_v25 = vld [vmem:[%s12927_s20 + $0x774] sm:$0xf0]  ;;  %v9226_v26 = vld [vmem:[%s12927_s20 + $0x770] sm:$0xf] }
 0x1c0   : > { %2554 = vmatpush.bf16.xpose.msrb.mxu1 %v8955_v32  ;;  %v9183_v32 = vor.u32 %v11667_v28, %v9182_v27  ;;  %v11677_v28 = vld [vmem:[%s12927_s20 + $0x778] sm:$0xf0]  ;;  %v9223_v38 = vor.u32 %v11675_v24, %v9220_v25  ;;  %v9172_v25 = vld [vmem:[%s12927_s20 + $0x714] sm:$0xf0] }
 0x1c1   : > { %2567 = vmatpush.bf16.xpose.msrb.mxu2 %v8959_v34  ;;  %2580 = vmatpush.bf16.xpose.msrb.mxu3 %v8963_v35  ;;  %v9074_v34 = vld [vmem:[%s12927_s20 + $0x648] sm:$0xf]  ;;  %v11640_v35 = vld [vmem:[%s12927_s20 + $0x650] sm:$0xf0]  ;;  %v9227_v39 = vor.u32 %v11677_v28, %v9226_v26  ;;  %v9178_v26 = vld [vmem:[%s12927_s20 + $0x710] sm:$0xf] }
 0x1c2   : > { %v9075_v42 = vor.u32 %v11640_v35, %v9074_v34  ;;  %v11699_v35 = vld [vmem:[%s12927_s20 + $0x82c] sm:$0xf]  ;;  %v9266_v28 = vld [vmem:[%s12927_s20 + $0x7c8] sm:$0xf] }
 0x1c3   : > { %v9319_v41 = vor.u32 %v11699_v35, %v9316_v36 }
 0x1c7   : > { %2542 = vmatpush.bf16.xpose.msrb.mxu0 %v8855_v47 }
 0x1c8   : > { %2555 = vmatpush.bf16.xpose.msrb.mxu1 %v8943_v51  ;;  %v11636_v51 = vld [vmem:[%s12927_s20 + $0x634] sm:$0xf] }
 0x1c9   : > { %2568 = vmatpush.bf16.xpose.msrb.mxu2 %v8947_v52  ;;  %2581 = vmatpush.bf16.xpose.msrb.mxu3 %v8951_v55  ;;  %v9064_v52 = vld [vmem:[%s12927_s20 + $0x63c] sm:$0xf0]  ;;  %v9158_v55 = vld [vmem:[%s12927_s20 + $0x6f0] sm:$0xf] }
 0x1ca   : > { %v9067_v60 = vor.u32 %v11636_v51, %v9064_v52 }
 0x1cb   : > { %v2440_v43 = vpop.f32.mrf.mxu0 }
 0x1cc   : > { %v2453_v44 = vpop.f32.mrf.mxu1 }
 0x1cd   : > { %v2454_v47 = vadd.f32 %v2453_v44, %v2440_v43  ;;  %v9208_v43 = vld [vmem:[%s12927_s20 + $0x75c] sm:$0xf0]  ;;  %v9214_v44 = vld [vmem:[%s12927_s20 + $0x758] sm:$0xf] }
 0x1ce   : > { %2543 = vmatmul.bf16.vlgmr.msrb.gmra.mxu0 %v12716_v0 }
 0x1cf   : > { %2587 = vmatpush.bf16.xpose.msra.mxu0 %v9123_v56  ;;  %2556 = vmatmul.bf16.vlgmr.msrb.gmra.mxu1 %v12716_v0  ;;  %v11661_v56 = vld [vmem:[%s12927_s20 + $0x6f8] sm:$0xf0] }
 0x1d0   : > { %2600 = vmatpush.bf16.xpose.msra.mxu1 %v9127_v57  ;;  %2569 = vmatmul.bf16.vlgmr.msrb.gmra.mxu2 %v12716_v0  ;;  %v9063_v57 = vor.u32 %v11637_v33, %v9062_v50  ;;  %v9159_v61 = vor.u32 %v11661_v56, %v9158_v55  ;;  %v9304_v50 = vld [vmem:[%s12927_s20 + $0x81c] sm:$0xf0]  ;;  %v9196_v55 = vld [vmem:[%s12927_s20 + $0x744] sm:$0xf0] }
 0x1d1   : > { %2613 = vmatpush.bf16.xpose.msra.mxu2 %v9131_v58  ;;  %2626 = vmatpush.bf16.xpose.msra.mxu3 %v9219_v59  ;;  %v9202_v56 = vld [vmem:[%s12927_s20 + $0x740] sm:$0xf] }
 0x1d2   : > { %2582 = vmatmul.bf16.vlgmr.msrb.gmra.mxu3 %v12716_v0 }
 0x1d3   : > { %v2442_v58 = vpop.f32.mrf.mxu0  ;;  %v2466_v59 = vpop.f32.mrf.mxu2 }
 0x1d4   : > { %v13423_v63 = vadd.f32 %v2466_v59, %v2454_v47  ;;  %v2455_v1 = vpop.f32.mrf.mxu1  ;;  %v11697_v47 = vld [vmem:[%s12927_s20 + $0x818] sm:$0xf0]  ;;  %v9290_v58 = vld [vmem:[%s12927_s20 + $0x7f8] sm:$0xf]  ;;  %v11694_v59 = vld [vmem:[%s12927_s20 + $0x800] sm:$0xf0] }
 0x1d5   : > { %v13433_v13 = vpop.f32.mrf.mxu3  ;;  %v9199_v1 = vor.u32 %v11669_v54, %v9196_v55  ;;  %v9291_v2 = vor.u32 %v11694_v59, %v9290_v58  ;;  %v9154_v54 = vld [vmem:[%s12927_s20 + $0x6e0] sm:$0xf]  ;;  %v11659_v55 = vld [vmem:[%s12927_s20 + $0x6e8] sm:$0xf0]  ;;  %v11681_v58 = vld [vmem:[%s12927_s20 + $0x79c] sm:$0xf] }
 0x1d6   : > { %v9244_v59 = vld [vmem:[%s12927_s20 + $0x7a4] sm:$0xf0] }
 0x1d7   : > { %2588 = vmatpush.bf16.xpose.msra.mxu0 %v9111_v6  ;;  %v9052_v6 = vld [vmem:[%s12927_s20 + $0x624] sm:$0xf0] }
 0x1d8   : > { %2601 = vmatpush.bf16.xpose.msra.mxu1 %v9115_v8  ;;  %v9058_v8 = vld [vmem:[%s12927_s20 + $0x620] sm:$0xf]  ;;  %v9055_v14 = vor.u32 %v11633_v5, %v9052_v6 }
 0x1d9   : > { %2614 = vmatpush.bf16.xpose.msra.mxu2 %v9119_v9  ;;  %2627 = vmatpush.bf16.xpose.msra.mxu3 %v9207_v10  ;;  %v11635_v9 = vld [vmem:[%s12927_s20 + $0x628] sm:$0xf0]  ;;  %v9146_v10 = vld [vmem:[%s12927_s20 + $0x6d8] sm:$0xf] }
 0x1da   : > { %v9059_v15 = vor.u32 %v11635_v9, %v9058_v8  ;;  %v9147_v3 = vor.u32 %v11658_v11, %v9146_v10  ;;  %v11666_v10 = vld [vmem:[%s12927_s20 + $0x724] sm:$0xf]  ;;  %v9184_v11 = vld [vmem:[%s12927_s20 + $0x72c] sm:$0xf0] }
 0x1db   : > { %v2468_v48 = vpop.f32.mrf.mxu2 }
 0x1dc   : > { %v11668_v48 = vld [vmem:[%s12927_s20 + $0x730] sm:$0xf0] }
 0x1df   : > { %2589 = vmatpush.bf16.xpose.msra.mxu0 %v9099_v17  ;;  %v11631_v17 = vld [vmem:[%s12927_s20 + $0x608] sm:$0xf0] }
 0x1e0   : > { %2602 = vmatpush.bf16.xpose.msra.mxu1 %v9103_v18  ;;  %v11630_v18 = vld [vmem:[%s12927_s20 + $0x604] sm:$0xf]  ;;  %v9039_v27 = vor.u32 %v11631_v17, %v9038_v16  ;;  %v9280_v17 = vld [vmem:[%s12927_s20 + $0x7ec] sm:$0xf0] }
 0x1e1   : > { %2615 = vmatpush.bf16.xpose.msra.mxu2 %v9107_v19  ;;  %2628 = vmatpush.bf16.xpose.msra.mxu3 %v9195_v20  ;;  %v9040_v19 = vld [vmem:[%s12927_s20 + $0x60c] sm:$0xf0]  ;;  %v9046_v20 = vld [vmem:[%s12927_s20 + $0x608] sm:$0xf]  ;;  %v11690_v16 = vld [vmem:[%s12927_s20 + $0x7e4] sm:$0xf] }
 0x1e2   : > { %v9047_v34 = vor.u32 %v11632_v21, %v9046_v20  ;;  %v9283_v22 = vor.u32 %v11690_v16, %v9280_v17  ;;  %v11723_v16 = vld [vmem:[%s12934_s18 + $0xac] sm:$0xf]  ;;  %v9412_v17 = vld [vmem:[%s12934_s18 + $0xb4] sm:$0xf0] }
 0x1e7   : > { %2590 = vmatpush.bf16.xpose.msra.mxu0 %v9087_v29  ;;  %v9314_v29 = vld [vmem:[%s12927_s20 + $0x828] sm:$0xf] }
 0x1e8   : > { %2603 = vmatpush.bf16.xpose.msra.mxu1 %v9091_v30  ;;  %v11700_v30 = vld [vmem:[%s12927_s20 + $0x830] sm:$0xf0] }
 0x1e9   : > { %2616 = vmatpush.bf16.xpose.msra.mxu2 %v9095_v31  ;;  %2629 = vmatpush.bf16.xpose.msra.mxu3 %v9183_v32  ;;  %v2481_v31 = vpop.f32.mrf.mxu3  ;;  %v9043_v32 = vor.u32 %v11630_v18, %v9040_v19  ;;  %v9315_v40 = vor.u32 %v11700_v30, %v9314_v29  ;;  %v9187_v18 = vor.u32 %v11666_v10, %v9184_v11  ;;  %v11688_v29 = vld [vmem:[%s12927_s20 + $0x7d0] sm:$0xf0]  ;;  %v11687_v30 = vld [vmem:[%s12927_s20 + $0x7cc] sm:$0xf]  ;;  %v11678_v11 = vld [vmem:[%s12927_s20 + $0x784] sm:$0xf] }
 0x1ea   : > { %v9268_v31 = vld [vmem:[%s12927_s20 + $0x7d4] sm:$0xf0]  ;;  %v9267_v35 = vor.u32 %v11688_v29, %v9266_v28  ;;  %v11679_v10 = vld [vmem:[%s12927_s20 + $0x788] sm:$0xf0]  ;;  %v11698_v29 = vld [vmem:[%s12927_s20 + $0x820] sm:$0xf0] }
 0x1eb   : > { %v9271_v36 = vor.u32 %v11687_v30, %v9268_v31  ;;  %v9310_v28 = vld [vmem:[%s12927_s20 + $0x818] sm:$0xf]  ;;  %v9398_v30 = vld [vmem:[%s12934_s18 + $0x90] sm:$0xf]  ;;  %v11721_v31 = vld [vmem:[%s12934_s18 + $0x98] sm:$0xf0] }
 0x1ef   : > { %2591 = vmatpush.bf16.xpose.msra.mxu0 %v9075_v42  ;;  %v11672_v42 = vld [vmem:[%s12927_s20 + $0x754] sm:$0xf] }
 0x1f0   : > { %2604 = vmatpush.bf16.xpose.msra.mxu1 %v9079_v45  ;;  %v11674_v45 = vld [vmem:[%s12927_s20 + $0x760] sm:$0xf0]  ;;  %v9211_v33 = vor.u32 %v11672_v42, %v9208_v43  ;;  %v9254_v42 = vld [vmem:[%s12927_s20 + $0x7b0] sm:$0xf]  ;;  %v11685_v43 = vld [vmem:[%s12927_s20 + $0x7b8] sm:$0xf0] }
 0x1f1   : > { %2617 = vmatpush.bf16.xpose.msra.mxu2 %v9083_v46  ;;  %2630 = vmatpush.bf16.xpose.msra.mxu3 %v9171_v49  ;;  %v9302_v46 = vld [vmem:[%s12927_s20 + $0x810] sm:$0xf]  ;;  %v11696_v49 = vld [vmem:[%s12927_s20 + $0x814] sm:$0xf]  ;;  %v9215_v51 = vor.u32 %v11674_v45, %v9214_v44  ;;  %v9256_v45 = vld [vmem:[%s12927_s20 + $0x7bc] sm:$0xf0] }
 0x1f2   : > { %v9303_v52 = vor.u32 %v11697_v47, %v9302_v46  ;;  %v9307_v53 = vor.u32 %v11696_v49, %v9304_v50  ;;  %v11684_v44 = vld [vmem:[%s12927_s20 + $0x7b4] sm:$0xf]  ;;  %v9255_v50 = vor.u32 %v11685_v43, %v9254_v42  ;;  %v9298_v42 = vld [vmem:[%s12927_s20 + $0x800] sm:$0xf]  ;;  %v11695_v43 = vld [vmem:[%s12927_s20 + $0x808] sm:$0xf0] }
 0x1f7   : > { %2592 = vmatpush.bf16.xpose.msra.mxu0 %v9063_v57  ;;  %v11671_v57 = vld [vmem:[%s12927_s20 + $0x748] sm:$0xf0] }
 0x1f8   : > { %2605 = vmatpush.bf16.xpose.msra.mxu1 %v9067_v60  ;;  %v11693_v60 = vld [vmem:[%s12927_s20 + $0x7fc] sm:$0xf] }
 0x1f9   : > { %2618 = vmatpush.bf16.xpose.msra.mxu2 %v9071_v62  ;;  %2631 = vmatpush.bf16.xpose.msra.mxu3 %v9159_v61  ;;  %v9292_v62 = vld [vmem:[%s12927_s20 + $0x804] sm:$0xf0]  ;;  %v9203_v61 = vor.u32 %v11671_v57, %v9202_v56  ;;  %v9242_v56 = vld [vmem:[%s12927_s20 + $0x798] sm:$0xf]  ;;  %v11682_v57 = vld [vmem:[%s12927_s20 + $0x7a0] sm:$0xf0] }
 0x1fa   : > { %v9295_v4 = vor.u32 %v11693_v60, %v9292_v62 }
 0x1ff   : > { %2593 = vmatpush.bf16.xpose.msra.mxu0 %v9051_v12  ;;  %v9190_v12 = vld [vmem:[%s12927_s20 + $0x728] sm:$0xf] }
 0x200   : > { %2606 = vmatpush.bf16.xpose.msra.mxu1 %v9055_v14  ;;  %v9278_v14 = vld [vmem:[%s12927_s20 + $0x7e0] sm:$0xf]  ;;  %v9191_v20 = vor.u32 %v11668_v48, %v9190_v12  ;;  %v9232_v12 = vld [vmem:[%s12927_s20 + $0x78c] sm:$0xf0] }
 0x201   : > { %2619 = vmatpush.bf16.xpose.msra.mxu2 %v9059_v15  ;;  %2632 = vmatpush.bf16.xpose.msra.mxu3 %v9147_v3  ;;  %v11691_v15 = vld [vmem:[%s12927_s20 + $0x7e8] sm:$0xf0]  ;;  %v2720_v3 = vrot.slane %v13423_v63, 4  ;;  %v9322_v48 = vld [vmem:[%s12927_s20 + $0x830] sm:$0xf] }
 0x202   : > { %v9279_v21 = vor.u32 %v11691_v15, %v9278_v14  ;;  %v11663_v63 = vld [vmem:[%s12927_s20 + $0x70c] sm:$0xf]  ;;  %v11701_v14 = vld [vmem:[%s12927_s20 + $0x838] sm:$0xf0]  ;;  %v9410_v15 = vld [vmem:[%s12934_s18 + $0xa8] sm:$0xf] }
 0x207   : > { %2594 = vmatpush.bf16.xpose.msra.mxu0 %v9039_v27  ;;  %v11665_v27 = vld [vmem:[%s12927_s20 + $0x718] sm:$0xf0] }
 0x208   : > { %2607 = vmatpush.bf16.xpose.msra.mxu1 %v9043_v32  ;;  %v9175_v32 = vor.u32 %v11663_v63, %v9172_v25  ;;  %v9323_v63 = vor.u32 %v11701_v14, %v9322_v48 }
 0x209   : > { %2620 = vmatpush.bf16.xpose.msra.mxu2 %v9047_v34  ;;  %2633 = vmatpush.bf16.xpose.msra.mxu3 %v9135_v37  ;;  %v9179_v34 = vor.u32 %v11665_v27, %v9178_v26  ;;  %v9415_v26 = vor.u32 %v11723_v16, %v9412_v17  ;;  %v11712_v16 = vld [vmem:[%s12934_s18 + $0x50] sm:$0xf0] }
 0x20b   : > { %v2492_v5 = vpop.f32.mrf.mxu0 }
 0x20c   : > { %v2493_v6 = vadd.f32 %v2492_v5, %v13433_v13  ;;  %v2505_v8 = vpop.f32.mrf.mxu1  ;;  %v9136_v5 = vld [vmem:[%s12927_s20 + $0x6cc] sm:$0xf0] }
 0x20e   : > { %2595 = vmatmul.bf16.vlgmr.msra.gmra.mxu0 %v12716_v0  ;;  %v2506_v9 = vadd.f32 %v2505_v8, %v2493_v6  ;;  %v9142_v6 = vld [vmem:[%s12927_s20 + $0x6c8] sm:$0xf]  ;;  %v11656_v8 = vld [vmem:[%s12927_s20 + $0x6d0] sm:$0xf0] }
 0x20f   : > { %2639 = vmatpush.bf16.xpose.msrb.mxu0 %v9223_v38  ;;  %2608 = vmatmul.bf16.vlgmr.msra.gmra.mxu1 %v12716_v0  ;;  %v11660_v38 = vld [vmem:[%s12927_s20 + $0x6f4] sm:$0xf] }
 0x210   : > { %2652 = vmatpush.bf16.xpose.msrb.mxu1 %v9227_v39  ;;  %2621 = vmatmul.bf16.vlgmr.msra.gmra.mxu2 %v12716_v0  ;;  %v2721_v13 = vrot.slane %v2506_v9, 3  ;;  %v9160_v39 = vld [vmem:[%s12927_s20 + $0x6fc] sm:$0xf0] }
 0x211   : > { %2665 = vmatpush.bf16.xpose.msrb.mxu2 %v9315_v40  ;;  %2678 = vmatpush.bf16.xpose.msrb.mxu3 %v9319_v41  ;;  %v9166_v40 = vld [vmem:[%s12927_s20 + $0x6f8] sm:$0xf]  ;;  %v11662_v41 = vld [vmem:[%s12927_s20 + $0x700] sm:$0xf0]  ;;  %v9163_v46 = vor.u32 %v11660_v38, %v9160_v39  ;;  %v9230_v9 = vld [vmem:[%s12927_s20 + $0x780] sm:$0xf]  ;;  %v9311_v38 = vor.u32 %v11698_v29, %v9310_v28  ;;  %v9399_v39 = vor.u32 %v11721_v31, %v9398_v30 }
 0x212   : > { %2634 = vmatmul.bf16.vlgmr.msra.gmra.mxu3 %v12716_v0  ;;  %v13482_v19 = vsel %vm2732_vm3, %v2720_v3, %v2721_v13  ;;  %v9167_v49 = vor.u32 %v11662_v41, %v9166_v40  ;;  %v11724_v3 = vld [vmem:[%s12934_s18 + $0xb0] sm:$0xf0] }
 0x213   : > { %v2494_v23 = vpop.f32.mrf.mxu0  ;;  %v13492_v37 = vpop.f32.mrf.mxu2  ;;  %v9411_v25 = vor.u32 %v11724_v3, %v9410_v15  ;;  %v9274_v15 = vld [vmem:[%s12927_s20 + $0x7d0] sm:$0xf]  ;;  %v11689_v3 = vld [vmem:[%s12927_s20 + $0x7d8] sm:$0xf0] }
 0x214   : > { %v2507_v24 = vpop.f32.mrf.mxu1  ;;  %v12717_v23 = vmov 0.0  }
 0x215   : > { %v13502_v47 = vpop.f32.mrf.mxu3  ;;  %507 = vst [vmem:[#allocation2 + $0x8] sm:$0xff] %v12717_v23  ;;  %v9235_v24 = vor.u32 %v11678_v11, %v9232_v12 }
 0x216   : > { %508 = vst [vmem:[#allocation2 + $0x10] sm:$0xff] %v12717_v23 }
 0x217   : > { %2640 = vmatpush.bf16.xpose.msrb.mxu0 %v9211_v33  ;;  %v9259_v33 = vor.u32 %v11684_v44, %v9256_v45  ;;  %509 = vst [vmem:[#allocation2 + $0x18] sm:$0xff] %v12717_v23  ;;  %v9386_v44 = vld [vmem:[%s12934_s18 + $0x78] sm:$0xf]  ;;  %v11718_v45 = vld [vmem:[%s12934_s18 + $0x80] sm:$0xf0] }
 0x218   : > { %2653 = vmatpush.bf16.xpose.msrb.mxu1 %v9215_v51 }
 0x219   : > { %2666 = vmatpush.bf16.xpose.msrb.mxu2 %v9303_v52  ;;  %2679 = vmatpush.bf16.xpose.msrb.mxu3 %v9307_v53  ;;  %v11657_v52 = vld [vmem:[%s12927_s20 + $0x6dc] sm:$0xf]  ;;  %v9148_v53 = vld [vmem:[%s12927_s20 + $0x6e4] sm:$0xf0] }
 0x21a   : > { %v9151_v60 = vor.u32 %v11657_v52, %v9148_v53  ;;  %v9387_v52 = vor.u32 %v11718_v45, %v9386_v44  ;;  %v9250_v45 = vld [vmem:[%s12927_s20 + $0x7a0] sm:$0xf] }
 0x21b   : > { %v2520_v51 = vpop.f32.mrf.mxu2 }
 0x21c   : > { %v9299_v51 = vor.u32 %v11695_v43, %v9298_v42 }
 0x21d   : > { %v2533_v62 = vpop.f32.mrf.mxu3 }
 0x21e   : > { %v11715_v62 = vld [vmem:[%s12934_s18 + $0x68] sm:$0xf0] }
 0x21f   : > { %2641 = vmatpush.bf16.xpose.msrb.mxu0 %v9199_v1  ;;  %v9155_v1 = vor.u32 %v11659_v55, %v9154_v54 }
 0x220   : > { %2654 = vmatpush.bf16.xpose.msrb.mxu1 %v9203_v61  ;;  %v9243_v61 = vor.u32 %v11682_v57, %v9242_v56  ;;  %v9286_v57 = vld [vmem:[%s12927_s20 + $0x7e8] sm:$0xf] }
 0x221   : > { %2667 = vmatpush.bf16.xpose.msrb.mxu2 %v9291_v2  ;;  %2680 = vmatpush.bf16.xpose.msrb.mxu3 %v9295_v4  ;;  %v9247_v2 = vor.u32 %v11681_v58, %v9244_v59  ;;  %v11654_v4 = vld [vmem:[%s12927_s20 + $0x6c4] sm:$0xf]  ;;  %v11692_v58 = vld [vmem:[%s12927_s20 + $0x7f0] sm:$0xf0]  ;;  %v9374_v59 = vld [vmem:[%s12934_s18 + $0x60] sm:$0xf] }
 0x222   : > { %v9139_v13 = vor.u32 %v11654_v4, %v9136_v5  ;;  %v11716_v4 = vld [vmem:[%s12934_s18 + $0x70] sm:$0xf0]  ;;  %v9287_v5 = vor.u32 %v11692_v58, %v9286_v57  ;;  %v9238_v58 = vld [vmem:[%s12927_s20 + $0x788] sm:$0xf] }
 0x227   : > { %2642 = vmatpush.bf16.xpose.msrb.mxu0 %v9187_v18  ;;  %v9143_v18 = vor.u32 %v11656_v8, %v9142_v6  ;;  %v9375_v8 = vor.u32 %v11715_v62, %v9374_v59  ;;  %v11680_v59 = vld [vmem:[%s12927_s20 + $0x790] sm:$0xf0]  ;;  %v11703_v62 = vld [vmem:[%s12934_s18 + $0x8] sm:$0xf0] }
 0x228   : > { %2655 = vmatpush.bf16.xpose.msrb.mxu1 %v9191_v20  ;;  %v9231_v20 = vor.u32 %v11679_v10, %v9230_v9 }
 0x229   : > { %2668 = vmatpush.bf16.xpose.msrb.mxu2 %v9279_v21  ;;  %2681 = vmatpush.bf16.xpose.msrb.mxu3 %v9283_v22  ;;  %v9418_v21 = vld [vmem:[%s12934_s18 + $0xb0] sm:$0xf]  ;;  %v11725_v22 = vld [vmem:[%s12934_s18 + $0xb8] sm:$0xf0] }
 0x22a   : > { %v9419_v27 = vor.u32 %v11725_v22, %v9418_v21  ;;  %v9364_v21 = vld [vmem:[%s12934_s18 + $0x54] sm:$0xf0]  ;;  %v9370_v22 = vld [vmem:[%s12934_s18 + $0x50] sm:$0xf] }
 0x22f   : > { %2643 = vmatpush.bf16.xpose.msrb.mxu0 %v9175_v32  ;;  %v11720_v32 = vld [vmem:[%s12934_s18 + $0x94] sm:$0xf] }
 0x230   : > { %2656 = vmatpush.bf16.xpose.msrb.mxu1 %v9179_v34  ;;  %v9400_v34 = vld [vmem:[%s12934_s18 + $0x9c] sm:$0xf0] }
 0x231   : > { %2669 = vmatpush.bf16.xpose.msrb.mxu2 %v9267_v35  ;;  %2682 = vmatpush.bf16.xpose.msrb.mxu3 %v9271_v36  ;;  %v9406_v35 = vld [vmem:[%s12934_s18 + $0x98] sm:$0xf]  ;;  %v11722_v36 = vld [vmem:[%s12934_s18 + $0xa0] sm:$0xf0]  ;;  %v9403_v40 = vor.u32 %v11720_v32, %v9400_v34 }
 0x232   : > { %v9407_v41 = vor.u32 %v11722_v36, %v9406_v35  ;;  %v9262_v34 = vld [vmem:[%s12927_s20 + $0x7b8] sm:$0xf]  ;;  %v11686_v35 = vld [vmem:[%s12927_s20 + $0x7c0] sm:$0xf0]  ;;  %v11709_v36 = vld [vmem:[%s12934_s18 + $0x38] sm:$0xf0] }
 0x237   : > { %2644 = vmatpush.bf16.xpose.msrb.mxu0 %v9163_v46  ;;  %v11717_v46 = vld [vmem:[%s12934_s18 + $0x7c] sm:$0xf] }
 0x238   : > { %2657 = vmatpush.bf16.xpose.msrb.mxu1 %v9167_v49  ;;  %v9388_v49 = vld [vmem:[%s12934_s18 + $0x84] sm:$0xf0] }
 0x239   : > { %2670 = vmatpush.bf16.xpose.msrb.mxu2 %v9255_v50  ;;  %2683 = vmatpush.bf16.xpose.msrb.mxu3 %v9259_v33  ;;  %v9394_v50 = vld [vmem:[%s12934_s18 + $0x80] sm:$0xf]  ;;  %v11719_v33 = vld [vmem:[%s12934_s18 + $0x88] sm:$0xf0]  ;;  %v9391_v53 = vor.u32 %v11717_v46, %v9388_v49  ;;  %v9338_v49 = vld [vmem:[%s12934_s18 + $0x18] sm:$0xf] }
 0x23a   : > { %v9395_v54 = vor.u32 %v11719_v33, %v9394_v50  ;;  %v11683_v46 = vld [vmem:[%s12927_s20 + $0x7a8] sm:$0xf0]  ;;  %v11706_v50 = vld [vmem:[%s12934_s18 + $0x20] sm:$0xf0]  ;;  %v11705_v33 = vld [vmem:[%s12934_s18 + $0x1c] sm:$0xf] }
 0x23f   : > { %2645 = vmatpush.bf16.xpose.msrb.mxu0 %v9151_v60  ;;  %v2532_v60 = vadd.f32 %v13502_v47, %v13492_v37 }
 0x240   : > { %2658 = vmatpush.bf16.xpose.msrb.mxu1 %v9155_v1  ;;  %v11714_v1 = vld [vmem:[%s12934_s18 + $0x64] sm:$0xf] }
 0x241   : > { %2671 = vmatpush.bf16.xpose.msrb.mxu2 %v9243_v61  ;;  %2684 = vmatpush.bf16.xpose.msrb.mxu3 %v9247_v2  ;;  %v9376_v61 = vld [vmem:[%s12934_s18 + $0x6c] sm:$0xf0]  ;;  %v9382_v2 = vld [vmem:[%s12934_s18 + $0x68] sm:$0xf] }
 0x242   : > { %v9379_v9 = vor.u32 %v11714_v1, %v9376_v61  ;;  %v9383_v12 = vor.u32 %v11716_v4, %v9382_v2  ;;  %v11702_v1 = vld [vmem:[%s12934_s18 + $0x4] sm:$0xf]  ;;  %v9328_v61 = vld [vmem:[%s12934_s18 + $0xc] sm:$0xf0]  ;;  %v9334_v2 = vld [vmem:[%s12934_s18 + $0x8] sm:$0xf] }
 0x243   : > { %v11704_v4 = vld [vmem:[%s12934_s18 + $0x10] sm:$0xf0] }
 0x247   : > { %2646 = vmatpush.bf16.xpose.msrb.mxu0 %v9139_v13  ;;  %v9362_v13 = vld [vmem:[%s12934_s18 + $0x48] sm:$0xf] }
 0x248   : > { %2659 = vmatpush.bf16.xpose.msrb.mxu1 %v9143_v18 }
 0x249   : > { %2672 = vmatpush.bf16.xpose.msrb.mxu2 %v9231_v20  ;;  %2685 = vmatpush.bf16.xpose.msrb.mxu3 %v9235_v24  ;;  %v11711_v20 = vld [vmem:[%s12934_s18 + $0x4c] sm:$0xf]  ;;  %v11713_v24 = vld [vmem:[%s12934_s18 + $0x58] sm:$0xf0] }
 0x24a   : > { %v9367_v28 = vor.u32 %v11711_v20, %v9364_v21  ;;  %v9371_v31 = vor.u32 %v11713_v24, %v9370_v22  ;;  %v11745_v20 = vld [vmem:[%s12934_s18 + $0x158] sm:$0xf0]  ;;  %v11744_v21 = vld [vmem:[%s12934_s18 + $0x154] sm:$0xf]  ;;  %v9496_v22 = vld [vmem:[%s12934_s18 + $0x15c] sm:$0xf0] }
 0x24b   : > { %v2544_v55 = vpop.f32.mrf.mxu0  ;;  %v9502_v24 = vld [vmem:[%s12934_s18 + $0x158] sm:$0xf] }
 0x24c   : > { %v2557_v56 = vpop.f32.mrf.mxu1  ;;  %v2545_v10 = vadd.f32 %v2544_v55, %v2532_v60  ;;  %v9339_v55 = vor.u32 %v11706_v50, %v9338_v49  ;;  %v9326_v60 = vld [vmem:[%s12934_s18] sm:$0xf]  ;;  %v9478_v49 = vld [vmem:[%s12934_s18 + $0x128] sm:$0xf]  ;;  %v11740_v50 = vld [vmem:[%s12934_s18 + $0x130] sm:$0xf0] }
 0x24e   : > { %2647 = vmatmul.bf16.vlgmr.msrb.gmra.mxu0 %v12716_v0  ;;  %v2722_v17 = vrot.slane %v2545_v10, 2  ;;  %v9508_v10 = vld [vmem:[%s12934_s18 + $0x174] sm:$0xf0] }
 0x24f   : > { %2691 = vmatpush.bf16.xpose.msra.mxu0 %v9323_v63  ;;  %2660 = vmatmul.bf16.vlgmr.msrb.gmra.mxu1 %v12716_v0 }
 0x250   : > { %4512 = vmatpush.bf16.xpose.msra.mxu1 %v9411_v25  ;;  %2673 = vmatmul.bf16.vlgmr.msrb.gmra.mxu2 %v12716_v0  ;;  %v9275_v25 = vor.u32 %v11689_v3, %v9274_v15  ;;  %v9335_v15 = vor.u32 %v11704_v4, %v9334_v2 }
 0x251   : > { %4525 = vmatpush.bf16.xpose.msra.mxu2 %v9415_v26  ;;  %4538 = vmatpush.bf16.xpose.msra.mxu3 %v9419_v27  ;;  %v9363_v27 = vor.u32 %v11712_v16, %v9362_v13 }
 0x252   : > { %2686 = vmatmul.bf16.vlgmr.msrb.gmra.mxu3 %v12716_v0 }
 0x253   : > { %v2570_v6 = vpop.f32.mrf.mxu2  ;;  %v2546_v37 = vpop.f32.mrf.mxu0 }
 0x254   : > { %v2571_v11 = vadd.f32 %v2570_v6, %v2557_v56  ;;  %v2559_v47 = vpop.f32.mrf.mxu1  ;;  %v11748_v6 = vld [vmem:[%s12934_s18 + $0x170] sm:$0xf0]  ;;  %v9331_v37 = vor.u32 %v11702_v1, %v9328_v61  ;;  %v9554_v1 = vld [vmem:[%s12934_s18 + $0x1c8] sm:$0xf] }
 0x255   : > { %v2583_v48 = vpop.f32.mrf.mxu3  ;;  %v9602_v47 = vld [vmem:[%s12934_s18 + $0x228] sm:$0xf]  ;;  %v11760_v61 = vld [vmem:[%s12934_s18 + $0x1d0] sm:$0xf0] }
 0x256   : > { %v2584_v14 = vadd.f32 %v2583_v48, %v2571_v11  ;;  %v9514_v11 = vld [vmem:[%s12934_s18 + $0x170] sm:$0xf]  ;;  %v9327_v48 = vor.u32 %v11703_v62, %v9326_v60  ;;  %v11737_v62 = vld [vmem:[%s12934_s18 + $0x118] sm:$0xf0] }
 0x257   : > { %2692 = vmatpush.bf16.xpose.msra.mxu0 %v9311_v38  ;;  %v11708_v38 = vld [vmem:[%s12934_s18 + $0x34] sm:$0xf]  ;;  %v9466_v60 = vld [vmem:[%s12934_s18 + $0x110] sm:$0xf] }
 0x258   : > { %4513 = vmatpush.bf16.xpose.msra.mxu1 %v9399_v39  ;;  %v2723_v18 = vrot.slane %v2584_v14, 1  ;;  %v9352_v39 = vld [vmem:[%s12934_s18 + $0x3c] sm:$0xf0]  ;;  %v11772_v14 = vld [vmem:[%s12934_s18 + $0x230] sm:$0xf0] }
 0x259   : > { %4526 = vmatpush.bf16.xpose.msra.mxu2 %v9403_v40  ;;  %4539 = vmatpush.bf16.xpose.msra.mxu3 %v9407_v41  ;;  %v11710_v40 = vld [vmem:[%s12934_s18 + $0x40] sm:$0xf0]  ;;  %v9263_v41 = vor.u32 %v11686_v35, %v9262_v34  ;;  %v9355_v43 = vor.u32 %v11708_v38, %v9352_v39  ;;  %v11741_v34 = vld [vmem:[%s12934_s18 + $0x13c] sm:$0xf]  ;;  %v9484_v35 = vld [vmem:[%s12934_s18 + $0x144] sm:$0xf0] }
 0x25a   : > { %v2735_v63 = vsel %vm2734_vm4, %v2722_v17, %v2723_v18  ;;  %v9603_v17 = vor.u32 %v11772_v14, %v9602_v47  ;;  %v9494_v18 = vld [vmem:[%s12934_s18 + $0x150] sm:$0xf]  ;;  %v9578_v38 = vld [vmem:[%s12934_s18 + $0x1f8] sm:$0xf]  ;;  %v11766_v39 = vld [vmem:[%s12934_s18 + $0x200] sm:$0xf0] }
 0x25b   : > { %v2737_v26 = vsel %vm2736_vm5, %v13482_v19, %v2735_v63  ;;  %v2572_v29 = vpop.f32.mrf.mxu2  ;;  %v9350_v19 = vld [vmem:[%s12934_s18 + $0x30] sm:$0xf]  ;;  %v11746_v63 = vld [vmem:[%s12934_s18 + $0x160] sm:$0xf0]  ;;  %v9454_v47 = vld [vmem:[%s12934_s18 + $0xf8] sm:$0xf] }
 0x25c   : > { %v2739_v30 = vsel %vm2738_vm6, %v13345_v7, %v2737_v26  ;;  %v9358_v7 = vld [vmem:[%s12934_s18 + $0x38] sm:$0xf]  ;;  %v9351_v42 = vor.u32 %v11709_v36, %v9350_v19  ;;  %v11769_v26 = vld [vmem:[%s12934_s18 + $0x218] sm:$0xf0]  ;;  %v9503_v29 = vor.u32 %v11746_v63, %v9502_v24  ;;  %v9490_v19 = vld [vmem:[%s12934_s18 + $0x140] sm:$0xf] }
 0x25d   : > { %v2585_v32 = vpop.f32.mrf.mxu3  ;;  %2746 = vst [vmem:[#allocation2] sm:$0xff] %v2739_v30  ;;  %v9359_v44 = vor.u32 %v11710_v40, %v9358_v7  ;;  %v11743_v36 = vld [vmem:[%s12934_s18 + $0x148] sm:$0xf0]  ;;  %v9487_v40 = vor.u32 %v11741_v34, %v9484_v35  ;;  %v11734_v14 = vld [vmem:[%s12934_s18 + $0x100] sm:$0xf0] }
 0x25e   : > { %v11742_v32 = vld [vmem:[%s12934_s18 + $0x140] sm:$0xf0]  ;;  %v9434_v63 = vld [vmem:[%s12934_s18 + $0xd8] sm:$0xf] }
 0x25f   : > { %2693 = vmatpush.bf16.xpose.msra.mxu0 %v9299_v51  ;;  %v9340_v51 = vld [vmem:[%s12934_s18 + $0x24] sm:$0xf0] }
 0x260   : > { %4514 = vmatpush.bf16.xpose.msra.mxu1 %v9387_v52  ;;  %v9346_v52 = vld [vmem:[%s12934_s18 + $0x20] sm:$0xf]  ;;  %v9343_v56 = vor.u32 %v11705_v33, %v9340_v51  ;;  %v11763_v51 = vld [vmem:[%s12934_s18 + $0x1e8] sm:$0xf0] }
 0x261   : > { %4527 = vmatpush.bf16.xpose.msra.mxu2 %v9391_v53  ;;  %4540 = vmatpush.bf16.xpose.msra.mxu3 %v9395_v54  ;;  %v11707_v53 = vld [vmem:[%s12934_s18 + $0x28] sm:$0xf0]  ;;  %v9251_v54 = vor.u32 %v11683_v46, %v9250_v45  ;;  %v11738_v45 = vld [vmem:[%s12934_s18 + $0x124] sm:$0xf]  ;;  %v9472_v46 = vld [vmem:[%s12934_s18 + $0x12c] sm:$0xf0] }
 0x262   : > { %v9347_v57 = vor.u32 %v11707_v53, %v9346_v52  ;;  %v9566_v33 = vld [vmem:[%s12934_s18 + $0x1e0] sm:$0xf]  ;;  %v9475_v53 = vor.u32 %v11738_v45, %v9472_v46  ;;  %v11751_v45 = vld [vmem:[%s12934_s18 + $0x188] sm:$0xf0] }
 0x263   : > { %v11771_v46 = vld [vmem:[%s12934_s18 + $0x22c] sm:$0xf] }
 0x267   : > { %2694 = vmatpush.bf16.xpose.msra.mxu0 %v9287_v5  ;;  %v9506_v5 = vld [vmem:[%s12934_s18 + $0x168] sm:$0xf] }
 0x268   : > { %4515 = vmatpush.bf16.xpose.msra.mxu1 %v9375_v8  ;;  %v11747_v8 = vld [vmem:[%s12934_s18 + $0x16c] sm:$0xf]  ;;  %v9507_v3 = vor.u32 %v11748_v6, %v9506_v5 }
 0x269   : > { %4528 = vmatpush.bf16.xpose.msra.mxu2 %v9379_v9  ;;  %4541 = vmatpush.bf16.xpose.msra.mxu3 %v9383_v12  ;;  %v9239_v9 = vor.u32 %v11680_v59, %v9238_v58  ;;  %v11749_v12 = vld [vmem:[%s12934_s18 + $0x178] sm:$0xf0]  ;;  %v9511_v13 = vor.u32 %v11747_v8, %v9508_v10  ;;  %v11735_v58 = vld [vmem:[%s12934_s18 + $0x10c] sm:$0xf]  ;;  %v9460_v59 = vld [vmem:[%s12934_s18 + $0x114] sm:$0xf0]  ;;  %v9467_v8 = vor.u32 %v11737_v62, %v9466_v60 }
 0x26a   : > { %v9515_v16 = vor.u32 %v11749_v12, %v9514_v11  ;;  %v9463_v6 = vor.u32 %v11735_v58, %v9460_v59  ;;  %v9555_v10 = vor.u32 %v11760_v61, %v9554_v1  ;;  %v9446_v11 = vld [vmem:[%s12934_s18 + $0xf0] sm:$0xf]  ;;  %v11733_v12 = vld [vmem:[%s12934_s18 + $0xf8] sm:$0xf0]  ;;  %v9700_v58 = vld [vmem:[%s12934_s18 + $0x2f4] sm:$0xf0] }
 0x26f   : > { %2695 = vmatpush.bf16.xpose.msra.mxu0 %v9275_v25  ;;  %v9590_v25 = vld [vmem:[%s12934_s18 + $0x210] sm:$0xf] }
 0x270   : > { %4516 = vmatpush.bf16.xpose.msra.mxu1 %v9363_v27  ;;  %v9495_v27 = vor.u32 %v11745_v20, %v9494_v18  ;;  %v9591_v30 = vor.u32 %v11769_v26, %v9590_v25  ;;  %v9455_v20 = vor.u32 %v11734_v14, %v9454_v47  ;;  %v11730_v25 = vld [vmem:[%s12934_s18 + $0xe0] sm:$0xf0]  ;;  %v11729_v26 = vld [vmem:[%s12934_s18 + $0xdc] sm:$0xf] }
 0x271   : > { %4529 = vmatpush.bf16.xpose.msra.mxu2 %v9367_v28  ;;  %4542 = vmatpush.bf16.xpose.msra.mxu3 %v9371_v31  ;;  %v9499_v28 = vor.u32 %v11744_v21, %v9496_v22  ;;  %v9482_v31 = vld [vmem:[%s12934_s18 + $0x138] sm:$0xf]  ;;  %v11765_v14 = vld [vmem:[%s12934_s18 + $0x1fc] sm:$0xf] }
 0x272   : > { %v9483_v7 = vor.u32 %v11742_v32, %v9482_v31  ;;  %v11754_v31 = vld [vmem:[%s12934_s18 + $0x1a0] sm:$0xf0]  ;;  %v9435_v32 = vor.u32 %v11730_v25, %v9434_v63 }
 0x277   : > { %2696 = vmatpush.bf16.xpose.msra.mxu0 %v9263_v41  ;;  %v9491_v41 = vor.u32 %v11743_v36, %v9490_v19 }
 0x278   : > { %4517 = vmatpush.bf16.xpose.msra.mxu1 %v9351_v42  ;;  %v9579_v42 = vor.u32 %v11766_v39, %v9578_v38  ;;  %v9422_v39 = vld [vmem:[%s12934_s18 + $0xc0] sm:$0xf] }
 0x279   : > { %4530 = vmatpush.bf16.xpose.msra.mxu2 %v9355_v43  ;;  %4543 = vmatpush.bf16.xpose.msra.mxu3 %v9359_v44  ;;  %v9470_v43 = vld [vmem:[%s12934_s18 + $0x120] sm:$0xf]  ;;  %v11739_v44 = vld [vmem:[%s12934_s18 + $0x128] sm:$0xf0] }
 0x27a   : > { %v9471_v52 = vor.u32 %v11739_v44, %v9470_v43  ;;  %v11728_v43 = vld [vmem:[%s12934_s18 + $0xd0] sm:$0xf0]  ;;  %v9518_v44 = vld [vmem:[%s12934_s18 + $0x180] sm:$0xf] }
 0x27b   : > { %v9519_v59 = vor.u32 %v11751_v45, %v9518_v44 }
 0x27f   : > { %2697 = vmatpush.bf16.xpose.msra.mxu0 %v9251_v54  ;;  %v9479_v54 = vor.u32 %v11740_v50, %v9478_v49  ;;  %v9604_v49 = vld [vmem:[%s12934_s18 + $0x234] sm:$0xf0]  ;;  %v9610_v50 = vld [vmem:[%s12934_s18 + $0x230] sm:$0xf] }
 0x280   : > { %4518 = vmatpush.bf16.xpose.msra.mxu1 %v9339_v55  ;;  %v9567_v55 = vor.u32 %v11763_v51, %v9566_v33  ;;  %v11773_v51 = vld [vmem:[%s12934_s18 + $0x238] sm:$0xf0]  ;;  %v9607_v60 = vor.u32 %v11771_v46, %v9604_v49  ;;  %v11759_v46 = vld [vmem:[%s12934_s18 + $0x1cc] sm:$0xf]  ;;  %v9556_v49 = vld [vmem:[%s12934_s18 + $0x1d4] sm:$0xf0] }
 0x281   : > { %4531 = vmatpush.bf16.xpose.msra.mxu2 %v9343_v56  ;;  %4544 = vmatpush.bf16.xpose.msra.mxu3 %v9347_v57  ;;  %v9458_v56 = vld [vmem:[%s12934_s18 + $0x108] sm:$0xf]  ;;  %v11736_v57 = vld [vmem:[%s12934_s18 + $0x110] sm:$0xf0]  ;;  %v9611_v62 = vor.u32 %v11773_v51, %v9610_v50  ;;  %v9562_v50 = vld [vmem:[%s12934_s18 + $0x1d0] sm:$0xf] }
 0x282   : > { %v9459_v2 = vor.u32 %v11736_v57, %v9458_v56  ;;  %v11795_v57 = vld [vmem:[%s12934_s18 + $0x2ec] sm:$0xf]  ;;  %v11784_v51 = vld [vmem:[%s12934_s18 + $0x290] sm:$0xf0] }
 0x283   : > { %v9703_v61 = vor.u32 %v11795_v57, %v9700_v58  ;;  %v11756_v58 = vld [vmem:[%s12934_s18 + $0x1b4] sm:$0xf] }
 0x287   : > { %2698 = vmatpush.bf16.xpose.msra.mxu0 %v9239_v9 }
 0x288   : > { %4519 = vmatpush.bf16.xpose.msra.mxu1 %v9327_v48  ;;  %v11732_v48 = vld [vmem:[%s12934_s18 + $0xf4] sm:$0xf] }
 0x289   : > { %4532 = vmatpush.bf16.xpose.msra.mxu2 %v9331_v37  ;;  %4545 = vmatpush.bf16.xpose.msra.mxu3 %v9335_v15  ;;  %v9448_v37 = vld [vmem:[%s12934_s18 + $0xfc] sm:$0xf0]  ;;  %v9542_v15 = vld [vmem:[%s12934_s18 + $0x1b0] sm:$0xf] }
 0x28a   : > { %v9451_v18 = vor.u32 %v11732_v48, %v9448_v37 }
 0x28b   : > { %v2596_v4 = vpop.f32.mrf.mxu0 }
 0x28c   : > { %v2609_v5 = vpop.f32.mrf.mxu1 }
 0x28d   : > { %v2610_v9 = vadd.f32 %v2609_v5, %v2596_v4  ;;  %v9592_v4 = vld [vmem:[%s12934_s18 + $0x21c] sm:$0xf0]  ;;  %v9598_v5 = vld [vmem:[%s12934_s18 + $0x218] sm:$0xf] }
 0x28e   : > { %2699 = vmatmul.bf16.vlgmr.msra.gmra.mxu0 %v12716_v0 }
 0x28f   : > { %4551 = vmatpush.bf16.xpose.msrb.mxu0 %v9507_v3  ;;  %4520 = vmatmul.bf16.vlgmr.msra.gmra.mxu1 %v12716_v0  ;;  %v11757_v3 = vld [vmem:[%s12934_s18 + $0x1b8] sm:$0xf0] }
 0x290   : > { %4564 = vmatpush.bf16.xpose.msrb.mxu1 %v9511_v13  ;;  %4533 = vmatmul.bf16.vlgmr.msra.gmra.mxu2 %v12716_v0  ;;  %v9447_v13 = vor.u32 %v11733_v12, %v9446_v11  ;;  %v9543_v24 = vor.u32 %v11757_v3, %v9542_v15  ;;  %v9688_v11 = vld [vmem:[%s12934_s18 + $0x2dc] sm:$0xf0]  ;;  %v9580_v15 = vld [vmem:[%s12934_s18 + $0x204] sm:$0xf0] }
 0x291   : > { %4577 = vmatpush.bf16.xpose.msrb.mxu2 %v9515_v16  ;;  %4590 = vmatpush.bf16.xpose.msrb.mxu3 %v9603_v17  ;;  %v9586_v3 = vld [vmem:[%s12934_s18 + $0x200] sm:$0xf] }
 0x292   : > { %4546 = vmatmul.bf16.vlgmr.msra.gmra.mxu3 %v12716_v0 }
 0x293   : > { %v2598_v16 = vpop.f32.mrf.mxu0  ;;  %v2622_v17 = vpop.f32.mrf.mxu2 }
 0x294   : > { %v13650_v21 = vadd.f32 %v2622_v17, %v2610_v9  ;;  %v2611_v22 = vpop.f32.mrf.mxu1  ;;  %v11793_v9 = vld [vmem:[%s12934_s18 + $0x2d8] sm:$0xf0]  ;;  %v9674_v16 = vld [vmem:[%s12934_s18 + $0x2b8] sm:$0xf]  ;;  %v11790_v17 = vld [vmem:[%s12934_s18 + $0x2c0] sm:$0xf0] }
 0x295   : > { %v13660_v35 = vpop.f32.mrf.mxu3  ;;  %v9583_v22 = vor.u32 %v11765_v14, %v9580_v15  ;;  %v9675_v63 = vor.u32 %v11790_v17, %v9674_v16  ;;  %v9626_v14 = vld [vmem:[%s12934_s18 + $0x258] sm:$0xf]  ;;  %v11778_v15 = vld [vmem:[%s12934_s18 + $0x260] sm:$0xf0] }
 0x297   : > { %4552 = vmatpush.bf16.xpose.msrb.mxu0 %v9495_v27  ;;  %v9436_v27 = vld [vmem:[%s12934_s18 + $0xe4] sm:$0xf0] }
 0x298   : > { %4565 = vmatpush.bf16.xpose.msrb.mxu1 %v9499_v28  ;;  %v9442_v28 = vld [vmem:[%s12934_s18 + $0xe0] sm:$0xf]  ;;  %v9439_v19 = vor.u32 %v11729_v26, %v9436_v27 }
 0x299   : > { %4578 = vmatpush.bf16.xpose.msrb.mxu2 %v9503_v29  ;;  %4591 = vmatpush.bf16.xpose.msrb.mxu3 %v9591_v30  ;;  %v11731_v29 = vld [vmem:[%s12934_s18 + $0xe8] sm:$0xf0]  ;;  %v9530_v30 = vld [vmem:[%s12934_s18 + $0x198] sm:$0xf] }
 0x29a   : > { %v9443_v36 = vor.u32 %v11731_v29, %v9442_v28  ;;  %v9531_v38 = vor.u32 %v11754_v31, %v9530_v30  ;;  %v11762_v30 = vld [vmem:[%s12934_s18 + $0x1e4] sm:$0xf]  ;;  %v9568_v31 = vld [vmem:[%s12934_s18 + $0x1ec] sm:$0xf0] }
 0x29b   : > { %v2624_v34 = vpop.f32.mrf.mxu2 }
 0x29c   : > { %v11764_v34 = vld [vmem:[%s12934_s18 + $0x1f0] sm:$0xf0] }
 0x29f   : > { %4553 = vmatpush.bf16.xpose.msrb.mxu0 %v9483_v7  ;;  %v11727_v7 = vld [vmem:[%s12934_s18 + $0xc8] sm:$0xf0] }
 0x2a0   : > { %4566 = vmatpush.bf16.xpose.msrb.mxu1 %v9487_v40  ;;  %v11726_v40 = vld [vmem:[%s12934_s18 + $0xc4] sm:$0xf]  ;;  %v9423_v33 = vor.u32 %v11727_v7, %v9422_v39  ;;  %v9664_v7 = vld [vmem:[%s12934_s18 + $0x2ac] sm:$0xf0] }
 0x2a1   : > { %4579 = vmatpush.bf16.xpose.msrb.mxu2 %v9491_v41  ;;  %4592 = vmatpush.bf16.xpose.msrb.mxu3 %v9579_v42  ;;  %v9424_v41 = vld [vmem:[%s12934_s18 + $0xcc] sm:$0xf0]  ;;  %v9430_v42 = vld [vmem:[%s12934_s18 + $0xc8] sm:$0xf]  ;;  %v11786_v39 = vld [vmem:[%s12934_s18 + $0x2a4] sm:$0xf] }
 0x2a2   : > { %v9431_v56 = vor.u32 %v11728_v43, %v9430_v42  ;;  %v9667_v43 = vor.u32 %v11786_v39, %v9664_v7  ;;  %v11819_v39 = vld [vmem:[%s12934_s18 + $0x3ac] sm:$0xf]  ;;  %v9796_v7 = vld [vmem:[%s12934_s18 + $0x3b4] sm:$0xf0] }
 0x2a7   : > { %4554 = vmatpush.bf16.xpose.msrb.mxu0 %v9471_v52  ;;  %v9698_v52 = vld [vmem:[%s12934_s18 + $0x2e8] sm:$0xf] }
 0x2a8   : > { %4567 = vmatpush.bf16.xpose.msrb.mxu1 %v9475_v53  ;;  %v11796_v53 = vld [vmem:[%s12934_s18 + $0x2f0] sm:$0xf0] }
 0x2a9   : > { %4580 = vmatpush.bf16.xpose.msrb.mxu2 %v9479_v54  ;;  %4593 = vmatpush.bf16.xpose.msrb.mxu3 %v9567_v55  ;;  %v2637_v54 = vpop.f32.mrf.mxu3  ;;  %v9427_v55 = vor.u32 %v11726_v40, %v9424_v41  ;;  %v9699_v1 = vor.u32 %v11796_v53, %v9698_v52  ;;  %v11783_v52 = vld [vmem:[%s12934_s18 + $0x28c] sm:$0xf]  ;;  %v9652_v53 = vld [vmem:[%s12934_s18 + $0x294] sm:$0xf0] }
 0x2aa   : > { %v9559_v54 = vor.u32 %v11759_v46, %v9556_v49  ;;  %v9655_v57 = vor.u32 %v11783_v52, %v9652_v53  ;;  %v9799_v49 = vor.u32 %v11819_v39, %v9796_v7  ;;  %v11817_v52 = vld [vmem:[%s12934_s18 + $0x398] sm:$0xf0]  ;;  %v11816_v53 = vld [vmem:[%s12934_s18 + $0x394] sm:$0xf] }
 0x2ab   : > { %v11809_v39 = vld [vmem:[%s12934_s18 + $0x358] sm:$0xf0] }
 0x2af   : > { %4555 = vmatpush.bf16.xpose.msrb.mxu0 %v9459_v2  ;;  %v11768_v2 = vld [vmem:[%s12934_s18 + $0x214] sm:$0xf] }
 0x2b0   : > { %4568 = vmatpush.bf16.xpose.msrb.mxu1 %v9463_v6  ;;  %v11770_v6 = vld [vmem:[%s12934_s18 + $0x220] sm:$0xf0]  ;;  %v9595_v12 = vor.u32 %v11768_v2, %v9592_v4  ;;  %v11780_v2 = vld [vmem:[%s12934_s18 + $0x274] sm:$0xf]  ;;  %v9640_v4 = vld [vmem:[%s12934_s18 + $0x27c] sm:$0xf0] }
 0x2b1   : > { %4581 = vmatpush.bf16.xpose.msrb.mxu2 %v9467_v8  ;;  %4594 = vmatpush.bf16.xpose.msrb.mxu3 %v9555_v10  ;;  %v9686_v8 = vld [vmem:[%s12934_s18 + $0x2d0] sm:$0xf]  ;;  %v11792_v10 = vld [vmem:[%s12934_s18 + $0x2d4] sm:$0xf]  ;;  %v9599_v48 = vor.u32 %v11770_v6, %v9598_v5 }
 0x2b2   : > { %v9687_v37 = vor.u32 %v11793_v9, %v9686_v8  ;;  %v9691_v47 = vor.u32 %v11792_v10, %v9688_v11  ;;  %v9643_v11 = vor.u32 %v11780_v2, %v9640_v4  ;;  %v11814_v2 = vld [vmem:[%s12934_s18 + $0x380] sm:$0xf0]  ;;  %v11813_v4 = vld [vmem:[%s12934_s18 + $0x37c] sm:$0xf] }
 0x2b7   : > { %4556 = vmatpush.bf16.xpose.msrb.mxu0 %v9447_v13  ;;  %v11767_v13 = vld [vmem:[%s12934_s18 + $0x208] sm:$0xf0] }
 0x2b8   : > { %4569 = vmatpush.bf16.xpose.msrb.mxu1 %v9451_v18  ;;  %v11789_v18 = vld [vmem:[%s12934_s18 + $0x2bc] sm:$0xf] }
 0x2b9   : > { %4582 = vmatpush.bf16.xpose.msrb.mxu2 %v9455_v20  ;;  %4595 = vmatpush.bf16.xpose.msrb.mxu3 %v9543_v24  ;;  %v9676_v20 = vld [vmem:[%s12934_s18 + $0x2c4] sm:$0xf0]  ;;  %v9587_v24 = vor.u32 %v11767_v13, %v9586_v3  ;;  %v11777_v3 = vld [vmem:[%s12934_s18 + $0x25c] sm:$0xf] }
 0x2ba   : > { %v9679_v25 = vor.u32 %v11789_v18, %v9676_v20  ;;  %v9628_v13 = vld [vmem:[%s12934_s18 + $0x264] sm:$0xf0]  ;;  %v510_v18 = vlaneseq }
 0x2bc   : > { %vm512_vm7 = vcmp.lt.s32.totalorder %v510_v18, 128  ;;  %vm13788_vm8 = vcmp.lt.s32.totalorder %v510_v18, 384  ;;  %v9658_v18 = vld [vmem:[%s12934_s18 + $0x290] sm:$0xf] }
 0x2bd   : > { %514 = vst.msk [vmem:[#allocation2 + $0x20] sm:$0x1] %vm512_vm7, %v12717_v23  ;;  %v9794_v23 = vld [vmem:[%s12934_s18 + $0x3a8] sm:$0xf] }
 0x2bf   : > { %4557 = vmatpush.bf16.xpose.msrb.mxu0 %v9435_v32  ;;  %v9574_v32 = vld [vmem:[%s12934_s18 + $0x1e8] sm:$0xf] }
 0x2c0   : > { %4570 = vmatpush.bf16.xpose.msrb.mxu1 %v9439_v19  ;;  %v9662_v19 = vld [vmem:[%s12934_s18 + $0x2a0] sm:$0xf]  ;;  %v9575_v41 = vor.u32 %v11764_v34, %v9574_v32  ;;  %v9616_v32 = vld [vmem:[%s12934_s18 + $0x24c] sm:$0xf0] }
 0x2c1   : > { %4583 = vmatpush.bf16.xpose.msrb.mxu2 %v9443_v36  ;;  %4596 = vmatpush.bf16.xpose.msrb.mxu3 %v9531_v38  ;;  %v11787_v36 = vld [vmem:[%s12934_s18 + $0x2a8] sm:$0xf0]  ;;  %v9706_v34 = vld [vmem:[%s12934_s18 + $0x2f0] sm:$0xf] }
 0x2c2   : > { %v9663_v42 = vor.u32 %v11787_v36, %v9662_v19  ;;  %v11797_v19 = vld [vmem:[%s12934_s18 + $0x2f8] sm:$0xf0] }
 0x2c7   : > { %4558 = vmatpush.bf16.xpose.msrb.mxu0 %v9423_v33  ;;  %v11761_v33 = vld [vmem:[%s12934_s18 + $0x1d8] sm:$0xf0] }
 0x2c8   : > { %4571 = vmatpush.bf16.xpose.msrb.mxu1 %v9427_v55  ;;  %v9563_v55 = vor.u32 %v11761_v33, %v9562_v50  ;;  %v9694_v33 = vld [vmem:[%s12934_s18 + $0x2d8] sm:$0xf] }
 0x2c9   : > { %4584 = vmatpush.bf16.xpose.msrb.mxu2 %v9431_v56  ;;  %4597 = vmatpush.bf16.xpose.msrb.mxu3 %v9519_v59  ;;  %v9544_v59 = vld [vmem:[%s12934_s18 + $0x1bc] sm:$0xf0] }
 0x2ca   : > { %v9547_v5 = vor.u32 %v11756_v58, %v9544_v59 }
 0x2cb   : > { %v2648_v26 = vpop.f32.mrf.mxu0 }
 0x2cc   : > { %v2649_v27 = vadd.f32 %v2648_v26, %v13660_v35  ;;  %v2661_v28 = vpop.f32.mrf.mxu1  ;;  %v9571_v35 = vor.u32 %v11762_v30, %v9568_v31  ;;  %v9520_v26 = vld [vmem:[%s12934_s18 + $0x18c] sm:$0xf0]  ;;  %v11775_v30 = vld [vmem:[%s12934_s18 + $0x248] sm:$0xf0]  ;;  %v11774_v31 = vld [vmem:[%s12934_s18 + $0x244] sm:$0xf] }
 0x2ce   : > { %4559 = vmatmul.bf16.vlgmr.msrb.gmra.mxu0 %v12716_v0  ;;  %v2662_v29 = vadd.f32 %v2661_v28, %v2649_v27  ;;  %v9526_v27 = vld [vmem:[%s12934_s18 + $0x188] sm:$0xf]  ;;  %v11752_v28 = vld [vmem:[%s12934_s18 + $0x190] sm:$0xf0] }
 0x2cf   : > { %4603 = vmatpush.bf16.xpose.msra.mxu0 %v9607_v60  ;;  %4572 = vmatmul.bf16.vlgmr.msrb.gmra.mxu1 %v12716_v0  ;;  %v9550_v60 = vld [vmem:[%s12934_s18 + $0x1b8] sm:$0xf] }
 0x2d0   : > { %4616 = vmatpush.bf16.xpose.msra.mxu1 %v9611_v62  ;;  %4585 = vmatmul.bf16.vlgmr.msrb.gmra.mxu2 %v12716_v0  ;;  %v2724_v38 = vrot.slane %v2662_v29, 7  ;;  %v11758_v62 = vld [vmem:[%s12934_s18 + $0x1c0] sm:$0xf0]  ;;  %v9614_v29 = vld [vmem:[%s12934_s18 + $0x240] sm:$0xf] }
 0x2d1   : > { %4629 = vmatpush.bf16.xpose.msra.mxu2 %v9699_v1  ;;  %4642 = vmatpush.bf16.xpose.msra.mxu3 %v9703_v61  ;;  %v9638_v1 = vld [vmem:[%s12934_s18 + $0x270] sm:$0xf]  ;;  %v11781_v61 = vld [vmem:[%s12934_s18 + $0x278] sm:$0xf0]  ;;  %v9551_v9 = vor.u32 %v11758_v62, %v9550_v60  ;;  %v9682_v62 = vld [vmem:[%s12934_s18 + $0x2c0] sm:$0xf] }
 0x2d2   : > { %4598 = vmatmul.bf16.vlgmr.msrb.gmra.mxu3 %v12716_v0  ;;  %v13709_v40 = vsel %vm2726_vm0, %v13650_v21, %v2724_v38  ;;  %v9650_v21 = vld [vmem:[%s12934_s18 + $0x288] sm:$0xf]  ;;  %v9639_v10 = vor.u32 %v11781_v61, %v9638_v1  ;;  %v11820_v38 = vld [vmem:[%s12934_s18 + $0x3b0] sm:$0xf0]  ;;  %v11791_v1 = vld [vmem:[%s12934_s18 + $0x2c8] sm:$0xf0] }
 0x2d3   : > { %v2650_v44 = vpop.f32.mrf.mxu0  ;;  %v9651_v56 = vor.u32 %v11784_v51, %v9650_v21  ;;  %v13727_v6 = vpop.f32.mrf.mxu2  ;;  %v9795_v46 = vor.u32 %v11820_v38, %v9794_v23  ;;  %v11794_v21 = vld [vmem:[%s12934_s18 + $0x2e0] sm:$0xf0]  ;;  %v9782_v51 = vld [vmem:[%s12934_s18 + $0x390] sm:$0xf]  ;;  %v9770_v61 = vld [vmem:[%s12934_s18 + $0x378] sm:$0xf] }
 0x2d4   : > { %v2663_v45 = vpop.f32.mrf.mxu1  ;;  %v9619_v44 = vor.u32 %v11774_v31, %v9616_v32  ;;  %v9783_v58 = vor.u32 %v11817_v52, %v9782_v51  ;;  %v11785_v32 = vld [vmem:[%s12934_s18 + $0x298] sm:$0xf0]  ;;  %v11807_v23 = vld [vmem:[%s12934_s18 + $0x34c] sm:$0xf]  ;;  %v9754_v38 = vld [vmem:[%s12934_s18 + $0x350] sm:$0xf] }
 0x2d5   : > { %v13729_v8 = vpop.f32.mrf.mxu3  ;;  %v9707_v45 = vor.u32 %v11797_v19, %v9706_v34  ;;  %v9746_v34 = vld [vmem:[%s12934_s18 + $0x348] sm:$0xf]  ;;  %v11808_v19 = vld [vmem:[%s12934_s18 + $0x350] sm:$0xf0]  ;;  %v9659_v7 = vor.u32 %v11785_v32, %v9658_v18  ;;  %v9736_v51 = vld [vmem:[%s12934_s18 + $0x33c] sm:$0xf0] }
 0x2d6   : > { %v9742_v52 = vld [vmem:[%s12934_s18 + $0x338] sm:$0xf]  ;;  %v11868_v18 = vld [vmem:[%s12934_s18 + $0x530] sm:$0xf0] }
 0x2d7   : > { %4604 = vmatpush.bf16.xpose.msra.mxu0 %v9595_v12  ;;  %v11753_v12 = vld [vmem:[%s12934_s18 + $0x19c] sm:$0xf] }
 0x2d8   : > { %4617 = vmatpush.bf16.xpose.msra.mxu1 %v9599_v48  ;;  %v9532_v48 = vld [vmem:[%s12934_s18 + $0x1a4] sm:$0xf0] }
 0x2d9   : > { %4630 = vmatpush.bf16.xpose.msra.mxu2 %v9687_v37  ;;  %4643 = vmatpush.bf16.xpose.msra.mxu3 %v9691_v47  ;;  %v9538_v37 = vld [vmem:[%s12934_s18 + $0x1a0] sm:$0xf]  ;;  %v11755_v47 = vld [vmem:[%s12934_s18 + $0x1a8] sm:$0xf0]  ;;  %v9535_v16 = vor.u32 %v11753_v12, %v9532_v48  ;;  %v9683_v12 = vor.u32 %v11791_v1, %v9682_v62  ;;  %v9771_v48 = vor.u32 %v11814_v2, %v9770_v61  ;;  %v9722_v1 = vld [vmem:[%s12934_s18 + $0x318] sm:$0xf] }
 0x2da   : > { %v11779_v62 = vld [vmem:[%s12934_s18 + $0x268] sm:$0xf0]  ;;  %v11802_v61 = vld [vmem:[%s12934_s18 + $0x320] sm:$0xf0]  ;;  %v11801_v2 = vld [vmem:[%s12934_s18 + $0x31c] sm:$0xf] }
 0x2db   : > { %v2676_v17 = vpop.f32.mrf.mxu2 }
 0x2dc   : > { %v11811_v17 = vld [vmem:[%s12934_s18 + $0x368] sm:$0xf0] }
 0x2dd   : > { %v2689_v20 = vpop.f32.mrf.mxu3 }
 0x2de   : > { %v11810_v20 = vld [vmem:[%s12934_s18 + $0x364] sm:$0xf] }
 0x2df   : > { %4605 = vmatpush.bf16.xpose.msra.mxu0 %v9583_v22  ;;  %v9539_v22 = vor.u32 %v11755_v47, %v9538_v37 }
 0x2e0   : > { %4618 = vmatpush.bf16.xpose.msra.mxu1 %v9587_v24  ;;  %v9627_v24 = vor.u32 %v11778_v15, %v9626_v14 }
 0x2e1   : > { %4631 = vmatpush.bf16.xpose.msra.mxu2 %v9675_v63  ;;  %4644 = vmatpush.bf16.xpose.msra.mxu3 %v9679_v25  ;;  %v9631_v63 = vor.u32 %v11777_v3, %v9628_v13  ;;  %v11750_v25 = vld [vmem:[%s12934_s18 + $0x184] sm:$0xf]  ;;  %v9670_v13 = vld [vmem:[%s12934_s18 + $0x2a8] sm:$0xf] }
 0x2e2   : > { %v9523_v36 = vor.u32 %v11750_v25, %v9520_v26  ;;  %v2705_v3 = vld [vmem:[#allocation2 + $0x8] sm:$0x7]  ;;  %v11812_v26 = vld [vmem:[%s12934_s18 + $0x370] sm:$0xf0] }
 0x2e3   : > { %v9766_v25 = vld [vmem:[%s12934_s18 + $0x368] sm:$0xf] }
 0x2e7   : > { %4606 = vmatpush.bf16.xpose.msra.mxu0 %v9571_v35  ;;  %v9527_v35 = vor.u32 %v11752_v28, %v9526_v27 }
 0x2e8   : > { %4619 = vmatpush.bf16.xpose.msra.mxu1 %v9575_v41  ;;  %v9615_v41 = vor.u32 %v11775_v30, %v9614_v29 }
 0x2e9   : > { %4632 = vmatpush.bf16.xpose.msra.mxu2 %v9663_v42  ;;  %4645 = vmatpush.bf16.xpose.msra.mxu3 %v9667_v43  ;;  %v9802_v42 = vld [vmem:[%s12934_s18 + $0x3b0] sm:$0xf]  ;;  %v11821_v43 = vld [vmem:[%s12934_s18 + $0x3b8] sm:$0xf0] }
 0x2ea   : > { %v9803_v50 = vor.u32 %v11821_v43, %v9802_v42  ;;  %v9755_v43 = vor.u32 %v11809_v39, %v9754_v38  ;;  %v9878_v38 = vld [vmem:[%s12934_s18 + $0x450] sm:$0xf]  ;;  %v11841_v39 = vld [vmem:[%s12934_s18 + $0x458] sm:$0xf0] }
 0x2ef   : > { %4607 = vmatpush.bf16.xpose.msra.mxu0 %v9559_v54  ;;  %v9784_v54 = vld [vmem:[%s12934_s18 + $0x39c] sm:$0xf0] }
 0x2f0   : > { %4620 = vmatpush.bf16.xpose.msra.mxu1 %v9563_v55  ;;  %v9790_v55 = vld [vmem:[%s12934_s18 + $0x398] sm:$0xf]  ;;  %v9787_v59 = vor.u32 %v11816_v53, %v9784_v54  ;;  %v11806_v53 = vld [vmem:[%s12934_s18 + $0x340] sm:$0xf0] }
 0x2f1   : > { %4633 = vmatpush.bf16.xpose.msra.mxu2 %v9651_v56  ;;  %4646 = vmatpush.bf16.xpose.msra.mxu3 %v9655_v57  ;;  %v11818_v56 = vld [vmem:[%s12934_s18 + $0x3a0] sm:$0xf0]  ;;  %v9695_v57 = vor.u32 %v11794_v21, %v9694_v33  ;;  %v11805_v33 = vld [vmem:[%s12934_s18 + $0x338] sm:$0xf0]  ;;  %v11804_v21 = vld [vmem:[%s12934_s18 + $0x334] sm:$0xf] }
 0x2f2   : > { %v9791_v60 = vor.u32 %v11818_v56, %v9790_v55 }
 0x2f7   : > { %4608 = vmatpush.bf16.xpose.msra.mxu0 %v9547_v5  ;;  %v9772_v5 = vld [vmem:[%s12934_s18 + $0x384] sm:$0xf0] }
 0x2f8   : > { %4621 = vmatpush.bf16.xpose.msra.mxu1 %v9551_v9  ;;  %v2688_v9 = vadd.f32 %v13729_v8, %v13727_v6  ;;  %v9775_v37 = vor.u32 %v11813_v4, %v9772_v5  ;;  %v11788_v8 = vld [vmem:[%s12934_s18 + $0x2b0] sm:$0xf0]  ;;  %v9724_v4 = vld [vmem:[%s12934_s18 + $0x324] sm:$0xf0]  ;;  %v9730_v5 = vld [vmem:[%s12934_s18 + $0x320] sm:$0xf] }
 0x2f9   : > { %4634 = vmatpush.bf16.xpose.msra.mxu2 %v9639_v10  ;;  %4647 = vmatpush.bf16.xpose.msra.mxu3 %v9643_v11  ;;  %v9778_v10 = vld [vmem:[%s12934_s18 + $0x380] sm:$0xf]  ;;  %v11815_v11 = vld [vmem:[%s12934_s18 + $0x388] sm:$0xf0]  ;;  %v9671_v28 = vor.u32 %v11788_v8, %v9670_v13  ;;  %v9712_v8 = vld [vmem:[%s12934_s18 + $0x30c] sm:$0xf0] }
 0x2fa   : > { %v9779_v47 = vor.u32 %v11815_v11, %v9778_v10  ;;  %v11799_v13 = vld [vmem:[%s12934_s18 + $0x308] sm:$0xf0] }
 0x2ff   : > { %4609 = vmatpush.bf16.xpose.msra.mxu0 %v9535_v16  ;;  %v9758_v16 = vld [vmem:[%s12934_s18 + $0x360] sm:$0xf] }
 0x300   : > { %4622 = vmatpush.bf16.xpose.msra.mxu1 %v9539_v22  ;;  %v9760_v22 = vld [vmem:[%s12934_s18 + $0x36c] sm:$0xf0]  ;;  %v9759_v29 = vor.u32 %v11811_v17, %v9758_v16  ;;  %v9718_v16 = vld [vmem:[%s12934_s18 + $0x308] sm:$0xf]  ;;  %v11800_v17 = vld [vmem:[%s12934_s18 + $0x310] sm:$0xf0] }
 0x301   : > { %4635 = vmatpush.bf16.xpose.msra.mxu2 %v9627_v24  ;;  %4648 = vmatpush.bf16.xpose.msra.mxu3 %v9631_v63  ;;  %v9763_v30 = vor.u32 %v11810_v20, %v9760_v22  ;;  %v9890_v20 = vld [vmem:[%s12934_s18 + $0x468] sm:$0xf]  ;;  %v11844_v22 = vld [vmem:[%s12934_s18 + $0x470] sm:$0xf0]  ;;  %v9719_v32 = vor.u32 %v11800_v17, %v9718_v16 }
 0x307   : > { %4610 = vmatpush.bf16.xpose.msra.mxu0 %v9523_v36  ;;  %v9748_v36 = vld [vmem:[%s12934_s18 + $0x354] sm:$0xf0] }
 0x308   : > { %4623 = vmatpush.bf16.xpose.msra.mxu1 %v9527_v35  ;;  %v9751_v42 = vor.u32 %v11807_v23, %v9748_v36 }
 0x309   : > { %4636 = vmatpush.bf16.xpose.msra.mxu2 %v9615_v41  ;;  %4649 = vmatpush.bf16.xpose.msra.mxu3 %v9619_v44  ;;  %v9747_v41 = vor.u32 %v11808_v19, %v9746_v34  ;;  %v9891_v34 = vor.u32 %v11844_v22, %v9890_v20  ;;  %v9842_v20 = vld [vmem:[%s12934_s18 + $0x408] sm:$0xf]  ;;  %v11832_v22 = vld [vmem:[%s12934_s18 + $0x410] sm:$0xf0] }
 0x30b   : > { %v2700_v14 = vpop.f32.mrf.mxu0 }
 0x30c   : > { %v2701_v15 = vadd.f32 %v2700_v14, %v2688_v9  ;;  %v4521_v35 = vpop.f32.mrf.mxu1  ;;  %v11803_v9 = vld [vmem:[%s12934_s18 + $0x328] sm:$0xf0]  ;;  %v9622_v14 = vld [vmem:[%s12934_s18 + $0x248] sm:$0xf] }
 0x30e   : > { %4611 = vmatmul.bf16.vlgmr.msra.gmra.mxu0 %v12716_v0  ;;  %v2725_v6 = vrot.slane %v2701_v15, 6  ;;  %v11776_v15 = vld [vmem:[%s12934_s18 + $0x250] sm:$0xf0] }
 0x30f   : > { %4655 = vmatpush.bf16.xpose.msrb.mxu0 %v9707_v45  ;;  %4624 = vmatmul.bf16.vlgmr.msra.gmra.mxu1 %v12716_v0 }
 0x310   : > { %4668 = vmatpush.bf16.xpose.msrb.mxu1 %v9795_v46  ;;  %4637 = vmatmul.bf16.vlgmr.msra.gmra.mxu2 %v12716_v0  ;;  %v2741_v24 = vsel %vm2730_vm2, %v13709_v40, %v2725_v6  ;;  %v9767_v40 = vor.u32 %v11812_v26, %v9766_v25  ;;  %v9646_v46 = vld [vmem:[%s12934_s18 + $0x278] sm:$0xf]  ;;  %v11798_v6 = vld [vmem:[%s12934_s18 + $0x304] sm:$0xf]  ;;  %v9623_v25 = vor.u32 %v11776_v15, %v9622_v14 }
 0x311   : > { %4681 = vmatpush.bf16.xpose.msrb.mxu2 %v9799_v49  ;;  %4694 = vmatpush.bf16.xpose.msrb.mxu3 %v9803_v50  ;;  %v2745_v27 = vadd.f32 %v2741_v24, %v2705_v3  ;;  %v11782_v49 = vld [vmem:[%s12934_s18 + $0x280] sm:$0xf0]  ;;  %v9734_v50 = vld [vmem:[%s12934_s18 + $0x330] sm:$0xf]  ;;  %v9710_v3 = vld [vmem:[%s12934_s18 + $0x300] sm:$0xf] }
 0x312   : > { %4650 = vmatmul.bf16.vlgmr.msra.gmra.mxu3 %v12716_v0  ;;  %v9647_v54 = vor.u32 %v11782_v49, %v9646_v46  ;;  %v9735_v56 = vor.u32 %v11805_v33, %v9734_v50  ;;  %v11843_v24 = vld [vmem:[%s12934_s18 + $0x46c] sm:$0xf]  ;;  %v9892_v26 = vld [vmem:[%s12934_s18 + $0x474] sm:$0xf0] }
 0x313   : > { %2751 = vst.msk [vmem:[#allocation2 + $0x8] sm:$0x7] %vm13788_vm8, %v2745_v27  ;;  %v2702_v31 = vpop.f32.mrf.mxu0  ;;  %v4534_v44 = vpop.f32.mrf.mxu2  ;;  %v9898_v27 = vld [vmem:[%s12934_s18 + $0x470] sm:$0xf]  ;;  %v9895_v19 = vor.u32 %v11843_v24, %v9892_v26  ;;  %v9866_v33 = vld [vmem:[%s12934_s18 + $0x438] sm:$0xf] }
 0x314   : > { %v4535_v45 = vadd.f32 %v4534_v44, %v4521_v35  ;;  %v4523_v55 = vpop.f32.mrf.mxu1  ;;  %v9986_v31 = vld [vmem:[%s12934_s18 + $0x528] sm:$0xf]  ;;  %v9880_v35 = vld [vmem:[%s12934_s18 + $0x45c] sm:$0xf0]  ;;  %v11865_v44 = vld [vmem:[%s12934_s18 + $0x518] sm:$0xf0] }
 0x315   : > { %v4547_v11 = vpop.f32.mrf.mxu3  ;;  %v9987_v36 = vor.u32 %v11868_v18, %v9986_v31  ;;  %v9962_v55 = vld [vmem:[%s12934_s18 + $0x4f8] sm:$0xf]  ;;  %v11831_v24 = vld [vmem:[%s12934_s18 + $0x40c] sm:$0xf] }
 0x316   : > { %v9844_v26 = vld [vmem:[%s12934_s18 + $0x414] sm:$0xf0] }
 0x317   : > { %4656 = vmatpush.bf16.xpose.msrb.mxu0 %v9695_v57  ;;  %v9739_v57 = vor.u32 %v11804_v21, %v9736_v51  ;;  %v11838_v21 = vld [vmem:[%s12934_s18 + $0x440] sm:$0xf0]  ;;  %v11837_v51 = vld [vmem:[%s12934_s18 + $0x43c] sm:$0xf]  ;;  %v9847_v31 = vor.u32 %v11831_v24, %v9844_v26  ;;  %v9982_v24 = vld [vmem:[%s12934_s18 + $0x518] sm:$0xf] }
 0x318   : > { %4669 = vmatpush.bf16.xpose.msrb.mxu1 %v9783_v58  ;;  %v9743_v58 = vor.u32 %v11806_v53, %v9742_v52  ;;  %v9868_v52 = vld [vmem:[%s12934_s18 + $0x444] sm:$0xf0]  ;;  %v9874_v53 = vld [vmem:[%s12934_s18 + $0x440] sm:$0xf]  ;;  %v11866_v26 = vld [vmem:[%s12934_s18 + $0x520] sm:$0xf0] }
 0x319   : > { %4682 = vmatpush.bf16.xpose.msrb.mxu2 %v9787_v59  ;;  %4695 = vmatpush.bf16.xpose.msrb.mxu3 %v9791_v60  ;;  %v9634_v60 = vld [vmem:[%s12934_s18 + $0x260] sm:$0xf] }
 0x31a   : > { %v9635_v10 = vor.u32 %v11779_v62, %v9634_v60 }
 0x31b   : > { %v4536_v59 = vpop.f32.mrf.mxu2 }
 0x31f   : > { %4657 = vmatpush.bf16.xpose.msrb.mxu0 %v9683_v12  ;;  %v9723_v12 = vor.u32 %v11802_v61, %v9722_v1 }
 0x320   : > { %4670 = vmatpush.bf16.xpose.msrb.mxu1 %v9771_v48  ;;  %v9727_v48 = vor.u32 %v11801_v2, %v9724_v4  ;;  %v9854_v2 = vld [vmem:[%s12934_s18 + $0x420] sm:$0xf]  ;;  %v11835_v4 = vld [vmem:[%s12934_s18 + $0x428] sm:$0xf0] }
 0x321   : > { %4683 = vmatpush.bf16.xpose.msrb.mxu2 %v9775_v37  ;;  %4696 = vmatpush.bf16.xpose.msrb.mxu3 %v9779_v47  ;;  %v13820_v37 = vadd.f32 %v4547_v11, %v4535_v45  ;;  %v9731_v47 = vor.u32 %v11803_v9, %v9730_v5  ;;  %v9879_v45 = vor.u32 %v11841_v39, %v9878_v38  ;;  %v11834_v5 = vld [vmem:[%s12934_s18 + $0x424] sm:$0xf]  ;;  %v9856_v9 = vld [vmem:[%s12934_s18 + $0x42c] sm:$0xf0]  ;;  %v11836_v11 = vld [vmem:[%s12934_s18 + $0x430] sm:$0xf0] }
 0x322   : > { %v9859_v15 = vor.u32 %v11834_v5, %v9856_v9  ;;  %v9838_v38 = vld [vmem:[%s12934_s18 + $0x3f8] sm:$0xf]  ;;  %v11830_v39 = vld [vmem:[%s12934_s18 + $0x400] sm:$0xf0]  ;;  %v9994_v9 = vld [vmem:[%s12934_s18 + $0x530] sm:$0xf] }
 0x323   : > { %v9988_v5 = vld [vmem:[%s12934_s18 + $0x534] sm:$0xf0] }
 0x327   : > { %4658 = vmatpush.bf16.xpose.msrb.mxu0 %v9671_v28  ;;  %v11845_v28 = vld [vmem:[%s12934_s18 + $0x478] sm:$0xf0] }
 0x328   : > { %4671 = vmatpush.bf16.xpose.msrb.mxu1 %v9759_v29  ;;  %v4549_v29 = vpop.f32.mrf.mxu3  ;;  %v9899_v23 = vor.u32 %v11845_v28, %v9898_v27  ;;  %v9850_v27 = vld [vmem:[%s12934_s18 + $0x410] sm:$0xf]  ;;  %v11833_v28 = vld [vmem:[%s12934_s18 + $0x418] sm:$0xf0] }
 0x329   : > { %4684 = vmatpush.bf16.xpose.msrb.mxu2 %v9763_v30  ;;  %4697 = vmatpush.bf16.xpose.msrb.mxu3 %v9767_v40  ;;  %v9711_v30 = vor.u32 %v11799_v13, %v9710_v3  ;;  %v9715_v40 = vor.u32 %v11798_v6, %v9712_v8  ;;  %v9938_v29 = vld [vmem:[%s12934_s18 + $0x4c8] sm:$0xf]  ;;  %v9851_v18 = vor.u32 %v11833_v28, %v9850_v27  ;;  %v10070_v27 = vld [vmem:[%s12934_s18 + $0x5d0] sm:$0xf]  ;;  %v11889_v28 = vld [vmem:[%s12934_s18 + $0x5d8] sm:$0xf0] }
 0x32f   : > { %4659 = vmatpush.bf16.xpose.msrb.mxu0 %v9659_v7  ;;  %v11840_v7 = vld [vmem:[%s12934_s18 + $0x454] sm:$0xf] }
 0x330   : > { %4672 = vmatpush.bf16.xpose.msrb.mxu1 %v9747_v41  ;;  %v9886_v41 = vld [vmem:[%s12934_s18 + $0x458] sm:$0xf]  ;;  %v9883_v46 = vor.u32 %v11840_v7, %v9880_v35  ;;  %v9926_v7 = vld [vmem:[%s12934_s18 + $0x4b0] sm:$0xf]  ;;  %v11853_v35 = vld [vmem:[%s12934_s18 + $0x4b8] sm:$0xf0] }
 0x331   : > { %4685 = vmatpush.bf16.xpose.msrb.mxu2 %v9751_v42  ;;  %4698 = vmatpush.bf16.xpose.msrb.mxu3 %v9755_v43  ;;  %v11842_v42 = vld [vmem:[%s12934_s18 + $0x460] sm:$0xf0]  ;;  %v9974_v43 = vld [vmem:[%s12934_s18 + $0x510] sm:$0xf] }
 0x332   : > { %v9887_v49 = vor.u32 %v11842_v42, %v9886_v41  ;;  %v9975_v50 = vor.u32 %v11865_v44, %v9974_v43  ;;  %v9839_v43 = vor.u32 %v11830_v39, %v9838_v38  ;;  %v9927_v44 = vor.u32 %v11853_v35, %v9926_v7  ;;  %v11886_v38 = vld [vmem:[%s12934_s18 + $0x5c0] sm:$0xf0]  ;;  %v11885_v39 = vld [vmem:[%s12934_s18 + $0x5bc] sm:$0xf]  ;;  %v10060_v7 = vld [vmem:[%s12934_s18 + $0x5c4] sm:$0xf0] }
 0x337   : > { %4660 = vmatpush.bf16.xpose.msrb.mxu0 %v9647_v54  ;;  %v11839_v54 = vld [vmem:[%s12934_s18 + $0x448] sm:$0xf0] }
 0x338   : > { %4673 = vmatpush.bf16.xpose.msrb.mxu1 %v9735_v56  ;;  %v11862_v56 = vld [vmem:[%s12934_s18 + $0x500] sm:$0xf0]  ;;  %v9875_v59 = vor.u32 %v11839_v54, %v9874_v53 }
 0x339   : > { %4686 = vmatpush.bf16.xpose.msrb.mxu2 %v9739_v57  ;;  %4699 = vmatpush.bf16.xpose.msrb.mxu3 %v9743_v58  ;;  %v9867_v57 = vor.u32 %v11838_v21, %v9866_v33  ;;  %v9871_v58 = vor.u32 %v11837_v51, %v9868_v52  ;;  %v9963_v60 = vor.u32 %v11862_v56, %v9962_v55  ;;  %v9826_v33 = vld [vmem:[%s12934_s18 + $0x3e0] sm:$0xf]  ;;  %v11827_v21 = vld [vmem:[%s12934_s18 + $0x3e8] sm:$0xf0]  ;;  %v9914_v51 = vld [vmem:[%s12934_s18 + $0x498] sm:$0xf] }
 0x33a   : > { %v11850_v52 = vld [vmem:[%s12934_s18 + $0x4a0] sm:$0xf0]  ;;  %v9827_v55 = vor.u32 %v11827_v21, %v9826_v33  ;;  %v11883_v33 = vld [vmem:[%s12934_s18 + $0x5a8] sm:$0xf0] }
 0x33b   : > { %v9915_v56 = vor.u32 %v11850_v52, %v9914_v51  ;;  %v11882_v51 = vld [vmem:[%s12934_s18 + $0x5a4] sm:$0xf]  ;;  %v10048_v52 = vld [vmem:[%s12934_s18 + $0x5ac] sm:$0xf0] }
 0x33f   : > { %4661 = vmatpush.bf16.xpose.msrb.mxu0 %v9635_v10  ;;  %v9862_v10 = vld [vmem:[%s12934_s18 + $0x428] sm:$0xf] }
 0x340   : > { %4674 = vmatpush.bf16.xpose.msrb.mxu1 %v9723_v12  ;;  %v9950_v12 = vld [vmem:[%s12934_s18 + $0x4e0] sm:$0xf]  ;;  %v9863_v3 = vor.u32 %v11836_v11, %v9862_v10  ;;  %v11869_v11 = vld [vmem:[%s12934_s18 + $0x538] sm:$0xf0] }
 0x341   : > { %4687 = vmatpush.bf16.xpose.msrb.mxu2 %v9727_v48  ;;  %4700 = vmatpush.bf16.xpose.msrb.mxu3 %v9731_v47  ;;  %v11859_v48 = vld [vmem:[%s12934_s18 + $0x4e8] sm:$0xf0]  ;;  %v9855_v47 = vor.u32 %v11835_v4, %v9854_v2 }
 0x342   : > { %v9951_v6 = vor.u32 %v11859_v48, %v9950_v12  ;;  %v11847_v2 = vld [vmem:[%s12934_s18 + $0x488] sm:$0xf0]  ;;  %v10082_v12 = vld [vmem:[%s12934_s18 + $0x5e8] sm:$0xf]  ;;  %v11892_v48 = vld [vmem:[%s12934_s18 + $0x5f0] sm:$0xf0] }
 0x343   : > { %v11867_v4 = vld [vmem:[%s12934_s18 + $0x52c] sm:$0xf] }
 0x347   : > { %4662 = vmatpush.bf16.xpose.msrb.mxu0 %v9623_v25 }
 0x348   : > { %4675 = vmatpush.bf16.xpose.msrb.mxu1 %v9711_v30  ;;  %v11856_v30 = vld [vmem:[%s12934_s18 + $0x4d0] sm:$0xf0] }
 0x349   : > { %4688 = vmatpush.bf16.xpose.msrb.mxu2 %v9715_v40  ;;  %4701 = vmatpush.bf16.xpose.msrb.mxu3 %v9719_v32  ;;  %v9843_v40 = vor.u32 %v11832_v22, %v9842_v20  ;;  %v11864_v20 = vld [vmem:[%s12934_s18 + $0x514] sm:$0xf]  ;;  %v9976_v22 = vld [vmem:[%s12934_s18 + $0x51c] sm:$0xf0] }
 0x34b   : > { %v4560_v62 = vpop.f32.mrf.mxu0 }
 0x34c   : > { %v4573_v1 = vpop.f32.mrf.mxu1 }
 0x34d   : > { %v4574_v61 = vadd.f32 %v4573_v1, %v4560_v62  ;;  %v9814_v62 = vld [vmem:[%s12934_s18 + $0x3c8] sm:$0xf]  ;;  %v11824_v1 = vld [vmem:[%s12934_s18 + $0x3d0] sm:$0xf0] }
 0x34e   : > { %4663 = vmatmul.bf16.vlgmr.msrb.gmra.mxu0 %v12716_v0 }
 0x34f   : > { %4707 = vmatpush.bf16.xpose.msra.mxu0 %v9891_v34  ;;  %4676 = vmatmul.bf16.vlgmr.msrb.gmra.mxu1 %v12716_v0  ;;  %v9939_v34 = vor.u32 %v11856_v30, %v9938_v29  ;;  %v11888_v29 = vld [vmem:[%s12934_s18 + $0x5d4] sm:$0xf]  ;;  %v10072_v30 = vld [vmem:[%s12934_s18 + $0x5dc] sm:$0xf0] }
 0x350   : > { %4720 = vmatpush.bf16.xpose.msra.mxu1 %v9895_v19  ;;  %4689 = vmatmul.bf16.vlgmr.msrb.gmra.mxu2 %v12716_v0  ;;  %v11829_v19 = vld [vmem:[%s12934_s18 + $0x3f8] sm:$0xf0] }
 0x351   : > { %4733 = vmatpush.bf16.xpose.msra.mxu2 %v9899_v23  ;;  %4746 = vmatpush.bf16.xpose.msra.mxu3 %v9987_v36  ;;  %v11828_v23 = vld [vmem:[%s12934_s18 + $0x3f4] sm:$0xf]  ;;  %v9832_v36 = vld [vmem:[%s12934_s18 + $0x3fc] sm:$0xf0] }
 0x352   : > { %4702 = vmatmul.bf16.vlgmr.msrb.gmra.mxu3 %v12716_v0  ;;  %v9835_v42 = vor.u32 %v11828_v23, %v9832_v36  ;;  %v11863_v23 = vld [vmem:[%s12934_s18 + $0x508] sm:$0xf0]  ;;  %v10058_v36 = vld [vmem:[%s12934_s18 + $0x5b8] sm:$0xf] }
 0x353   : > { %v4586_v14 = vpop.f32.mrf.mxu2  ;;  %v4562_v8 = vpop.f32.mrf.mxu0 }
 0x354   : > { %v4587_v13 = vadd.f32 %v4586_v14, %v4574_v61  ;;  %v4575_v16 = vpop.f32.mrf.mxu1  ;;  %v9902_v61 = vld [vmem:[%s12934_s18 + $0x480] sm:$0xf]  ;;  %v9815_v14 = vor.u32 %v11824_v1, %v9814_v62  ;;  %v9995_v8 = vor.u32 %v11869_v11, %v9994_v9  ;;  %v10034_v62 = vld [vmem:[%s12934_s18 + $0x588] sm:$0xf]  ;;  %v11880_v1 = vld [vmem:[%s12934_s18 + $0x590] sm:$0xf0] }
 0x355   : > { %v10083_v16 = vor.u32 %v11892_v48, %v10082_v12  ;;  %v4599_v21 = vpop.f32.mrf.mxu3  ;;  %v10035_v12 = vor.u32 %v11880_v1, %v10034_v62  ;;  %v10186_v62 = vld [vmem:[%s12934_s18 + $0x6b0] sm:$0xf]  ;;  %v11917_v1 = vld [vmem:[%s12934_s18 + $0x6b8] sm:$0xf0] }
 0x356   : > { %v4954_v17 = vrot.slane %v4587_v13, 7  ;;  %v9903_v13 = vor.u32 %v11847_v2, %v9902_v61  ;;  %v11879_v2 = vld [vmem:[%s12934_s18 + $0x58c] sm:$0xf] }
 0x357   : > { %4708 = vmatpush.bf16.xpose.msra.mxu0 %v9879_v45  ;;  %v9818_v45 = vld [vmem:[%s12934_s18 + $0x3d8] sm:$0xf] }
 0x358   : > { %4721 = vmatpush.bf16.xpose.msra.mxu1 %v9883_v46  ;;  %v13871_v25 = vsel %vm2726_vm0, %v13820_v37, %v4954_v17  ;;  %v9830_v37 = vld [vmem:[%s12934_s18 + $0x3f0] sm:$0xf]  ;;  %v11826_v46 = vld [vmem:[%s12934_s18 + $0x3e0] sm:$0xf0] }
 0x359   : > { %4734 = vmatpush.bf16.xpose.msra.mxu2 %v9887_v49  ;;  %4747 = vmatpush.bf16.xpose.msra.mxu3 %v9975_v50  ;;  %v9831_v41 = vor.u32 %v11829_v19, %v9830_v37  ;;  %v11825_v49 = vld [vmem:[%s12934_s18 + $0x3dc] sm:$0xf]  ;;  %v9820_v50 = vld [vmem:[%s12934_s18 + $0x3e4] sm:$0xf0]  ;;  %v9819_v53 = vor.u32 %v11826_v46, %v9818_v45  ;;  %v9970_v19 = vld [vmem:[%s12934_s18 + $0x500] sm:$0xf] }
 0x35a   : > { %v9823_v54 = vor.u32 %v11825_v49, %v9820_v50  ;;  %v9964_v37 = vld [vmem:[%s12934_s18 + $0x504] sm:$0xf0]  ;;  %v9952_v45 = vld [vmem:[%s12934_s18 + $0x4ec] sm:$0xf0]  ;;  %v11860_v49 = vld [vmem:[%s12934_s18 + $0x4f0] sm:$0xf0] }
 0x35b   : > { %v4588_v32 = vpop.f32.mrf.mxu2  ;;  %v9958_v46 = vld [vmem:[%s12934_s18 + $0x4e8] sm:$0xf]  ;;  %v10046_v50 = vld [vmem:[%s12934_s18 + $0x5a0] sm:$0xf] }
 0x35c   : > { %v10075_v32 = vor.u32 %v11888_v29, %v10072_v30 }
 0x35d   : > { %v4601_v61 = vpop.f32.mrf.mxu3 }
 0x35f   : > { %4709 = vmatpush.bf16.xpose.msra.mxu0 %v9867_v57  ;;  %v9806_v57 = vld [vmem:[%s12934_s18 + $0x3c0] sm:$0xf] }
 0x360   : > { %4722 = vmatpush.bf16.xpose.msra.mxu1 %v9871_v58  ;;  %v11823_v58 = vld [vmem:[%s12934_s18 + $0x3c8] sm:$0xf0] }
 0x361   : > { %4735 = vmatpush.bf16.xpose.msra.mxu2 %v9875_v59  ;;  %4748 = vmatpush.bf16.xpose.msra.mxu3 %v9963_v60  ;;  %v11822_v59 = vld [vmem:[%s12934_s18 + $0x3c4] sm:$0xf]  ;;  %v9808_v60 = vld [vmem:[%s12934_s18 + $0x3cc] sm:$0xf0]  ;;  %v9807_v10 = vor.u32 %v11823_v58, %v9806_v57  ;;  %v11855_v57 = vld [vmem:[%s12934_s18 + $0x4cc] sm:$0xf] }
 0x362   : > { %v9940_v58 = vld [vmem:[%s12934_s18 + $0x4d4] sm:$0xf0] }
 0x367   : > { %4710 = vmatpush.bf16.xpose.msra.mxu0 %v9855_v47  ;;  %v9811_v47 = vor.u32 %v11822_v59, %v9808_v60  ;;  %v9946_v59 = vld [vmem:[%s12934_s18 + $0x4d0] sm:$0xf]  ;;  %v11857_v60 = vld [vmem:[%s12934_s18 + $0x4d8] sm:$0xf0] }
 0x368   : > { %4723 = vmatpush.bf16.xpose.msra.mxu1 %v9859_v15  ;;  %v11891_v15 = vld [vmem:[%s12934_s18 + $0x5ec] sm:$0xf]  ;;  %v9947_v11 = vor.u32 %v11857_v60, %v9946_v59 }
 0x369   : > { %4736 = vmatpush.bf16.xpose.msra.mxu2 %v9863_v3  ;;  %4749 = vmatpush.bf16.xpose.msra.mxu3 %v9951_v6  ;;  %v10084_v3 = vld [vmem:[%s12934_s18 + $0x5f4] sm:$0xf0]  ;;  %v9991_v6 = vor.u32 %v11867_v4, %v9988_v5  ;;  %v9943_v5 = vor.u32 %v11855_v57, %v9940_v58  ;;  %v11915_v57 = vld [vmem:[%s12934_s18 + $0x6ac] sm:$0xf] }
 0x36a   : > { %v10087_v17 = vor.u32 %v11891_v15, %v10084_v3  ;;  %v10036_v4 = vld [vmem:[%s12934_s18 + $0x594] sm:$0xf0]  ;;  %v11852_v15 = vld [vmem:[%s12934_s18 + $0x4b4] sm:$0xf]  ;;  %v9928_v3 = vld [vmem:[%s12934_s18 + $0x4bc] sm:$0xf0] }
 0x36b   : > { %v10180_v58 = vld [vmem:[%s12934_s18 + $0x6b4] sm:$0xf0] }
 0x36f   : > { %4711 = vmatpush.bf16.xpose.msra.mxu0 %v9843_v40  ;;  %v9979_v40 = vor.u32 %v11864_v20, %v9976_v22  ;;  %v10024_v20 = vld [vmem:[%s12934_s18 + $0x57c] sm:$0xf0]  ;;  %v9931_v22 = vor.u32 %v11852_v15, %v9928_v3  ;;  %v10174_v3 = vld [vmem:[%s12934_s18 + $0x698] sm:$0xf] }
 0x370   : > { %4724 = vmatpush.bf16.xpose.msra.mxu1 %v9847_v31  ;;  %v9983_v31 = vor.u32 %v11866_v26, %v9982_v24  ;;  %v10168_v15 = vld [vmem:[%s12934_s18 + $0x69c] sm:$0xf0] }
 0x371   : > { %4737 = vmatpush.bf16.xpose.msra.mxu2 %v9851_v18  ;;  %4750 = vmatpush.bf16.xpose.msra.mxu3 %v9939_v34  ;;  %v10071_v18 = vor.u32 %v11889_v28, %v10070_v27  ;;  %v11861_v34 = vld [vmem:[%s12934_s18 + $0x4fc] sm:$0xf] }
 0x372   : > { %v9967_v35 = vor.u32 %v11861_v34, %v9964_v37  ;;  %v9922_v34 = vld [vmem:[%s12934_s18 + $0x4a0] sm:$0xf]  ;;  %v11851_v37 = vld [vmem:[%s12934_s18 + $0x4a8] sm:$0xf0] }
 0x377   : > { %4712 = vmatpush.bf16.xpose.msra.mxu0 %v9831_v41  ;;  %v9971_v41 = vor.u32 %v11863_v23, %v9970_v19  ;;  %v10010_v19 = vld [vmem:[%s12934_s18 + $0x558] sm:$0xf]  ;;  %v11874_v23 = vld [vmem:[%s12934_s18 + $0x560] sm:$0xf0] }
 0x378   : > { %4725 = vmatpush.bf16.xpose.msra.mxu1 %v9835_v42  ;;  %v10059_v42 = vor.u32 %v11886_v38, %v10058_v36  ;;  %v11873_v36 = vld [vmem:[%s12934_s18 + $0x55c] sm:$0xf]  ;;  %v10012_v38 = vld [vmem:[%s12934_s18 + $0x564] sm:$0xf0] }
 0x379   : > { %4738 = vmatpush.bf16.xpose.msra.mxu2 %v9839_v43  ;;  %4751 = vmatpush.bf16.xpose.msra.mxu3 %v9927_v44  ;;  %v10063_v43 = vor.u32 %v11885_v39, %v10060_v7  ;;  %v11858_v44 = vld [vmem:[%s12934_s18 + $0x4e4] sm:$0xf] }
 0x37f   : > { %4713 = vmatpush.bf16.xpose.msra.mxu0 %v9819_v53  ;;  %v9955_v53 = vor.u32 %v11858_v44, %v9952_v45  ;;  %v11846_v44 = vld [vmem:[%s12934_s18 + $0x484] sm:$0xf]  ;;  %v9904_v45 = vld [vmem:[%s12934_s18 + $0x48c] sm:$0xf0] }
 0x380   : > { %4726 = vmatpush.bf16.xpose.msra.mxu1 %v9823_v54  ;;  %v9959_v54 = vor.u32 %v11860_v49, %v9958_v46  ;;  %v9910_v46 = vld [vmem:[%s12934_s18 + $0x488] sm:$0xf]  ;;  %v11848_v49 = vld [vmem:[%s12934_s18 + $0x490] sm:$0xf0] }
 0x381   : > { %4739 = vmatpush.bf16.xpose.msra.mxu2 %v9827_v55  ;;  %4752 = vmatpush.bf16.xpose.msra.mxu3 %v9915_v56  ;;  %v10047_v55 = vor.u32 %v11883_v33, %v10046_v50  ;;  %v10051_v56 = vor.u32 %v11882_v51, %v10048_v52  ;;  %v9998_v50 = vld [vmem:[%s12934_s18 + $0x540] sm:$0xf]  ;;  %v11871_v33 = vld [vmem:[%s12934_s18 + $0x548] sm:$0xf0]  ;;  %v10000_v51 = vld [vmem:[%s12934_s18 + $0x54c] sm:$0xf0]  ;;  %v9911_v59 = vor.u32 %v11848_v49, %v9910_v46 }
 0x382   : > { %v10090_v52 = vld [vmem:[%s12934_s18 + $0x5f0] sm:$0xf]  ;;  %v9999_v60 = vor.u32 %v11871_v33, %v9998_v50 }
 0x387   : > { %4714 = vmatpush.bf16.xpose.msra.mxu0 %v9807_v10 }
 0x388   : > { %4727 = vmatpush.bf16.xpose.msra.mxu1 %v9811_v47  ;;  %v10039_v47 = vor.u32 %v11879_v2, %v10036_v4 }
 0x389   : > { %4740 = vmatpush.bf16.xpose.msra.mxu2 %v9815_v14  ;;  %4753 = vmatpush.bf16.xpose.msra.mxu3 %v9903_v13  ;;  %v9934_v13 = vld [vmem:[%s12934_s18 + $0x4b8] sm:$0xf] }
 0x38b   : > { %v4612_v9 = vpop.f32.mrf.mxu0 }
 0x38c   : > { %v4625_v10 = vpop.f32.mrf.mxu1  ;;  %v4613_v48 = vadd.f32 %v4612_v9, %v4599_v21  ;;  %v11870_v21 = vld [vmem:[%s12934_s18 + $0x544] sm:$0xf]  ;;  %v10187_v9 = vor.u32 %v11917_v1, %v10186_v62 }
 0x38d   : > { %v10003_v61 = vor.u32 %v11870_v21, %v10000_v51  ;;  %v10042_v21 = vld [vmem:[%s12934_s18 + $0x590] sm:$0xf]  ;;  %v11881_v51 = vld [vmem:[%s12934_s18 + $0x598] sm:$0xf0] }
 0x38e   : > { %4715 = vmatmul.bf16.vlgmr.msra.gmra.mxu0 %v12716_v0  ;;  %v13946_v14 = vadd.f32 %v4625_v10, %v4613_v48  ;;  %v10078_v10 = vld [vmem:[%s12934_s18 + $0x5d8] sm:$0xf]  ;;  %v11913_v48 = vld [vmem:[%s12934_s18 + $0x698] sm:$0xf0] }
 0x38f   : > { %4759 = vmatpush.bf16.xpose.msrb.mxu0 %v9991_v6  ;;  %4728 = vmatmul.bf16.vlgmr.msra.gmra.mxu1 %v12716_v0  ;;  %v11854_v6 = vld [vmem:[%s12934_s18 + $0x4c0] sm:$0xf0] }
 0x390   : > { %4772 = vmatpush.bf16.xpose.msrb.mxu1 %v9995_v8  ;;  %4741 = vmatmul.bf16.vlgmr.msra.gmra.mxu2 %v12716_v0  ;;  %v10022_v8 = vld [vmem:[%s12934_s18 + $0x570] sm:$0xf]  ;;  %v9935_v27 = vor.u32 %v11854_v6, %v9934_v13  ;;  %v11914_v13 = vld [vmem:[%s12934_s18 + $0x6a0] sm:$0xf0] }
 0x391   : > { %4785 = vmatpush.bf16.xpose.msrb.mxu2 %v10083_v16  ;;  %4798 = vmatpush.bf16.xpose.msrb.mxu3 %v10087_v17  ;;  %v11877_v16 = vld [vmem:[%s12934_s18 + $0x578] sm:$0xf0]  ;;  %v11876_v17 = vld [vmem:[%s12934_s18 + $0x574] sm:$0xf] }
 0x392   : > { %4754 = vmatmul.bf16.vlgmr.msra.gmra.mxu3 %v12716_v0  ;;  %v10023_v28 = vor.u32 %v11877_v16, %v10022_v8 }
 0x393   : > { %v4614_v24 = vpop.f32.mrf.mxu0  ;;  %v4638_v26 = vpop.f32.mrf.mxu2 }
 0x394   : > { %v4627_v29 = vpop.f32.mrf.mxu1  ;;  %v10154_v24 = vld [vmem:[%s12934_s18 + $0x678] sm:$0xf] }
 0x395   : > { %v4651_v30 = vpop.f32.mrf.mxu3  ;;  %v10162_v29 = vld [vmem:[%s12934_s18 + $0x680] sm:$0xf] }
 0x397   : > { %4760 = vmatpush.bf16.xpose.msrb.mxu0 %v9979_v40  ;;  %v10027_v40 = vor.u32 %v11876_v17, %v10024_v20  ;;  %v10175_v17 = vor.u32 %v11914_v13, %v10174_v3  ;;  %v10066_v20 = vld [vmem:[%s12934_s18 + $0x5c0] sm:$0xf] }
 0x398   : > { %4773 = vmatpush.bf16.xpose.msrb.mxu1 %v9983_v31  ;;  %v13956_v31 = vadd.f32 %v4651_v30, %v4638_v26  ;;  %v11910_v26 = vld [vmem:[%s12934_s18 + $0x680] sm:$0xf0]  ;;  %v11911_v30 = vld [vmem:[%s12934_s18 + $0x688] sm:$0xf0] }
 0x399   : > { %4786 = vmatpush.bf16.xpose.msrb.mxu2 %v10071_v18  ;;  %4799 = vmatpush.bf16.xpose.msrb.mxu3 %v10075_v32  ;;  %v11849_v18 = vld [vmem:[%s12934_s18 + $0x49c] sm:$0xf]  ;;  %v9916_v32 = vld [vmem:[%s12934_s18 + $0x4a4] sm:$0xf0] }
 0x39a   : > { %v9919_v39 = vor.u32 %v11849_v18, %v9916_v32  ;;  %v10155_v18 = vor.u32 %v11910_v26, %v10154_v24  ;;  %v11897_v24 = vld [vmem:[%s12934_s18 + $0x61c] sm:$0xf]  ;;  %v10108_v26 = vld [vmem:[%s12934_s18 + $0x624] sm:$0xf0] }
 0x39b   : > { %v4640_v7 = vpop.f32.mrf.mxu2 }
 0x39c   : > { %v10142_v7 = vld [vmem:[%s12934_s18 + $0x660] sm:$0xf] }
 0x39f   : > { %4761 = vmatpush.bf16.xpose.msrb.mxu0 %v9967_v35  ;;  %v9923_v35 = vor.u32 %v11851_v37, %v9922_v34  ;;  %v10163_v34 = vor.u32 %v11911_v30, %v10162_v29 }
 0x3a0   : > { %4774 = vmatpush.bf16.xpose.msrb.mxu1 %v9971_v41  ;;  %v10011_v41 = vor.u32 %v11874_v23, %v10010_v19  ;;  %v10054_v23 = vld [vmem:[%s12934_s18 + $0x5a8] sm:$0xf] }
 0x3a1   : > { %4787 = vmatpush.bf16.xpose.msrb.mxu2 %v10059_v42  ;;  %4800 = vmatpush.bf16.xpose.msrb.mxu3 %v10063_v43  ;;  %v4653_v42 = vpop.f32.mrf.mxu3  ;;  %v10015_v43 = vor.u32 %v11873_v36, %v10012_v38  ;;  %v4955_v36 = vrot.slane %v13946_v14, 6 }
 0x3a2   : > { %v10144_v42 = vld [vmem:[%s12934_s18 + $0x66c] sm:$0xf0] }
 0x3a7   : > { %4762 = vmatpush.bf16.xpose.msrb.mxu0 %v9955_v53  ;;  %v11893_v53 = vld [vmem:[%s12934_s18 + $0x5f8] sm:$0xf0] }
 0x3a8   : > { %4775 = vmatpush.bf16.xpose.msrb.mxu1 %v9959_v54  ;;  %v10178_v54 = vld [vmem:[%s12934_s18 + $0x6a8] sm:$0xf]  ;;  %v10091_v2 = vor.u32 %v11893_v53, %v10090_v52  ;;  %v11904_v53 = vld [vmem:[%s12934_s18 + $0x650] sm:$0xf0] }
 0x3a9   : > { %4788 = vmatpush.bf16.xpose.msrb.mxu2 %v10047_v55  ;;  %4801 = vmatpush.bf16.xpose.msrb.mxu3 %v10051_v56  ;;  %v9907_v55 = vor.u32 %v11846_v44, %v9904_v45  ;;  %v11916_v56 = vld [vmem:[%s12934_s18 + $0x6b0] sm:$0xf0]  ;;  %v10130_v52 = vld [vmem:[%s12934_s18 + $0x648] sm:$0xf] }
 0x3aa   : > { %v10179_v4 = vor.u32 %v11916_v56, %v10178_v54  ;;  %v11908_v44 = vld [vmem:[%s12934_s18 + $0x670] sm:$0xf0]  ;;  %v11903_v54 = vld [vmem:[%s12934_s18 + $0x64c] sm:$0xf]  ;;  %v11905_v56 = vld [vmem:[%s12934_s18 + $0x658] sm:$0xf0] }
 0x3af   : > { %4763 = vmatpush.bf16.xpose.msrb.mxu0 %v9943_v5  ;;  %v10183_v5 = vor.u32 %v11915_v57, %v10180_v58  ;;  %v10043_v57 = vor.u32 %v11881_v51, %v10042_v21  ;;  %v10370_v21 = vld [vmem:[%s12934_s18 + $0x828] sm:$0xf]  ;;  %v11964_v51 = vld [vmem:[%s12934_s18 + $0x830] sm:$0xf0] }
 0x3b0   : > { %4776 = vmatpush.bf16.xpose.msrb.mxu1 %v9947_v11  ;;  %v11890_v11 = vld [vmem:[%s12934_s18 + $0x5e0] sm:$0xf0] }
 0x3b1   : > { %4789 = vmatpush.bf16.xpose.msrb.mxu2 %v10035_v12  ;;  %4802 = vmatpush.bf16.xpose.msrb.mxu3 %v10039_v47  ;;  %v10166_v12 = vld [vmem:[%s12934_s18 + $0x690] sm:$0xf]  ;;  %v11912_v47 = vld [vmem:[%s12934_s18 + $0x694] sm:$0xf]  ;;  %v10079_v6 = vor.u32 %v11890_v11, %v10078_v10  ;;  %v10120_v11 = vld [vmem:[%s12934_s18 + $0x63c] sm:$0xf0] }
 0x3b2   : > { %v10167_v8 = vor.u32 %v11913_v48, %v10166_v12  ;;  %v10171_v16 = vor.u32 %v11912_v47, %v10168_v15  ;;  %v11900_v10 = vld [vmem:[%s12934_s18 + $0x634] sm:$0xf]  ;;  %v10126_v12 = vld [vmem:[%s12934_s18 + $0x638] sm:$0xf]  ;;  %v11902_v48 = vld [vmem:[%s12934_s18 + $0x640] sm:$0xf0] }
 0x3b3   : > { %v10123_v13 = vor.u32 %v11900_v10, %v10120_v11  ;;  %v10250_v10 = vld [vmem:[%s12934_s18 + $0x738] sm:$0xf]  ;;  %v11934_v11 = vld [vmem:[%s12934_s18 + $0x740] sm:$0xf0] }
 0x3b7   : > { %4764 = vmatpush.bf16.xpose.msrb.mxu0 %v9931_v22  ;;  %v11887_v22 = vld [vmem:[%s12934_s18 + $0x5c8] sm:$0xf0] }
 0x3b8   : > { %4777 = vmatpush.bf16.xpose.msrb.mxu1 %v9935_v27  ;;  %v11909_v27 = vld [vmem:[%s12934_s18 + $0x67c] sm:$0xf] }
 0x3b9   : > { %4790 = vmatpush.bf16.xpose.msrb.mxu2 %v10023_v28  ;;  %4803 = vmatpush.bf16.xpose.msrb.mxu3 %v10027_v40  ;;  %v10156_v28 = vld [vmem:[%s12934_s18 + $0x684] sm:$0xf0]  ;;  %v10067_v40 = vor.u32 %v11887_v22, %v10066_v20  ;;  %v10106_v20 = vld [vmem:[%s12934_s18 + $0x618] sm:$0xf]  ;;  %v11898_v22 = vld [vmem:[%s12934_s18 + $0x620] sm:$0xf0] }
 0x3ba   : > { %v10159_v32 = vor.u32 %v11909_v27, %v10156_v28  ;;  %v10114_v27 = vld [vmem:[%s12934_s18 + $0x620] sm:$0xf]  ;;  %v11899_v28 = vld [vmem:[%s12934_s18 + $0x628] sm:$0xf0] }
 0x3bf   : > { %4765 = vmatpush.bf16.xpose.msrb.mxu0 %v9919_v39  ;;  %v11884_v39 = vld [vmem:[%s12934_s18 + $0x5b0] sm:$0xf0] }
 0x3c0   : > { %4778 = vmatpush.bf16.xpose.msrb.mxu1 %v9923_v35  ;;  %v11907_v35 = vld [vmem:[%s12934_s18 + $0x668] sm:$0xf0]  ;;  %v10055_v45 = vor.u32 %v11884_v39, %v10054_v23  ;;  %v10094_v23 = vld [vmem:[%s12934_s18 + $0x600] sm:$0xf]  ;;  %v10096_v39 = vld [vmem:[%s12934_s18 + $0x60c] sm:$0xf0] }
 0x3c1   : > { %4791 = vmatpush.bf16.xpose.msrb.mxu2 %v10011_v41  ;;  %4804 = vmatpush.bf16.xpose.msrb.mxu3 %v10015_v43  ;;  %v11906_v41 = vld [vmem:[%s12934_s18 + $0x664] sm:$0xf]  ;;  %v10143_v46 = vor.u32 %v11907_v35, %v10142_v7  ;;  %v10102_v7 = vld [vmem:[%s12934_s18 + $0x608] sm:$0xf]  ;;  %v11896_v35 = vld [vmem:[%s12934_s18 + $0x610] sm:$0xf0] }
 0x3c2   : > { %v10147_v49 = vor.u32 %v11906_v41, %v10144_v42  ;;  %v10274_v41 = vld [vmem:[%s12934_s18 + $0x768] sm:$0xf]  ;;  %v11940_v42 = vld [vmem:[%s12934_s18 + $0x770] sm:$0xf0] }
 0x3c7   : > { %4766 = vmatpush.bf16.xpose.msrb.mxu0 %v9907_v55  ;;  %v10138_v55 = vld [vmem:[%s12934_s18 + $0x650] sm:$0xf] }
 0x3c8   : > { %4779 = vmatpush.bf16.xpose.msrb.mxu1 %v9911_v59  ;;  %v10131_v59 = vor.u32 %v11904_v53, %v10130_v52  ;;  %v10139_v62 = vor.u32 %v11905_v56, %v10138_v55  ;;  %v10103_v52 = vor.u32 %v11896_v35, %v10102_v7  ;;  %v10275_v53 = vor.u32 %v11940_v42, %v10274_v41  ;;  %v10262_v56 = vld [vmem:[%s12934_s18 + $0x750] sm:$0xf] }
 0x3c9   : > { %4792 = vmatpush.bf16.xpose.msrb.mxu2 %v9999_v60  ;;  %4805 = vmatpush.bf16.xpose.msrb.mxu3 %v10003_v61  ;;  %v10371_v55 = vor.u32 %v11964_v51, %v10370_v21 }
 0x3cb   : > { %v4664_v37 = vpop.f32.mrf.mxu0 }
 0x3cc   : > { %v4665_v19 = vadd.f32 %v4664_v37, %v13956_v31  ;;  %v10150_v31 = vld [vmem:[%s12934_s18 + $0x668] sm:$0xf]  ;;  %v4677_v58 = vpop.f32.mrf.mxu1 }
 0x3cd   : > { %v10151_v50 = vor.u32 %v11908_v44, %v10150_v31  ;;  %v10006_v37 = vld [vmem:[%s12934_s18 + $0x548] sm:$0xf]  ;;  %v10276_v44 = vld [vmem:[%s12934_s18 + $0x774] sm:$0xf0] }
 0x3ce   : > { %4767 = vmatmul.bf16.vlgmr.msrb.gmra.mxu0 %v12716_v0  ;;  %v4956_v38 = vrot.slane %v4665_v19, 5  ;;  %v11872_v19 = vld [vmem:[%s12934_s18 + $0x550] sm:$0xf0] }
 0x3cf   : > { %4811 = vmatpush.bf16.xpose.msra.mxu0 %v10091_v2  ;;  %4780 = vmatmul.bf16.vlgmr.msrb.gmra.mxu1 %v12716_v0  ;;  %v10030_v2 = vld [vmem:[%s12934_s18 + $0x578] sm:$0xf]  ;;  %v10007_v31 = vor.u32 %v11872_v19, %v10006_v37 }
 0x3d0   : > { %4824 = vmatpush.bf16.xpose.msra.mxu1 %v10179_v4  ;;  %4793 = vmatmul.bf16.vlgmr.msrb.gmra.mxu2 %v12716_v0  ;;  %v4964_v43 = vsel %vm2728_vm1, %v4955_v36, %v4956_v38  ;;  %v11878_v4 = vld [vmem:[%s12934_s18 + $0x580] sm:$0xf0]  ;;  %v11895_v36 = vld [vmem:[%s12934_s18 + $0x608] sm:$0xf0] }
 0x3d1   : > { %4837 = vmatpush.bf16.xpose.msra.mxu2 %v10183_v5  ;;  %4850 = vmatpush.bf16.xpose.msra.mxu3 %v10187_v9  ;;  %v14015_v14 = vsel %vm2730_vm2, %v13871_v25, %v4964_v43  ;;  %v10132_v25 = vld [vmem:[%s12934_s18 + $0x654] sm:$0xf0]  ;;  %v10118_v5 = vld [vmem:[%s12934_s18 + $0x630] sm:$0xf]  ;;  %v11901_v9 = vld [vmem:[%s12934_s18 + $0x638] sm:$0xf0]  ;;  %v10031_v47 = vor.u32 %v11878_v4, %v10030_v2 }
 0x3d2   : > { %4806 = vmatmul.bf16.vlgmr.msrb.gmra.mxu3 %v12716_v0  ;;  %v10135_v60 = vor.u32 %v11903_v54, %v10132_v25  ;;  %v10119_v3 = vor.u32 %v11901_v9, %v10118_v5  ;;  %v11894_v38 = vld [vmem:[%s12934_s18 + $0x604] sm:$0xf]  ;;  %v11939_v43 = vld [vmem:[%s12934_s18 + $0x76c] sm:$0xf] }
 0x3d3   : > { %v4666_v33 = vpop.f32.mrf.mxu0  ;;  %v4690_v1 = vpop.f32.mrf.mxu2  ;;  %v10279_v54 = vor.u32 %v11939_v43, %v10276_v44  ;;  %v10226_v43 = vld [vmem:[%s12934_s18 + $0x708] sm:$0xf]  ;;  %v11927_v44 = vld [vmem:[%s12934_s18 + $0x70c] sm:$0xf] }
 0x3d4   : > { %v4691_v61 = vadd.f32 %v4690_v1, %v4677_v58  ;;  %v4679_v15 = vpop.f32.mrf.mxu1  ;;  %v10099_v33 = vor.u32 %v11894_v38, %v10096_v39  ;;  %v11936_v58 = vld [vmem:[%s12934_s18 + $0x754] sm:$0xf]  ;;  %v10358_v1 = vld [vmem:[%s12934_s18 + $0x810] sm:$0xf] }
 0x3d5   : > { %v4703_v30 = vpop.f32.mrf.mxu3  ;;  %v11935_v15 = vld [vmem:[%s12934_s18 + $0x748] sm:$0xf0] }
 0x3d7   : > { %4812 = vmatpush.bf16.xpose.msra.mxu0 %v10079_v6  ;;  %v10127_v6 = vor.u32 %v11902_v48, %v10126_v12  ;;  %v11933_v12 = vld [vmem:[%s12934_s18 + $0x73c] sm:$0xf]  ;;  %v10252_v48 = vld [vmem:[%s12934_s18 + $0x744] sm:$0xf0] }
 0x3d8   : > { %4825 = vmatpush.bf16.xpose.msra.mxu1 %v10167_v8 }
 0x3d9   : > { %4838 = vmatpush.bf16.xpose.msra.mxu2 %v10171_v16  ;;  %4851 = vmatpush.bf16.xpose.msra.mxu3 %v10175_v17  ;;  %v10018_v16 = vld [vmem:[%s12934_s18 + $0x560] sm:$0xf]  ;;  %v11875_v17 = vld [vmem:[%s12934_s18 + $0x568] sm:$0xf0] }
 0x3da   : > { %v10019_v29 = vor.u32 %v11875_v17, %v10018_v16 }
 0x3db   : > { %v4692_v8 = vpop.f32.mrf.mxu2 }
 0x3dc   : > { %v10255_v8 = vor.u32 %v11933_v12, %v10252_v48  ;;  %v10210_v12 = vld [vmem:[%s12934_s18 + $0x6e0] sm:$0xf]  ;;  %v11923_v48 = vld [vmem:[%s12934_s18 + $0x6e8] sm:$0xf0] }
 0x3df   : > { %4813 = vmatpush.bf16.xpose.msra.mxu0 %v10067_v40  ;;  %v10107_v40 = vor.u32 %v11898_v22, %v10106_v20 }
 0x3e0   : > { %4826 = vmatpush.bf16.xpose.msra.mxu1 %v10155_v18  ;;  %v10111_v18 = vor.u32 %v11897_v24, %v10108_v26  ;;  %v10238_v26 = vld [vmem:[%s12934_s18 + $0x720] sm:$0xf] }
 0x3e1   : > { %4839 = vmatpush.bf16.xpose.msra.mxu2 %v10159_v32  ;;  %4852 = vmatpush.bf16.xpose.msra.mxu3 %v10163_v34  ;;  %v14041_v32 = vadd.f32 %v4703_v30, %v4691_v61  ;;  %v10115_v34 = vor.u32 %v11899_v28, %v10114_v27  ;;  %v11961_v61 = vld [vmem:[%s12934_s18 + $0x818] sm:$0xf0]  ;;  %v11931_v27 = vld [vmem:[%s12934_s18 + $0x728] sm:$0xf0]  ;;  %v11930_v28 = vld [vmem:[%s12934_s18 + $0x724] sm:$0xf] }
 0x3e2   : > { %v10359_v9 = vor.u32 %v11961_v61, %v10358_v1  ;;  %v10246_v30 = vld [vmem:[%s12934_s18 + $0x728] sm:$0xf]  ;;  %v10239_v37 = vor.u32 %v11931_v27, %v10238_v26  ;;  %v11920_v26 = vld [vmem:[%s12934_s18 + $0x6d0] sm:$0xf0]  ;;  %v10286_v27 = vld [vmem:[%s12934_s18 + $0x780] sm:$0xf] }
 0x3e3   : > { %v4957_v41 = vrot.slane %v14041_v32, 4  ;;  %v10322_v32 = vld [vmem:[%s12934_s18 + $0x7c8] sm:$0xf] }
 0x3e7   : > { %4814 = vmatpush.bf16.xpose.msra.mxu0 %v10055_v45  ;;  %v10282_v45 = vld [vmem:[%s12934_s18 + $0x770] sm:$0xf] }
 0x3e8   : > { %4827 = vmatpush.bf16.xpose.msra.mxu1 %v10143_v46  ;;  %v11941_v46 = vld [vmem:[%s12934_s18 + $0x778] sm:$0xf0] }
 0x3e9   : > { %4840 = vmatpush.bf16.xpose.msra.mxu2 %v10147_v49  ;;  %4853 = vmatpush.bf16.xpose.msra.mxu3 %v10151_v50  ;;  %v4705_v49 = vpop.f32.mrf.mxu3  ;;  %v10095_v50 = vor.u32 %v11895_v36, %v10094_v23  ;;  %v10283_v25 = vor.u32 %v11941_v46, %v10282_v45  ;;  %v10228_v46 = vld [vmem:[%s12934_s18 + $0x714] sm:$0xf0] }
 0x3ea   : > { %v10234_v49 = vld [vmem:[%s12934_s18 + $0x710] sm:$0xf]  ;;  %v10231_v51 = vor.u32 %v11927_v44, %v10228_v46  ;;  %v10360_v44 = vld [vmem:[%s12934_s18 + $0x81c] sm:$0xf0]  ;;  %v10366_v46 = vld [vmem:[%s12934_s18 + $0x818] sm:$0xf] }
 0x3ef   : > { %4815 = vmatpush.bf16.xpose.msra.mxu0 %v10043_v57  ;;  %v11937_v57 = vld [vmem:[%s12934_s18 + $0x758] sm:$0xf0] }
 0x3f0   : > { %4828 = vmatpush.bf16.xpose.msra.mxu1 %v10131_v59  ;;  %v10264_v59 = vld [vmem:[%s12934_s18 + $0x75c] sm:$0xf0]  ;;  %v10263_v2 = vor.u32 %v11937_v57, %v10262_v56  ;;  %v11924_v56 = vld [vmem:[%s12934_s18 + $0x6f4] sm:$0xf] }
 0x3f1   : > { %4841 = vmatpush.bf16.xpose.msra.mxu2 %v10135_v60  ;;  %4854 = vmatpush.bf16.xpose.msra.mxu3 %v10139_v62  ;;  %v10270_v60 = vld [vmem:[%s12934_s18 + $0x758] sm:$0xf]  ;;  %v11938_v62 = vld [vmem:[%s12934_s18 + $0x760] sm:$0xf0]  ;;  %v10267_v4 = vor.u32 %v11936_v58, %v10264_v59  ;;  %v10216_v57 = vld [vmem:[%s12934_s18 + $0x6fc] sm:$0xf0] }
 0x3f2   : > { %v10271_v5 = vor.u32 %v11938_v62, %v10270_v60  ;;  %v10222_v58 = vld [vmem:[%s12934_s18 + $0x6f8] sm:$0xf]  ;;  %v11926_v59 = vld [vmem:[%s12934_s18 + $0x700] sm:$0xf0]  ;;  %v10310_v60 = vld [vmem:[%s12934_s18 + $0x7b0] sm:$0xf]  ;;  %v10219_v61 = vor.u32 %v11924_v56, %v10216_v57 }
 0x3f3   : > { %v11949_v62 = vld [vmem:[%s12934_s18 + $0x7b8] sm:$0xf0]  ;;  %v10354_v56 = vld [vmem:[%s12934_s18 + $0x800] sm:$0xf]  ;;  %v11959_v57 = vld [vmem:[%s12934_s18 + $0x808] sm:$0xf0] }
 0x3f7   : > { %4816 = vmatpush.bf16.xpose.msra.mxu0 %v10031_v47  ;;  %v10258_v47 = vld [vmem:[%s12934_s18 + $0x740] sm:$0xf] }
 0x3f8   : > { %4829 = vmatpush.bf16.xpose.msra.mxu1 %v10119_v3  ;;  %v10346_v3 = vld [vmem:[%s12934_s18 + $0x7f8] sm:$0xf]  ;;  %v10259_v16 = vor.u32 %v11935_v15, %v10258_v47  ;;  %v11946_v15 = vld [vmem:[%s12934_s18 + $0x7a0] sm:$0xf0] }
 0x3f9   : > { %4842 = vmatpush.bf16.xpose.msra.mxu2 %v10123_v13  ;;  %4855 = vmatpush.bf16.xpose.msra.mxu3 %v10127_v6  ;;  %v11958_v13 = vld [vmem:[%s12934_s18 + $0x800] sm:$0xf0]  ;;  %v10251_v6 = vor.u32 %v11934_v11, %v10250_v10  ;;  %v11921_v10 = vld [vmem:[%s12934_s18 + $0x6dc] sm:$0xf]  ;;  %v10204_v11 = vld [vmem:[%s12934_s18 + $0x6e4] sm:$0xf0] }
 0x3fa   : > { %v10347_v17 = vor.u32 %v11958_v13, %v10346_v3  ;;  %v10298_v47 = vld [vmem:[%s12934_s18 + $0x798] sm:$0xf]  ;;  %v10207_v13 = vor.u32 %v11921_v10, %v10204_v11  ;;  %v10342_v10 = vld [vmem:[%s12934_s18 + $0x7e8] sm:$0xf]  ;;  %v11956_v11 = vld [vmem:[%s12934_s18 + $0x7f0] sm:$0xf0] }
 0x3ff   : > { %4817 = vmatpush.bf16.xpose.msra.mxu0 %v10019_v29  ;;  %v10240_v29 = vld [vmem:[%s12934_s18 + $0x72c] sm:$0xf0] }
 0x400   : > { %4830 = vmatpush.bf16.xpose.msra.mxu1 %v10107_v40  ;;  %v11932_v40 = vld [vmem:[%s12934_s18 + $0x730] sm:$0xf0]  ;;  %v10243_v23 = vor.u32 %v11930_v28, %v10240_v29  ;;  %v11943_v28 = vld [vmem:[%s12934_s18 + $0x788] sm:$0xf0] }
 0x401   : > { %4843 = vmatpush.bf16.xpose.msra.mxu2 %v10111_v18  ;;  %4856 = vmatpush.bf16.xpose.msra.mxu3 %v10115_v34  ;;  %v10334_v18 = vld [vmem:[%s12934_s18 + $0x7e0] sm:$0xf]  ;;  %v11955_v34 = vld [vmem:[%s12934_s18 + $0x7e8] sm:$0xf0]  ;;  %v10247_v36 = vor.u32 %v11932_v40, %v10246_v30  ;;  %v10372_v30 = vld [vmem:[%s12934_s18 + $0x834] sm:$0xf0] }
 0x402   : > { %v10335_v39 = vor.u32 %v11955_v34, %v10334_v18  ;;  %v11963_v29 = vld [vmem:[%s12934_s18 + $0x82c] sm:$0xf]  ;;  %v10378_v40 = vld [vmem:[%s12934_s18 + $0x830] sm:$0xf]  ;;  %v11965_v34 = vld [vmem:[%s12934_s18 + $0x838] sm:$0xf0] }
 0x407   : > { %4818 = vmatpush.bf16.xpose.msra.mxu0 %v10007_v31  ;;  %v11928_v31 = vld [vmem:[%s12934_s18 + $0x710] sm:$0xf0] }
 0x408   : > { %4831 = vmatpush.bf16.xpose.msra.mxu1 %v10095_v50  ;;  %v11929_v50 = vld [vmem:[%s12934_s18 + $0x718] sm:$0xf0]  ;;  %v10227_v21 = vor.u32 %v11928_v31, %v10226_v43  ;;  %v11960_v31 = vld [vmem:[%s12934_s18 + $0x814] sm:$0xf] }
 0x409   : > { %4844 = vmatpush.bf16.xpose.msra.mxu2 %v10099_v33  ;;  %4857 = vmatpush.bf16.xpose.msra.mxu3 %v10103_v52  ;;  %v11952_v33 = vld [vmem:[%s12934_s18 + $0x7d0] sm:$0xf0]  ;;  %v10235_v52 = vor.u32 %v11929_v50, %v10234_v49  ;;  %v11962_v49 = vld [vmem:[%s12934_s18 + $0x820] sm:$0xf0]  ;;  %v10454_v50 = vld [vmem:[%s12940_s22 + $0x90] sm:$0xf] }
 0x40b   : > { %v4716_v20 = vpop.f32.mrf.mxu0 }
 0x40c   : > { %v4729_v22 = vpop.f32.mrf.mxu1 }
 0x40d   : > { %v4730_v24 = vadd.f32 %v4729_v22, %v4716_v20  ;;  %v11918_v20 = vld [vmem:[%s12934_s18 + $0x6c4] sm:$0xf]  ;;  %v10192_v22 = vld [vmem:[%s12934_s18 + $0x6cc] sm:$0xf0] }
 0x40e   : > { %4819 = vmatmul.bf16.vlgmr.msra.gmra.mxu0 %v12716_v0 }
 0x40f   : > { %4863 = vmatpush.bf16.xpose.msrb.mxu0 %v10275_v53  ;;  %4832 = vmatmul.bf16.vlgmr.msra.gmra.mxu1 %v12716_v0 }
 0x410   : > { %4876 = vmatpush.bf16.xpose.msrb.mxu1 %v10279_v54  ;;  %4845 = vmatmul.bf16.vlgmr.msra.gmra.mxu2 %v12716_v0  ;;  %v10323_v54 = vor.u32 %v11952_v33, %v10322_v32  ;;  %v11985_v32 = vld [vmem:[%s12940_s22 + $0x98] sm:$0xf0]  ;;  %v11984_v33 = vld [vmem:[%s12940_s22 + $0x94] sm:$0xf] }
 0x411   : > { %4889 = vmatpush.bf16.xpose.msrb.mxu2 %v10283_v25  ;;  %4902 = vmatpush.bf16.xpose.msrb.mxu3 %v10371_v55  ;;  %v10214_v25 = vld [vmem:[%s12934_s18 + $0x6f0] sm:$0xf]  ;;  %v11925_v55 = vld [vmem:[%s12934_s18 + $0x6f8] sm:$0xf0] }
 0x412   : > { %4858 = vmatmul.bf16.vlgmr.msra.gmra.mxu3 %v12716_v0  ;;  %v10215_v1 = vor.u32 %v11925_v55, %v10214_v25  ;;  %v11957_v25 = vld [vmem:[%s12934_s18 + $0x7fc] sm:$0xf]  ;;  %v10348_v55 = vld [vmem:[%s12934_s18 + $0x804] sm:$0xf0] }
 0x413   : > { %v4742_v19 = vpop.f32.mrf.mxu2  ;;  %v4718_v7 = vpop.f32.mrf.mxu0 }
 0x414   : > { %v4743_v38 = vadd.f32 %v4742_v19, %v4730_v24  ;;  %v4731_v35 = vpop.f32.mrf.mxu1  ;;  %v10198_v24 = vld [vmem:[%s12934_s18 + $0x6c8] sm:$0xf]  ;;  %v11988_v19 = vld [vmem:[%s12940_s22 + $0xb0] sm:$0xf0]  ;;  %v10287_v7 = vor.u32 %v11943_v28, %v10286_v27 }
 0x415   : > { %v10375_v35 = vor.u32 %v11963_v29, %v10372_v30  ;;  %v11976_v27 = vld [vmem:[%s12940_s22 + $0x50] sm:$0xf0]  ;;  %v11975_v29 = vld [vmem:[%s12940_s22 + $0x4c] sm:$0xf]  ;;  %v10420_v30 = vld [vmem:[%s12940_s22 + $0x54] sm:$0xf0] }
 0x416   : > { %v4958_v42 = vrot.slane %v4743_v38, 3  ;;  %v11987_v38 = vld [vmem:[%s12940_s22 + $0xac] sm:$0xf] }
 0x417   : > { %4864 = vmatpush.bf16.xpose.msrb.mxu0 %v10263_v2  ;;  %v10223_v2 = vor.u32 %v11926_v59, %v10222_v58  ;;  %v10442_v58 = vld [vmem:[%s12940_s22 + $0x78] sm:$0xf]  ;;  %v11982_v59 = vld [vmem:[%s12940_s22 + $0x80] sm:$0xf0] }
 0x418   : > { %4877 = vmatpush.bf16.xpose.msrb.mxu1 %v10267_v4  ;;  %v14092_v45 = vsel %vm2732_vm3, %v4957_v41, %v4958_v42  ;;  %v10311_v4 = vor.u32 %v11949_v62, %v10310_v60  ;;  %v10379_v41 = vor.u32 %v11965_v34, %v10378_v40  ;;  %v11981_v60 = vld [vmem:[%s12940_s22 + $0x7c] sm:$0xf]  ;;  %v10444_v62 = vld [vmem:[%s12940_s22 + $0x84] sm:$0xf0] }
 0x419   : > { %4890 = vmatpush.bf16.xpose.msrb.mxu2 %v10271_v5  ;;  %4903 = vmatpush.bf16.xpose.msrb.mxu3 %v10359_v9  ;;  %v10202_v5 = vld [vmem:[%s12934_s18 + $0x6d8] sm:$0xf]  ;;  %v11922_v9 = vld [vmem:[%s12934_s18 + $0x6e0] sm:$0xf0] }
 0x41a   : > { %v10203_v3 = vor.u32 %v11922_v9, %v10202_v5  ;;  %v11954_v5 = vld [vmem:[%s12934_s18 + $0x7e4] sm:$0xf]  ;;  %v10336_v9 = vld [vmem:[%s12934_s18 + $0x7ec] sm:$0xf0] }
 0x41b   : > { %v4744_v53 = vpop.f32.mrf.mxu2 }
 0x41c   : > { %v10455_v53 = vor.u32 %v11985_v32, %v10454_v50 }
 0x41f   : > { %4865 = vmatpush.bf16.xpose.msrb.mxu0 %v10251_v6  ;;  %v10211_v6 = vor.u32 %v11923_v48, %v10210_v12  ;;  %v10430_v12 = vld [vmem:[%s12940_s22 + $0x60] sm:$0xf]  ;;  %v11979_v48 = vld [vmem:[%s12940_s22 + $0x68] sm:$0xf0] }
 0x420   : > { %4878 = vmatpush.bf16.xpose.msrb.mxu1 %v10255_v8  ;;  %v10299_v8 = vor.u32 %v11946_v15, %v10298_v47  ;;  %v14157_v47 = vpop.f32.mrf.mxu3  ;;  %v11978_v15 = vld [vmem:[%s12940_s22 + $0x64] sm:$0xf] }
 0x421   : > { %4891 = vmatpush.bf16.xpose.msrb.mxu2 %v10259_v16  ;;  %4904 = vmatpush.bf16.xpose.msrb.mxu3 %v10347_v17  ;;  %v10190_v16 = vld [vmem:[%s12934_s18 + $0x6c0] sm:$0xf]  ;;  %v11919_v17 = vld [vmem:[%s12934_s18 + $0x6c8] sm:$0xf0] }
 0x422   : > { %v10191_v18 = vor.u32 %v11919_v17, %v10190_v16  ;;  %v11951_v17 = vld [vmem:[%s12934_s18 + $0x7cc] sm:$0xf] }
 0x427   : > { %4866 = vmatpush.bf16.xpose.msrb.mxu0 %v10239_v37  ;;  %v10466_v37 = vld [vmem:[%s12940_s22 + $0xa8] sm:$0xf] }
 0x428   : > { %4879 = vmatpush.bf16.xpose.msrb.mxu1 %v10243_v23  ;;  %v10195_v23 = vor.u32 %v11918_v20, %v10192_v22  ;;  %v10467_v42 = vor.u32 %v11988_v19, %v10466_v37  ;;  %v10324_v20 = vld [vmem:[%s12934_s18 + $0x7d4] sm:$0xf0]  ;;  %v10330_v22 = vld [vmem:[%s12934_s18 + $0x7d0] sm:$0xf]  ;;  %v4757_v28 = vpop.f32.mrf.mxu3  ;;  %v10423_v19 = vor.u32 %v11975_v29, %v10420_v30 }
 0x429   : > { %4892 = vmatpush.bf16.xpose.msrb.mxu2 %v10247_v36  ;;  %4905 = vmatpush.bf16.xpose.msrb.mxu3 %v10335_v39  ;;  %v10199_v36 = vor.u32 %v11920_v26, %v10198_v24  ;;  %v10468_v39 = vld [vmem:[%s12940_s22 + $0xb4] sm:$0xf0]  ;;  %v11953_v24 = vld [vmem:[%s12934_s18 + $0x7d8] sm:$0xf0]  ;;  %v10418_v26 = vld [vmem:[%s12940_s22 + $0x48] sm:$0xf]  ;;  %v10327_v40 = vor.u32 %v11951_v17, %v10324_v20 }
 0x42a   : > { %v10471_v43 = vor.u32 %v11987_v38, %v10468_v39  ;;  %v10331_v34 = vor.u32 %v11953_v24, %v10330_v22  ;;  %v10419_v37 = vor.u32 %v11976_v27, %v10418_v26  ;;  %v10312_v38 = vld [vmem:[%s12934_s18 + $0x7bc] sm:$0xf0]  ;;  %v10318_v39 = vld [vmem:[%s12934_s18 + $0x7b8] sm:$0xf]  ;;  %v10570_v24 = vld [vmem:[%s12940_s22 + $0x170] sm:$0xf] }
 0x42b   : > { %v10564_v17 = vld [vmem:[%s12940_s22 + $0x174] sm:$0xf0]  ;;  %v12013_v26 = vld [vmem:[%s12940_s22 + $0x178] sm:$0xf0] }
 0x42f   : > { %4867 = vmatpush.bf16.xpose.msrb.mxu0 %v10227_v21  ;;  %v10456_v21 = vld [vmem:[%s12940_s22 + $0x9c] sm:$0xf0] }
 0x430   : > { %4880 = vmatpush.bf16.xpose.msrb.mxu1 %v10231_v51  ;;  %v10363_v51 = vor.u32 %v11960_v31, %v10360_v44 }
 0x431   : > { %4893 = vmatpush.bf16.xpose.msrb.mxu2 %v10235_v52  ;;  %4906 = vmatpush.bf16.xpose.msrb.mxu3 %v10323_v54  ;;  %v10367_v52 = vor.u32 %v11962_v49, %v10366_v46  ;;  %v10459_v54 = vor.u32 %v11984_v33, %v10456_v21 }
 0x437   : > { %4868 = vmatpush.bf16.xpose.msrb.mxu0 %v10215_v1  ;;  %v10351_v1 = vor.u32 %v11957_v25, %v10348_v55  ;;  %v10394_v25 = vld [vmem:[%s12940_s22 + $0x18] sm:$0xf]  ;;  %v11970_v55 = vld [vmem:[%s12940_s22 + $0x20] sm:$0xf0] }
 0x438   : > { %4881 = vmatpush.bf16.xpose.msrb.mxu1 %v10219_v61  ;;  %v10355_v61 = vor.u32 %v11959_v57, %v10354_v56  ;;  %v11969_v56 = vld [vmem:[%s12940_s22 + $0x1c] sm:$0xf]  ;;  %v10396_v57 = vld [vmem:[%s12940_s22 + $0x24] sm:$0xf0] }
 0x439   : > { %4894 = vmatpush.bf16.xpose.msrb.mxu2 %v10223_v2  ;;  %4907 = vmatpush.bf16.xpose.msrb.mxu3 %v10311_v4  ;;  %v10443_v2 = vor.u32 %v11982_v59, %v10442_v58  ;;  %v10447_v4 = vor.u32 %v11981_v60, %v10444_v62  ;;  %v10395_v62 = vor.u32 %v11970_v55, %v10394_v25  ;;  %v12007_v25 = vld [vmem:[%s12940_s22 + $0x148] sm:$0xf0] }
 0x43f   : > { %4869 = vmatpush.bf16.xpose.msrb.mxu0 %v10203_v3  ;;  %v10432_v3 = vld [vmem:[%s12940_s22 + $0x6c] sm:$0xf0] }
 0x440   : > { %4882 = vmatpush.bf16.xpose.msrb.mxu1 %v10207_v13  ;;  %v10339_v13 = vor.u32 %v11954_v5, %v10336_v9  ;;  %v10435_v16 = vor.u32 %v11978_v15, %v10432_v3  ;;  %v10294_v5 = vld [vmem:[%s12934_s18 + $0x788] sm:$0xf]  ;;  %v11944_v9 = vld [vmem:[%s12934_s18 + $0x790] sm:$0xf0]  ;;  %v10474_v15 = vld [vmem:[%s12940_s22 + $0xb0] sm:$0xf] }
 0x441   : > { %4895 = vmatpush.bf16.xpose.msrb.mxu2 %v10211_v6  ;;  %4908 = vmatpush.bf16.xpose.msrb.mxu3 %v10299_v8  ;;  %v10343_v6 = vor.u32 %v11956_v11, %v10342_v10  ;;  %v10431_v8 = vor.u32 %v11979_v48, %v10430_v12  ;;  %v10382_v10 = vld [vmem:[%s12940_s22] sm:$0xf]  ;;  %v11967_v11 = vld [vmem:[%s12940_s22 + $0x8] sm:$0xf0]  ;;  %v11966_v12 = vld [vmem:[%s12940_s22 + $0x4] sm:$0xf]  ;;  %v10295_v20 = vor.u32 %v11944_v9, %v10294_v5 }
 0x442   : > { %v10384_v48 = vld [vmem:[%s12940_s22 + $0xc] sm:$0xf0]  ;;  %v11989_v3 = vld [vmem:[%s12940_s22 + $0xb8] sm:$0xf0]  ;;  %v10383_v22 = vor.u32 %v11967_v11, %v10382_v10  ;;  %v10534_v9 = vld [vmem:[%s12940_s22 + $0x128] sm:$0xf] }
 0x443   : > { %v10387_v27 = vor.u32 %v11966_v12, %v10384_v48  ;;  %v10475_v28 = vor.u32 %v11989_v3, %v10474_v15  ;;  %v12004_v10 = vld [vmem:[%s12940_s22 + $0x130] sm:$0xf0] }
 0x447   : > { %4870 = vmatpush.bf16.xpose.msrb.mxu0 %v10191_v18 }
 0x448   : > { %4883 = vmatpush.bf16.xpose.msrb.mxu1 %v10195_v23 }
 0x449   : > { %4896 = vmatpush.bf16.xpose.msrb.mxu2 %v10199_v36  ;;  %4909 = vmatpush.bf16.xpose.msrb.mxu3 %v10287_v7  ;;  %v11948_v36 = vld [vmem:[%s12934_s18 + $0x7b4] sm:$0xf]  ;;  %v11950_v7 = vld [vmem:[%s12934_s18 + $0x7c0] sm:$0xf0] }
 0x44a   : > { %v10315_v31 = vor.u32 %v11948_v36, %v10312_v38  ;;  %v10319_v49 = vor.u32 %v11950_v7, %v10318_v39  ;;  %v12009_v36 = vld [vmem:[%s12940_s22 + $0x158] sm:$0xf0]  ;;  %v12008_v38 = vld [vmem:[%s12940_s22 + $0x154] sm:$0xf]  ;;  %v10552_v39 = vld [vmem:[%s12940_s22 + $0x15c] sm:$0xf0] }
 0x44b   : > { %v14169_v18 = vpop.f32.mrf.mxu0  ;;  %v10558_v7 = vld [vmem:[%s12940_s22 + $0x158] sm:$0xf] }
 0x44c   : > { %v14171_v23 = vpop.f32.mrf.mxu1 }
 0x44e   : > { %4871 = vmatmul.bf16.vlgmr.msrb.gmra.mxu0 %v12716_v0 }
 0x44f   : > { %4915 = vmatpush.bf16.xpose.msra.mxu0 %v10375_v35  ;;  %4884 = vmatmul.bf16.vlgmr.msrb.gmra.mxu1 %v12716_v0  ;;  %v10406_v35 = vld [vmem:[%s12940_s22 + $0x30] sm:$0xf] }
 0x450   : > { %4928 = vmatpush.bf16.xpose.msra.mxu1 %v10379_v41  ;;  %4897 = vmatmul.bf16.vlgmr.msrb.gmra.mxu2 %v12716_v0  ;;  %v11973_v41 = vld [vmem:[%s12940_s22 + $0x38] sm:$0xf0] }
 0x451   : > { %6738 = vmatpush.bf16.xpose.msra.mxu2 %v10467_v42  ;;  %6751 = vmatpush.bf16.xpose.msra.mxu3 %v10471_v43  ;;  %v11972_v42 = vld [vmem:[%s12940_s22 + $0x34] sm:$0xf]  ;;  %v10408_v43 = vld [vmem:[%s12940_s22 + $0x3c] sm:$0xf0]  ;;  %v10407_v50 = vor.u32 %v11973_v41, %v10406_v35  ;;  %v12010_v35 = vld [vmem:[%s12940_s22 + $0x160] sm:$0xf0] }
 0x452   : > { %4910 = vmatmul.bf16.vlgmr.msrb.gmra.mxu3 %v12716_v0  ;;  %v10411_v33 = vor.u32 %v11972_v42, %v10408_v43  ;;  %v10555_v43 = vor.u32 %v12008_v38, %v10552_v39  ;;  %v11997_v38 = vld [vmem:[%s12940_s22 + $0xf8] sm:$0xf0]  ;;  %v11996_v39 = vld [vmem:[%s12940_s22 + $0xf4] sm:$0xf] }
 0x453   : > { %v4770_v44 = vpop.f32.mrf.mxu0  ;;  %v14181_v46 = vpop.f32.mrf.mxu2 }
 0x454   : > { %v4783_v21 = vpop.f32.mrf.mxu1  ;;  %v4769_v44 = vadd.f32 %v14169_v18, %v14157_v47 }
 0x455   : > { %v14183_v32 = vpop.f32.mrf.mxu3  ;;  %v12006_v21 = vld [vmem:[%s12940_s22 + $0x140] sm:$0xf0] }
 0x456   : > { %v4782_v47 = vadd.f32 %v14171_v23, %v4769_v44  ;;  %v12002_v23 = vld [vmem:[%s12940_s22 + $0x124] sm:$0xf] }
 0x457   : > { %4916 = vmatpush.bf16.xpose.msra.mxu0 %v10363_v51  ;;  %v11945_v51 = vld [vmem:[%s12934_s18 + $0x79c] sm:$0xf] }
 0x458   : > { %4929 = vmatpush.bf16.xpose.msra.mxu1 %v10367_v52  ;;  %v10300_v52 = vld [vmem:[%s12934_s18 + $0x7a4] sm:$0xf0] }
 0x459   : > { %6739 = vmatpush.bf16.xpose.msra.mxu2 %v10455_v53  ;;  %6752 = vmatpush.bf16.xpose.msra.mxu3 %v10459_v54  ;;  %v10306_v53 = vld [vmem:[%s12934_s18 + $0x7a0] sm:$0xf]  ;;  %v11947_v54 = vld [vmem:[%s12934_s18 + $0x7a8] sm:$0xf0]  ;;  %v10303_v58 = vor.u32 %v11945_v51, %v10300_v52  ;;  %v12005_v51 = vld [vmem:[%s12940_s22 + $0x13c] sm:$0xf] }
 0x45a   : > { %v10307_v60 = vor.u32 %v11947_v54, %v10306_v53  ;;  %v10540_v52 = vld [vmem:[%s12940_s22 + $0x144] sm:$0xf0]  ;;  %v4808_v53 = vadd.f32 %v14183_v32, %v14181_v46  ;;  %v10546_v54 = vld [vmem:[%s12940_s22 + $0x140] sm:$0xf]  ;;  %v4959_v46 = vrot.slane %v4782_v47, 2 }
 0x45b   : > { %v4796_v59 = vpop.f32.mrf.mxu2 }
 0x45f   : > { %4917 = vmatpush.bf16.xpose.msra.mxu0 %v10351_v1  ;;  %v4809_v1 = vpop.f32.mrf.mxu3 }
 0x460   : > { %4930 = vmatpush.bf16.xpose.msra.mxu1 %v10355_v61  ;;  %v10399_v61 = vor.u32 %v11969_v56, %v10396_v57  ;;  %v10543_v56 = vor.u32 %v12005_v51, %v10540_v52  ;;  %v10547_v57 = vor.u32 %v12007_v25, %v10546_v54  ;;  %v10526_v1 = vld [vmem:[%s12940_s22 + $0x120] sm:$0xf]  ;;  %v10490_v51 = vld [vmem:[%s12940_s22 + $0xd8] sm:$0xf]  ;;  %v11994_v52 = vld [vmem:[%s12940_s22 + $0xe0] sm:$0xf0] }
 0x461   : > { %6740 = vmatpush.bf16.xpose.msra.mxu2 %v10443_v2  ;;  %6753 = vmatpush.bf16.xpose.msra.mxu3 %v10447_v4  ;;  %v11942_v2 = vld [vmem:[%s12934_s18 + $0x784] sm:$0xf]  ;;  %v10288_v4 = vld [vmem:[%s12934_s18 + $0x78c] sm:$0xf0]  ;;  %v10492_v54 = vld [vmem:[%s12940_s22 + $0xe4] sm:$0xf0] }
 0x462   : > { %v10498_v25 = vld [vmem:[%s12940_s22 + $0xe0] sm:$0xf] }
 0x467   : > { %4918 = vmatpush.bf16.xpose.msra.mxu0 %v10339_v13  ;;  %v10562_v13 = vld [vmem:[%s12940_s22 + $0x168] sm:$0xf] }
 0x468   : > { %4931 = vmatpush.bf16.xpose.msra.mxu1 %v10343_v6  ;;  %v10291_v6 = vor.u32 %v11942_v2, %v10288_v4  ;;  %v10528_v2 = vld [vmem:[%s12940_s22 + $0x12c] sm:$0xf0] }
 0x469   : > { %6741 = vmatpush.bf16.xpose.msra.mxu2 %v10431_v8  ;;  %6754 = vmatpush.bf16.xpose.msra.mxu3 %v10435_v16  ;;  %v12012_v8 = vld [vmem:[%s12940_s22 + $0x170] sm:$0xf0]  ;;  %v12011_v16 = vld [vmem:[%s12940_s22 + $0x16c] sm:$0xf]  ;;  %v10531_v3 = vor.u32 %v12002_v23, %v10528_v2  ;;  %v10658_v2 = vld [vmem:[%s12940_s22 + $0x228] sm:$0xf] }
 0x46a   : > { %v10563_v29 = vor.u32 %v12012_v8, %v10562_v13  ;;  %v10567_v30 = vor.u32 %v12011_v16, %v10564_v17  ;;  %v4941_v4 = vld [vmem:[#allocation2 + $0xb] sm:$0xff]  ;;  %v11992_v23 = vld [vmem:[%s12940_s22 + $0xd0] sm:$0xf0] }
 0x46b   : > { %v10426_v16 = vld [vmem:[%s12940_s22 + $0x50] sm:$0xf]  ;;  %v10514_v17 = vld [vmem:[%s12940_s22 + $0x108] sm:$0xf] }
 0x46f   : > { %4919 = vmatpush.bf16.xpose.msra.mxu0 %v10327_v40  ;;  %v10571_v40 = vor.u32 %v12013_v26, %v10570_v24  ;;  %v10522_v24 = vld [vmem:[%s12940_s22 + $0x110] sm:$0xf]  ;;  %v12001_v26 = vld [vmem:[%s12940_s22 + $0x118] sm:$0xf0] }
 0x470   : > { %4932 = vmatpush.bf16.xpose.msra.mxu1 %v10331_v34  ;;  %v10462_v34 = vld [vmem:[%s12940_s22 + $0x98] sm:$0xf] }
 0x471   : > { %6742 = vmatpush.bf16.xpose.msra.mxu2 %v10419_v37  ;;  %6755 = vmatpush.bf16.xpose.msra.mxu3 %v10423_v19  ;;  %v11986_v37 = vld [vmem:[%s12940_s22 + $0xa0] sm:$0xf0]  ;;  %v10550_v19 = vld [vmem:[%s12940_s22 + $0x150] sm:$0xf] }
 0x472   : > { %v10463_v41 = vor.u32 %v11986_v37, %v10462_v34  ;;  %v10551_v42 = vor.u32 %v12009_v36, %v10550_v19  ;;  %v10414_v37 = vld [vmem:[%s12940_s22 + $0x38] sm:$0xf]  ;;  %v11974_v19 = vld [vmem:[%s12940_s22 + $0x40] sm:$0xf0]  ;;  %v10502_v36 = vld [vmem:[%s12940_s22 + $0xf0] sm:$0xf] }
 0x477   : > { %4920 = vmatpush.bf16.xpose.msra.mxu0 %v10315_v31  ;;  %v10559_v31 = vor.u32 %v12010_v35, %v10558_v7  ;;  %v10504_v7 = vld [vmem:[%s12940_s22 + $0xfc] sm:$0xf0]  ;;  %v10510_v35 = vld [vmem:[%s12940_s22 + $0xf8] sm:$0xf] }
 0x478   : > { %4933 = vmatpush.bf16.xpose.msra.mxu1 %v10319_v49  ;;  %v10450_v49 = vld [vmem:[%s12940_s22 + $0x80] sm:$0xf]  ;;  %v10507_v44 = vor.u32 %v11996_v39, %v10504_v7  ;;  %v10634_v39 = vld [vmem:[%s12940_s22 + $0x1f8] sm:$0xf]  ;;  %v12030_v7 = vld [vmem:[%s12940_s22 + $0x200] sm:$0xf0] }
 0x479   : > { %6743 = vmatpush.bf16.xpose.msra.mxu2 %v10407_v50  ;;  %6756 = vmatpush.bf16.xpose.msra.mxu3 %v10411_v33  ;;  %v11983_v50 = vld [vmem:[%s12940_s22 + $0x88] sm:$0xf0]  ;;  %v10538_v33 = vld [vmem:[%s12940_s22 + $0x138] sm:$0xf] }
 0x47a   : > { %v10451_v55 = vor.u32 %v11983_v50, %v10450_v49  ;;  %v10539_v18 = vor.u32 %v12006_v21, %v10538_v33  ;;  %v10402_v33 = vld [vmem:[%s12940_s22 + $0x20] sm:$0xf]  ;;  %v11971_v21 = vld [vmem:[%s12940_s22 + $0x28] sm:$0xf0] }
 0x47b   : > { %v10403_v47 = vor.u32 %v11971_v21, %v10402_v33 }
 0x47f   : > { %4921 = vmatpush.bf16.xpose.msra.mxu0 %v10303_v58 }
 0x480   : > { %4934 = vmatpush.bf16.xpose.msra.mxu1 %v10307_v60  ;;  %v10438_v60 = vld [vmem:[%s12940_s22 + $0x68] sm:$0xf] }
 0x481   : > { %6744 = vmatpush.bf16.xpose.msra.mxu2 %v10395_v62  ;;  %6757 = vmatpush.bf16.xpose.msra.mxu3 %v10399_v61  ;;  %v11980_v62 = vld [vmem:[%s12940_s22 + $0x70] sm:$0xf0]  ;;  %v12003_v61 = vld [vmem:[%s12940_s22 + $0x128] sm:$0xf0] }
 0x482   : > { %v10439_v12 = vor.u32 %v11980_v62, %v10438_v60  ;;  %v10527_v15 = vor.u32 %v12003_v61, %v10526_v1  ;;  %v11968_v60 = vld [vmem:[%s12940_s22 + $0x10] sm:$0xf0]  ;;  %v11990_v62 = vld [vmem:[%s12940_s22 + $0xc4] sm:$0xf]  ;;  %v10480_v1 = vld [vmem:[%s12940_s22 + $0xcc] sm:$0xf0] }
 0x483   : > { %v10486_v61 = vld [vmem:[%s12940_s22 + $0xc8] sm:$0xf] }
 0x487   : > { %4922 = vmatpush.bf16.xpose.msra.mxu0 %v10291_v6  ;;  %v10535_v6 = vor.u32 %v12004_v10, %v10534_v9  ;;  %v10660_v10 = vld [vmem:[%s12940_s22 + $0x234] sm:$0xf0] }
 0x488   : > { %4935 = vmatpush.bf16.xpose.msra.mxu1 %v10295_v20  ;;  %v12000_v20 = vld [vmem:[%s12940_s22 + $0x110] sm:$0xf0] }
 0x489   : > { %6745 = vmatpush.bf16.xpose.msra.mxu2 %v10383_v22  ;;  %6758 = vmatpush.bf16.xpose.msra.mxu3 %v10387_v27  ;;  %v10516_v22 = vld [vmem:[%s12940_s22 + $0x114] sm:$0xf0] }
 0x48b   : > { %v4820_v58 = vpop.f32.mrf.mxu0 }
 0x48c   : > { %v4821_v59 = vadd.f32 %v4820_v58, %v4808_v53  ;;  %v11993_v53 = vld [vmem:[%s12940_s22 + $0xdc] sm:$0xf] }
 0x48e   : > { %4923 = vmatmul.bf16.vlgmr.msra.gmra.mxu0 %v12716_v0  ;;  %v4960_v32 = vrot.slane %v4821_v59, 1  ;;  %v10390_v59 = vld [vmem:[%s12940_s22 + $0x8] sm:$0xf] }
 0x48f   : > { %6764 = vmatpush.bf16.xpose.msrb.mxu0 %v10475_v28  ;;  %4936 = vmatmul.bf16.vlgmr.msra.gmra.mxu1 %v12716_v0  ;;  %v14255_v28 = vpop.f32.mrf.mxu1  ;;  %v10391_v9 = vor.u32 %v11968_v60, %v10390_v59 }
 0x490   : > { %6777 = vmatpush.bf16.xpose.msrb.mxu1 %v10563_v29  ;;  %6746 = vmatmul.bf16.vlgmr.msra.gmra.mxu2 %v12716_v0  ;;  %v4967_v5 = vsel %vm2734_vm4, %v4959_v46, %v4960_v32  ;;  %v10515_v29 = vor.u32 %v12000_v20, %v10514_v17  ;;  %v10478_v46 = vld [vmem:[%s12940_s22 + $0xc0] sm:$0xf]  ;;  %v11991_v32 = vld [vmem:[%s12940_s22 + $0xc8] sm:$0xf0] }
 0x491   : > { %6790 = vmatpush.bf16.xpose.msrb.mxu2 %v10567_v30  ;;  %6803 = vmatpush.bf16.xpose.msrb.mxu3 %v10571_v40  ;;  %v4968_v11 = vsel %vm2736_vm5, %v14092_v45, %v4967_v5  ;;  %v11977_v45 = vld [vmem:[%s12940_s22 + $0x58] sm:$0xf0]  ;;  %v10523_v40 = vor.u32 %v12001_v26, %v10522_v24  ;;  %v12035_v5 = vld [vmem:[%s12940_s22 + $0x22c] sm:$0xf]  ;;  %v12032_v24 = vld [vmem:[%s12940_s22 + $0x214] sm:$0xf] }
 0x492   : > { %6759 = vmatmul.bf16.vlgmr.msra.gmra.mxu3 %v12716_v0  ;;  %v4969_v48 = vsel %vm2738_vm6, %v14015_v14, %v4968_v11  ;;  %v11999_v14 = vld [vmem:[%s12940_s22 + $0x10c] sm:$0xf]  ;;  %v10427_v27 = vor.u32 %v11977_v45, %v10426_v16  ;;  %v10666_v11 = vld [vmem:[%s12940_s22 + $0x230] sm:$0xf]  ;;  %v10663_v45 = vor.u32 %v12035_v5, %v10660_v10  ;;  %v10648_v26 = vld [vmem:[%s12940_s22 + $0x21c] sm:$0xf0] }
 0x493   : > { %v4974_v13 = vadd.f32 %v4969_v48, %v4941_v4  ;;  %v4822_v8 = vpop.f32.mrf.mxu0  ;;  %v10519_v30 = vor.u32 %v11999_v14, %v10516_v22  ;;  %v14257_v34 = vpop.f32.mrf.mxu2  ;;  %v12036_v4 = vld [vmem:[%s12940_s22 + $0x230] sm:$0xf0]  ;;  %v10646_v14 = vld [vmem:[%s12940_s22 + $0x210] sm:$0xf]  ;;  %v12033_v22 = vld [vmem:[%s12940_s22 + $0x218] sm:$0xf0] }
 0x494   : > { %v10487_v8 = vor.u32 %v11992_v23, %v10486_v61  ;;  %v10659_v16 = vor.u32 %v12036_v4, %v10658_v2  ;;  %v10610_v23 = vld [vmem:[%s12940_s22 + $0x1c8] sm:$0xf]  ;;  %v12024_v2 = vld [vmem:[%s12940_s22 + $0x1d0] sm:$0xf0]  ;;  %v12023_v4 = vld [vmem:[%s12940_s22 + $0x1cc] sm:$0xf] }
 0x495   : > { %4976 = vst [vmem:[#allocation2 + $0xb] sm:$0xff] %v4974_v13  ;;  %v10754_v13 = vld [vmem:[%s12940_s22 + $0x2e8] sm:$0xf]  ;;  %v10612_v5 = vld [vmem:[%s12940_s22 + $0x1d4] sm:$0xf0] }
 0x496   : > { %v12025_v10 = vld [vmem:[%s12940_s22 + $0x1d8] sm:$0xf0] }
 0x497   : > { %6765 = vmatpush.bf16.xpose.msrb.mxu0 %v10463_v41  ;;  %v11998_v41 = vld [vmem:[%s12940_s22 + $0x100] sm:$0xf0] }
 0x498   : > { %6778 = vmatpush.bf16.xpose.msrb.mxu1 %v10551_v42  ;;  %v10415_v42 = vor.u32 %v11974_v19, %v10414_v37  ;;  %v10511_v49 = vor.u32 %v11998_v41, %v10510_v35  ;;  %v10647_v37 = vor.u32 %v12033_v22, %v10646_v14  ;;  %v10651_v19 = vor.u32 %v12032_v24, %v10648_v26  ;;  %v12029_v35 = vld [vmem:[%s12940_s22 + $0x1fc] sm:$0xf]  ;;  %v10636_v41 = vld [vmem:[%s12940_s22 + $0x204] sm:$0xf0]  ;;  %v12022_v14 = vld [vmem:[%s12940_s22 + $0x1c0] sm:$0xf0] }
 0x499   : > { %6791 = vmatpush.bf16.xpose.msrb.mxu2 %v10555_v43  ;;  %6804 = vmatpush.bf16.xpose.msrb.mxu3 %v10559_v31  ;;  %v4835_v43 = vpop.f32.mrf.mxu1  ;;  %v10503_v31 = vor.u32 %v11997_v38, %v10502_v36  ;;  %v10694_v22 = vld [vmem:[%s12940_s22 + $0x270] sm:$0xf]  ;;  %v12045_v24 = vld [vmem:[%s12940_s22 + $0x278] sm:$0xf0] }
 0x49a   : > { %v12031_v43 = vld [vmem:[%s12940_s22 + $0x208] sm:$0xf0] }
 0x49b   : > { %v4848_v50 = vpop.f32.mrf.mxu2 }
 0x49c   : > { %v10639_v50 = vor.u32 %v12029_v35, %v10636_v41  ;;  %v12042_v35 = vld [vmem:[%s12940_s22 + $0x260] sm:$0xf0] }
 0x49f   : > { %6766 = vmatpush.bf16.xpose.msrb.mxu0 %v10451_v55  ;;  %v11995_v55 = vld [vmem:[%s12940_s22 + $0xe8] sm:$0xf0] }
 0x4a0   : > { %6779 = vmatpush.bf16.xpose.msrb.mxu1 %v10539_v18  ;;  %v14275_v18 = vpop.f32.mrf.mxu3  ;;  %v10499_v58 = vor.u32 %v11995_v55, %v10498_v25  ;;  %v12026_v25 = vld [vmem:[%s12940_s22 + $0x1e4] sm:$0xf]  ;;  %v10624_v55 = vld [vmem:[%s12940_s22 + $0x1ec] sm:$0xf0] }
 0x4a1   : > { %6792 = vmatpush.bf16.xpose.msrb.mxu2 %v10543_v56  ;;  %6805 = vmatpush.bf16.xpose.msrb.mxu3 %v10547_v57  ;;  %v10491_v56 = vor.u32 %v11994_v52, %v10490_v51  ;;  %v10495_v57 = vor.u32 %v11993_v53, %v10492_v54  ;;  %v10622_v53 = vld [vmem:[%s12940_s22 + $0x1e0] sm:$0xf]  ;;  %v12027_v54 = vld [vmem:[%s12940_s22 + $0x1e8] sm:$0xf0] }
 0x4a2   : > { %v10623_v59 = vor.u32 %v12027_v54, %v10622_v53  ;;  %v10582_v53 = vld [vmem:[%s12940_s22 + $0x188] sm:$0xf]  ;;  %v12016_v54 = vld [vmem:[%s12940_s22 + $0x190] sm:$0xf0] }
 0x4a7   : > { %6767 = vmatpush.bf16.xpose.msrb.mxu0 %v10439_v12  ;;  %v12037_v12 = vld [vmem:[%s12940_s22 + $0x238] sm:$0xf0] }
 0x4a8   : > { %6780 = vmatpush.bf16.xpose.msrb.mxu1 %v10527_v15  ;;  %v4861_v48 = vpop.f32.mrf.mxu3  ;;  %v10479_v15 = vor.u32 %v11991_v32, %v10478_v46  ;;  %v10667_v17 = vor.u32 %v12037_v12, %v10666_v11  ;;  %v10627_v46 = vor.u32 %v12026_v25, %v10624_v55  ;;  %v10706_v11 = vld [vmem:[%s12940_s22 + $0x288] sm:$0xf]  ;;  %v12048_v12 = vld [vmem:[%s12940_s22 + $0x290] sm:$0xf0]  ;;  %v10670_v25 = vld [vmem:[%s12940_s22 + $0x240] sm:$0xf] }
 0x4a9   : > { %6793 = vmatpush.bf16.xpose.msrb.mxu2 %v10531_v3  ;;  %6806 = vmatpush.bf16.xpose.msrb.mxu3 %v10535_v6  ;;  %v10483_v3 = vor.u32 %v11990_v62, %v10480_v1  ;;  %v12060_v6 = vld [vmem:[%s12940_s22 + $0x2f0] sm:$0xf0]  ;;  %v10611_v48 = vor.u32 %v12024_v2, %v10610_v23  ;;  %v12039_v55 = vld [vmem:[%s12940_s22 + $0x248] sm:$0xf0]  ;;  %v10852_v2 = vld [vmem:[%s12940_s22 + $0x3b4] sm:$0xf0] }
 0x4aa   : > { %v10755_v20 = vor.u32 %v12060_v6, %v10754_v13  ;;  %v10707_v6 = vor.u32 %v12048_v12, %v10706_v11  ;;  %v12083_v23 = vld [vmem:[%s12940_s22 + $0x3ac] sm:$0xf]  ;;  %v12056_v12 = vld [vmem:[%s12940_s22 + $0x2d4] sm:$0xf] }
 0x4ab   : > { %v10855_v11 = vor.u32 %v12083_v23, %v10852_v2  ;;  %v12049_v23 = vld [vmem:[%s12940_s22 + $0x298] sm:$0xf0]  ;;  %v10802_v2 = vld [vmem:[%s12940_s22 + $0x348] sm:$0xf] }
 0x4af   : > { %6768 = vmatpush.bf16.xpose.msrb.mxu0 %v10427_v27  ;;  %v10654_v27 = vld [vmem:[%s12940_s22 + $0x218] sm:$0xf] }
 0x4b0   : > { %6781 = vmatpush.bf16.xpose.msrb.mxu1 %v10515_v29  ;;  %v12034_v29 = vld [vmem:[%s12940_s22 + $0x220] sm:$0xf0] }
 0x4b1   : > { %6794 = vmatpush.bf16.xpose.msrb.mxu2 %v10519_v30  ;;  %6807 = vmatpush.bf16.xpose.msrb.mxu3 %v10523_v40  ;;  %v10742_v30 = vld [vmem:[%s12940_s22 + $0x2d0] sm:$0xf]  ;;  %v12057_v40 = vld [vmem:[%s12940_s22 + $0x2d8] sm:$0xf0]  ;;  %v10655_v36 = vor.u32 %v12034_v29, %v10654_v27 }
 0x4b2   : > { %v10743_v38 = vor.u32 %v12057_v40, %v10742_v30  ;;  %v10695_v30 = vor.u32 %v12045_v24, %v10694_v22  ;;  %v10586_v40 = vld [vmem:[%s12940_s22 + $0x198] sm:$0xf]  ;;  %v12053_v24 = vld [vmem:[%s12940_s22 + $0x2bc] sm:$0xf] }
 0x4b7   : > { %6769 = vmatpush.bf16.xpose.msrb.mxu0 %v10415_v42  ;;  %v10642_v42 = vld [vmem:[%s12940_s22 + $0x200] sm:$0xf] }
 0x4b8   : > { %6782 = vmatpush.bf16.xpose.msrb.mxu1 %v10503_v31  ;;  %v10730_v31 = vld [vmem:[%s12940_s22 + $0x2b8] sm:$0xf]  ;;  %v10643_v33 = vor.u32 %v12031_v43, %v10642_v42 }
 0x4b9   : > { %6795 = vmatpush.bf16.xpose.msrb.mxu2 %v10507_v44  ;;  %6808 = vmatpush.bf16.xpose.msrb.mxu3 %v10511_v49  ;;  %v12054_v44 = vld [vmem:[%s12940_s22 + $0x2c0] sm:$0xf0]  ;;  %v10635_v49 = vor.u32 %v12030_v7, %v10634_v39  ;;  %v12019_v39 = vld [vmem:[%s12940_s22 + $0x1a8] sm:$0xf0]  ;;  %v10682_v7 = vld [vmem:[%s12940_s22 + $0x258] sm:$0xf] }
 0x4ba   : > { %v10731_v21 = vor.u32 %v12054_v44, %v10730_v31  ;;  %v10683_v44 = vor.u32 %v12042_v35, %v10682_v7 }
 0x4bf   : > { %6770 = vmatpush.bf16.xpose.msrb.mxu0 %v10403_v47  ;;  %v10630_v47 = vld [vmem:[%s12940_s22 + $0x1e8] sm:$0xf] }
 0x4c0   : > { %6783 = vmatpush.bf16.xpose.msrb.mxu1 %v10491_v56  ;;  %v12028_v56 = vld [vmem:[%s12940_s22 + $0x1f0] sm:$0xf0] }
 0x4c1   : > { %6796 = vmatpush.bf16.xpose.msrb.mxu2 %v10495_v57  ;;  %6809 = vmatpush.bf16.xpose.msrb.mxu3 %v10499_v58  ;;  %v10718_v57 = vld [vmem:[%s12940_s22 + $0x2a0] sm:$0xf]  ;;  %v12051_v58 = vld [vmem:[%s12940_s22 + $0x2a8] sm:$0xf0]  ;;  %v10631_v32 = vor.u32 %v12028_v56, %v10630_v47  ;;  %v10756_v56 = vld [vmem:[%s12940_s22 + $0x2f4] sm:$0xf0] }
 0x4c2   : > { %v10719_v62 = vor.u32 %v12051_v58, %v10718_v57  ;;  %v12059_v47 = vld [vmem:[%s12940_s22 + $0x2ec] sm:$0xf]  ;;  %v10762_v57 = vld [vmem:[%s12940_s22 + $0x2f0] sm:$0xf] }
 0x4c7   : > { %6771 = vmatpush.bf16.xpose.msrb.mxu0 %v10391_v9  ;;  %v10618_v9 = vld [vmem:[%s12940_s22 + $0x1d0] sm:$0xf] }
 0x4c8   : > { %6784 = vmatpush.bf16.xpose.msrb.mxu1 %v10479_v15  ;;  %v10615_v15 = vor.u32 %v12023_v4, %v10612_v5  ;;  %v10671_v4 = vor.u32 %v12039_v55, %v10670_v25  ;;  %v10759_v5 = vor.u32 %v12059_v47, %v10756_v56  ;;  %v10816_v25 = vld [vmem:[%s12940_s22 + $0x36c] sm:$0xf0] }
 0x4c9   : > { %6797 = vmatpush.bf16.xpose.msrb.mxu2 %v10483_v3  ;;  %6810 = vmatpush.bf16.xpose.msrb.mxu3 %v10487_v8  ;;  %v10619_v3 = vor.u32 %v12025_v10, %v10618_v9  ;;  %v10598_v8 = vld [vmem:[%s12940_s22 + $0x1b0] sm:$0xf] }
 0x4cb   : > { %v14313_v51 = vpop.f32.mrf.mxu0 }
 0x4cc   : > { %v14315_v52 = vpop.f32.mrf.mxu1 }
 0x4cd   : > { %v4886_v22 = vadd.f32 %v14315_v52, %v14313_v51  ;;  %v4847_v52 = vadd.f32 %v14257_v34, %v14255_v28  ;;  %v12052_v34 = vld [vmem:[%s12940_s22 + $0x2b0] sm:$0xf0] }
 0x4ce   : > { %6772 = vmatmul.bf16.vlgmr.msrb.gmra.mxu0 %v12716_v0 }
 0x4cf   : > { %6816 = vmatpush.bf16.xpose.msra.mxu0 %v10659_v16  ;;  %6785 = vmatmul.bf16.vlgmr.msrb.gmra.mxu1 %v12716_v0  ;;  %v12021_v16 = vld [vmem:[%s12940_s22 + $0x1b8] sm:$0xf0]  ;;  %v4860_v28 = vadd.f32 %v14275_v18, %v4847_v52 }
 0x4d0   : > { %6829 = vmatpush.bf16.xpose.msra.mxu1 %v10663_v45  ;;  %6798 = vmatmul.bf16.vlgmr.msrb.gmra.mxu2 %v12716_v0  ;;  %v12020_v45 = vld [vmem:[%s12940_s22 + $0x1b4] sm:$0xf]  ;;  %v10599_v26 = vor.u32 %v12021_v16, %v10598_v8  ;;  %v10840_v16 = vld [vmem:[%s12940_s22 + $0x39c] sm:$0xf0] }
 0x4d1   : > { %6842 = vmatpush.bf16.xpose.msra.mxu2 %v10667_v17  ;;  %6855 = vmatpush.bf16.xpose.msra.mxu3 %v10755_v20  ;;  %v10600_v17 = vld [vmem:[%s12940_s22 + $0x1bc] sm:$0xf0]  ;;  %v10606_v20 = vld [vmem:[%s12940_s22 + $0x1b8] sm:$0xf]  ;;  %v12080_v8 = vld [vmem:[%s12940_s22 + $0x394] sm:$0xf] }
 0x4d2   : > { %6811 = vmatmul.bf16.vlgmr.msrb.gmra.mxu3 %v12716_v0  ;;  %v10603_v27 = vor.u32 %v12020_v45, %v10600_v17  ;;  %v10607_v29 = vor.u32 %v12022_v14, %v10606_v20  ;;  %v10843_v14 = vor.u32 %v12080_v8, %v10840_v16  ;;  %v12046_v8 = vld [vmem:[%s12940_s22 + $0x280] sm:$0xf0]  ;;  %v10790_v16 = vld [vmem:[%s12940_s22 + $0x330] sm:$0xf] }
 0x4d3   : > { %v14325_v60 = vpop.f32.mrf.mxu2  ;;  %v4874_v1 = vpop.f32.mrf.mxu0 }
 0x4d4   : > { %v4887_v61 = vpop.f32.mrf.mxu1 }
 0x4d5   : > { %v14351_v42 = vpop.f32.mrf.mxu3  ;;  %v10583_v61 = vor.u32 %v12016_v54, %v10582_v53  ;;  %v12075_v53 = vld [vmem:[%s12940_s22 + $0x368] sm:$0xf0] }
 0x4d7   : > { %6817 = vmatpush.bf16.xpose.msra.mxu0 %v10647_v37  ;;  %v12018_v37 = vld [vmem:[%s12940_s22 + $0x1a0] sm:$0xf0] }
 0x4d8   : > { %6830 = vmatpush.bf16.xpose.msra.mxu1 %v10651_v19  ;;  %v12017_v19 = vld [vmem:[%s12940_s22 + $0x19c] sm:$0xf]  ;;  %v10587_v41 = vor.u32 %v12018_v37, %v10586_v40  ;;  %v12078_v40 = vld [vmem:[%s12940_s22 + $0x380] sm:$0xf0] }
 0x4d9   : > { %6843 = vmatpush.bf16.xpose.msra.mxu2 %v10655_v36  ;;  %6856 = vmatpush.bf16.xpose.msra.mxu3 %v10743_v38  ;;  %v10588_v36 = vld [vmem:[%s12940_s22 + $0x1a4] sm:$0xf0]  ;;  %v10594_v38 = vld [vmem:[%s12940_s22 + $0x1a0] sm:$0xf]  ;;  %v12077_v37 = vld [vmem:[%s12940_s22 + $0x37c] sm:$0xf] }
 0x4da   : > { %v10591_v43 = vor.u32 %v12017_v19, %v10588_v36  ;;  %v10595_v31 = vor.u32 %v12019_v39, %v10594_v38  ;;  %v10828_v19 = vld [vmem:[%s12940_s22 + $0x384] sm:$0xf0]  ;;  %v4899_v36 = vadd.f32 %v14325_v60, %v4886_v22 }
 0x4db   : > { %v4900_v13 = vpop.f32.mrf.mxu2  ;;  %v10831_v7 = vor.u32 %v12077_v37, %v10828_v19  ;;  %v10690_v37 = vld [vmem:[%s12940_s22 + $0x260] sm:$0xf]  ;;  %v12043_v19 = vld [vmem:[%s12940_s22 + $0x268] sm:$0xf0] }
 0x4dc   : > { %v10838_v13 = vld [vmem:[%s12940_s22 + $0x390] sm:$0xf] }
 0x4df   : > { %6818 = vmatpush.bf16.xpose.msra.mxu0 %v10635_v49  ;;  %v10574_v49 = vld [vmem:[%s12940_s22 + $0x180] sm:$0xf] }
 0x4e0   : > { %6831 = vmatpush.bf16.xpose.msra.mxu1 %v10639_v50  ;;  %v12015_v50 = vld [vmem:[%s12940_s22 + $0x188] sm:$0xf0] }
 0x4e1   : > { %6844 = vmatpush.bf16.xpose.msra.mxu2 %v10643_v33  ;;  %6857 = vmatpush.bf16.xpose.msra.mxu3 %v10731_v21  ;;  %v12014_v33 = vld [vmem:[%s12940_s22 + $0x184] sm:$0xf]  ;;  %v10576_v21 = vld [vmem:[%s12940_s22 + $0x18c] sm:$0xf0]  ;;  %v10575_v58 = vor.u32 %v12015_v50, %v10574_v49 }
 0x4e2   : > { %v10579_v1 = vor.u32 %v12014_v33, %v10576_v21  ;;  %v12050_v49 = vld [vmem:[%s12940_s22 + $0x2a4] sm:$0xf]  ;;  %v10720_v50 = vld [vmem:[%s12940_s22 + $0x2ac] sm:$0xf0]  ;;  %v10726_v33 = vld [vmem:[%s12940_s22 + $0x2a8] sm:$0xf] }
 0x4e3   : > { %v10814_v21 = vld [vmem:[%s12940_s22 + $0x360] sm:$0xf]  ;;  %v10723_v47 = vor.u32 %v12050_v49, %v10720_v50  ;;  %v12040_v49 = vld [vmem:[%s12940_s22 + $0x250] sm:$0xf0] }
 0x4e4   : > { %v10815_v18 = vor.u32 %v12075_v53, %v10814_v21  ;;  %v10766_v50 = vld [vmem:[%s12940_s22 + $0x300] sm:$0xf]  ;;  %v10858_v21 = vld [vmem:[%s12940_s22 + $0x3b0] sm:$0xf]  ;;  %v12085_v53 = vld [vmem:[%s12940_s22 + $0x3b8] sm:$0xf0] }
 0x4e7   : > { %6819 = vmatpush.bf16.xpose.msra.mxu0 %v10623_v59  ;;  %v12061_v59 = vld [vmem:[%s12940_s22 + $0x2f8] sm:$0xf0] }
 0x4e8   : > { %6832 = vmatpush.bf16.xpose.msra.mxu1 %v10627_v46  ;;  %v10850_v46 = vld [vmem:[%s12940_s22 + $0x3a8] sm:$0xf]  ;;  %v10763_v9 = vor.u32 %v12061_v59, %v10762_v57  ;;  %v10727_v57 = vor.u32 %v12052_v34, %v10726_v33  ;;  %v12063_v33 = vld [vmem:[%s12940_s22 + $0x308] sm:$0xf0]  ;;  %v10768_v34 = vld [vmem:[%s12940_s22 + $0x30c] sm:$0xf0] }
 0x4e9   : > { %6845 = vmatpush.bf16.xpose.msra.mxu2 %v10631_v32  ;;  %6858 = vmatpush.bf16.xpose.msra.mxu3 %v10719_v62  ;;  %v12084_v32 = vld [vmem:[%s12940_s22 + $0x3b0] sm:$0xf0]  ;;  %v4913_v62 = vpop.f32.mrf.mxu3 }
 0x4ea   : > { %v10851_v10 = vor.u32 %v12084_v32, %v10850_v46  ;;  %v12047_v62 = vld [vmem:[%s12940_s22 + $0x28c] sm:$0xf] }
 0x4ef   : > { %6820 = vmatpush.bf16.xpose.msra.mxu0 %v10611_v48  ;;  %v10744_v48 = vld [vmem:[%s12940_s22 + $0x2dc] sm:$0xf0] }
 0x4f0   : > { %6833 = vmatpush.bf16.xpose.msra.mxu1 %v10615_v15  ;;  %v10750_v15 = vld [vmem:[%s12940_s22 + $0x2d8] sm:$0xf]  ;;  %v10747_v45 = vor.u32 %v12056_v12, %v10744_v48 }
 0x4f1   : > { %6846 = vmatpush.bf16.xpose.msra.mxu2 %v10619_v3  ;;  %6859 = vmatpush.bf16.xpose.msra.mxu3 %v10707_v6  ;;  %v12058_v3 = vld [vmem:[%s12940_s22 + $0x2e0] sm:$0xf0]  ;;  %v12081_v6 = vld [vmem:[%s12940_s22 + $0x398] sm:$0xf0] }
 0x4f2   : > { %v10751_v17 = vor.u32 %v12058_v3, %v10750_v15  ;;  %v10839_v20 = vor.u32 %v12081_v6, %v10838_v13  ;;  %v12044_v3 = vld [vmem:[%s12940_s22 + $0x274] sm:$0xf]  ;;  %v10696_v13 = vld [vmem:[%s12940_s22 + $0x27c] sm:$0xf0]  ;;  %v10702_v6 = vld [vmem:[%s12940_s22 + $0x278] sm:$0xf] }
 0x4f7   : > { %6821 = vmatpush.bf16.xpose.msra.mxu0 %v10599_v26  ;;  %v10732_v26 = vld [vmem:[%s12940_s22 + $0x2c4] sm:$0xf0] }
 0x4f8   : > { %6834 = vmatpush.bf16.xpose.msra.mxu1 %v10603_v27  ;;  %v10738_v27 = vld [vmem:[%s12940_s22 + $0x2c0] sm:$0xf]  ;;  %v10735_v38 = vor.u32 %v12053_v24, %v10732_v26  ;;  %v10703_v24 = vor.u32 %v12046_v8, %v10702_v6  ;;  %v12079_v8 = vld [vmem:[%s12940_s22 + $0x388] sm:$0xf0] }
 0x4f9   : > { %6847 = vmatpush.bf16.xpose.msra.mxu2 %v10607_v29  ;;  %6860 = vmatpush.bf16.xpose.msra.mxu3 %v10695_v30  ;;  %v12055_v29 = vld [vmem:[%s12940_s22 + $0x2c8] sm:$0xf0]  ;;  %v10826_v30 = vld [vmem:[%s12940_s22 + $0x378] sm:$0xf]  ;;  %v10834_v6 = vld [vmem:[%s12940_s22 + $0x380] sm:$0xf] }
 0x4fa   : > { %v10739_v39 = vor.u32 %v12055_v29, %v10738_v27  ;;  %v10827_v51 = vor.u32 %v12078_v40, %v10826_v30  ;;  %v12041_v30 = vld [vmem:[%s12940_s22 + $0x25c] sm:$0xf]  ;;  %v10684_v40 = vld [vmem:[%s12940_s22 + $0x264] sm:$0xf0] }
 0x4fb   : > { %v10687_v52 = vor.u32 %v12041_v30, %v10684_v40 }
 0x4ff   : > { %6822 = vmatpush.bf16.xpose.msra.mxu0 %v10587_v41 }
 0x500   : > { %6835 = vmatpush.bf16.xpose.msra.mxu1 %v10591_v43 }
 0x501   : > { %6848 = vmatpush.bf16.xpose.msra.mxu2 %v10595_v31  ;;  %6861 = vmatpush.bf16.xpose.msra.mxu3 %v10683_v44  ;;  %v4961_v31 = vrot.slane %v4899_v36, 7  ;;  %v4942_v44 = vld [vmem:[#allocation2 + $0x13] sm:$0x7]  ;;  %v10778_v36 = vld [vmem:[%s12940_s22 + $0x318] sm:$0xf] }
 0x503   : > { %v4970_v55 = vsel %vm2726_vm0, %v4860_v28, %v4961_v31  ;;  %v12038_v31 = vld [vmem:[%s12940_s22 + $0x244] sm:$0xf] }
 0x504   : > { %v12062_v28 = vld [vmem:[%s12940_s22 + $0x304] sm:$0xf] }
 0x507   : > { %6823 = vmatpush.bf16.xpose.msra.mxu0 %v10575_v58 }
 0x508   : > { %6836 = vmatpush.bf16.xpose.msra.mxu1 %v10579_v1  ;;  %v10708_v1 = vld [vmem:[%s12940_s22 + $0x294] sm:$0xf0] }
 0x509   : > { %6849 = vmatpush.bf16.xpose.msra.mxu2 %v10583_v61  ;;  %6862 = vmatpush.bf16.xpose.msra.mxu3 %v10671_v4  ;;  %v10714_v61 = vld [vmem:[%s12940_s22 + $0x290] sm:$0xf]  ;;  %v12072_v4 = vld [vmem:[%s12940_s22 + $0x350] sm:$0xf0] }
 0x50a   : > { %v10803_v12 = vor.u32 %v12072_v4, %v10802_v2  ;;  %v10934_v2 = vld [vmem:[%s12940_s22 + $0x450] sm:$0xf]  ;;  %v12105_v4 = vld [vmem:[%s12940_s22 + $0x458] sm:$0xf0] }
 0x50b   : > { %v4924_v35 = vpop.f32.mrf.mxu0 }
 0x50c   : > { %v4925_v41 = vadd.f32 %v4924_v35, %v14351_v42  ;;  %v4937_v43 = vpop.f32.mrf.mxu1  ;;  %v12074_v42 = vld [vmem:[%s12940_s22 + $0x364] sm:$0xf]  ;;  %v10691_v35 = vor.u32 %v12043_v19, %v10690_v37 }
 0x50d   : > { %v10819_v59 = vor.u32 %v12074_v42, %v10816_v25  ;;  %v12108_v25 = vld [vmem:[%s12940_s22 + $0x470] sm:$0xf0] }
 0x50e   : > { %6824 = vmatmul.bf16.vlgmr.msra.gmra.mxu0 %v12716_v0  ;;  %v4938_v60 = vadd.f32 %v4937_v43, %v4925_v41 }
 0x50f   : > { %6868 = vmatpush.bf16.xpose.msrb.mxu0 %v10759_v5  ;;  %6837 = vmatmul.bf16.vlgmr.msra.gmra.mxu1 %v12716_v0  ;;  %v12071_v5 = vld [vmem:[%s12940_s22 + $0x34c] sm:$0xf] }
 0x510   : > { %6881 = vmatpush.bf16.xpose.msrb.mxu1 %v10763_v9  ;;  %6850 = vmatmul.bf16.vlgmr.msra.gmra.mxu2 %v12716_v0  ;;  %v4962_v54 = vrot.slane %v4938_v60, 6  ;;  %v10804_v9 = vld [vmem:[%s12940_s22 + $0x354] sm:$0xf0]  ;;  %v10672_v60 = vld [vmem:[%s12940_s22 + $0x24c] sm:$0xf0] }
 0x511   : > { %6894 = vmatpush.bf16.xpose.msrb.mxu2 %v10851_v10  ;;  %6907 = vmatpush.bf16.xpose.msrb.mxu3 %v10855_v11  ;;  %v10711_v10 = vor.u32 %v12047_v62, %v10708_v1  ;;  %v10715_v11 = vor.u32 %v12049_v23, %v10714_v61  ;;  %v10807_v48 = vor.u32 %v12071_v5, %v10804_v9  ;;  %v10846_v61 = vld [vmem:[%s12940_s22 + $0x398] sm:$0xf]  ;;  %v12082_v23 = vld [vmem:[%s12940_s22 + $0x3a0] sm:$0xf0]  ;;  %v12104_v5 = vld [vmem:[%s12940_s22 + $0x454] sm:$0xf] }
 0x512   : > { %6863 = vmatmul.bf16.vlgmr.msra.gmra.mxu3 %v12716_v0  ;;  %v4971_v56 = vsel %vm2730_vm2, %v4970_v55, %v4962_v54  ;;  %v10946_v54 = vld [vmem:[%s12940_s22 + $0x468] sm:$0xf]  ;;  %v10675_v42 = vor.u32 %v12038_v31, %v10672_v60  ;;  %v12107_v55 = vld [vmem:[%s12940_s22 + $0x46c] sm:$0xf]  ;;  %v10936_v9 = vld [vmem:[%s12940_s22 + $0x45c] sm:$0xf0] }
 0x513   : > { %v4975_v58 = vadd.f32 %v4971_v56, %v4942_v44  ;;  %v4926_v46 = vpop.f32.mrf.mxu0  ;;  %v14416_v15 = vpop.f32.mrf.mxu2  ;;  %v10678_v44 = vld [vmem:[%s12940_s22 + $0x248] sm:$0xf] }
 0x514   : > { %v4939_v32 = vpop.f32.mrf.mxu1  ;;  %v10679_v56 = vor.u32 %v12040_v49, %v10678_v44  ;;  %v10859_v46 = vor.u32 %v12085_v53, %v10858_v21  ;;  %v10810_v21 = vld [vmem:[%s12940_s22 + $0x350] sm:$0xf]  ;;  %v12073_v53 = vld [vmem:[%s12940_s22 + $0x358] sm:$0xf0] }
 0x515   : > { %4977 = vst.msk [vmem:[#allocation2 + $0x13] sm:$0x7] %vm13788_vm8, %v4975_v58  ;;  %v14426_v22 = vpop.f32.mrf.mxu3  ;;  %v12109_v58 = vld [vmem:[%s12940_s22 + $0x478] sm:$0xf0]  ;;  %v10947_v32 = vor.u32 %v12108_v25, %v10946_v54  ;;  %v10898_v54 = vld [vmem:[%s12940_s22 + $0x408] sm:$0xf] }
 0x517   : > { %6869 = vmatpush.bf16.xpose.msrb.mxu0 %v10747_v45  ;;  %v12069_v45 = vld [vmem:[%s12940_s22 + $0x338] sm:$0xf0] }
 0x518   : > { %6882 = vmatpush.bf16.xpose.msrb.mxu1 %v10751_v17  ;;  %v12068_v17 = vld [vmem:[%s12940_s22 + $0x334] sm:$0xf]  ;;  %v10791_v26 = vor.u32 %v12069_v45, %v10790_v16  ;;  %v10922_v16 = vld [vmem:[%s12940_s22 + $0x438] sm:$0xf]  ;;  %v12102_v45 = vld [vmem:[%s12940_s22 + $0x440] sm:$0xf0] }
 0x519   : > { %6895 = vmatpush.bf16.xpose.msrb.mxu2 %v10839_v20  ;;  %6908 = vmatpush.bf16.xpose.msrb.mxu3 %v10843_v14  ;;  %v10792_v20 = vld [vmem:[%s12940_s22 + $0x33c] sm:$0xf0]  ;;  %v10699_v14 = vor.u32 %v12044_v3, %v10696_v13  ;;  %v10939_v3 = vor.u32 %v12104_v5, %v10936_v9  ;;  %v12092_v5 = vld [vmem:[%s12940_s22 + $0x3f4] sm:$0xf] }
 0x51a   : > { %v10795_v27 = vor.u32 %v12068_v17, %v10792_v20  ;;  %v12101_v17 = vld [vmem:[%s12940_s22 + $0x43c] sm:$0xf]  ;;  %v10924_v20 = vld [vmem:[%s12940_s22 + $0x444] sm:$0xf0]  ;;  %v10888_v9 = vld [vmem:[%s12940_s22 + $0x3fc] sm:$0xf0] }
 0x51b   : > { %v6749_v29 = vpop.f32.mrf.mxu2  ;;  %v10927_v30 = vor.u32 %v12101_v17, %v10924_v20  ;;  %v12089_v17 = vld [vmem:[%s12940_s22 + $0x3dc] sm:$0xf]  ;;  %v10876_v20 = vld [vmem:[%s12940_s22 + $0x3e4] sm:$0xf0] }
 0x51c   : > { %v10923_v29 = vor.u32 %v12102_v45, %v10922_v16  ;;  %v10874_v16 = vld [vmem:[%s12940_s22 + $0x3d8] sm:$0xf]  ;;  %v12090_v45 = vld [vmem:[%s12940_s22 + $0x3e0] sm:$0xf0] }
 0x51f   : > { %6870 = vmatpush.bf16.xpose.msrb.mxu0 %v10735_v38  ;;  %v12066_v38 = vld [vmem:[%s12940_s22 + $0x320] sm:$0xf0] }
 0x520   : > { %6883 = vmatpush.bf16.xpose.msrb.mxu1 %v10739_v39  ;;  %v12065_v39 = vld [vmem:[%s12940_s22 + $0x31c] sm:$0xf]  ;;  %v10779_v41 = vor.u32 %v12066_v38, %v10778_v36  ;;  %v10822_v38 = vld [vmem:[%s12940_s22 + $0x368] sm:$0xf] }
 0x521   : > { %6896 = vmatpush.bf16.xpose.msrb.mxu2 %v10827_v51  ;;  %6909 = vmatpush.bf16.xpose.msrb.mxu3 %v10831_v7  ;;  %v10780_v51 = vld [vmem:[%s12940_s22 + $0x324] sm:$0xf0]  ;;  %v6762_v7 = vpop.f32.mrf.mxu3 }
 0x522   : > { %v10783_v43 = vor.u32 %v12065_v39, %v10780_v51  ;;  %v12076_v39 = vld [vmem:[%s12940_s22 + $0x370] sm:$0xf0]  ;;  %v12098_v51 = vld [vmem:[%s12940_s22 + $0x424] sm:$0xf]  ;;  %v10918_v7 = vld [vmem:[%s12940_s22 + $0x428] sm:$0xf] }
 0x527   : > { %6871 = vmatpush.bf16.xpose.msrb.mxu0 %v10723_v47  ;;  %v10948_v47 = vld [vmem:[%s12940_s22 + $0x474] sm:$0xf0] }
 0x528   : > { %6884 = vmatpush.bf16.xpose.msrb.mxu1 %v10727_v57  ;;  %v10767_v57 = vor.u32 %v12063_v33, %v10766_v50  ;;  %v10951_v62 = vor.u32 %v12107_v55, %v10948_v47  ;;  %v12095_v55 = vld [vmem:[%s12940_s22 + $0x40c] sm:$0xf]  ;;  %v10900_v47 = vld [vmem:[%s12940_s22 + $0x414] sm:$0xf0] }
 0x529   : > { %6897 = vmatpush.bf16.xpose.msrb.mxu2 %v10815_v18  ;;  %6910 = vmatpush.bf16.xpose.msrb.mxu3 %v10819_v59  ;;  %v10954_v18 = vld [vmem:[%s12940_s22 + $0x470] sm:$0xf]  ;;  %v10771_v59 = vor.u32 %v12062_v28, %v10768_v34 }
 0x52a   : > { %v10955_v1 = vor.u32 %v12109_v58, %v10954_v18  ;;  %v10811_v58 = vor.u32 %v12073_v53, %v10810_v21 }
 0x52f   : > { %6872 = vmatpush.bf16.xpose.msrb.mxu0 %v10711_v10  ;;  %v10942_v10 = vld [vmem:[%s12940_s22 + $0x458] sm:$0xf] }
 0x530   : > { %6885 = vmatpush.bf16.xpose.msrb.mxu1 %v10715_v11  ;;  %v12106_v11 = vld [vmem:[%s12940_s22 + $0x460] sm:$0xf0] }
 0x531   : > { %6898 = vmatpush.bf16.xpose.msrb.mxu2 %v10803_v12  ;;  %6911 = vmatpush.bf16.xpose.msrb.mxu3 %v10807_v48  ;;  %v10847_v12 = vor.u32 %v12082_v23, %v10846_v61  ;;  %v10935_v48 = vor.u32 %v12105_v4, %v10934_v2  ;;  %v10943_v13 = vor.u32 %v12106_v11, %v10942_v10  ;;  %v10798_v61 = vld [vmem:[%s12940_s22 + $0x338] sm:$0xf]  ;;  %v12070_v23 = vld [vmem:[%s12940_s22 + $0x340] sm:$0xf0]  ;;  %v10886_v2 = vld [vmem:[%s12940_s22 + $0x3f0] sm:$0xf] }
 0x532   : > { %v12093_v4 = vld [vmem:[%s12940_s22 + $0x3f8] sm:$0xf0]  ;;  %v10894_v10 = vld [vmem:[%s12940_s22 + $0x3f8] sm:$0xf]  ;;  %v12094_v11 = vld [vmem:[%s12940_s22 + $0x400] sm:$0xf0] }
 0x537   : > { %6873 = vmatpush.bf16.xpose.msrb.mxu0 %v10699_v14  ;;  %v6761_v14 = vadd.f32 %v14426_v22, %v14416_v15  ;;  %v10910_v15 = vld [vmem:[%s12940_s22 + $0x420] sm:$0xf]  ;;  %v12099_v22 = vld [vmem:[%s12940_s22 + $0x428] sm:$0xf0] }
 0x538   : > { %6886 = vmatpush.bf16.xpose.msrb.mxu1 %v10703_v24  ;;  %v10930_v24 = vld [vmem:[%s12940_s22 + $0x440] sm:$0xf]  ;;  %v10911_v31 = vor.u32 %v12099_v22, %v10910_v15  ;;  %v10870_v15 = vld [vmem:[%s12940_s22 + $0x3c8] sm:$0xf]  ;;  %v12088_v22 = vld [vmem:[%s12940_s22 + $0x3d0] sm:$0xf0] }
 0x539   : > { %6899 = vmatpush.bf16.xpose.msrb.mxu2 %v10791_v26  ;;  %6912 = vmatpush.bf16.xpose.msrb.mxu3 %v10795_v27  ;;  %v12103_v26 = vld [vmem:[%s12940_s22 + $0x448] sm:$0xf0]  ;;  %v10835_v27 = vor.u32 %v12079_v8, %v10834_v6  ;;  %v10786_v6 = vld [vmem:[%s12940_s22 + $0x320] sm:$0xf] }
 0x53a   : > { %v10931_v40 = vor.u32 %v12103_v26, %v10930_v24  ;;  %v12067_v8 = vld [vmem:[%s12940_s22 + $0x328] sm:$0xf0] }
 0x53b   : > { %v12091_v24 = vld [vmem:[%s12940_s22 + $0x3e8] sm:$0xf0]  ;;  %v10787_v26 = vor.u32 %v12067_v8, %v10786_v6  ;;  %v12122_v8 = vld [vmem:[%s12940_s22 + $0x4e4] sm:$0xf] }
 0x53c   : > { %v12123_v6 = vld [vmem:[%s12940_s22 + $0x4e8] sm:$0xf0] }
 0x53f   : > { %6874 = vmatpush.bf16.xpose.msrb.mxu0 %v10687_v52  ;;  %v10912_v52 = vld [vmem:[%s12940_s22 + $0x42c] sm:$0xf0] }
 0x540   : > { %6887 = vmatpush.bf16.xpose.msrb.mxu1 %v10691_v35  ;;  %v12100_v35 = vld [vmem:[%s12940_s22 + $0x430] sm:$0xf0]  ;;  %v10915_v60 = vor.u32 %v12098_v51, %v10912_v52  ;;  %v11042_v51 = vld [vmem:[%s12940_s22 + $0x528] sm:$0xf] }
 0x541   : > { %6900 = vmatpush.bf16.xpose.msrb.mxu2 %v10779_v41  ;;  %6913 = vmatpush.bf16.xpose.msrb.mxu3 %v10783_v43  ;;  %v10823_v41 = vor.u32 %v12076_v39, %v10822_v38  ;;  %v10919_v49 = vor.u32 %v12100_v35, %v10918_v7  ;;  %v12086_v38 = vld [vmem:[%s12940_s22 + $0x3c4] sm:$0xf]  ;;  %v10864_v39 = vld [vmem:[%s12940_s22 + $0x3cc] sm:$0xf0]  ;;  %v12132_v52 = vld [vmem:[%s12940_s22 + $0x530] sm:$0xf0] }
 0x542   : > { %v12131_v7 = vld [vmem:[%s12940_s22 + $0x52c] sm:$0xf] }
 0x547   : > { %6875 = vmatpush.bf16.xpose.msrb.mxu0 %v10675_v42  ;;  %v12096_v42 = vld [vmem:[%s12940_s22 + $0x410] sm:$0xf0] }
 0x548   : > { %6888 = vmatpush.bf16.xpose.msrb.mxu1 %v10679_v56  ;;  %v10906_v56 = vld [vmem:[%s12940_s22 + $0x410] sm:$0xf] }
 0x549   : > { %6901 = vmatpush.bf16.xpose.msrb.mxu2 %v10767_v57  ;;  %6914 = vmatpush.bf16.xpose.msrb.mxu3 %v10771_v59  ;;  %v12097_v57 = vld [vmem:[%s12940_s22 + $0x418] sm:$0xf0]  ;;  %v10899_v59 = vor.u32 %v12096_v42, %v10898_v54  ;;  %v11030_v54 = vld [vmem:[%s12940_s22 + $0x510] sm:$0xf] }
 0x54a   : > { %v12129_v42 = vld [vmem:[%s12940_s22 + $0x518] sm:$0xf0] }
 0x54b   : > { %v6773_v37 = vpop.f32.mrf.mxu0 }
 0x54c   : > { %v6774_v19 = vadd.f32 %v6773_v37, %v6761_v14  ;;  %v6786_v36 = vpop.f32.mrf.mxu1  ;;  %v10882_v14 = vld [vmem:[%s12940_s22 + $0x3e0] sm:$0xf]  ;;  %v12064_v37 = vld [vmem:[%s12940_s22 + $0x310] sm:$0xf0] }
 0x54e   : > { %6876 = vmatmul.bf16.vlgmr.msrb.gmra.mxu0 %v12716_v0 }
 0x54f   : > { %6920 = vmatpush.bf16.xpose.msra.mxu0 %v10859_v46  ;;  %6889 = vmatmul.bf16.vlgmr.msrb.gmra.mxu1 %v12716_v0  ;;  %v10903_v46 = vor.u32 %v12095_v55, %v10900_v47  ;;  %v11032_v55 = vld [vmem:[%s12940_s22 + $0x51c] sm:$0xf0]  ;;  %v11038_v47 = vld [vmem:[%s12940_s22 + $0x518] sm:$0xf] }
 0x550   : > { %6933 = vmatpush.bf16.xpose.msra.mxu1 %v10947_v32  ;;  %6902 = vmatmul.bf16.vlgmr.msrb.gmra.mxu2 %v12716_v0 }
 0x551   : > { %6946 = vmatpush.bf16.xpose.msra.mxu2 %v10951_v62  ;;  %6959 = vmatpush.bf16.xpose.msra.mxu3 %v10955_v1  ;;  %v10907_v62 = vor.u32 %v12097_v57, %v10906_v56  ;;  %v12130_v56 = vld [vmem:[%s12940_s22 + $0x520] sm:$0xf0]  ;;  %v11126_v57 = vld [vmem:[%s12940_s22 + $0x5d0] sm:$0xf] }
 0x552   : > { %6915 = vmatmul.bf16.vlgmr.msrb.gmra.mxu3 %v12716_v0 }
 0x553   : > { %v6799_v43 = vpop.f32.mrf.mxu2  ;;  %v6775_v33 = vpop.f32.mrf.mxu0 }
 0x554   : > { %v6800_v44 = vadd.f32 %v6799_v43, %v6786_v36  ;;  %v6788_v28 = vpop.f32.mrf.mxu1  ;;  %v12087_v36 = vld [vmem:[%s12940_s22 + $0x3c8] sm:$0xf0]  ;;  %v11050_v43 = vld [vmem:[%s12940_s22 + $0x530] sm:$0xf]  ;;  %v10871_v33 = vor.u32 %v12088_v22, %v10870_v15  ;;  %v12144_v15 = vld [vmem:[%s12940_s22 + $0x590] sm:$0xf0] }
 0x555   : > { %v6812_v50 = vpop.f32.mrf.mxu3  ;;  %v11043_v28 = vor.u32 %v12132_v52, %v11042_v51 }
 0x556   : > { %v6813_v34 = vadd.f32 %v6812_v50, %v6800_v44  ;;  %v10867_v44 = vor.u32 %v12086_v38, %v10864_v39  ;;  %v12156_v50 = vld [vmem:[%s12940_s22 + $0x5f0] sm:$0xf0]  ;;  %v12121_v38 = vld [vmem:[%s12940_s22 + $0x4d8] sm:$0xf0]  ;;  %v11090_v39 = vld [vmem:[%s12940_s22 + $0x588] sm:$0xf] }
 0x557   : > { %6921 = vmatpush.bf16.xpose.msra.mxu0 %v10847_v12  ;;  %v10799_v12 = vor.u32 %v12070_v23, %v10798_v61  ;;  %v12126_v61 = vld [vmem:[%s12940_s22 + $0x500] sm:$0xf0]  ;;  %v12125_v23 = vld [vmem:[%s12940_s22 + $0x4fc] sm:$0xf] }
 0x558   : > { %6934 = vmatpush.bf16.xpose.msra.mxu1 %v10935_v48  ;;  %v7180_v25 = vrot.slane %v6813_v34, 7  ;;  %v10887_v48 = vor.u32 %v12093_v4, %v10886_v2  ;;  %v11020_v2 = vld [vmem:[%s12940_s22 + $0x504] sm:$0xf0]  ;;  %v11026_v4 = vld [vmem:[%s12940_s22 + $0x500] sm:$0xf] }
 0x559   : > { %6947 = vmatpush.bf16.xpose.msra.mxu2 %v10939_v3  ;;  %6960 = vmatpush.bf16.xpose.msra.mxu3 %v10943_v13  ;;  %v10891_v3 = vor.u32 %v12092_v5, %v10888_v9  ;;  %v10895_v13 = vor.u32 %v12094_v11, %v10894_v10  ;;  %v12127_v5 = vld [vmem:[%s12940_s22 + $0x508] sm:$0xf0]  ;;  %v11114_v9 = vld [vmem:[%s12940_s22 + $0x5b8] sm:$0xf]  ;;  %v12150_v10 = vld [vmem:[%s12940_s22 + $0x5c0] sm:$0xf0] }
 0x55a   : > { %v14491_v18 = vsel %vm2726_vm0, %v6774_v19, %v7180_v25  ;;  %v10862_v19 = vld [vmem:[%s12940_s22 + $0x3c0] sm:$0xf]  ;;  %v12128_v25 = vld [vmem:[%s12940_s22 + $0x514] sm:$0xf] }
 0x55b   : > { %v6801_v32 = vpop.f32.mrf.mxu2 }
 0x55c   : > { %v11039_v32 = vor.u32 %v12130_v56, %v11038_v47 }
 0x55d   : > { %v6814_v1 = vpop.f32.mrf.mxu3 }
 0x55e   : > { %v11018_v1 = vld [vmem:[%s12940_s22 + $0x4f8] sm:$0xf] }
 0x55f   : > { %6922 = vmatpush.bf16.xpose.msra.mxu0 %v10835_v27  ;;  %v10875_v27 = vor.u32 %v12090_v45, %v10874_v16  ;;  %v11019_v11 = vor.u32 %v12126_v61, %v11018_v1  ;;  %v11008_v16 = vld [vmem:[%s12940_s22 + $0x4ec] sm:$0xf0]  ;;  %v11014_v45 = vld [vmem:[%s12940_s22 + $0x4e8] sm:$0xf]  ;;  %v11066_v1 = vld [vmem:[%s12940_s22 + $0x558] sm:$0xf] }
 0x560   : > { %6935 = vmatpush.bf16.xpose.msra.mxu1 %v10923_v29  ;;  %v10879_v29 = vor.u32 %v12089_v17, %v10876_v20  ;;  %v12124_v17 = vld [vmem:[%s12940_s22 + $0x4f0] sm:$0xf0]  ;;  %v11102_v20 = vld [vmem:[%s12940_s22 + $0x5a0] sm:$0xf]  ;;  %v12138_v61 = vld [vmem:[%s12940_s22 + $0x560] sm:$0xf0] }
 0x561   : > { %6948 = vmatpush.bf16.xpose.msra.mxu2 %v10927_v30  ;;  %6961 = vmatpush.bf16.xpose.msra.mxu3 %v10931_v40  ;;  %v10883_v30 = vor.u32 %v12091_v24, %v10882_v14  ;;  %v10774_v40 = vld [vmem:[%s12940_s22 + $0x308] sm:$0xf]  ;;  %v12147_v14 = vld [vmem:[%s12940_s22 + $0x5a8] sm:$0xf0] }
 0x562   : > { %v10775_v35 = vor.u32 %v12064_v37, %v10774_v40  ;;  %v12120_v40 = vld [vmem:[%s12940_s22 + $0x4d0] sm:$0xf0]  ;;  %v12119_v37 = vld [vmem:[%s12940_s22 + $0x4cc] sm:$0xf] }
 0x567   : > { %6923 = vmatpush.bf16.xpose.msra.mxu0 %v10823_v41  ;;  %v11044_v41 = vld [vmem:[%s12940_s22 + $0x534] sm:$0xf0] }
 0x568   : > { %6936 = vmatpush.bf16.xpose.msra.mxu1 %v10911_v31  ;;  %v12133_v31 = vld [vmem:[%s12940_s22 + $0x538] sm:$0xf0]  ;;  %v11047_v34 = vor.u32 %v12131_v7, %v11044_v41 }
 0x569   : > { %6949 = vmatpush.bf16.xpose.msra.mxu2 %v10915_v60  ;;  %6962 = vmatpush.bf16.xpose.msra.mxu3 %v10919_v49  ;;  %v10863_v60 = vor.u32 %v12087_v36, %v10862_v19  ;;  %v11138_v49 = vld [vmem:[%s12940_s22 + $0x5e8] sm:$0xf]  ;;  %v11051_v21 = vor.u32 %v12133_v31, %v11050_v43  ;;  %v10996_v19 = vld [vmem:[%s12940_s22 + $0x4d4] sm:$0xf0]  ;;  %v11002_v36 = vld [vmem:[%s12940_s22 + $0x4d0] sm:$0xf]  ;;  %v11091_v43 = vor.u32 %v12144_v15, %v11090_v39 }
 0x56a   : > { %v11139_v53 = vor.u32 %v12156_v50, %v11138_v49  ;;  %v10999_v7 = vor.u32 %v12119_v37, %v10996_v19  ;;  %v10982_v31 = vld [vmem:[%s12940_s22 + $0x4b0] sm:$0xf]  ;;  %v10984_v49 = vld [vmem:[%s12940_s22 + $0x4bc] sm:$0xf0]  ;;  %v10990_v50 = vld [vmem:[%s12940_s22 + $0x4b8] sm:$0xf] }
 0x56b   : > { %v12179_v37 = vld [vmem:[%s12940_s22 + $0x6ac] sm:$0xf]  ;;  %v11236_v19 = vld [vmem:[%s12940_s22 + $0x6b4] sm:$0xf0] }
 0x56f   : > { %6924 = vmatpush.bf16.xpose.msra.mxu0 %v10811_v58  ;;  %v12153_v58 = vld [vmem:[%s12940_s22 + $0x5d8] sm:$0xf0] }
 0x570   : > { %6937 = vmatpush.bf16.xpose.msra.mxu1 %v10899_v59  ;;  %v11031_v59 = vor.u32 %v12129_v42, %v11030_v54 }
 0x571   : > { %6950 = vmatpush.bf16.xpose.msra.mxu2 %v10903_v46  ;;  %6963 = vmatpush.bf16.xpose.msra.mxu3 %v10907_v62  ;;  %v11035_v46 = vor.u32 %v12128_v25, %v11032_v55  ;;  %v11127_v62 = vor.u32 %v12153_v58, %v11126_v57  ;;  %v10970_v57 = vld [vmem:[%s12940_s22 + $0x498] sm:$0xf]  ;;  %v12114_v58 = vld [vmem:[%s12940_s22 + $0x4a0] sm:$0xf0] }
 0x577   : > { %6925 = vmatpush.bf16.xpose.msra.mxu0 %v10799_v12  ;;  %v11023_v12 = vor.u32 %v12125_v23, %v11020_v2  ;;  %v10971_v23 = vor.u32 %v12114_v58, %v10970_v57 }
 0x578   : > { %6938 = vmatpush.bf16.xpose.msra.mxu1 %v10887_v48  ;;  %v11027_v48 = vor.u32 %v12127_v5, %v11026_v4 }
 0x579   : > { %6951 = vmatpush.bf16.xpose.msra.mxu2 %v10891_v3  ;;  %6964 = vmatpush.bf16.xpose.msra.mxu3 %v10895_v13  ;;  %v11115_v3 = vor.u32 %v12150_v10, %v11114_v9  ;;  %v11006_v13 = vld [vmem:[%s12940_s22 + $0x4e0] sm:$0xf]  ;;  %v11067_v10 = vor.u32 %v12138_v61, %v11066_v1  ;;  %v12146_v61 = vld [vmem:[%s12940_s22 + $0x5a4] sm:$0xf] }
 0x57a   : > { %v11007_v24 = vor.u32 %v12123_v6, %v11006_v13  ;;  %v10966_v13 = vld [vmem:[%s12940_s22 + $0x488] sm:$0xf]  ;;  %v12112_v6 = vld [vmem:[%s12940_s22 + $0x490] sm:$0xf0] }
 0x57f   : > { %6926 = vmatpush.bf16.xpose.msra.mxu0 %v10787_v26  ;;  %v11011_v26 = vor.u32 %v12122_v8, %v11008_v16  ;;  %v11054_v8 = vld [vmem:[%s12940_s22 + $0x540] sm:$0xf]  ;;  %v12135_v16 = vld [vmem:[%s12940_s22 + $0x548] sm:$0xf0] }
 0x580   : > { %6939 = vmatpush.bf16.xpose.msra.mxu1 %v10875_v27  ;;  %v11015_v27 = vor.u32 %v12124_v17, %v11014_v45  ;;  %v12155_v45 = vld [vmem:[%s12940_s22 + $0x5ec] sm:$0xf]  ;;  %v11140_v17 = vld [vmem:[%s12940_s22 + $0x5f4] sm:$0xf0] }
 0x581   : > { %6952 = vmatpush.bf16.xpose.msra.mxu2 %v10879_v29  ;;  %6965 = vmatpush.bf16.xpose.msra.mxu3 %v10883_v30  ;;  %v11103_v29 = vor.u32 %v12147_v14, %v11102_v20  ;;  %v10994_v30 = vld [vmem:[%s12940_s22 + $0x4c8] sm:$0xf]  ;;  %v11146_v20 = vld [vmem:[%s12940_s22 + $0x5f0] sm:$0xf] }
 0x582   : > { %v10995_v22 = vor.u32 %v12120_v40, %v10994_v30  ;;  %v10967_v40 = vor.u32 %v12112_v6, %v10966_v13 }
 0x587   : > { %6927 = vmatpush.bf16.xpose.msra.mxu0 %v10775_v35  ;;  %v11003_v35 = vor.u32 %v12121_v38, %v11002_v36  ;;  %v11055_v36 = vor.u32 %v12135_v16, %v11054_v8  ;;  %v11143_v38 = vor.u32 %v12155_v45, %v11140_v17 }
 0x588   : > { %6940 = vmatpush.bf16.xpose.msra.mxu1 %v10863_v60  ;;  %v12117_v60 = vld [vmem:[%s12940_s22 + $0x4b8] sm:$0xf0] }
 0x589   : > { %6953 = vmatpush.bf16.xpose.msra.mxu2 %v10867_v44  ;;  %6966 = vmatpush.bf16.xpose.msra.mxu3 %v10871_v33  ;;  %v12116_v44 = vld [vmem:[%s12940_s22 + $0x4b4] sm:$0xf]  ;;  %v12118_v33 = vld [vmem:[%s12940_s22 + $0x4c0] sm:$0xf0] }
 0x58a   : > { %v10987_v42 = vor.u32 %v12116_v44, %v10984_v49  ;;  %v10991_v25 = vor.u32 %v12118_v33, %v10990_v50 }
 0x58b   : > { %v6825_v51 = vpop.f32.mrf.mxu0 }
 0x58c   : > { %v6838_v52 = vpop.f32.mrf.mxu1 }
 0x58d   : > { %v6839_v41 = vadd.f32 %v6838_v52, %v6825_v51  ;;  %v12152_v51 = vld [vmem:[%s12940_s22 + $0x5d4] sm:$0xf]  ;;  %v11128_v52 = vld [vmem:[%s12940_s22 + $0x5dc] sm:$0xf0] }
 0x58e   : > { %6928 = vmatmul.bf16.vlgmr.msra.gmra.mxu0 %v12716_v0  ;;  %v11131_v44 = vor.u32 %v12152_v51, %v11128_v52  ;;  %v12142_v51 = vld [vmem:[%s12940_s22 + $0x580] sm:$0xf0]  ;;  %v11174_v52 = vld [vmem:[%s12940_s22 + $0x630] sm:$0xf] }
 0x58f   : > { %6972 = vmatpush.bf16.xpose.msrb.mxu0 %v11043_v28  ;;  %6941 = vmatmul.bf16.vlgmr.msra.gmra.mxu1 %v12716_v0  ;;  %v11078_v28 = vld [vmem:[%s12940_s22 + $0x570] sm:$0xf] }
 0x590   : > { %6985 = vmatpush.bf16.xpose.msrb.mxu1 %v11047_v34  ;;  %6954 = vmatmul.bf16.vlgmr.msra.gmra.mxu2 %v12716_v0  ;;  %v12141_v34 = vld [vmem:[%s12940_s22 + $0x578] sm:$0xf0] }
 0x591   : > { %6998 = vmatpush.bf16.xpose.msrb.mxu2 %v11051_v21  ;;  %7011 = vmatpush.bf16.xpose.msrb.mxu3 %v11139_v53  ;;  %v10983_v21 = vor.u32 %v12117_v60, %v10982_v31  ;;  %v11079_v56 = vor.u32 %v12141_v34, %v11078_v28  ;;  %v12176_v31 = vld [vmem:[%s12940_s22 + $0x694] sm:$0xf]  ;;  %v11224_v60 = vld [vmem:[%s12940_s22 + $0x69c] sm:$0xf0]  ;;  %v12149_v28 = vld [vmem:[%s12940_s22 + $0x5bc] sm:$0xf] }
 0x592   : > { %6967 = vmatmul.bf16.vlgmr.msra.gmra.mxu3 %v12716_v0  ;;  %v11227_v33 = vor.u32 %v12176_v31, %v11224_v60  ;;  %v11116_v34 = vld [vmem:[%s12940_s22 + $0x5c4] sm:$0xf0] }
 0x593   : > { %v6827_v53 = vpop.f32.mrf.mxu0  ;;  %v6851_v54 = vpop.f32.mrf.mxu2 }
 0x594   : > { %v14569_v55 = vadd.f32 %v6851_v54, %v6839_v41  ;;  %v6840_v47 = vpop.f32.mrf.mxu1  ;;  %v11222_v41 = vld [vmem:[%s12940_s22 + $0x690] sm:$0xf]  ;;  %v12151_v53 = vld [vmem:[%s12940_s22 + $0x5c8] sm:$0xf0]  ;;  %v11210_v54 = vld [vmem:[%s12940_s22 + $0x678] sm:$0xf] }
 0x595   : > { %v14579_v4 = vpop.f32.mrf.mxu3  ;;  %v11212_v47 = vld [vmem:[%s12940_s22 + $0x684] sm:$0xf0] }
 0x597   : > { %6973 = vmatpush.bf16.xpose.msrb.mxu0 %v11031_v59  ;;  %v12113_v59 = vld [vmem:[%s12940_s22 + $0x49c] sm:$0xf] }
 0x598   : > { %6986 = vmatpush.bf16.xpose.msrb.mxu1 %v11035_v46  ;;  %v10972_v46 = vld [vmem:[%s12940_s22 + $0x4a4] sm:$0xf0] }
 0x599   : > { %6999 = vmatpush.bf16.xpose.msrb.mxu2 %v11039_v32  ;;  %7012 = vmatpush.bf16.xpose.msrb.mxu3 %v11127_v62  ;;  %v10978_v32 = vld [vmem:[%s12940_s22 + $0x4a0] sm:$0xf]  ;;  %v12115_v62 = vld [vmem:[%s12940_s22 + $0x4a8] sm:$0xf0]  ;;  %v10975_v5 = vor.u32 %v12113_v59, %v10972_v46 }
 0x59a   : > { %v10979_v9 = vor.u32 %v12115_v62, %v10978_v32 }
 0x59b   : > { %v6853_v2 = vpop.f32.mrf.mxu2 }
 0x59c   : > { %v11110_v2 = vld [vmem:[%s12940_s22 + $0x5a8] sm:$0xf] }
 0x59f   : > { %6974 = vmatpush.bf16.xpose.msrb.mxu0 %v11019_v11  ;;  %v10958_v11 = vld [vmem:[%s12940_s22 + $0x480] sm:$0xf] }
 0x5a0   : > { %6987 = vmatpush.bf16.xpose.msrb.mxu1 %v11023_v12  ;;  %v12111_v12 = vld [vmem:[%s12940_s22 + $0x488] sm:$0xf0] }
 0x5a1   : > { %7000 = vmatpush.bf16.xpose.msrb.mxu2 %v11027_v48  ;;  %7013 = vmatpush.bf16.xpose.msrb.mxu3 %v11115_v3  ;;  %v12110_v48 = vld [vmem:[%s12940_s22 + $0x484] sm:$0xf]  ;;  %v10960_v3 = vld [vmem:[%s12940_s22 + $0x48c] sm:$0xf0]  ;;  %v10959_v14 = vor.u32 %v12111_v12, %v10958_v11  ;;  %v7181_v11 = vrot.slane %v14569_v55, 6 }
 0x5a2   : > { %v10963_v30 = vor.u32 %v12110_v48, %v10960_v3  ;;  %v11200_v48 = vld [vmem:[%s12940_s22 + $0x66c] sm:$0xf0] }
 0x5a7   : > { %6975 = vmatpush.bf16.xpose.msrb.mxu0 %v11007_v24  ;;  %v12157_v24 = vld [vmem:[%s12940_s22 + $0x5f8] sm:$0xf0] }
 0x5a8   : > { %6988 = vmatpush.bf16.xpose.msrb.mxu1 %v11011_v26  ;;  %v11234_v26 = vld [vmem:[%s12940_s22 + $0x6a8] sm:$0xf]  ;;  %v11147_v39 = vor.u32 %v12157_v24, %v11146_v20  ;;  %v12143_v20 = vld [vmem:[%s12940_s22 + $0x58c] sm:$0xf]  ;;  %v11098_v24 = vld [vmem:[%s12940_s22 + $0x590] sm:$0xf] }
 0x5a9   : > { %7001 = vmatpush.bf16.xpose.msrb.mxu2 %v11015_v27  ;;  %7014 = vmatpush.bf16.xpose.msrb.mxu3 %v11103_v29  ;;  %v12180_v27 = vld [vmem:[%s12940_s22 + $0x6b0] sm:$0xf0]  ;;  %v6866_v29 = vpop.f32.mrf.mxu3 }
 0x5aa   : > { %v11235_v15 = vor.u32 %v12180_v27, %v11234_v26  ;;  %v12145_v26 = vld [vmem:[%s12940_s22 + $0x598] sm:$0xf0]  ;;  %v11186_v27 = vld [vmem:[%s12940_s22 + $0x648] sm:$0xf]  ;;  %v12168_v29 = vld [vmem:[%s12940_s22 + $0x650] sm:$0xf0] }
 0x5af   : > { %6976 = vmatpush.bf16.xpose.msrb.mxu0 %v10995_v22  ;;  %v11239_v22 = vor.u32 %v12179_v37, %v11236_v19  ;;  %v11099_v37 = vor.u32 %v12145_v26, %v11098_v24  ;;  %v11187_v19 = vor.u32 %v12168_v29, %v11186_v27  ;;  %v11230_v27 = vld [vmem:[%s12940_s22 + $0x698] sm:$0xf]  ;;  %v12178_v29 = vld [vmem:[%s12940_s22 + $0x6a0] sm:$0xf0] }
 0x5b0   : > { %6989 = vmatpush.bf16.xpose.msrb.mxu1 %v10999_v7  ;;  %v11134_v7 = vld [vmem:[%s12940_s22 + $0x5d8] sm:$0xf] }
 0x5b1   : > { %7002 = vmatpush.bf16.xpose.msrb.mxu2 %v11003_v35  ;;  %7015 = vmatpush.bf16.xpose.msrb.mxu3 %v11091_v43  ;;  %v12154_v35 = vld [vmem:[%s12940_s22 + $0x5e0] sm:$0xf0]  ;;  %v12177_v43 = vld [vmem:[%s12940_s22 + $0x698] sm:$0xf0] }
 0x5b2   : > { %v11135_v49 = vor.u32 %v12154_v35, %v11134_v7  ;;  %v11223_v50 = vor.u32 %v12177_v43, %v11222_v41  ;;  %v12165_v7 = vld [vmem:[%s12940_s22 + $0x638] sm:$0xf0]  ;;  %v12164_v35 = vld [vmem:[%s12940_s22 + $0x634] sm:$0xf]  ;;  %v11176_v41 = vld [vmem:[%s12940_s22 + $0x63c] sm:$0xf0] }
 0x5b7   : > { %6977 = vmatpush.bf16.xpose.msrb.mxu0 %v10983_v21  ;;  %v11122_v21 = vld [vmem:[%s12940_s22 + $0x5c0] sm:$0xf] }
 0x5b8   : > { %6990 = vmatpush.bf16.xpose.msrb.mxu1 %v10987_v42  ;;  %v12174_v42 = vld [vmem:[%s12940_s22 + $0x680] sm:$0xf0]  ;;  %v11123_v57 = vor.u32 %v12151_v53, %v11122_v21  ;;  %v11074_v21 = vld [vmem:[%s12940_s22 + $0x560] sm:$0xf]  ;;  %v12139_v53 = vld [vmem:[%s12940_s22 + $0x568] sm:$0xf0] }
 0x5b9   : > { %7003 = vmatpush.bf16.xpose.msrb.mxu2 %v10991_v25  ;;  %7016 = vmatpush.bf16.xpose.msrb.mxu3 %v11079_v56  ;;  %v12173_v25 = vld [vmem:[%s12940_s22 + $0x67c] sm:$0xf]  ;;  %v11119_v56 = vor.u32 %v12149_v28, %v11116_v34  ;;  %v11211_v58 = vor.u32 %v12174_v42, %v11210_v54  ;;  %v11068_v34 = vld [vmem:[%s12940_s22 + $0x564] sm:$0xf0]  ;;  %v11162_v54 = vld [vmem:[%s12940_s22 + $0x618] sm:$0xf] }
 0x5ba   : > { %v11215_v59 = vor.u32 %v12173_v25, %v11212_v47  ;;  %v12137_v28 = vld [vmem:[%s12940_s22 + $0x55c] sm:$0xf]  ;;  %v12162_v42 = vld [vmem:[%s12940_s22 + $0x620] sm:$0xf0]  ;;  %v11164_v47 = vld [vmem:[%s12940_s22 + $0x624] sm:$0xf0] }
 0x5bb   : > { %v12161_v25 = vld [vmem:[%s12940_s22 + $0x61c] sm:$0xf] }
 0x5bf   : > { %6978 = vmatpush.bf16.xpose.msrb.mxu0 %v10971_v23  ;;  %v11104_v23 = vld [vmem:[%s12940_s22 + $0x5ac] sm:$0xf0] }
 0x5c0   : > { %6991 = vmatpush.bf16.xpose.msrb.mxu1 %v10975_v5  ;;  %v12148_v5 = vld [vmem:[%s12940_s22 + $0x5b0] sm:$0xf0]  ;;  %v11107_v3 = vor.u32 %v12146_v61, %v11104_v23  ;;  %v11150_v23 = vld [vmem:[%s12940_s22 + $0x600] sm:$0xf] }
 0x5c1   : > { %7004 = vmatpush.bf16.xpose.msrb.mxu2 %v10979_v9  ;;  %7017 = vmatpush.bf16.xpose.msrb.mxu3 %v11067_v10  ;;  %v11198_v9 = vld [vmem:[%s12940_s22 + $0x660] sm:$0xf]  ;;  %v12171_v10 = vld [vmem:[%s12940_s22 + $0x668] sm:$0xf0]  ;;  %v11111_v6 = vor.u32 %v12148_v5, %v11110_v2  ;;  %v12136_v61 = vld [vmem:[%s12940_s22 + $0x550] sm:$0xf0] }
 0x5c2   : > { %v11199_v8 = vor.u32 %v12171_v10, %v11198_v9  ;;  %v12159_v2 = vld [vmem:[%s12940_s22 + $0x608] sm:$0xf0]  ;;  %v12158_v5 = vld [vmem:[%s12940_s22 + $0x604] sm:$0xf]  ;;  %v11152_v9 = vld [vmem:[%s12940_s22 + $0x60c] sm:$0xf0] }
 0x5c3   : > { %v11242_v10 = vld [vmem:[%s12940_s22 + $0x6b0] sm:$0xf] }
 0x5c7   : > { %6979 = vmatpush.bf16.xpose.msrb.mxu0 %v10959_v14  ;;  %v11092_v14 = vld [vmem:[%s12940_s22 + $0x594] sm:$0xf0] }
 0x5c8   : > { %6992 = vmatpush.bf16.xpose.msrb.mxu1 %v10963_v30  ;;  %v11188_v30 = vld [vmem:[%s12940_s22 + $0x654] sm:$0xf0] }
 0x5c9   : > { %7005 = vmatpush.bf16.xpose.msrb.mxu2 %v10967_v40  ;;  %7018 = vmatpush.bf16.xpose.msrb.mxu3 %v11055_v36  ;;  %v11095_v40 = vor.u32 %v12143_v20, %v11092_v14 }
 0x5cb   : > { %v6877_v46 = vpop.f32.mrf.mxu0 }
 0x5cc   : > { %v6878_v32 = vadd.f32 %v6877_v46, %v14579_v4  ;;  %v6890_v62 = vpop.f32.mrf.mxu1  ;;  %v12170_v4 = vld [vmem:[%s12940_s22 + $0x664] sm:$0xf]  ;;  %v11167_v46 = vor.u32 %v12161_v25, %v11164_v47  ;;  %v11294_v25 = vld [vmem:[%s12940_s22 + $0x720] sm:$0xf]  ;;  %v12195_v47 = vld [vmem:[%s12940_s22 + $0x728] sm:$0xf0] }
 0x5cd   : > { %v11203_v55 = vor.u32 %v12170_v4, %v11200_v48  ;;  %v12204_v48 = vld [vmem:[%s12940_s22 + $0x770] sm:$0xf0] }
 0x5ce   : > { %6980 = vmatmul.bf16.vlgmr.msrb.gmra.mxu0 %v12716_v0  ;;  %v6891_v1 = vadd.f32 %v6890_v62, %v6878_v32  ;;  %v12134_v32 = vld [vmem:[%s12940_s22 + $0x544] sm:$0xf]  ;;  %v11056_v62 = vld [vmem:[%s12940_s22 + $0x54c] sm:$0xf0] }
 0x5cf   : > { %7024 = vmatpush.bf16.xpose.msra.mxu0 %v11143_v38  ;;  %6993 = vmatmul.bf16.vlgmr.msrb.gmra.mxu1 %v12716_v0  ;;  %v11059_v4 = vor.u32 %v12134_v32, %v11056_v62 }
 0x5d0   : > { %7037 = vmatpush.bf16.xpose.msra.mxu1 %v11147_v39  ;;  %7006 = vmatmul.bf16.vlgmr.msrb.gmra.mxu2 %v12716_v0  ;;  %v7182_v12 = vrot.slane %v6891_v1, 5  ;;  %v12140_v39 = vld [vmem:[%s12940_s22 + $0x574] sm:$0xf]  ;;  %v11062_v1 = vld [vmem:[%s12940_s22 + $0x548] sm:$0xf] }
 0x5d1   : > { %7050 = vmatpush.bf16.xpose.msra.mxu2 %v11235_v15  ;;  %7063 = vmatpush.bf16.xpose.msra.mxu3 %v11239_v22  ;;  %v11080_v15 = vld [vmem:[%s12940_s22 + $0x57c] sm:$0xf0]  ;;  %v11086_v22 = vld [vmem:[%s12940_s22 + $0x578] sm:$0xf] }
 0x5d2   : > { %7019 = vmatmul.bf16.vlgmr.msrb.gmra.mxu3 %v12716_v0  ;;  %v7190_v13 = vsel %vm2728_vm1, %v7181_v11, %v7182_v12  ;;  %v11083_v43 = vor.u32 %v12140_v39, %v11080_v15  ;;  %v11087_v60 = vor.u32 %v12142_v51, %v11086_v22  ;;  %v12181_v11 = vld [vmem:[%s12940_s22 + $0x6b8] sm:$0xf0]  ;;  %v11330_v12 = vld [vmem:[%s12940_s22 + $0x768] sm:$0xf]  ;;  %v11218_v51 = vld [vmem:[%s12940_s22 + $0x680] sm:$0xf] }
 0x5d3   : > { %v14630_v16 = vsel %vm2730_vm2, %v14491_v18, %v7190_v13  ;;  %v6879_v45 = vpop.f32.mrf.mxu0  ;;  %v12167_v18 = vld [vmem:[%s12940_s22 + $0x64c] sm:$0xf]  ;;  %v6903_v38 = vpop.f32.mrf.mxu2  ;;  %v11332_v13 = vld [vmem:[%s12940_s22 + $0x774] sm:$0xf0]  ;;  %v11243_v20 = vor.u32 %v12181_v11, %v11242_v10  ;;  %v11331_v14 = vor.u32 %v12204_v48, %v11330_v12  ;;  %v11194_v10 = vld [vmem:[%s12940_s22 + $0x650] sm:$0xf] }
 0x5d4   : > { %v6892_v17 = vpop.f32.mrf.mxu1  ;;  %v11191_v36 = vor.u32 %v12167_v18, %v11188_v30  ;;  %v12205_v45 = vld [vmem:[%s12940_s22 + $0x778] sm:$0xf0]  ;;  %v11318_v18 = vld [vmem:[%s12940_s22 + $0x750] sm:$0xf]  ;;  %v11282_v12 = vld [vmem:[%s12940_s22 + $0x708] sm:$0xf] }
 0x5d5   : > { %v6916_v31 = vpop.f32.mrf.mxu3  ;;  %v11155_v17 = vor.u32 %v12158_v5, %v11152_v9  ;;  %v12201_v30 = vld [vmem:[%s12940_s22 + $0x758] sm:$0xf0] }
 0x5d6   : > { %v11319_v39 = vor.u32 %v12201_v30, %v11318_v18  ;;  %v12169_v11 = vld [vmem:[%s12940_s22 + $0x658] sm:$0xf0]  ;;  %v12166_v18 = vld [vmem:[%s12940_s22 + $0x640] sm:$0xf0]  ;;  %v11270_v30 = vld [vmem:[%s12940_s22 + $0x6f0] sm:$0xf] }
 0x5d7   : > { %7025 = vmatpush.bf16.xpose.msra.mxu0 %v11131_v44  ;;  %v11175_v44 = vor.u32 %v12165_v7, %v11174_v52  ;;  %v12175_v52 = vld [vmem:[%s12940_s22 + $0x688] sm:$0xf0]  ;;  %v11306_v7 = vld [vmem:[%s12940_s22 + $0x738] sm:$0xf] }
 0x5d8   : > { %7038 = vmatpush.bf16.xpose.msra.mxu1 %v11135_v49  ;;  %v14648_v49 = vadd.f32 %v6916_v31, %v6903_v38  ;;  %v11231_v38 = vor.u32 %v12178_v29, %v11230_v27  ;;  %v11314_v31 = vld [vmem:[%s12940_s22 + $0x740] sm:$0xf]  ;;  %v11182_v29 = vld [vmem:[%s12940_s22 + $0x638] sm:$0xf] }
 0x5d9   : > { %7051 = vmatpush.bf16.xpose.msra.mxu2 %v11223_v50  ;;  %7064 = vmatpush.bf16.xpose.msra.mxu3 %v11227_v33  ;;  %v11179_v50 = vor.u32 %v12164_v35, %v11176_v41  ;;  %v12198_v35 = vld [vmem:[%s12940_s22 + $0x740] sm:$0xf0]  ;;  %v12197_v41 = vld [vmem:[%s12940_s22 + $0x73c] sm:$0xf] }
 0x5db   : > { %v6905_v33 = vpop.f32.mrf.mxu2 }
 0x5df   : > { %7026 = vmatpush.bf16.xpose.msra.mxu0 %v11119_v56  ;;  %v11071_v56 = vor.u32 %v12137_v28, %v11068_v34 }
 0x5e0   : > { %7039 = vmatpush.bf16.xpose.msra.mxu1 %v11123_v57  ;;  %v6918_v57 = vpop.f32.mrf.mxu3 }
 0x5e1   : > { %7052 = vmatpush.bf16.xpose.msra.mxu2 %v11211_v58  ;;  %7065 = vmatpush.bf16.xpose.msra.mxu3 %v11215_v59  ;;  %v11075_v58 = vor.u32 %v12139_v53, %v11074_v21  ;;  %v11163_v59 = vor.u32 %v12162_v42, %v11162_v54  ;;  %v11206_v54 = vld [vmem:[%s12940_s22 + $0x668] sm:$0xf]  ;;  %v12172_v42 = vld [vmem:[%s12940_s22 + $0x670] sm:$0xf0]  ;;  %v11296_v57 = vld [vmem:[%s12940_s22 + $0x72c] sm:$0xf0] }
 0x5e7   : > { %7027 = vmatpush.bf16.xpose.msra.mxu0 %v11107_v3  ;;  %v12203_v3 = vld [vmem:[%s12940_s22 + $0x76c] sm:$0xf] }
 0x5e8   : > { %7040 = vmatpush.bf16.xpose.msra.mxu1 %v11111_v6  ;;  %v11063_v6 = vor.u32 %v12136_v61, %v11062_v1  ;;  %v11335_v24 = vor.u32 %v12203_v3, %v11332_v13  ;;  %v12191_v13 = vld [vmem:[%s12940_s22 + $0x70c] sm:$0xf] }
 0x5e9   : > { %7053 = vmatpush.bf16.xpose.msra.mxu2 %v11199_v8  ;;  %7066 = vmatpush.bf16.xpose.msra.mxu3 %v11203_v55  ;;  %v11151_v8 = vor.u32 %v12159_v2, %v11150_v23  ;;  %v11338_v55 = vld [vmem:[%s12940_s22 + $0x770] sm:$0xf] }
 0x5ea   : > { %v11339_v26 = vor.u32 %v12205_v45, %v11338_v55  ;;  %v12193_v55 = vld [vmem:[%s12940_s22 + $0x718] sm:$0xf0] }
 0x5ef   : > { %7028 = vmatpush.bf16.xpose.msra.mxu0 %v11095_v40  ;;  %v12200_v40 = vld [vmem:[%s12940_s22 + $0x754] sm:$0xf] }
 0x5f0   : > { %7041 = vmatpush.bf16.xpose.msra.mxu1 %v11099_v37  ;;  %v11320_v37 = vld [vmem:[%s12940_s22 + $0x75c] sm:$0xf0] }
 0x5f1   : > { %7054 = vmatpush.bf16.xpose.msra.mxu2 %v11187_v19  ;;  %7067 = vmatpush.bf16.xpose.msra.mxu3 %v11191_v36  ;;  %v11326_v19 = vld [vmem:[%s12940_s22 + $0x758] sm:$0xf]  ;;  %v12202_v36 = vld [vmem:[%s12940_s22 + $0x760] sm:$0xf0]  ;;  %v11323_v15 = vor.u32 %v12200_v40, %v11320_v37  ;;  %v12189_v40 = vld [vmem:[%s12940_s22 + $0x6f8] sm:$0xf0] }
 0x5f2   : > { %v11327_v22 = vor.u32 %v12202_v36, %v11326_v19  ;;  %v12188_v37 = vld [vmem:[%s12940_s22 + $0x6f4] sm:$0xf]  ;;  %v11272_v19 = vld [vmem:[%s12940_s22 + $0x6fc] sm:$0xf0]  ;;  %v11278_v36 = vld [vmem:[%s12940_s22 + $0x6f8] sm:$0xf] }
 0x5f7   : > { %7029 = vmatpush.bf16.xpose.msra.mxu0 %v11083_v43  ;;  %v11308_v43 = vld [vmem:[%s12940_s22 + $0x744] sm:$0xf0] }
 0x5f8   : > { %7042 = vmatpush.bf16.xpose.msra.mxu1 %v11087_v60  ;;  %v12199_v60 = vld [vmem:[%s12940_s22 + $0x748] sm:$0xf0]  ;;  %v11311_v33 = vor.u32 %v12197_v41, %v11308_v43  ;;  %v12186_v41 = vld [vmem:[%s12940_s22 + $0x6e0] sm:$0xf0]  ;;  %v12185_v43 = vld [vmem:[%s12940_s22 + $0x6dc] sm:$0xf] }
 0x5f9   : > { %7055 = vmatpush.bf16.xpose.msra.mxu2 %v11175_v44  ;;  %7068 = vmatpush.bf16.xpose.msra.mxu3 %v11179_v50  ;;  %v11219_v44 = vor.u32 %v12175_v52, %v11218_v51  ;;  %v11307_v50 = vor.u32 %v12198_v35, %v11306_v7  ;;  %v11315_v28 = vor.u32 %v12199_v60, %v11314_v31  ;;  %v11170_v52 = vld [vmem:[%s12940_s22 + $0x620] sm:$0xf]  ;;  %v12163_v7 = vld [vmem:[%s12940_s22 + $0x628] sm:$0xf0]  ;;  %v11258_v35 = vld [vmem:[%s12940_s22 + $0x6d8] sm:$0xf] }
 0x5fa   : > { %v11260_v31 = vld [vmem:[%s12940_s22 + $0x6e4] sm:$0xf0]  ;;  %v11266_v60 = vld [vmem:[%s12940_s22 + $0x6e0] sm:$0xf] }
 0x5ff   : > { %7030 = vmatpush.bf16.xpose.msra.mxu0 %v11071_v56  ;;  %v12194_v56 = vld [vmem:[%s12940_s22 + $0x724] sm:$0xf] }
 0x600   : > { %7043 = vmatpush.bf16.xpose.msra.mxu1 %v11075_v58  ;;  %v11302_v58 = vld [vmem:[%s12940_s22 + $0x728] sm:$0xf]  ;;  %v11299_v62 = vor.u32 %v12194_v56, %v11296_v57  ;;  %v12184_v57 = vld [vmem:[%s12940_s22 + $0x6d0] sm:$0xf0] }
 0x601   : > { %7056 = vmatpush.bf16.xpose.msra.mxu2 %v11163_v59  ;;  %7069 = vmatpush.bf16.xpose.msra.mxu3 %v11167_v46  ;;  %v12196_v59 = vld [vmem:[%s12940_s22 + $0x730] sm:$0xf0]  ;;  %v11207_v46 = vor.u32 %v12172_v42, %v11206_v54  ;;  %v11246_v54 = vld [vmem:[%s12940_s22 + $0x6c0] sm:$0xf]  ;;  %v12183_v42 = vld [vmem:[%s12940_s22 + $0x6c8] sm:$0xf0] }
 0x602   : > { %v11303_v61 = vor.u32 %v12196_v59, %v11302_v58  ;;  %v11254_v56 = vld [vmem:[%s12940_s22 + $0x6c8] sm:$0xf]  ;;  %v12228_v59 = vld [vmem:[%s12940_s22 + $0x830] sm:$0xf0] }
 0x603   : > { %v11426_v58 = vld [vmem:[%s12940_s22 + $0x828] sm:$0xf] }
 0x607   : > { %7031 = vmatpush.bf16.xpose.msra.mxu0 %v11059_v4  ;;  %v12192_v4 = vld [vmem:[%s12940_s22 + $0x710] sm:$0xf0] }
 0x608   : > { %7044 = vmatpush.bf16.xpose.msra.mxu1 %v11063_v6  ;;  %v11284_v6 = vld [vmem:[%s12940_s22 + $0x714] sm:$0xf0] }
 0x609   : > { %7057 = vmatpush.bf16.xpose.msra.mxu2 %v11151_v8  ;;  %7070 = vmatpush.bf16.xpose.msra.mxu3 %v11155_v17  ;;  %v11290_v8 = vld [vmem:[%s12940_s22 + $0x710] sm:$0xf]  ;;  %v11195_v17 = vor.u32 %v12169_v11, %v11194_v10  ;;  %v7217_v11 = vld [vmem:[#allocation9] sm:$0xff] }
 0x60b   : > { %v6929_v34 = vpop.f32.mrf.mxu0 }
 0x60c   : > { %v6930_v21 = vadd.f32 %v6929_v34, %v14648_v49  ;;  %v6942_v53 = vpop.f32.mrf.mxu1  ;;  %v11295_v49 = vor.u32 %v12195_v47, %v11294_v25  ;;  %v12182_v25 = vld [vmem:[%s12940_s22 + $0x6c4] sm:$0xf]  ;;  %v11248_v47 = vld [vmem:[%s12940_s22 + $0x6cc] sm:$0xf0] }
 0x60e   : > { %7032 = vmatmul.bf16.vlgmr.msra.gmra.mxu0 %v12716_v0  ;;  %v7183_v48 = vrot.slane %v6930_v21, 4  ;;  %v11158_v21 = vld [vmem:[%s12940_s22 + $0x608] sm:$0xf] }
 0x60f   : > { %7076 = vmatpush.bf16.xpose.msrb.mxu0 %v11243_v20  ;;  %7045 = vmatmul.bf16.vlgmr.msra.gmra.mxu1 %v12716_v0  ;;  %v11283_v20 = vor.u32 %v12192_v4, %v11282_v12  ;;  %v11414_v12 = vld [vmem:[%s12940_s22 + $0x810] sm:$0xf]  ;;  %v12225_v4 = vld [vmem:[%s12940_s22 + $0x818] sm:$0xf0] }
 0x610   : > { %7089 = vmatpush.bf16.xpose.msrb.mxu1 %v11331_v14  ;;  %7058 = vmatmul.bf16.vlgmr.msra.gmra.mxu2 %v12716_v0  ;;  %v11287_v14 = vor.u32 %v12191_v13, %v11284_v6  ;;  %v11422_v13 = vld [vmem:[%s12940_s22 + $0x818] sm:$0xf]  ;;  %v12226_v6 = vld [vmem:[%s12940_s22 + $0x820] sm:$0xf0] }
 0x611   : > { %7102 = vmatpush.bf16.xpose.msrb.mxu2 %v11335_v24  ;;  %7115 = vmatpush.bf16.xpose.msrb.mxu3 %v11339_v26  ;;  %v11291_v26 = vor.u32 %v12193_v55, %v11290_v8  ;;  %v11415_v8 = vor.u32 %v12225_v4, %v11414_v12  ;;  %v11354_v4 = vld [vmem:[%s12940_s22 + $0x798] sm:$0xf] }
 0x612   : > { %7071 = vmatmul.bf16.vlgmr.msra.gmra.mxu3 %v12716_v0 }
 0x613   : > { %v6955_v32 = vpop.f32.mrf.mxu2  ;;  %v6931_v2 = vpop.f32.mrf.mxu0 }
 0x614   : > { %v6956_v1 = vadd.f32 %v6955_v32, %v6942_v53  ;;  %v6944_v5 = vpop.f32.mrf.mxu1  ;;  %v12160_v53 = vld [vmem:[%s12940_s22 + $0x610] sm:$0xf0]  ;;  %v11255_v2 = vor.u32 %v12184_v57, %v11254_v56  ;;  %v7220_v56 = vld [vmem:[#allocation9 + $0x18] sm:$0xff] }
 0x615   : > { %v6968_v23 = vpop.f32.mrf.mxu3  ;;  %v11159_v32 = vor.u32 %v12160_v53, %v11158_v21  ;;  %v11427_v5 = vor.u32 %v12228_v59, %v11426_v58  ;;  %v11386_v21 = vld [vmem:[%s12940_s22 + $0x7d0] sm:$0xf]  ;;  %v12217_v53 = vld [vmem:[%s12940_s22 + $0x7d8] sm:$0xf0] }
 0x616   : > { %v6969_v9 = vadd.f32 %v6968_v23, %v6956_v1  ;;  %v12229_v1 = vld [vmem:[%s12940_s22 + $0x838] sm:$0xf0]  ;;  %v11251_v23 = vor.u32 %v12182_v25, %v11248_v47  ;;  %v11387_v47 = vor.u32 %v12217_v53, %v11386_v21  ;;  %v11366_v58 = vld [vmem:[%s12940_s22 + $0x7b0] sm:$0xf]  ;;  %v7208_v21 = vld [vmem:[#allocation2 + $0x8] sm:$0xff] }
 0x617   : > { %7077 = vmatpush.bf16.xpose.msrb.mxu0 %v11231_v38  ;;  %v12190_v38 = vld [vmem:[%s12940_s22 + $0x700] sm:$0xf0]  ;;  %v12213_v59 = vld [vmem:[%s12940_s22 + $0x7b8] sm:$0xf0] }
 0x618   : > { %7090 = vmatpush.bf16.xpose.msrb.mxu1 %v11319_v39  ;;  %v7184_v3 = vrot.slane %v6969_v9, 3  ;;  %v11183_v39 = vor.u32 %v12166_v18, %v11182_v29  ;;  %v11279_v51 = vor.u32 %v12190_v38, %v11278_v36  ;;  %v11410_v29 = vld [vmem:[%s12940_s22 + $0x800] sm:$0xf]  ;;  %v12223_v18 = vld [vmem:[%s12940_s22 + $0x808] sm:$0xf0] }
 0x619   : > { %7103 = vmatpush.bf16.xpose.msrb.mxu2 %v11323_v15  ;;  %7116 = vmatpush.bf16.xpose.msrb.mxu3 %v11327_v22  ;;  %v11271_v15 = vor.u32 %v12189_v40, %v11270_v30  ;;  %v11275_v22 = vor.u32 %v12188_v37, %v11272_v19  ;;  %v11411_v37 = vor.u32 %v12223_v18, %v11410_v29  ;;  %v7207_v19 = vld [vmem:[#allocation2] sm:$0xff]  ;;  %v12207_v29 = vld [vmem:[%s12940_s22 + $0x788] sm:$0xf0] }
 0x61a   : > { %v14712_v45 = vsel %vm2732_vm3, %v7183_v48, %v7184_v3  ;;  %v12224_v48 = vld [vmem:[%s12940_s22 + $0x814] sm:$0xf]  ;;  %v11416_v3 = vld [vmem:[%s12940_s22 + $0x81c] sm:$0xf0]  ;;  %v14760_v36 = vmul.f32 0.0026041667, %v7207_v19 }
 0x61b   : > { %v6957_v24 = vpop.f32.mrf.mxu2  ;;  %v11419_v55 = vor.u32 %v12224_v48, %v11416_v3  ;;  %v11390_v38 = vld [vmem:[%s12940_s22 + $0x7e0] sm:$0xf]  ;;  %v12210_v48 = vld [vmem:[%s12940_s22 + $0x7a0] sm:$0xf0]  ;;  %v12209_v3 = vld [vmem:[%s12940_s22 + $0x79c] sm:$0xf] }
 0x61c   : > { %v12222_v24 = vld [vmem:[%s12940_s22 + $0x800] sm:$0xf0] }
 0x61d   : > { %v6970_v27 = vpop.f32.mrf.mxu3  ;;  %v12206_v18 = vld [vmem:[%s12940_s22 + $0x784] sm:$0xf] }
 0x61e   : > { %v11404_v27 = vld [vmem:[%s12940_s22 + $0x804] sm:$0xf0] }
 0x61f   : > { %7078 = vmatpush.bf16.xpose.msrb.mxu0 %v11219_v44  ;;  %v12187_v44 = vld [vmem:[%s12940_s22 + $0x6e8] sm:$0xf0] }
 0x620   : > { %7091 = vmatpush.bf16.xpose.msrb.mxu1 %v11307_v50  ;;  %v11171_v50 = vor.u32 %v12163_v7, %v11170_v52  ;;  %v11267_v34 = vor.u32 %v12187_v44, %v11266_v60  ;;  %v12220_v52 = vld [vmem:[%s12940_s22 + $0x7f0] sm:$0xf0]  ;;  %v11378_v60 = vld [vmem:[%s12940_s22 + $0x7c8] sm:$0xf] }
 0x621   : > { %7104 = vmatpush.bf16.xpose.msrb.mxu2 %v11311_v33  ;;  %7117 = vmatpush.bf16.xpose.msrb.mxu3 %v11315_v28  ;;  %v11259_v33 = vor.u32 %v12186_v41, %v11258_v35  ;;  %v11263_v28 = vor.u32 %v12185_v43, %v11260_v31  ;;  %v7256_v35 = vperm.slane %v14760_v36, 0  ;;  %v7219_v31 = vld [vmem:[#allocation9 + $0x10] sm:$0xff] }
 0x622   : > { %v12216_v44 = vld [vmem:[%s12940_s22 + $0x7d0] sm:$0xf0] }
 0x627   : > { %7079 = vmatpush.bf16.xpose.msrb.mxu0 %v11207_v46  ;;  %v12227_v46 = vld [vmem:[%s12940_s22 + $0x82c] sm:$0xf] }
 0x628   : > { %7092 = vmatpush.bf16.xpose.msrb.mxu1 %v11295_v49  ;;  %v11428_v49 = vld [vmem:[%s12940_s22 + $0x834] sm:$0xf0] }
 0x629   : > { %7105 = vmatpush.bf16.xpose.msrb.mxu2 %v11299_v62  ;;  %7118 = vmatpush.bf16.xpose.msrb.mxu3 %v11303_v61  ;;  %v11434_v62 = vld [vmem:[%s12940_s22 + $0x830] sm:$0xf]  ;;  %v11247_v61 = vor.u32 %v12183_v42, %v11246_v54  ;;  %v11431_v9 = vor.u32 %v12227_v46, %v11428_v49  ;;  %v11379_v54 = vor.u32 %v12216_v44, %v11378_v60  ;;  %v7257_v42 = vperm.slane %v14760_v36, 1  ;;  %v12212_v46 = vld [vmem:[%s12940_s22 + $0x7b4] sm:$0xf] }
 0x62a   : > { %v11435_v10 = vor.u32 %v12229_v1, %v11434_v62  ;;  %v11368_v62 = vld [vmem:[%s12940_s22 + $0x7bc] sm:$0xf0]  ;;  %v11374_v1 = vld [vmem:[%s12940_s22 + $0x7b8] sm:$0xf]  ;;  %v7231_v60 = vld [vmem:[#allocation9 + $0x70] sm:$0xff] }
 0x62f   : > { %7080 = vmatpush.bf16.xpose.msrb.mxu0 %v11195_v17  ;;  %v11423_v17 = vor.u32 %v12226_v6, %v11422_v13  ;;  %v11356_v13 = vld [vmem:[%s12940_s22 + $0x7a4] sm:$0xf0]  ;;  %v11362_v6 = vld [vmem:[%s12940_s22 + $0x7a0] sm:$0xf] }
 0x630   : > { %7093 = vmatpush.bf16.xpose.msrb.mxu1 %v11283_v20  ;;  %v7218_v20 = vld [vmem:[#allocation9 + $0x8] sm:$0xff] }
 0x631   : > { %7106 = vmatpush.bf16.xpose.msrb.mxu2 %v11287_v14  ;;  %7119 = vmatpush.bf16.xpose.msrb.mxu3 %v11291_v26  ;;  %v11402_v14 = vld [vmem:[%s12940_s22 + $0x7f8] sm:$0xf]  ;;  %v12221_v26 = vld [vmem:[%s12940_s22 + $0x7fc] sm:$0xf] }
 0x632   : > { %v11403_v30 = vor.u32 %v12222_v24, %v11402_v14  ;;  %v11407_v40 = vor.u32 %v12221_v26, %v11404_v27  ;;  %v7222_v24 = vld [vmem:[#allocation9 + $0x28] sm:$0xff]  ;;  %v11342_v27 = vld [vmem:[%s12940_s22 + $0x780] sm:$0xf] }
 0x633   : > { %v11343_v19 = vor.u32 %v12207_v29, %v11342_v27 }
 0x637   : > { %7081 = vmatpush.bf16.xpose.msrb.mxu0 %v11183_v39  ;;  %v12219_v39 = vld [vmem:[%s12940_s22 + $0x7e8] sm:$0xf0] }
 0x638   : > { %7094 = vmatpush.bf16.xpose.msrb.mxu1 %v11271_v15  ;;  %v12218_v15 = vld [vmem:[%s12940_s22 + $0x7e4] sm:$0xf]  ;;  %v11391_v7 = vor.u32 %v12219_v39, %v11390_v38  ;;  %v7260_v38 = vperm.slane %v14760_v36, 4 }
 0x639   : > { %7107 = vmatpush.bf16.xpose.msrb.mxu2 %v11275_v22  ;;  %7120 = vmatpush.bf16.xpose.msrb.mxu3 %v11279_v51  ;;  %v11392_v22 = vld [vmem:[%s12940_s22 + $0x7ec] sm:$0xf0]  ;;  %v11398_v51 = vld [vmem:[%s12940_s22 + $0x7e8] sm:$0xf] }
 0x63a   : > { %v11395_v41 = vor.u32 %v12218_v15, %v11392_v22  ;;  %v11399_v43 = vor.u32 %v12220_v52, %v11398_v51  ;;  %v7223_v22 = vld [vmem:[#allocation9 + $0x30] sm:$0xff]  ;;  %v7225_v51 = vld [vmem:[#allocation9 + $0x40] sm:$0xff]  ;;  %v7226_v52 = vld [vmem:[#allocation9 + $0x48] sm:$0xff] }
 0x63f   : > { %7082 = vmatpush.bf16.xpose.msrb.mxu0 %v11171_v50  ;;  %v12215_v50 = vld [vmem:[%s12940_s22 + $0x7cc] sm:$0xf] }
 0x640   : > { %7095 = vmatpush.bf16.xpose.msrb.mxu1 %v11259_v33 }
 0x641   : > { %7108 = vmatpush.bf16.xpose.msrb.mxu2 %v11263_v28  ;;  %7121 = vmatpush.bf16.xpose.msrb.mxu3 %v11267_v34  ;;  %v11380_v34 = vld [vmem:[%s12940_s22 + $0x7d4] sm:$0xf0] }
 0x642   : > { %v11383_v25 = vor.u32 %v12215_v50, %v11380_v34  ;;  %v7262_v50 = vperm.slane %v14760_v36, 6  ;;  %v7228_v34 = vld [vmem:[#allocation9 + $0x58] sm:$0xff] }
 0x647   : > { %7083 = vmatpush.bf16.xpose.msrb.mxu0 %v11159_v32 }
 0x648   : > { %7096 = vmatpush.bf16.xpose.msrb.mxu1 %v11247_v61  ;;  %v12214_v61 = vld [vmem:[%s12940_s22 + $0x7c0] sm:$0xf0] }
 0x649   : > { %7109 = vmatpush.bf16.xpose.msrb.mxu2 %v11251_v23  ;;  %7122 = vmatpush.bf16.xpose.msrb.mxu3 %v11255_v2  ;;  %v11367_v23 = vor.u32 %v12213_v59, %v11366_v58  ;;  %v7258_v2 = vperm.slane %v14760_v36, 2  ;;  %v7263_v59 = vperm.slane %v14760_v36, 7 }
 0x64b   : > { %v14772_v33 = vpop.f32.mrf.mxu0 }
 0x64c   : > { %v14774_v28 = vpop.f32.mrf.mxu1 }
 0x64d   : > { %v6995_v44 = vadd.f32 %v14774_v28, %v14772_v33 }
 0x64e   : > { %7084 = vmatmul.bf16.vlgmr.msrb.gmra.mxu0 %v12716_v0 }
 0x64f   : > { %7128 = vmatpush.bf16.xpose.msra.mxu0 %v11427_v5  ;;  %7097 = vmatmul.bf16.vlgmr.msrb.gmra.mxu1 %v12716_v0  ;;  %v11371_v5 = vor.u32 %v12212_v46, %v11368_v62  ;;  %v7167_v62 = vld [vmem:[#allocation2 + $0x16] sm:$0xff] }
 0x650   : > { %7141 = vmatpush.bf16.xpose.msra.mxu1 %v11431_v9  ;;  %7110 = vmatmul.bf16.vlgmr.msrb.gmra.mxu2 %v12716_v0  ;;  %v11375_v9 = vor.u32 %v12214_v61, %v11374_v1  ;;  %v7235_v61 = vld [vmem:[#allocation9 + $0x90] sm:$0xff] }
 0x651   : > { %7154 = vmatpush.bf16.xpose.msra.mxu2 %v11435_v10  ;;  %7337 = vmatpush.xpose.msra.mxu3 %v7217_v11  ;;  %v7221_v10 = vld [vmem:[#allocation9 + $0x20] sm:$0xff] }
 0x652   : > { %7123 = vmatmul.bf16.vlgmr.msrb.gmra.mxu3 %v12716_v0 }
 0x653   : > { %v14780_v57 = vpop.f32.mrf.mxu2  ;;  %v6983_v32 = vpop.f32.mrf.mxu0 }
 0x654   : > { %v6996_v49 = vpop.f32.mrf.mxu1  ;;  %v7232_v32 = vld [vmem:[#allocation9 + $0x78] sm:$0xff] }
 0x655   : > { %7357 = vmatpush.xpose.msrb.mxu3 %v7218_v20  ;;  %v14789_v11 = vpop.f32.mrf.mxu3  ;;  %v11359_v20 = vor.u32 %v12209_v3, %v11356_v13  ;;  %v7233_v49 = vld [vmem:[#allocation9 + $0x80] sm:$0xff] }
 0x657   : > { %7129 = vmatpush.bf16.xpose.msra.mxu0 %v11415_v8  ;;  %v12211_v8 = vld [vmem:[%s12940_s22 + $0x7a8] sm:$0xf0] }
 0x658   : > { %7142 = vmatpush.bf16.xpose.msra.mxu1 %v11419_v55  ;;  %v11355_v55 = vor.u32 %v12210_v48, %v11354_v4  ;;  %v11363_v14 = vor.u32 %v12211_v8, %v11362_v6  ;;  %v7237_v6 = vld [vmem:[#allocation9 + $0xa0] sm:$0xff]  ;;  %v7238_v8 = vld [vmem:[#allocation9 + $0xa8] sm:$0xff] }
 0x659   : > { %7155 = vmatpush.bf16.xpose.msra.mxu2 %v11423_v17  ;;  %v7259_v17 = vperm.slane %v14760_v36, 3 }
 0x65b   : > { %v7009_v12 = vpop.f32.mrf.mxu2 }
 0x65d   : > { %v7022_v26 = vpop.f32.mrf.mxu3 }
 0x65f   : > { %7130 = vmatpush.bf16.xpose.msra.mxu0 %v11403_v30  ;;  %v11344_v30 = vld [vmem:[%s12940_s22 + $0x78c] sm:$0xf0] }
 0x660   : > { %7143 = vmatpush.bf16.xpose.msra.mxu1 %v11407_v40  ;;  %v11350_v40 = vld [vmem:[%s12940_s22 + $0x788] sm:$0xf]  ;;  %v11347_v39 = vor.u32 %v12206_v18, %v11344_v30  ;;  %v7240_v18 = vld [vmem:[#allocation9 + $0xb8] sm:$0xff] }
 0x661   : > { %7156 = vmatpush.bf16.xpose.msra.mxu2 %v11411_v37  ;;  %v12208_v37 = vld [vmem:[%s12940_s22 + $0x790] sm:$0xf0] }
 0x662   : > { %7338 = vmatmul.f32.vlgmr.msra.gmra.mxu3 %v7256_v35  ;;  %v11351_v15 = vor.u32 %v12208_v37, %v11350_v40  ;;  %v7261_v35 = vperm.slane %v14760_v36, 5 }
 0x663   : > { %7377 = vmatpush.xpose.msra.mxu3 %v7219_v31  ;;  %v7230_v31 = vld [vmem:[#allocation9 + $0x68] sm:$0xff] }
 0x667   : > { %7131 = vmatpush.bf16.xpose.msra.mxu0 %v11391_v7  ;;  %v7227_v7 = vld [vmem:[#allocation9 + $0x50] sm:$0xff] }
 0x668   : > { %7144 = vmatpush.bf16.xpose.msra.mxu1 %v11395_v41  ;;  %v7224_v41 = vld [vmem:[#allocation9 + $0x38] sm:$0xff] }
 0x669   : > { %7157 = vmatpush.bf16.xpose.msra.mxu2 %v11399_v43  ;;  %v7229_v43 = vld [vmem:[#allocation9 + $0x60] sm:$0xff] }
 0x66a   : > { %7358 = vmatmul.f32.vlgmr.msrb.gmra.mxu3 %v7257_v42 }
 0x66b   : > { %7397 = vmatpush.xpose.msrb.mxu3 %v7220_v56 }
 0x66f   : > { %7132 = vmatpush.bf16.xpose.msra.mxu0 %v11379_v54  ;;  %v7008_v54 = vadd.f32 %v14780_v57, %v6995_v44  ;;  %v7234_v57 = vld [vmem:[#allocation9 + $0x88] sm:$0xff]  ;;  %v7244_v44 = vld [vmem:[#allocation9 + $0xd8] sm:$0xff] }
 0x670   : > { %7145 = vmatpush.bf16.xpose.msra.mxu1 %v11383_v25 }
 0x671   : > { %7158 = vmatpush.bf16.xpose.msra.mxu2 %v11387_v47  ;;  %v7185_v56 = vrot.slane %v7008_v54, 2 }
 0x672   : > { %7378 = vmatmul.f32.vlgmr.msra.gmra.mxu3 %v7258_v2 }
 0x673   : > { %7417 = vmatpush.xpose.msra.mxu3 %v7221_v10 }
 0x677   : > { %7133 = vmatpush.bf16.xpose.msra.mxu0 %v11367_v23 }
 0x678   : > { %7146 = vmatpush.bf16.xpose.msra.mxu1 %v11371_v5 }
 0x679   : > { %7159 = vmatpush.bf16.xpose.msra.mxu2 %v11375_v9 }
 0x67a   : > { %7398 = vmatmul.f32.vlgmr.msrb.gmra.mxu3 %v7259_v17 }
 0x67b   : > { %7437 = vmatpush.xpose.msrb.mxu3 %v7222_v24 }
 0x67f   : > { %7134 = vmatpush.bf16.xpose.msra.mxu0 %v11355_v55  ;;  %v7239_v55 = vld [vmem:[#allocation9 + $0xb0] sm:$0xff] }
 0x680   : > { %7147 = vmatpush.bf16.xpose.msra.mxu1 %v11359_v20 }
 0x681   : > { %7160 = vmatpush.bf16.xpose.msra.mxu2 %v11363_v14 }
 0x682   : > { %7418 = vmatmul.f32.vlgmr.msra.gmra.mxu3 %v7260_v38 }
 0x683   : > { %7457 = vmatpush.xpose.msra.mxu3 %v7223_v22 }
 0x687   : > { %7135 = vmatpush.bf16.xpose.msra.mxu0 %v11343_v19 }
 0x688   : > { %7148 = vmatpush.bf16.xpose.msra.mxu1 %v11347_v39 }
 0x689   : > { %7161 = vmatpush.bf16.xpose.msra.mxu2 %v11351_v15 }
 0x68a   : > { %7438 = vmatmul.f32.vlgmr.msrb.gmra.mxu3 %v7261_v35 }
 0x68b   : > { %7477 = vmatpush.xpose.msrb.mxu3 %v7224_v41  ;;  %v7033_v53 = vpop.f32.mrf.mxu0 }
 0x68c   : > { %v7034_v42 = vadd.f32 %v7033_v53, %v14789_v11  ;;  %v7046_v25 = vpop.f32.mrf.mxu1  ;;  %v7248_v53 = vld [vmem:[#allocation9 + $0xf8] sm:$0xff] }
 0x68e   : > { %7136 = vmatmul.bf16.vlgmr.msra.gmra.mxu0 %v12716_v0  ;;  %v7047_v47 = vadd.f32 %v7046_v25, %v7034_v42  ;;  %v7246_v25 = vld [vmem:[#allocation9 + $0xe8] sm:$0xff] }
 0x68f   : > { %7497 = vmatpush.xpose.msrb.mxu0 %v7225_v51  ;;  %7149 = vmatmul.bf16.vlgmr.msra.gmra.mxu1 %v12716_v0 }
 0x690   : > { %7517 = vmatpush.xpose.msrb.mxu1 %v7226_v52  ;;  %7162 = vmatmul.bf16.vlgmr.msra.gmra.mxu2 %v12716_v0  ;;  %v7213_v0 = vmul.f32 0.0026041667, %v7208_v21  ;;  %v7186_v58 = vrot.slane %v7047_v47, 1  ;;  %v7245_v21 = vld [vmem:[#allocation9 + $0xe0] sm:$0xff] }
 0x691   : > { %7537 = vmatpush.xpose.msrb.mxu2 %v7227_v7 }
 0x692   : > { %7458 = vmatmul.f32.vlgmr.msra.gmra.mxu3 %v7262_v50  ;;  %v7264_v46 = vperm.slane %v7213_v0, 0  ;;  %v7265_v33 = vperm.slane %v7213_v0, 1  ;;  %v7266_v28 = vperm.slane %v7213_v0, 2  ;;  %v7193_v1 = vsel %vm2734_vm4, %v7185_v56, %v7186_v58  ;;  %v7242_v50 = vld [vmem:[#allocation9 + $0xc8] sm:$0xff] }
 0x693   : > { %7577 = vmatpush.xpose.msra.mxu0 %v7229_v43  ;;  %7557 = vmatpush.xpose.msra.mxu3 %v7228_v34  ;;  %v7059_v23 = vpop.f32.mrf.mxu2  ;;  %v7194_v2 = vsel %vm2736_vm5, %v14712_v45, %v7193_v1  ;;  %v7035_v36 = vpop.f32.mrf.mxu0  ;;  %v7267_v4 = vperm.slane %v7213_v0, 3  ;;  %v7268_v48 = vperm.slane %v7213_v0, 4  ;;  %v7269_v3 = vperm.slane %v7213_v0, 5  ;;  %v7236_v45 = vld [vmem:[#allocation9 + $0x98] sm:$0xff]  ;;  %v7247_v34 = vld [vmem:[#allocation9 + $0xf0] sm:$0xff] }
 0x694   : > { %7597 = vmatpush.xpose.msra.mxu1 %v7230_v31  ;;  %v7195_v9 = vsel %vm2738_vm6, %v14630_v16, %v7194_v2  ;;  %v7048_v11 = vpop.f32.mrf.mxu1  ;;  %v7270_v13 = vperm.slane %v7213_v0, 6  ;;  %v7271_v24 = vperm.slane %v7213_v0, 7  ;;  %v7243_v31 = vld [vmem:[#allocation9 + $0xd0] sm:$0xff] }
 0x695   : > { %7617 = vmatpush.xpose.msra.mxu2 %v7231_v60  ;;  %v7072_v5 = vpop.f32.mrf.mxu3  ;;  %v7200_v12 = vadd.f32 %v7195_v9, %v7167_v62  ;;  %v7241_v60 = vld [vmem:[#allocation9 + $0xc0] sm:$0xff] }
 0x696   : > { %v7073_v10 = vadd.f32 %v7072_v5, %v7059_v23 }
 0x697   : > { %7202 = vst [vmem:[#allocation2 + $0x16] sm:$0xff] %v7200_v12 }
 0x69a   : > { %7478 = vmatmul.f32.vlgmr.msrb.gmra.mxu3 %v7263_v59 }
 0x69b   : > { %7637 = vmatpush.xpose.msrb.mxu3 %v7232_v32  ;;  %v7061_v17 = vpop.f32.mrf.mxu2  ;;  %v7168_v32 = vld [vmem:[#allocation2 + $0x1e] sm:$0x7] }
 0x69d   : > { %v7074_v16 = vpop.f32.mrf.mxu3 }
 0x69e   : > { %7498 = vmatmul.f32.vlgmr.msrb.gmra.mxu0 %v7264_v46  ;;  %v7209_v20 = vld [vmem:[#allocation2 + $0x10] sm:$0xff] }
 0x69f   : > { %7518 = vmatmul.f32.vlgmr.msrb.gmra.mxu1 %v7265_v33  ;;  %7657 = vmatpush.xpose.msrb.mxu0 %v7233_v49  ;;  %v7214_v14 = vmul.f32 0.0026041667, %v7209_v20 }
 0x6a0   : > { %7538 = vmatmul.f32.vlgmr.msrb.gmra.mxu2 %v7266_v28  ;;  %7677 = vmatpush.xpose.msrb.mxu1 %v7234_v57 }
 0x6a1   : > { %7697 = vmatpush.xpose.msrb.mxu2 %v7235_v61  ;;  %v7272_v26 = vperm.slane %v7214_v14, 0  ;;  %v7273_v27 = vperm.slane %v7214_v14, 1  ;;  %v7274_v29 = vperm.slane %v7214_v14, 2  ;;  %v7275_v30 = vperm.slane %v7214_v14, 3 }
 0x6a2   : > { %7558 = vmatmul.f32.vlgmr.msra.gmra.mxu3 %v7267_v4  ;;  %v7276_v40 = vperm.slane %v7214_v14, 4  ;;  %v7277_v37 = vperm.slane %v7214_v14, 5  ;;  %v7278_v19 = vperm.slane %v7214_v14, 6  ;;  %v7279_v38 = vperm.slane %v7214_v14, 7  ;;  %v7249_v4 = vld [vmem:[#allocation9 + $0x100] sm:$0xff] }
 0x6a3   : > { %7717 = vmatpush.xpose.msra.mxu3 %v7236_v45  ;;  %v7250_v14 = vld [vmem:[#allocation11] sm:$0x1] }
 0x6a6   : > { %7578 = vmatmul.f32.vlgmr.msra.gmra.mxu0 %v7268_v48 }
 0x6a7   : > { %7598 = vmatmul.f32.vlgmr.msra.gmra.mxu1 %v7269_v3  ;;  %7737 = vmatpush.xpose.msra.mxu0 %v7237_v6 }
 0x6a8   : > { %7618 = vmatmul.f32.vlgmr.msra.gmra.mxu2 %v7270_v13  ;;  %7757 = vmatpush.xpose.msra.mxu1 %v7238_v8 }
 0x6a9   : > { %7777 = vmatpush.xpose.msra.mxu2 %v7239_v55 }
 0x6aa   : > { %7638 = vmatmul.f32.vlgmr.msrb.gmra.mxu3 %v7271_v24 }
 0x6ab   : > { %7797 = vmatpush.xpose.msrb.mxu3 %v7240_v18 }
 0x6ae   : > { %7658 = vmatmul.f32.vlgmr.msrb.gmra.mxu0 %v7272_v26 }
 0x6af   : > { %7678 = vmatmul.f32.vlgmr.msrb.gmra.mxu1 %v7273_v27  ;;  %7817 = vmatpush.xpose.msrb.mxu0 %v7241_v60 }
 0x6b0   : > { %7698 = vmatmul.f32.vlgmr.msrb.gmra.mxu2 %v7274_v29  ;;  %7837 = vmatpush.xpose.msrb.mxu1 %v7242_v50 }
 0x6b1   : > { %7857 = vmatpush.xpose.msrb.mxu2 %v7243_v31 }
 0x6b2   : > { %7718 = vmatmul.f32.vlgmr.msra.gmra.mxu3 %v7275_v30 }
 0x6b3   : > { %7877 = vmatpush.xpose.msra.mxu3 %v7244_v44 }
 0x6b6   : > { %7738 = vmatmul.f32.vlgmr.msra.gmra.mxu0 %v7276_v40 }
 0x6b7   : > { %7758 = vmatmul.f32.vlgmr.msra.gmra.mxu1 %v7277_v37  ;;  %7897 = vmatpush.xpose.msra.mxu0 %v7245_v21 }
 0x6b8   : > { %7778 = vmatmul.f32.vlgmr.msra.gmra.mxu2 %v7278_v19  ;;  %7917 = vmatpush.xpose.msra.mxu1 %v7246_v25 }
 0x6b9   : > { %7937 = vmatpush.xpose.msra.mxu2 %v7247_v34 }
 0x6ba   : > { %7798 = vmatmul.f32.vlgmr.msrb.gmra.mxu3 %v7279_v38 }
 0x6bb   : > { %7957 = vmatpush.xpose.msrb.mxu3 %v7248_v53 }
 0x6cb   : > { %v7085_v39 = vpop.f32.mrf.mxu0 }
 0x6cc   : > { %v7086_v15 = vadd.f32 %v7085_v39, %v7073_v10  ;;  %v7098_v22 = vpop.f32.mrf.mxu1 }
 0x6d3   : > { %v7111_v51 = vpop.f32.mrf.mxu2  ;;  %v7087_v7 = vpop.f32.mrf.mxu0 }
 0x6d4   : > { %v7100_v35 = vpop.f32.mrf.mxu1  ;;  %v7112_v54 = vadd.f32 %v7111_v51, %v7098_v22 }
 0x6d5   : > { %v7124_v52 = vpop.f32.mrf.mxu3 }
 0x6d6   : > { %v7125_v47 = vadd.f32 %v7124_v52, %v7112_v54 }
 0x6d8   : > { %v7187_v58 = vrot.slane %v7125_v47, 7 }
 0x6da   : > { %v7196_v62 = vsel %vm2726_vm0, %v7086_v15, %v7187_v58 }
 0x6db   : > { %v7113_v41 = vpop.f32.mrf.mxu2 }
 0x6dd   : > { %v7126_v43 = vpop.f32.mrf.mxu3 }
 0x6e5   : > { %v7339_v61 = vpop.f32.mrf.mxu3 }
 0x6e6   : > { %v7340_v24 = vadd.f32 %v7339_v61, %v7250_v14  ;;  %v12721_v14 = vmov 5  }
 0x6ed   : > { %v7359_v36 = vpop.f32.mrf.mxu3 }
 0x6ee   : > { %v7360_v27 = vadd.f32 %v7359_v36, %v7340_v24  ;;  %v12722_v24 = vmov 3  }
 0x6f5   : > { %v7379_v6 = vpop.f32.mrf.mxu3 }
 0x6f6   : > { %v7380_v29 = vadd.f32 %v7379_v6, %v7360_v27 }
 0x6fd   : > { %v7399_v17 = vpop.f32.mrf.mxu3 }
 0x6fe   : > { %v7400_v18 = vadd.f32 %v7399_v17, %v7380_v29 }
 0x705   : > { %v7419_v16 = vpop.f32.mrf.mxu3 }
 0x706   : > { %v7420_v30 = vadd.f32 %v7419_v16, %v7400_v18 }
 0x70b   : > { %v7137_v42 = vpop.f32.mrf.mxu0 }
 0x70c   : > { %v7150_v0 = vpop.f32.mrf.mxu1 }
 0x70d   : > { %v7151_v56 = vadd.f32 %v7150_v0, %v7137_v42  ;;  %v7439_v20 = vpop.f32.mrf.mxu3 }
 0x70e   : > { %v7440_v40 = vadd.f32 %v7439_v20, %v7420_v30 }
 0x713   : > { %v7163_v59 = vpop.f32.mrf.mxu2  ;;  %v7139_v33 = vpop.f32.mrf.mxu0 }
 0x714   : > { %v7164_v46 = vadd.f32 %v7163_v59, %v7151_v56  ;;  %v7152_v28 = vpop.f32.mrf.mxu1 }
 0x715   : > { %v7459_v26 = vpop.f32.mrf.mxu3  ;;  %v12718_v28 = vmov 4  }
 0x716   : > { %v7188_v49 = vrot.slane %v7164_v46, 6  ;;  %v7460_v19 = vadd.f32 %v7459_v26, %v7440_v40  ;;  %12369 = vset.pattern.permute.xlu2 %v12718_v28  ;;  %v12723_v26 = vmov 1  }
 0x718   : > { %v7197_v1 = vsel %vm2730_vm2, %v7196_v62, %v7188_v49  ;;  %v12720_v49 = vmov 0  }
 0x719   : > { %v7201_v57 = vadd.f32 %v7197_v1, %v7168_v32  ;;  %v12719_v32 = vmov 2   ;;  %12365 = vset.pattern.permute.xlu0 %v12720_v49 }
 0x71a   : > { %12367 = vset.pattern.permute.xlu1 %v12719_v32 }
 0x71b   : > { %7203 = vst.msk [vmem:[#allocation2 + $0x1e] sm:$0x7] %vm13788_vm8, %v7201_v57  ;;  %v7165_v23 = vpop.f32.mrf.mxu2  ;;  %v7499_v39 = vpop.f32.mrf.mxu0 }
 0x71c   : > { %v7519_v22 = vpop.f32.mrf.mxu1 }
 0x71d   : > { %v7479_v37 = vpop.f32.mrf.mxu3 }
 0x71e   : > { %v7480_v38 = vadd.f32 %v7479_v37, %v7460_v19 }
 0x720   : > { %v7500_v15 = vadd.f32 %v7499_v39, %v7480_v38 }
 0x722   : > { %v7210_v2 = vld [vmem:[#allocation2 + $0x18] sm:$0xff]  ;;  %v7211_v63 = vld [vmem:[#allocation2 + $0x20] sm:$0x1]  ;;  %v7520_v51 = vadd.f32 %v7519_v22, %v7500_v15 }
 0x723   : > { %v7215_v5 = vmul.f32 0.0026041667, %v7210_v2  ;;  %v7216_v8 = vmul.f32 0.0026041667, %v7211_v63  ;;  %v7539_v52 = vpop.f32.mrf.mxu2  ;;  %v7579_v43 = vpop.f32.mrf.mxu0 }
 0x724   : > { %v7540_v7 = vadd.f32 %v7539_v52, %v7520_v51  ;;  %v7599_v60 = vpop.f32.mrf.mxu1 }
 0x725   : > { %v7280_v9 = vperm.slane %v7215_v5, 0  ;;  %v7281_v10 = vperm.slane %v7215_v5, 1  ;;  %v7282_v11 = vperm.slane %v7215_v5, 2  ;;  %v7283_v12 = vperm.slane %v7215_v5, 3  ;;  %v7559_v35 = vpop.f32.mrf.mxu3 }
 0x726   : > { %v7284_v48 = vperm.slane %v7215_v5, 4  ;;  %v7285_v3 = vperm.slane %v7215_v5, 5  ;;  %v7286_v13 = vperm.slane %v7215_v5, 6  ;;  %v7287_v45 = vperm.slane %v7215_v5, 7 }
 0x727   : > { %7818 = vmatmul.f32.vlgmr.msrb.gmra.mxu0 %v7280_v9  ;;  %7838 = vmatmul.f32.vlgmr.msrb.gmra.mxu1 %v7281_v10  ;;  %v7288_v55 = vperm.slane %v7216_v8, 0  ;;  %v7560_v41 = vadd.f32 %v7559_v35, %v7540_v7 }
 0x728   : > { %7858 = vmatmul.f32.vlgmr.msrb.gmra.mxu2 %v7282_v11  ;;  %7878 = vmatmul.f32.vlgmr.msra.gmra.mxu3 %v7283_v12 }
 0x729   : > { %7977 = vmatpush.xpose.msrb.mxu0 %v7249_v4  ;;  %v7580_v31 = vadd.f32 %v7579_v43, %v7560_v41 }
 0x72b   : > { %v7600_v44 = vadd.f32 %v7599_v60, %v7580_v31  ;;  %v7619_v50 = vpop.f32.mrf.mxu2  ;;  %v7659_v54 = vpop.f32.mrf.mxu0 }
 0x72c   : > { %v7679_v25 = vpop.f32.mrf.mxu1 }
 0x72d   : > { %v7620_v34 = vadd.f32 %v7619_v50, %v7600_v44  ;;  %v7639_v21 = vpop.f32.mrf.mxu3 }
 0x72f   : > { %7898 = vmatmul.f32.vlgmr.msra.gmra.mxu0 %v7284_v48  ;;  %7918 = vmatmul.f32.vlgmr.msra.gmra.mxu1 %v7285_v3  ;;  %v7640_v53 = vadd.f32 %v7639_v21, %v7620_v34 }
 0x730   : > { %7938 = vmatmul.f32.vlgmr.msra.gmra.mxu2 %v7286_v13  ;;  %7958 = vmatmul.f32.vlgmr.msrb.gmra.mxu3 %v7287_v45 }
 0x731   : > { %v7660_v42 = vadd.f32 %v7659_v54, %v7640_v53 }
 0x733   : > { %v7680_v0 = vadd.f32 %v7679_v25, %v7660_v42  ;;  %v7699_v47 = vpop.f32.mrf.mxu2  ;;  %v7739_v46 = vpop.f32.mrf.mxu0 }
 0x734   : > { %v7759_v62 = vpop.f32.mrf.mxu1 }
 0x735   : > { %v7700_v56 = vadd.f32 %v7699_v47, %v7680_v0  ;;  %v7719_v58 = vpop.f32.mrf.mxu3 }
 0x737   : > { %7978 = vmatmul.f32.vlgmr.msrb.gmra.mxu0 %v7288_v55  ;;  %v7720_v59 = vadd.f32 %v7719_v58, %v7700_v56 }
 0x739   : > { %v7740_v33 = vadd.f32 %v7739_v46, %v7720_v59 }
 0x73b   : > { %v7760_v1 = vadd.f32 %v7759_v62, %v7740_v33  ;;  %v7779_v57 = vpop.f32.mrf.mxu2 }
 0x73d   : > { %v7780_v61 = vadd.f32 %v7779_v57, %v7760_v1  ;;  %v7799_v23 = vpop.f32.mrf.mxu3 }
 0x73f   : > { %v7800_v2 = vadd.f32 %v7799_v23, %v7780_v61 }
 0x7a4   : > { %v7819_v5 = vpop.f32.mrf.mxu0  ;;  %v7839_v9 = vpop.f32.mrf.mxu1 }
 0x7a5   : > { %v7820_v36 = vadd.f32 %v7819_v5, %v7800_v2 }
 0x7a7   : > { %v7840_v10 = vadd.f32 %v7839_v9, %v7820_v36 }
 0x7ab   : > { %v7859_v11 = vpop.f32.mrf.mxu2  ;;  %v7879_v12 = vpop.f32.mrf.mxu3 }
 0x7ac   : > { %v7860_v4 = vadd.f32 %v7859_v11, %v7840_v10  ;;  %v7899_v48 = vpop.f32.mrf.mxu0  ;;  %v7919_v45 = vpop.f32.mrf.mxu1 }
 0x7ae   : > { %v7880_v3 = vadd.f32 %v7879_v12, %v7860_v4 }
 0x7b0   : > { %v7900_v13 = vadd.f32 %v7899_v48, %v7880_v3 }
 0x7b2   : > { %v7920_v63 = vadd.f32 %v7919_v45, %v7900_v13 }
 0x7b3   : > { %v7939_v6 = vpop.f32.mrf.mxu2  ;;  %v7959_v55 = vpop.f32.mrf.mxu3 }
 0x7b4   : > { %v7940_v8 = vadd.f32 %v7939_v6, %v7920_v63  ;;  %v7979_v16 = vpop.f32.mrf.mxu0 }
 0x7b6   : > { %v7960_v17 = vadd.f32 %v7959_v55, %v7940_v8 }
 0x7b8   : > { %v7980_v20 = vadd.f32 %v7979_v16, %v7960_v17 }
 0x7ba   : > { %8015 = vperm.xlu2 %12369, %v7980_v20   ;;  %8001 = vperm.xlu1 %12367, %v7980_v20   ;;  %8028 = vst.msk [vmem:[%s497_s11] sm:$0x1] %vm8027_vm9, %v7980_v20 }
 0x7bb   : > { %7987 = vperm.xlu0 %12365, %v7980_v20  }
 0x7c2   : > { %12370 = vset.pattern.permute.xlu2 %v12721_v14  ;;  %12368 = vset.pattern.permute.xlu1 %v12722_v24 }
 0x7c3   : > { %12366 = vset.pattern.permute.xlu0 %v12723_v26  ;;  %8022 = vperm.xlu2 %12370, %v7980_v20  }
 0x7c4   : > { %8008 = vperm.xlu1 %12368, %v7980_v20   ;;  %7994 = vperm.xlu0 %12366, %v7980_v20  }
 0x7c5   : > { %12609 = shalt.err (!%p12606_p12)
}
 0x7c6   : > { %12260 = dma.vmem_to_hbm [thread:$0]  (%p12852_p7), %s8059_s17, 16, %s8061_s19, %s8035_s3   ;;  %v7984_v18 = vld [vmem:[#allocation12] sm:$0x1]  ;;  %v7982_v37 = vld [vmem:[#allocation14] sm:$0x1] }
 0x7c7   : > { %v7992_v19 = vld [vmem:[#allocation12 + $0x1] sm:$0x1]  ;;  %v7999_v38 = vld [vmem:[#allocation12 + $0x2] sm:$0x1]  ;;  %v8006_v51 = vld [vmem:[#allocation12 + $0x3] sm:$0x1] }
 0x7c8   : > { %v8013_v41 = vld [vmem:[#allocation12 + $0x4] sm:$0x1]  ;;  %s14927_s21 = sld [smem:[#allocation34_spill]]  ;;  %v8020_v60 = vld [vmem:[#allocation12 + $0x5] sm:$0x1]  ;;  %s491_s0 = scalar_lea.vmem [#allocation15], %s12923_s23 }
 0x7c9   : > { %s8045_s7 = sshll.u32 %s491_s0, 4  ;;  %s8031_s22 = scalar_lea.sflag [#allocation5], %s12923_s23  ;;  %s8046_s7 = int_to_ptr.vmem [resolvable:$true] %s8045_s7 }
 0x7cc   : > { %12371 = vset.pattern.permute.xlu0 %v12721_v14 }
 0x7ce   : > { %s8043_s20 = scalar_lea.hbm %s14927_s21, %s12700_s30  ;;  %s12630_s14 = scalar_lea.hbm %s14927_s21, 2 }
 0x7cf   : > { %s8047_s18 = sshll.u32 %s8043_s20, 4  ;;  %s8048_s18 = int_to_ptr.hbm [resolvable:$true] %s8047_s18 }
 0x7d0   : > { %s12624_s11 = sshra.s32 %s8048_s18, 4  ;;  %s12625_s11 = int_to_ptr.hbm [resolvable:$true] %s12624_s11 }
 0x7d1   : > { %s12626_s13 = scalar_lea.hbm %s12625_s11, 1  ;;  %p12631_p5 = scmp.lt.s32.totalorder %s12625_s11, %s14927_s21 }
 0x7d2   : > { %p12627_p13 = scmp.ne.s32.totalorder %s12625_s11, %s12626_s13  ;;  %p12632_p10 = scmp.lt.s32.totalorder %s12630_s14, %s12626_s13 }
 0x7d4   : > { %p12628_p0 = pnand %p12627_p13, %p12852_p7  ;;  %p12633_p1 = por %p12632_p10, %p12631_p5 }
 0x7d6   : > { %p12629_p3 = pneg %p12628_p0 }
 0x7d8   : > { %p12634_p2 = pnand %p12633_p1, %p12629_p3 }
 0x814   : > { %v8016_v30 = vpop.permute.xlu2 %8015 }
 0x815   : > { %v8018_v50 = vmul.f32 %v8016_v30, %v8013_v41 }
 0x81d   : > { %v8023_v44 = vpop.permute.xlu2 %8022 }
 0x81e   : > { %v8025_v21 = vmul.f32 %v8023_v44, %v8020_v60 }
 0x82c   : > { %v8002_v29 = vpop.permute.xlu1 %8001 }
 0x82d   : > { %v7988_v27 = vpop.permute.xlu0 %7987  ;;  %v8004_v7 = vmul.f32 %v8002_v29, %v7999_v38 }
 0x82e   : > { %v7990_v40 = vmul.f32 %v7988_v27, %v7984_v18 }
 0x830   : > { %v7991_v15 = vadd.f32 %v7990_v40, %v7982_v37 }
 0x836   : > { %v7995_v39 = vpop.permute.xlu0 %7994  ;;  %v8009_v52 = vpop.permute.xlu1 %8008 }
 0x837   : > { %v7997_v22 = vmul.f32 %v7995_v39, %v7992_v19  ;;  %v8011_v43 = vmul.f32 %v8009_v52, %v8006_v51 }
 0x839   : > { %v7998_v35 = vadd.f32 %v7997_v22, %v7991_v15 }
 0x83b   : > { %v8005_v31 = vadd.f32 %v8004_v7, %v7998_v35 }
 0x83d   : > { %v8012_v34 = vadd.f32 %v8011_v43, %v8005_v31 }
 0x83f   : > { %v8019_v53 = vadd.f32 %v8018_v50, %v8012_v34 }
 0x841   : > { %v8026_v54 = vadd.f32 %v8025_v21, %v8019_v53 }
 0x843   : > { %8029 = vst.msk [vmem:[%s491_s0] sm:$0x1] %vm8027_vm9, %v8026_v54 }
 0x844   : > { %12637 = shalt.err (!%p12634_p2)
}
 0x845   : > { %12259 = dma.vmem_to_hbm [thread:$0]  (%p12852_p7), %s8046_s7, 16, %s8048_s18, %s8031_s22  }
 0x846 PF: > { %s14928_s23 = sld [smem:[#allocation24_spill]]  ;;  %p14930_p4 = scmp.ge.s32.totalorder %s12708_s10, 2 }
 0x848   : > { %p12287_p8 = pnand %p14930_p4, %p12814_p6 }
 0x84a   : > { %p12288_p9 = pneg %p12287_p8 }
 0x84c   : > { %s8072_s26 = sand.u32 1, %s14928_s23  }
 0x84d   : > { %s8073_s9 = scalar_lea.sflag [#allocation5], %s8072_s26 }
 0x84e   : > { %12679 = dma.done.wait (%p12288_p9), %s8073_s9, 16  }
 0x84f   : > { %12681 = vsyncadd (%p12288_p9), %s8073_s9, 4294967280  ;;  %s8082_s27 = scalar_lea.sflag [#allocation17], %s8072_s26 }
 0x850   : > { %12683 = dma.done.wait (%p12288_p9), %s8082_s27, 16  }
 0x851   : > { %12685 = vsyncadd (%p12288_p9), %s8082_s27, 4294967280  ;;  %s33_s10 = sadd.s32 1, %s12708_s10   ;;  %s14931_s16 = sld [smem:[#allocation28_spill]] }
 0x852   : > { %p30_p11 = scmp.ge.s32.totalorder %s33_s10, 4   ;;  %s14932_s30 = sld [smem:[#allocation25_spill]] }
 0x853   : > { %s14933_s9 = sld [smem:[#allocation27_spill]]  ;;  %s14934_s27 = smov %s12692_s28 }
 0x854   : > { %s14935_s28 = smov %s12696_s29  ;;  %32 = sbr.rel (!%p30_p11) target bundleno = 19 (0x13), region = 158 }
 0x857   : > { %s14936_s29 = smov %s14931_s16 }
 0x859   :  { %8087 = vsyncpa [#allocation4], 1 }
 0x85a   :  { %8089 = vsyncpa [#allocation4 + $0x1], 1 }
 0x85b   :  { %8090 = vsyncpa [#allocation7], 1 }
 0x85c   :  { %8092 = vsyncpa [#allocation7 + $0x1], 1 }
 0x85d   :  { %8093 = vsyncpa [#allocation10], 1 }
 0x85e   :  { %8094 = vsyncpa [#allocation13], 1 }
 0x85f   :  { %8095 = vsyncpa [#allocation5], 1 }
 0x860   :  { %8097 = vsyncpa [#allocation5 + $0x1], 1 }
 0x861   :  { %8098 = vsyncpa [#allocation17], 1 }
 0x862   :  { %8100 = vsyncpa [#allocation17 + $0x1], 1 }

</bundles_post_ra>
